<compile_context>
chip_gen: v7x
topology: tpu7x:2x2x1
jax: 0.10.0
libtpu: 0.0.40
codegen_flags: <defaults>
</compile_context>

<pallas_src>
import functools

import numpy as np
import jax
import jax.numpy as jnp
from jax.experimental import pallas as pl
from jax.experimental.pallas import tpu as pltpu

EPS = 1e-5
_LP = 128                  # zero-halo lanes on each side of the packed image block
_MM_DTYPE = jnp.float32    # set to jnp.bfloat16 when bitwise parity is not needed


def _totalgroup_kernel(H, W, C, lk, pk, touched, n_img, dmax,
                       x_ref, mask_ref, imask_ref,
                       w_pre_ref, b_pre_ref,
                       ln_g_ref, ln_b_ref,
                       wa_ref, ww_ref, mb_ref,
                       w_pc_ref,
                       wc_ref, bc_ref,
                       w1t_ref, b1_ref, w2_ref, b2_ref,
                       wp_ref, bp_ref,
                       w_last_ref, b_last_ref,
                       o_ref,
                       pad_ref):
    f32 = jnp.float32
    HW = H * W
    L = n_img * HW                       # packed lane width of one grid step

    # Zero ONLY the lane-halo strips (8 vregs); the interior is always written
    # by stage() before any read.  Done every step: with a "parallel" batch
    # grid the scratch is undefined at each core's first step.
    pad_ref[0:C, 0:_LP] = jnp.zeros((C, _LP), f32)
    pad_ref[0:C, _LP + L:_LP + L + _LP] = jnp.zeros((C, _LP), f32)

    def stage(t, rows):
        pad_ref[0:rows, _LP:_LP + L] = t

    def tap(rows, dh, dw):
        # v[c, img*HW + h*W + w] = staged[c, img, h+dh, w+dw] (zero outside the
        # image).  Row (dh) validity is covered by the zero lane-halo when one
        # image is resident; with lane-packed images the precomputed mask also
        # stops the flat shift from bleeding into the neighbouring image.
        off = _LP + dh * W + dw
        v = pad_ref[0:rows, off:off + L]
        if dw != 0 or (n_img > 1 and dh != 0):
            mi = (dh + dmax) * (2 * dmax + 1) + (dw + dmax)
            v = v * mask_ref[mi:mi + 1, :]
        return v

    def conv_same(t, w_taps_ref, bias, kk, rows):
        # kxk 'same' conv = kk*kk small MXU matmuls accumulated in registers
        # (no im2col buffer round trip).
        stage(t, rows)
        p = kk // 2
        acc = None
        for dh in range(kk):
            for dw in range(kk):
                ti = dh * kk + dw
                c = jnp.dot(w_taps_ref[ti].astype(_MM_DTYPE),
                            tap(rows, dh - p, dw - p).astype(_MM_DTYPE),
                            preferred_element_type=f32)
                acc = c if acc is None else acc + c
        return acc if bias is None else acc + bias

    x = x_ref[0]                                               # [C, L]

    # ---------------- pre: 3x3 conv (default_conv) ----------------
    y = conv_same(x, w_pre_ref, b_pre_ref[...], 3, C)

    # ---------------- LayerNorm4D (channel-dim mean/var, biased) ----------
    u = jnp.mean(y, axis=0, keepdims=True)
    d = y - u
    var = jnp.mean(d * d, axis=0, keepdims=True)
    # NOTE: MXU f32 dots use the backend default precision; parity with the
    # f32 PyTorch reference is to a few ulps, not bitwise.
    n = d / jnp.sqrt(var + EPS)
    n = n * ln_g_ref[...] + ln_b_ref[...]

    # ---------------- TDSSRGM h/w mixers ----------------
    # h_mixer (Conv3d (k,k,1)): channel taps folded into banded [C,C] matrices
    # (built in the wrapper) -> lk sublane-ALIGNED taps + lk MXU matmuls, no
    # unaligned dc=+-1 sublane relayouts.
    stage(n, C)
    p = lk // 2
    out_h = None
    for j in range(lk):
        c = jnp.dot(wa_ref[j].astype(_MM_DTYPE),
                    tap(C, j - p, 0).astype(_MM_DTYPE),
                    preferred_element_type=f32)
        out_h = c if out_h is None else out_h + c
    out_h = out_h + mb_ref[0]
    # w_mixer (Conv3d (1,1,k)): scalar taps over W on the VPU.
    out_w = None
    for m in range(lk):
        c = ww_ref[m] * tap(C, 0, m - p)
        out_w = c if out_w is None else out_w + c
    out_w = out_w + mb_ref[1]
    hw = pad_ref[0:C, _LP:_LP + L] + out_h * out_w             # n + h*w

    # ---------------- PConv (first `touched` channels), in-place merge -----
    # Full hw is staged so there are no stale interior rows in this phase and
    # the untouched rows are already in place for the merge (no concat).
    stage(hw, C)
    pp = pk // 2
    t_acc = None
    for dh in range(pk):
        for dw in range(pk):
            ti = dh * pk + dw
            c = jnp.dot(w_pc_ref[ti].astype(_MM_DTYPE),
                        tap(touched, dh - pp, dw - pp).astype(_MM_DTYPE),
                        preferred_element_type=f32)
            t_acc = c if t_acc is None else t_acc + c
    pad_ref[0:touched, _LP:_LP + L] = t_acc                    # overwrite in place
    hw2 = pad_ref[0:C, _LP:_LP + L]                            # merged result

    # ---------------- c_mixer (1x1) ----------------
    chw1 = jnp.dot(wc_ref[...].astype(_MM_DTYPE), hw2.astype(_MM_DTYPE),
                   preferred_element_type=f32) + bc_ref[...]

    # ---------------- CALayer (squeeze/excite), VPU only, per packed image --
    inv_hw = 1.0 / HW
    att_map = None
    for i in range(n_img):
        if n_img == 1:
            pooled = jnp.sum(hw2, axis=1, keepdims=True) * inv_hw          # [C,1]
        else:
            mimg = imask_ref[i:i + 1, :]                                   # [1,L]
            pooled = jnp.sum(hw2 * mimg, axis=1, keepdims=True) * inv_hw
        hdn = jnp.sum(w1t_ref[...] * pooled, axis=0, keepdims=True) + b1_ref[...]
        hdn = jnp.maximum(hdn, 0.0)                                        # [1,Cr]
        att = jax.nn.sigmoid(
            jnp.sum(w2_ref[...] * hdn, axis=1, keepdims=True) + b2_ref[...])  # [C,1]
        a = att if n_img == 1 else att * mimg
        att_map = a if att_map is None else att_map + a
    chw2 = hw2 * att_map

    # ---------------- combine + proj (1x1) + TransLayer2 residual ----------
    chw = hw2 + chw1 * chw2
    sg = jnp.dot(wp_ref[...].astype(_MM_DTYPE), chw.astype(_MM_DTYPE),
                 preferred_element_type=f32) + bp_ref[...]
    t2 = y + sg

    # ---------------- last: 3x3 conv ----------------
    o_ref[0] = conv_same(t2, w_last_ref, b_last_ref[...], 3, C)


def _tensorcores_per_device():
    # Chips that expose 2 TensorCores behind one JAX device (megacore / v7x):
    # keep one image per grid step there; single-TC chips (v5e/v6e) pack.
    try:
        kind = jax.devices()[0].device_kind.lower()
    except Exception:
        return 1
    if ("v4" in kind and "lite" not in kind) or "v5p" in kind or "7" in kind:
        return 2
    return 1


@jax.jit
def totalgroup_forward(x_nchw, params):
    """x_nchw: [B, C, H, W] float32 (PyTorch layout). Returns [B, C, H, W]."""
    x_nchw = x_nchw.astype(jnp.float32)
    B, C, H, W = x_nchw.shape
    HW = H * W

    lk = params['wh'].shape[0]              # largeks2 (mixer kernel size)
    pk = params['w_pconv'].shape[-1]        # pks2
    touched = params['w_pconv'].shape[0]    # planes // pratio2
    dmax = max(1, pk // 2, lk // 2)

    # Images per grid step: pack the batch into lanes on single-TC chips so
    # the serial grid shrinks and matmul N widens; one image per step on 2-TC
    # chips so both cores get work (grid axis is "parallel").
    cores = _tensorcores_per_device()
    ipb = max(1, B // cores)
    ipb = min(ipb, max(1, 2048 // HW))      # cap packed lane width (vreg/VMEM pressure)
    while B % ipb != 0:
        ipb -= 1
    nb = B // ipb
    L = ipb * HW

    # Flat-shift halo: each (dh, dw) tap is a lane shift by dh*W+dw, so the
    # halo must cover the largest shift.  This bounds W (< ~127 for 3x3);
    # larger resolutions need H-tiling + a reworked tap(); on v7x re-derive
    # that tiling against 64 MiB physical / 32 MiB scoped VMEM (half of v6e).
    assert _LP >= dmax * (W + 1), "image too wide for the flat-shift halo"

    # ---- grid-invariant constants built once in the wrapper ----
    lane = np.arange(L)
    hpos = (lane % HW) // W
    wpos = lane % W
    mask_rows = []
    for dh in range(-dmax, dmax + 1):
        for dw in range(-dmax, dmax + 1):
            ok = ((hpos + dh >= 0) & (hpos + dh < H)
                  & (wpos + dw >= 0) & (wpos + dw < W))
            mask_rows.append(ok.astype(np.float32))
    tap_masks = jnp.asarray(np.stack(mask_rows))                  # [(2dmax+1)^2, L]
    img_masks = jnp.asarray(
        np.stack([(lane // HW == i).astype(np.float32) for i in range(ipb)]))  # [ipb, L]

    def conv_taps(w_oihw):
        # OIHW -> [kh*kw, Cout, Cin]: one small weight matrix per tap.
        co, ci, kh, kw = w_oihw.shape
        return jnp.transpose(w_oihw.astype(jnp.float32),
                             (2, 3, 0, 1)).reshape(kh * kw, co, ci)

    # h_mixer channel taps folded into banded [C, C] matrices (one per H-tap):
    # wa[j][c, c+dc] = wh[dc+p, j]  -> out_h = sum_j wa[j] @ (H-shift_j of n).
    p = lk // 2
    eyes = np.stack([np.eye(C, k=dc, dtype=np.float32) for dc in range(-p, p + 1)])
    wa = jnp.tensordot(params['wh'].astype(jnp.float32).T, jnp.asarray(eyes),
                       axes=[[1], [0]])                           # [lk, C, C]

    col = lambda v: v.reshape(-1, 1).astype(jnp.float32)
    row = lambda v: v.reshape(1, -1).astype(jnp.float32)

    # Pack the batch into the lane axis: [nb, C, ipb*HW].
    xp = (x_nchw.reshape(nb, ipb, C, HW)
          .transpose(0, 2, 1, 3).reshape(nb, C, L))

    vm = lambda a: (a, pl.BlockSpec(a.shape, lambda b, n=a.ndim: (0,) * n))
    sm = lambda a: (a, pl.BlockSpec(memory_space=pltpu.MemorySpace.SMEM))

    inputs = [
        (xp, pl.BlockSpec((1, C, L), lambda b: (b, 0, 0))),
        vm(tap_masks), vm(img_masks),
        vm(conv_taps(params['w_pre'])), vm(col(params['b_pre'])),
        vm(col(params['ln_g'])), vm(col(params['ln_b'])),
        vm(wa),
        sm(params['ww'].astype(jnp.float32)),
        sm(jnp.stack([params['bh'], params['bw']]).astype(jnp.float32)),
        vm(conv_taps(params['w_pconv'])),
        vm(params['wc'].astype(jnp.float32)), vm(col(params['bc'])),
        vm(jnp.transpose(params['w1']).astype(jnp.float32)), vm(row(params['b1'])),
        vm(params['w2'].astype(jnp.float32)), vm(col(params['b2'])),
        vm(params['wp'].astype(jnp.float32)), vm(col(params['bp'])),
        vm(conv_taps(params['w_last'])), vm(col(params['b_last'])),
    ]
    arrays = [a for a, _ in inputs]
    in_specs = [s for _, s in inputs]

    kern = functools.partial(_totalgroup_kernel,
                             H, W, C, lk, pk, touched, ipb, dmax)

    out = pl.pallas_call(
        kern,
        out_shape=jax.ShapeDtypeStruct((nb, C, L), jnp.float32),
        grid_spec=pltpu.PrefetchScalarGridSpec(
            num_scalar_prefetch=0,
            grid=(nb,),
            in_specs=in_specs,
            out_specs=pl.BlockSpec((1, C, L), lambda b: (b, 0, 0)),
            scratch_shapes=[
                pltpu.VMEM((C, L + 2 * _LP), jnp.float32),   # zero-lane-halo staging
            ],
        ),
        compiler_params=pltpu.CompilerParams(
            dimension_semantics=("parallel",)),               # batch blocks independent
    )(*arrays)

    return (out.reshape(nb, C, ipb, HW)
            .transpose(0, 2, 1, 3).reshape(B, C, H, W))


if __name__ == "__main__":
    # Totalgroup(out_feats2=32, largeks2=3, pks2=3, pratio2=4, up_scale)
    B, C, H, W = 2, 32, 16, 16
    largeks2, pks2, pratio2 = 3, 3, 4
    touched = C // pratio2                  # PConv touched channels
    Cr = max(C // 16, 1)                    # CALayer reduction = 16
    # NOTE: up_scale / use_tail do not affect Totalgroup.forward.
    # TODO(synk): CALayer is an external EFGN dependency; implemented per the
    # standard RCAN definition (avg-pool -> 1x1 -> ReLU -> 1x1 -> sigmoid gate).

    key = jax.random.PRNGKey(0)
    ks = jax.random.split(key, 20)
    s = 0.1
    params = dict(
        w_pre=s * jax.random.normal(ks[0], (C, C, 3, 3), jnp.float32),      # OIHW
        b_pre=s * jax.random.normal(ks[1], (C,), jnp.float32),
        ln_g=jnp.ones((C,), jnp.float32),
        ln_b=jnp.zeros((C,), jnp.float32),
        wh=s * jax.random.normal(ks[2], (largeks2, largeks2), jnp.float32),  # Conv3d (k,k,1) taps
        bh=s * jax.random.normal(ks[3], (), jnp.float32),
        ww=s * jax.random.normal(ks[4], (largeks2,), jnp.float32),           # Conv3d (1,1,k) taps
        bw=s * jax.random.normal(ks[5], (), jnp.float32),
        w_pconv=s * jax.random.normal(ks[6], (touched, touched, pks2, pks2), jnp.float32),
        wc=s * jax.random.normal(ks[7], (C, C), jnp.float32),
        bc=s * jax.random.normal(ks[8], (C,), jnp.float32),
        w1=s * jax.random.normal(ks[9], (Cr, C), jnp.float32),
        b1=s * jax.random.normal(ks[10], (Cr,), jnp.float32),
        w2=s * jax.random.normal(ks[11], (C, Cr), jnp.float32),
        b2=s * jax.random.normal(ks[12], (C,), jnp.float32),
        wp=s * jax.random.normal(ks[13], (C, C), jnp.float32),
        bp=s * jax.random.normal(ks[14], (C,), jnp.float32),
        w_last=s * jax.random.normal(ks[15], (C, C, 3, 3), jnp.float32),
        b_last=s * jax.random.normal(ks[16], (C,), jnp.float32),
    )

    x = jax.random.normal(ks[17], (B, C, H, W), jnp.float32)   # NCHW like PyTorch

    out = totalgroup_forward(x, params)
    out = jax.block_until_ready(out)
    assert out.shape == (B, C, H, W)
    assert bool(jnp.all(jnp.isfinite(out)))
    print("KERNEL_OK")
</pallas_src>

<mosaic_0001>
module attributes {stable_mosaic.version = 11 : i64} {
  func.func @_totalgroup_kernel(%arg0: i32, %arg1: memref<1x32x512xf32, #tpu.memory_space<vmem>>, %arg2: memref<9x512xf32, #tpu.memory_space<vmem>>, %arg3: memref<2x512xf32, #tpu.memory_space<vmem>>, %arg4: memref<9x32x32xf32, #tpu.memory_space<vmem>>, %arg5: memref<32x1xf32, #tpu.memory_space<vmem>>, %arg6: memref<32x1xf32, #tpu.memory_space<vmem>>, %arg7: memref<32x1xf32, #tpu.memory_space<vmem>>, %arg8: memref<3x32x32xf32, #tpu.memory_space<vmem>>, %arg9: memref<3xf32, #tpu.memory_space<smem>>, %arg10: memref<2xf32, #tpu.memory_space<smem>>, %arg11: memref<9x8x8xf32, #tpu.memory_space<vmem>>, %arg12: memref<32x32xf32, #tpu.memory_space<vmem>>, %arg13: memref<32x1xf32, #tpu.memory_space<vmem>>, %arg14: memref<32x2xf32, #tpu.memory_space<vmem>>, %arg15: memref<1x2xf32, #tpu.memory_space<vmem>>, %arg16: memref<32x2xf32, #tpu.memory_space<vmem>>, %arg17: memref<32x1xf32, #tpu.memory_space<vmem>>, %arg18: memref<32x32xf32, #tpu.memory_space<vmem>>, %arg19: memref<32x1xf32, #tpu.memory_space<vmem>>, %arg20: memref<9x32x32xf32, #tpu.memory_space<vmem>>, %arg21: memref<32x1xf32, #tpu.memory_space<vmem>>, %arg22: memref<1x32x512xf32, #tpu.memory_space<vmem>>, %arg23: memref<32x768xf32, #tpu.memory_space<vmem>>) attributes {dimension_semantics = [#tpu.dimension_semantics<parallel>], iteration_bounds = array<i64: 1>, scalar_prefetch = 0 : i64, scratch_operands = 1 : i64, tpu.core_type = #tpu.core_type<tc>, window_params = [{transform_indices = @transform_0, window_bounds = array<i64: 1, 32, 512>}, {pipeline_mode = #tpu.pipeline_mode<synchronous>, transform_indices = @transform_1, window_bounds = array<i64: 9, 512>}, {pipeline_mode = #tpu.pipeline_mode<synchronous>, transform_indices = @transform_2, window_bounds = array<i64: 2, 512>}, {pipeline_mode = #tpu.pipeline_mode<synchronous>, transform_indices = @transform_3, window_bounds = array<i64: 9, 32, 32>}, {pipeline_mode = #tpu.pipeline_mode<synchronous>, transform_indices = @transform_4, window_bounds = array<i64: 32, 1>}, {pipeline_mode = #tpu.pipeline_mode<synchronous>, transform_indices = @transform_5, window_bounds = array<i64: 32, 1>}, {pipeline_mode = #tpu.pipeline_mode<synchronous>, transform_indices = @transform_6, window_bounds = array<i64: 32, 1>}, {pipeline_mode = #tpu.pipeline_mode<synchronous>, transform_indices = @transform_7, window_bounds = array<i64: 3, 32, 32>}, {transform_indices = @transform_8, window_bounds = array<i64: 3>}, {transform_indices = @transform_9, window_bounds = array<i64: 2>}, {pipeline_mode = #tpu.pipeline_mode<synchronous>, transform_indices = @transform_10, window_bounds = array<i64: 9, 8, 8>}, {pipeline_mode = #tpu.pipeline_mode<synchronous>, transform_indices = @transform_11, window_bounds = array<i64: 32, 32>}, {pipeline_mode = #tpu.pipeline_mode<synchronous>, transform_indices = @transform_12, window_bounds = array<i64: 32, 1>}, {pipeline_mode = #tpu.pipeline_mode<synchronous>, transform_indices = @transform_13, window_bounds = array<i64: 32, 2>}, {pipeline_mode = #tpu.pipeline_mode<synchronous>, transform_indices = @transform_14, window_bounds = array<i64: 1, 2>}, {pipeline_mode = #tpu.pipeline_mode<synchronous>, transform_indices = @transform_15, window_bounds = array<i64: 32, 2>}, {pipeline_mode = #tpu.pipeline_mode<synchronous>, transform_indices = @transform_16, window_bounds = array<i64: 32, 1>}, {pipeline_mode = #tpu.pipeline_mode<synchronous>, transform_indices = @transform_17, window_bounds = array<i64: 32, 32>}, {pipeline_mode = #tpu.pipeline_mode<synchronous>, transform_indices = @transform_18, window_bounds = array<i64: 32, 1>}, {pipeline_mode = #tpu.pipeline_mode<synchronous>, transform_indices = @transform_19, window_bounds = array<i64: 9, 32, 32>}, {pipeline_mode = #tpu.pipeline_mode<synchronous>, transform_indices = @transform_20, window_bounds = array<i64: 32, 1>}, {transform_indices = @transform_21, window_bounds = array<i64: 1, 32, 512>}]} {
    %cst = arith.constant 0.000000e+00 : f32
    %0 = vector.broadcast %cst : f32 to vector<32x128xf32>
    %c0 = arith.constant 0 : index
    %c0_0 = arith.constant 0 : index
    %1 = vector.load %arg23[%c0, %c0_0] : memref<32x768xf32, #tpu.memory_space<vmem>>, vector<32x128xf32>
    tpu.vector_store %arg23[%c0, %c0_0], %0 {strides = array<i32>} : memref<32x768xf32, #tpu.memory_space<vmem>>, vector<32x128xf32>,
    %cst_1 = arith.constant 0.000000e+00 : f32
    %2 = vector.broadcast %cst_1 : f32 to vector<32x128xf32>
    %c0_2 = arith.constant 0 : index
    %c640 = arith.constant 640 : index
    %3 = vector.load %arg23[%c0_2, %c640] : memref<32x768xf32, #tpu.memory_space<vmem>>, vector<32x128xf32>
    tpu.vector_store %arg23[%c0_2, %c640], %2 {strides = array<i32>} : memref<32x768xf32, #tpu.memory_space<vmem>>, vector<32x128xf32>,
    %c0_3 = arith.constant 0 : index
    %c0_4 = arith.constant 0 : index
    %c0_5 = arith.constant 0 : index
    %4 = vector.load %arg1[%c0_3, %c0_4, %c0_5] : memref<1x32x512xf32, #tpu.memory_space<vmem>>, vector<1x32x512xf32>
    %5 = vector.shape_cast %4 : vector<1x32x512xf32> to vector<32x512xf32>
    %c0_6 = arith.constant 0 : index
    %c0_7 = arith.constant 0 : index
    %6 = vector.load %arg5[%c0_6, %c0_7] : memref<32x1xf32, #tpu.memory_space<vmem>>, vector<32x1xf32>
    %c0_8 = arith.constant 0 : index
    %c128 = arith.constant 128 : index
    %7 = vector.load %arg23[%c0_8, %c128] : memref<32x768xf32, #tpu.memory_space<vmem>>, vector<32x512xf32>
    tpu.vector_store %arg23[%c0_8, %c128], %5 {strides = array<i32>} : memref<32x768xf32, #tpu.memory_space<vmem>>, vector<32x512xf32>,
    %c0_9 = arith.constant 0 : index
    %c0_10 = arith.constant 0 : index
    %c0_11 = arith.constant 0 : index
    %8 = vector.load %arg4[%c0_9, %c0_10, %c0_11] : memref<9x32x32xf32, #tpu.memory_space<vmem>>, vector<1x32x32xf32>
    %9 = vector.shape_cast %8 : vector<1x32x32xf32> to vector<32x32xf32>
    %c0_12 = arith.constant 0 : index
    %c111 = arith.constant 111 : index
    %10 = vector.load %arg23[%c0_12, %c111] : memref<32x768xf32, #tpu.memory_space<vmem>>, vector<32x512xf32>
    %c0_13 = arith.constant 0 : index
    %c0_14 = arith.constant 0 : index
    %11 = vector.load %arg2[%c0_13, %c0_14] : memref<9x512xf32, #tpu.memory_space<vmem>>, vector<1x512xf32>
    %12 = vector.broadcast %11 : vector<1x512xf32> to vector<32x512xf32>
    %13 = arith.mulf %10, %12 : vector<32x512xf32>
    %cst_15 = arith.constant dense<0.000000e+00> : vector<32x512xf32>
    %14 = tpu.matmul %9, %13, %cst_15 {dimension_numbers = #tpu.dot_dimension_numbers<[1], [0], [0], [1], [0, 0, 1, 1], [], []>} : vector<32x32xf32>, vector<32x512xf32>, vector<32x512xf32> -> vector<32x512xf32>
    %c1 = arith.constant 1 : index
    %c0_16 = arith.constant 0 : index
    %c0_17 = arith.constant 0 : index
    %15 = vector.load %arg4[%c1, %c0_16, %c0_17] : memref<9x32x32xf32, #tpu.memory_space<vmem>>, vector<1x32x32xf32>
    %16 = vector.shape_cast %15 : vector<1x32x32xf32> to vector<32x32xf32>
    %c0_18 = arith.constant 0 : index
    %c112 = arith.constant 112 : index
    %17 = vector.load %arg23[%c0_18, %c112] : memref<32x768xf32, #tpu.memory_space<vmem>>, vector<32x512xf32>
    %c1_19 = arith.constant 1 : index
    %c0_20 = arith.constant 0 : index
    %18 = vector.load %arg2[%c1_19, %c0_20] : memref<9x512xf32, #tpu.memory_space<vmem>>, vector<1x512xf32>
    %19 = vector.broadcast %18 : vector<1x512xf32> to vector<32x512xf32>
    %20 = arith.mulf %17, %19 : vector<32x512xf32>
    %cst_21 = arith.constant dense<0.000000e+00> : vector<32x512xf32>
    %21 = tpu.matmul %16, %20, %cst_21 {dimension_numbers = #tpu.dot_dimension_numbers<[1], [0], [0], [1], [0, 0, 1, 1], [], []>} : vector<32x32xf32>, vector<32x512xf32>, vector<32x512xf32> -> vector<32x512xf32>
    %22 = arith.addf %14, %21 : vector<32x512xf32>
    %c2 = arith.constant 2 : index
    %c0_22 = arith.constant 0 : index
    %c0_23 = arith.constant 0 : index
    %23 = vector.load %arg4[%c2, %c0_22, %c0_23] : memref<9x32x32xf32, #tpu.memory_space<vmem>>, vector<1x32x32xf32>
    %24 = vector.shape_cast %23 : vector<1x32x32xf32> to vector<32x32xf32>
    %c0_24 = arith.constant 0 : index
    %c113 = arith.constant 113 : index
    %25 = vector.load %arg23[%c0_24, %c113] : memref<32x768xf32, #tpu.memory_space<vmem>>, vector<32x512xf32>
    %c2_25 = arith.constant 2 : index
    %c0_26 = arith.constant 0 : index
    %26 = vector.load %arg2[%c2_25, %c0_26] : memref<9x512xf32, #tpu.memory_space<vmem>>, vector<1x512xf32>
    %27 = vector.broadcast %26 : vector<1x512xf32> to vector<32x512xf32>
    %28 = arith.mulf %25, %27 : vector<32x512xf32>
    %cst_27 = arith.constant dense<0.000000e+00> : vector<32x512xf32>
    %29 = tpu.matmul %24, %28, %cst_27 {dimension_numbers = #tpu.dot_dimension_numbers<[1], [0], [0], [1], [0, 0, 1, 1], [], []>} : vector<32x32xf32>, vector<32x512xf32>, vector<32x512xf32> -> vector<32x512xf32>
    %30 = arith.addf %22, %29 : vector<32x512xf32>
    %c3 = arith.constant 3 : index
    %c0_28 = arith.constant 0 : index
    %c0_29 = arith.constant 0 : index
    %31 = vector.load %arg4[%c3, %c0_28, %c0_29] : memref<9x32x32xf32, #tpu.memory_space<vmem>>, vector<1x32x32xf32>
    %32 = vector.shape_cast %31 : vector<1x32x32xf32> to vector<32x32xf32>
    %c0_30 = arith.constant 0 : index
    %c127 = arith.constant 127 : index
    %33 = vector.load %arg23[%c0_30, %c127] : memref<32x768xf32, #tpu.memory_space<vmem>>, vector<32x512xf32>
    %c3_31 = arith.constant 3 : index
    %c0_32 = arith.constant 0 : index
    %34 = vector.load %arg2[%c3_31, %c0_32] : memref<9x512xf32, #tpu.memory_space<vmem>>, vector<1x512xf32>
    %35 = vector.broadcast %34 : vector<1x512xf32> to vector<32x512xf32>
    %36 = arith.mulf %33, %35 : vector<32x512xf32>
    %cst_33 = arith.constant dense<0.000000e+00> : vector<32x512xf32>
    %37 = tpu.matmul %32, %36, %cst_33 {dimension_numbers = #tpu.dot_dimension_numbers<[1], [0], [0], [1], [0, 0, 1, 1], [], []>} : vector<32x32xf32>, vector<32x512xf32>, vector<32x512xf32> -> vector<32x512xf32>
    %38 = arith.addf %30, %37 : vector<32x512xf32>
    %c4 = arith.constant 4 : index
    %c0_34 = arith.constant 0 : index
    %c0_35 = arith.constant 0 : index
    %39 = vector.load %arg4[%c4, %c0_34, %c0_35] : memref<9x32x32xf32, #tpu.memory_space<vmem>>, vector<1x32x32xf32>
    %40 = vector.shape_cast %39 : vector<1x32x32xf32> to vector<32x32xf32>
    %c0_36 = arith.constant 0 : index
    %c128_37 = arith.constant 128 : index
    %41 = vector.load %arg23[%c0_36, %c128_37] : memref<32x768xf32, #tpu.memory_space<vmem>>, vector<32x512xf32>
    %cst_38 = arith.constant dense<0.000000e+00> : vector<32x512xf32>
    %42 = tpu.matmul %40, %41, %cst_38 {dimension_numbers = #tpu.dot_dimension_numbers<[1], [0], [0], [1], [0, 0, 1, 1], [], []>} : vector<32x32xf32>, vector<32x512xf32>, vector<32x512xf32> -> vector<32x512xf32>
    %43 = arith.addf %38, %42 : vector<32x512xf32>
    %c5 = arith.constant 5 : index
    %c0_39 = arith.constant 0 : index
    %c0_40 = arith.constant 0 : index
    %44 = vector.load %arg4[%c5, %c0_39, %c0_40] : memref<9x32x32xf32, #tpu.memory_space<vmem>>, vector<1x32x32xf32>
    %45 = vector.shape_cast %44 : vector<1x32x32xf32> to vector<32x32xf32>
    %c0_41 = arith.constant 0 : index
    %c129 = arith.constant 129 : index
    %46 = vector.load %arg23[%c0_41, %c129] : memref<32x768xf32, #tpu.memory_space<vmem>>, vector<32x512xf32>
    %c5_42 = arith.constant 5 : index
    %c0_43 = arith.constant 0 : index
    %47 = vector.load %arg2[%c5_42, %c0_43] : memref<9x512xf32, #tpu.memory_space<vmem>>, vector<1x512xf32>
    %48 = vector.broadcast %47 : vector<1x512xf32> to vector<32x512xf32>
    %49 = arith.mulf %46, %48 : vector<32x512xf32>
    %cst_44 = arith.constant dense<0.000000e+00> : vector<32x512xf32>
    %50 = tpu.matmul %45, %49, %cst_44 {dimension_numbers = #tpu.dot_dimension_numbers<[1], [0], [0], [1], [0, 0, 1, 1], [], []>} : vector<32x32xf32>, vector<32x512xf32>, vector<32x512xf32> -> vector<32x512xf32>
    %51 = arith.addf %43, %50 : vector<32x512xf32>
    %c6 = arith.constant 6 : index
    %c0_45 = arith.constant 0 : index
    %c0_46 = arith.constant 0 : index
    %52 = vector.load %arg4[%c6, %c0_45, %c0_46] : memref<9x32x32xf32, #tpu.memory_space<vmem>>, vector<1x32x32xf32>
    %53 = vector.shape_cast %52 : vector<1x32x32xf32> to vector<32x32xf32>
    %c0_47 = arith.constant 0 : index
    %c143 = arith.constant 143 : index
    %54 = vector.load %arg23[%c0_47, %c143] : memref<32x768xf32, #tpu.memory_space<vmem>>, vector<32x512xf32>
    %c6_48 = arith.constant 6 : index
    %c0_49 = arith.constant 0 : index
    %55 = vector.load %arg2[%c6_48, %c0_49] : memref<9x512xf32, #tpu.memory_space<vmem>>, vector<1x512xf32>
    %56 = vector.broadcast %55 : vector<1x512xf32> to vector<32x512xf32>
    %57 = arith.mulf %54, %56 : vector<32x512xf32>
    %cst_50 = arith.constant dense<0.000000e+00> : vector<32x512xf32>
    %58 = tpu.matmul %53, %57, %cst_50 {dimension_numbers = #tpu.dot_dimension_numbers<[1], [0], [0], [1], [0, 0, 1, 1], [], []>} : vector<32x32xf32>, vector<32x512xf32>, vector<32x512xf32> -> vector<32x512xf32>
    %59 = arith.addf %51, %58 : vector<32x512xf32>
    %c7 = arith.constant 7 : index
    %c0_51 = arith.constant 0 : index
    %c0_52 = arith.constant 0 : index
    %60 = vector.load %arg4[%c7, %c0_51, %c0_52] : memref<9x32x32xf32, #tpu.memory_space<vmem>>, vector<1x32x32xf32>
    %61 = vector.shape_cast %60 : vector<1x32x32xf32> to vector<32x32xf32>
    %c0_53 = arith.constant 0 : index
    %c144 = arith.constant 144 : index
    %62 = vector.load %arg23[%c0_53, %c144] : memref<32x768xf32, #tpu.memory_space<vmem>>, vector<32x512xf32>
    %c7_54 = arith.constant 7 : index
    %c0_55 = arith.constant 0 : index
    %63 = vector.load %arg2[%c7_54, %c0_55] : memref<9x512xf32, #tpu.memory_space<vmem>>, vector<1x512xf32>
    %64 = vector.broadcast %63 : vector<1x512xf32> to vector<32x512xf32>
    %65 = arith.mulf %62, %64 : vector<32x512xf32>
    %cst_56 = arith.constant dense<0.000000e+00> : vector<32x512xf32>
    %66 = tpu.matmul %61, %65, %cst_56 {dimension_numbers = #tpu.dot_dimension_numbers<[1], [0], [0], [1], [0, 0, 1, 1], [], []>} : vector<32x32xf32>, vector<32x512xf32>, vector<32x512xf32> -> vector<32x512xf32>
    %67 = arith.addf %59, %66 : vector<32x512xf32>
    %c8 = arith.constant 8 : index
    %c0_57 = arith.constant 0 : index
    %c0_58 = arith.constant 0 : index
    %68 = vector.load %arg4[%c8, %c0_57, %c0_58] : memref<9x32x32xf32, #tpu.memory_space<vmem>>, vector<1x32x32xf32>
    %69 = vector.shape_cast %68 : vector<1x32x32xf32> to vector<32x32xf32>
    %c0_59 = arith.constant 0 : index
    %c145 = arith.constant 145 : index
    %70 = vector.load %arg23[%c0_59, %c145] : memref<32x768xf32, #tpu.memory_space<vmem>>, vector<32x512xf32>
    %c8_60 = arith.constant 8 : index
    %c0_61 = arith.constant 0 : index
    %71 = vector.load %arg2[%c8_60, %c0_61] : memref<9x512xf32, #tpu.memory_space<vmem>>, vector<1x512xf32>
    %72 = vector.broadcast %71 : vector<1x512xf32> to vector<32x512xf32>
    %73 = arith.mulf %70, %72 : vector<32x512xf32>
    %cst_62 = arith.constant dense<0.000000e+00> : vector<32x512xf32>
    %74 = tpu.matmul %69, %73, %cst_62 {dimension_numbers = #tpu.dot_dimension_numbers<[1], [0], [0], [1], [0, 0, 1, 1], [], []>} : vector<32x32xf32>, vector<32x512xf32>, vector<32x512xf32> -> vector<32x512xf32>
    %75 = arith.addf %67, %74 : vector<32x512xf32>
    %76 = vector.broadcast %6 : vector<32x1xf32> to vector<32x512xf32>
    %77 = arith.addf %75, %76 : vector<32x512xf32>
    %cst_63 = arith.constant dense<0.000000e+00> : vector<512xf32>
    %78 = vector.multi_reduction <add>, %77, %cst_63 [0] : vector<32x512xf32> to vector<512xf32>
    %79 = vector.shape_cast %78 : vector<512xf32> to vector<1x512xf32>
    %cst_64 = arith.constant 3.200000e+01 : f32
    %80 = vector.broadcast %cst_64 : f32 to vector<1x512xf32>
    %81 = arith.divf %79, %80 : vector<1x512xf32>
    %82 = vector.broadcast %81 : vector<1x512xf32> to vector<32x512xf32>
    %83 = arith.subf %77, %82 : vector<32x512xf32>
    %84 = arith.mulf %83, %83 : vector<32x512xf32>
    %cst_65 = arith.constant dense<0.000000e+00> : vector<512xf32>
    %85 = vector.multi_reduction <add>, %84, %cst_65 [0] : vector<32x512xf32> to vector<512xf32>
    %86 = vector.shape_cast %85 : vector<512xf32> to vector<1x512xf32>
    %cst_66 = arith.constant 3.200000e+01 : f32
    %87 = vector.broadcast %cst_66 : f32 to vector<1x512xf32>
    %88 = arith.divf %86, %87 : vector<1x512xf32>
    %cst_67 = arith.constant 9.99999974E-6 : f32
    %89 = vector.broadcast %cst_67 : f32 to vector<1x512xf32>
    %90 = arith.addf %88, %89 : vector<1x512xf32>
    %91 = math.sqrt %90 : vector<1x512xf32>
    %92 = vector.broadcast %91 : vector<1x512xf32> to vector<32x512xf32>
    %93 = arith.divf %83, %92 : vector<32x512xf32>
    %c0_68 = arith.constant 0 : index
    %c0_69 = arith.constant 0 : index
    %94 = vector.load %arg6[%c0_68, %c0_69] : memref<32x1xf32, #tpu.memory_space<vmem>>, vector<32x1xf32>
    %95 = vector.broadcast %94 : vector<32x1xf32> to vector<32x512xf32>
    %96 = arith.mulf %93, %95 : vector<32x512xf32>
    %c0_70 = arith.constant 0 : index
    %c0_71 = arith.constant 0 : index
    %97 = vector.load %arg7[%c0_70, %c0_71] : memref<32x1xf32, #tpu.memory_space<vmem>>, vector<32x1xf32>
    %98 = vector.broadcast %97 : vector<32x1xf32> to vector<32x512xf32>
    %99 = arith.addf %96, %98 : vector<32x512xf32>
    %c0_72 = arith.constant 0 : index
    %c128_73 = arith.constant 128 : index
    %100 = vector.load %arg23[%c0_72, %c128_73] : memref<32x768xf32, #tpu.memory_space<vmem>>, vector<32x512xf32>
    tpu.vector_store %arg23[%c0_72, %c128_73], %99 {strides = array<i32>} : memref<32x768xf32, #tpu.memory_space<vmem>>, vector<32x512xf32>,
    %c0_74 = arith.constant 0 : index
    %c0_75 = arith.constant 0 : index
    %c0_76 = arith.constant 0 : index
    %101 = vector.load %arg8[%c0_74, %c0_75, %c0_76] : memref<3x32x32xf32, #tpu.memory_space<vmem>>, vector<1x32x32xf32>
    %102 = vector.shape_cast %101 : vector<1x32x32xf32> to vector<32x32xf32>
    %c0_77 = arith.constant 0 : index
    %c112_78 = arith.constant 112 : index
    %103 = vector.load %arg23[%c0_77, %c112_78] : memref<32x768xf32, #tpu.memory_space<vmem>>, vector<32x512xf32>
    %c1_79 = arith.constant 1 : index
    %c0_80 = arith.constant 0 : index
    %104 = vector.load %arg2[%c1_79, %c0_80] : memref<9x512xf32, #tpu.memory_space<vmem>>, vector<1x512xf32>
    %105 = vector.broadcast %104 : vector<1x512xf32> to vector<32x512xf32>
    %106 = arith.mulf %103, %105 : vector<32x512xf32>
    %cst_81 = arith.constant dense<0.000000e+00> : vector<32x512xf32>
    %107 = tpu.matmul %102, %106, %cst_81 {dimension_numbers = #tpu.dot_dimension_numbers<[1], [0], [0], [1], [0, 0, 1, 1], [], []>} : vector<32x32xf32>, vector<32x512xf32>, vector<32x512xf32> -> vector<32x512xf32>
    %c1_82 = arith.constant 1 : index
    %c0_83 = arith.constant 0 : index
    %c0_84 = arith.constant 0 : index
    %108 = vector.load %arg8[%c1_82, %c0_83, %c0_84] : memref<3x32x32xf32, #tpu.memory_space<vmem>>, vector<1x32x32xf32>
    %109 = vector.shape_cast %108 : vector<1x32x32xf32> to vector<32x32xf32>
    %c0_85 = arith.constant 0 : index
    %c128_86 = arith.constant 128 : index
    %110 = vector.load %arg23[%c0_85, %c128_86] : memref<32x768xf32, #tpu.memory_space<vmem>>, vector<32x512xf32>
    %cst_87 = arith.constant dense<0.000000e+00> : vector<32x512xf32>
    %111 = tpu.matmul %109, %110, %cst_87 {dimension_numbers = #tpu.dot_dimension_numbers<[1], [0], [0], [1], [0, 0, 1, 1], [], []>} : vector<32x32xf32>, vector<32x512xf32>, vector<32x512xf32> -> vector<32x512xf32>
    %112 = arith.addf %107, %111 : vector<32x512xf32>
    %c2_88 = arith.constant 2 : index
    %c0_89 = arith.constant 0 : index
    %c0_90 = arith.constant 0 : index
    %113 = vector.load %arg8[%c2_88, %c0_89, %c0_90] : memref<3x32x32xf32, #tpu.memory_space<vmem>>, vector<1x32x32xf32>
    %114 = vector.shape_cast %113 : vector<1x32x32xf32> to vector<32x32xf32>
    %c0_91 = arith.constant 0 : index
    %c144_92 = arith.constant 144 : index
    %115 = vector.load %arg23[%c0_91, %c144_92] : memref<32x768xf32, #tpu.memory_space<vmem>>, vector<32x512xf32>
    %c7_93 = arith.constant 7 : index
    %c0_94 = arith.constant 0 : index
    %116 = vector.load %arg2[%c7_93, %c0_94] : memref<9x512xf32, #tpu.memory_space<vmem>>, vector<1x512xf32>
    %117 = vector.broadcast %116 : vector<1x512xf32> to vector<32x512xf32>
    %118 = arith.mulf %115, %117 : vector<32x512xf32>
    %cst_95 = arith.constant dense<0.000000e+00> : vector<32x512xf32>
    %119 = tpu.matmul %114, %118, %cst_95 {dimension_numbers = #tpu.dot_dimension_numbers<[1], [0], [0], [1], [0, 0, 1, 1], [], []>} : vector<32x32xf32>, vector<32x512xf32>, vector<32x512xf32> -> vector<32x512xf32>
    %120 = arith.addf %112, %119 : vector<32x512xf32>
    %c0_96 = arith.constant 0 : index
    %121 = memref.load %arg10[%c0_96] : memref<2xf32, #tpu.memory_space<smem>>
    %122 = vector.broadcast %121 : f32 to vector<32x512xf32>
    %123 = arith.addf %120, %122 : vector<32x512xf32>
    %c0_97 = arith.constant 0 : index
    %124 = memref.load %arg9[%c0_97] : memref<3xf32, #tpu.memory_space<smem>>
    %c0_98 = arith.constant 0 : index
    %c127_99 = arith.constant 127 : index
    %125 = vector.load %arg23[%c0_98, %c127_99] : memref<32x768xf32, #tpu.memory_space<vmem>>, vector<32x512xf32>
    %c3_100 = arith.constant 3 : index
    %c0_101 = arith.constant 0 : index
    %126 = vector.load %arg2[%c3_100, %c0_101] : memref<9x512xf32, #tpu.memory_space<vmem>>, vector<1x512xf32>
    %127 = vector.broadcast %126 : vector<1x512xf32> to vector<32x512xf32>
    %128 = arith.mulf %125, %127 : vector<32x512xf32>
    %129 = vector.broadcast %124 : f32 to vector<32x512xf32>
    %130 = arith.mulf %129, %128 : vector<32x512xf32>
    %c1_102 = arith.constant 1 : index
    %131 = memref.load %arg9[%c1_102] : memref<3xf32, #tpu.memory_space<smem>>
    %c0_103 = arith.constant 0 : index
    %c128_104 = arith.constant 128 : index
    %132 = vector.load %arg23[%c0_103, %c128_104] : memref<32x768xf32, #tpu.memory_space<vmem>>, vector<32x512xf32>
    %133 = vector.broadcast %131 : f32 to vector<32x512xf32>
    %134 = arith.mulf %133, %132 : vector<32x512xf32>
    %135 = arith.addf %130, %134 : vector<32x512xf32>
    %c2_105 = arith.constant 2 : index
    %136 = memref.load %arg9[%c2_105] : memref<3xf32, #tpu.memory_space<smem>>
    %c0_106 = arith.constant 0 : index
    %c129_107 = arith.constant 129 : index
    %137 = vector.load %arg23[%c0_106, %c129_107] : memref<32x768xf32, #tpu.memory_space<vmem>>, vector<32x512xf32>
    %c5_108 = arith.constant 5 : index
    %c0_109 = arith.constant 0 : index
    %138 = vector.load %arg2[%c5_108, %c0_109] : memref<9x512xf32, #tpu.memory_space<vmem>>, vector<1x512xf32>
    %139 = vector.broadcast %138 : vector<1x512xf32> to vector<32x512xf32>
    %140 = arith.mulf %137, %139 : vector<32x512xf32>
    %141 = vector.broadcast %136 : f32 to vector<32x512xf32>
    %142 = arith.mulf %141, %140 : vector<32x512xf32>
    %143 = arith.addf %135, %142 : vector<32x512xf32>
    %c1_110 = arith.constant 1 : index
    %144 = memref.load %arg10[%c1_110] : memref<2xf32, #tpu.memory_space<smem>>
    %145 = vector.broadcast %144 : f32 to vector<32x512xf32>
    %146 = arith.addf %143, %145 : vector<32x512xf32>
    %c0_111 = arith.constant 0 : index
    %c128_112 = arith.constant 128 : index
    %147 = vector.load %arg23[%c0_111, %c128_112] : memref<32x768xf32, #tpu.memory_space<vmem>>, vector<32x512xf32>
    %148 = arith.mulf %123, %146 : vector<32x512xf32>
    %149 = arith.addf %147, %148 : vector<32x512xf32>
    %c0_113 = arith.constant 0 : index
    %c128_114 = arith.constant 128 : index
    %150 = vector.load %arg23[%c0_113, %c128_114] : memref<32x768xf32, #tpu.memory_space<vmem>>, vector<32x512xf32>
    tpu.vector_store %arg23[%c0_113, %c128_114], %149 {strides = array<i32>} : memref<32x768xf32, #tpu.memory_space<vmem>>, vector<32x512xf32>,
    %c0_115 = arith.constant 0 : index
    %c0_116 = arith.constant 0 : index
    %c0_117 = arith.constant 0 : index
    %151 = vector.load %arg11[%c0_115, %c0_116, %c0_117] : memref<9x8x8xf32, #tpu.memory_space<vmem>>, vector<1x8x8xf32>
    %152 = vector.shape_cast %151 : vector<1x8x8xf32> to vector<8x8xf32>
    %c0_118 = arith.constant 0 : index
    %c111_119 = arith.constant 111 : index
    %153 = vector.load %arg23[%c0_118, %c111_119] : memref<32x768xf32, #tpu.memory_space<vmem>>, vector<8x512xf32>
    %c0_120 = arith.constant 0 : index
    %c0_121 = arith.constant 0 : index
    %154 = vector.load %arg2[%c0_120, %c0_121] : memref<9x512xf32, #tpu.memory_space<vmem>>, vector<1x512xf32>
    %155 = vector.broadcast %154 : vector<1x512xf32> to vector<8x512xf32>
    %156 = arith.mulf %153, %155 : vector<8x512xf32>
    %cst_122 = arith.constant dense<0.000000e+00> : vector<8x512xf32>
    %157 = tpu.matmul %152, %156, %cst_122 {dimension_numbers = #tpu.dot_dimension_numbers<[1], [0], [0], [1], [0, 0, 1, 1], [], []>} : vector<8x8xf32>, vector<8x512xf32>, vector<8x512xf32> -> vector<8x512xf32>
    %c1_123 = arith.constant 1 : index
    %c0_124 = arith.constant 0 : index
    %c0_125 = arith.constant 0 : index
    %158 = vector.load %arg11[%c1_123, %c0_124, %c0_125] : memref<9x8x8xf32, #tpu.memory_space<vmem>>, vector<1x8x8xf32>
    %159 = vector.shape_cast %158 : vector<1x8x8xf32> to vector<8x8xf32>
    %c0_126 = arith.constant 0 : index
    %c112_127 = arith.constant 112 : index
    %160 = vector.load %arg23[%c0_126, %c112_127] : memref<32x768xf32, #tpu.memory_space<vmem>>, vector<8x512xf32>
    %c1_128 = arith.constant 1 : index
    %c0_129 = arith.constant 0 : index
    %161 = vector.load %arg2[%c1_128, %c0_129] : memref<9x512xf32, #tpu.memory_space<vmem>>, vector<1x512xf32>
    %162 = vector.broadcast %161 : vector<1x512xf32> to vector<8x512xf32>
    %163 = arith.mulf %160, %162 : vector<8x512xf32>
    %cst_130 = arith.constant dense<0.000000e+00> : vector<8x512xf32>
    %164 = tpu.matmul %159, %163, %cst_130 {dimension_numbers = #tpu.dot_dimension_numbers<[1], [0], [0], [1], [0, 0, 1, 1], [], []>} : vector<8x8xf32>, vector<8x512xf32>, vector<8x512xf32> -> vector<8x512xf32>
    %165 = arith.addf %157, %164 : vector<8x512xf32>
    %c2_131 = arith.constant 2 : index
    %c0_132 = arith.constant 0 : index
    %c0_133 = arith.constant 0 : index
    %166 = vector.load %arg11[%c2_131, %c0_132, %c0_133] : memref<9x8x8xf32, #tpu.memory_space<vmem>>, vector<1x8x8xf32>
    %167 = vector.shape_cast %166 : vector<1x8x8xf32> to vector<8x8xf32>
    %c0_134 = arith.constant 0 : index
    %c113_135 = arith.constant 113 : index
    %168 = vector.load %arg23[%c0_134, %c113_135] : memref<32x768xf32, #tpu.memory_space<vmem>>, vector<8x512xf32>
    %c2_136 = arith.constant 2 : index
    %c0_137 = arith.constant 0 : index
    %169 = vector.load %arg2[%c2_136, %c0_137] : memref<9x512xf32, #tpu.memory_space<vmem>>, vector<1x512xf32>
    %170 = vector.broadcast %169 : vector<1x512xf32> to vector<8x512xf32>
    %171 = arith.mulf %168, %170 : vector<8x512xf32>
    %cst_138 = arith.constant dense<0.000000e+00> : vector<8x512xf32>
    %172 = tpu.matmul %167, %171, %cst_138 {dimension_numbers = #tpu.dot_dimension_numbers<[1], [0], [0], [1], [0, 0, 1, 1], [], []>} : vector<8x8xf32>, vector<8x512xf32>, vector<8x512xf32> -> vector<8x512xf32>
    %173 = arith.addf %165, %172 : vector<8x512xf32>
    %c3_139 = arith.constant 3 : index
    %c0_140 = arith.constant 0 : index
    %c0_141 = arith.constant 0 : index
    %174 = vector.load %arg11[%c3_139, %c0_140, %c0_141] : memref<9x8x8xf32, #tpu.memory_space<vmem>>, vector<1x8x8xf32>
    %175 = vector.shape_cast %174 : vector<1x8x8xf32> to vector<8x8xf32>
    %c0_142 = arith.constant 0 : index
    %c127_143 = arith.constant 127 : index
    %176 = vector.load %arg23[%c0_142, %c127_143] : memref<32x768xf32, #tpu.memory_space<vmem>>, vector<8x512xf32>
    %c3_144 = arith.constant 3 : index
    %c0_145 = arith.constant 0 : index
    %177 = vector.load %arg2[%c3_144, %c0_145] : memref<9x512xf32, #tpu.memory_space<vmem>>, vector<1x512xf32>
    %178 = vector.broadcast %177 : vector<1x512xf32> to vector<8x512xf32>
    %179 = arith.mulf %176, %178 : vector<8x512xf32>
    %cst_146 = arith.constant dense<0.000000e+00> : vector<8x512xf32>
    %180 = tpu.matmul %175, %179, %cst_146 {dimension_numbers = #tpu.dot_dimension_numbers<[1], [0], [0], [1], [0, 0, 1, 1], [], []>} : vector<8x8xf32>, vector<8x512xf32>, vector<8x512xf32> -> vector<8x512xf32>
    %181 = arith.addf %173, %180 : vector<8x512xf32>
    %c4_147 = arith.constant 4 : index
    %c0_148 = arith.constant 0 : index
    %c0_149 = arith.constant 0 : index
    %182 = vector.load %arg11[%c4_147, %c0_148, %c0_149] : memref<9x8x8xf32, #tpu.memory_space<vmem>>, vector<1x8x8xf32>
    %183 = vector.shape_cast %182 : vector<1x8x8xf32> to vector<8x8xf32>
    %c0_150 = arith.constant 0 : index
    %c128_151 = arith.constant 128 : index
    %184 = vector.load %arg23[%c0_150, %c128_151] : memref<32x768xf32, #tpu.memory_space<vmem>>, vector<8x512xf32>
    %cst_152 = arith.constant dense<0.000000e+00> : vector<8x512xf32>
    %185 = tpu.matmul %183, %184, %cst_152 {dimension_numbers = #tpu.dot_dimension_numbers<[1], [0], [0], [1], [0, 0, 1, 1], [], []>} : vector<8x8xf32>, vector<8x512xf32>, vector<8x512xf32> -> vector<8x512xf32>
    %186 = arith.addf %181, %185 : vector<8x512xf32>
    %c5_153 = arith.constant 5 : index
    %c0_154 = arith.constant 0 : index
    %c0_155 = arith.constant 0 : index
    %187 = vector.load %arg11[%c5_153, %c0_154, %c0_155] : memref<9x8x8xf32, #tpu.memory_space<vmem>>, vector<1x8x8xf32>
    %188 = vector.shape_cast %187 : vector<1x8x8xf32> to vector<8x8xf32>
    %c0_156 = arith.constant 0 : index
    %c129_157 = arith.constant 129 : index
    %189 = vector.load %arg23[%c0_156, %c129_157] : memref<32x768xf32, #tpu.memory_space<vmem>>, vector<8x512xf32>
    %c5_158 = arith.constant 5 : index
    %c0_159 = arith.constant 0 : index
    %190 = vector.load %arg2[%c5_158, %c0_159] : memref<9x512xf32, #tpu.memory_space<vmem>>, vector<1x512xf32>
    %191 = vector.broadcast %190 : vector<1x512xf32> to vector<8x512xf32>
    %192 = arith.mulf %189, %191 : vector<8x512xf32>
    %cst_160 = arith.constant dense<0.000000e+00> : vector<8x512xf32>
    %193 = tpu.matmul %188, %192, %cst_160 {dimension_numbers = #tpu.dot_dimension_numbers<[1], [0], [0], [1], [0, 0, 1, 1], [], []>} : vector<8x8xf32>, vector<8x512xf32>, vector<8x512xf32> -> vector<8x512xf32>
    %194 = arith.addf %186, %193 : vector<8x512xf32>
    %c6_161 = arith.constant 6 : index
    %c0_162 = arith.constant 0 : index
    %c0_163 = arith.constant 0 : index
    %195 = vector.load %arg11[%c6_161, %c0_162, %c0_163] : memref<9x8x8xf32, #tpu.memory_space<vmem>>, vector<1x8x8xf32>
    %196 = vector.shape_cast %195 : vector<1x8x8xf32> to vector<8x8xf32>
    %c0_164 = arith.constant 0 : index
    %c143_165 = arith.constant 143 : index
    %197 = vector.load %arg23[%c0_164, %c143_165] : memref<32x768xf32, #tpu.memory_space<vmem>>, vector<8x512xf32>
    %c6_166 = arith.constant 6 : index
    %c0_167 = arith.constant 0 : index
    %198 = vector.load %arg2[%c6_166, %c0_167] : memref<9x512xf32, #tpu.memory_space<vmem>>, vector<1x512xf32>
    %199 = vector.broadcast %198 : vector<1x512xf32> to vector<8x512xf32>
    %200 = arith.mulf %197, %199 : vector<8x512xf32>
    %cst_168 = arith.constant dense<0.000000e+00> : vector<8x512xf32>
    %201 = tpu.matmul %196, %200, %cst_168 {dimension_numbers = #tpu.dot_dimension_numbers<[1], [0], [0], [1], [0, 0, 1, 1], [], []>} : vector<8x8xf32>, vector<8x512xf32>, vector<8x512xf32> -> vector<8x512xf32>
    %202 = arith.addf %194, %201 : vector<8x512xf32>
    %c7_169 = arith.constant 7 : index
    %c0_170 = arith.constant 0 : index
    %c0_171 = arith.constant 0 : index
    %203 = vector.load %arg11[%c7_169, %c0_170, %c0_171] : memref<9x8x8xf32, #tpu.memory_space<vmem>>, vector<1x8x8xf32>
    %204 = vector.shape_cast %203 : vector<1x8x8xf32> to vector<8x8xf32>
    %c0_172 = arith.constant 0 : index
    %c144_173 = arith.constant 144 : index
    %205 = vector.load %arg23[%c0_172, %c144_173] : memref<32x768xf32, #tpu.memory_space<vmem>>, vector<8x512xf32>
    %c7_174 = arith.constant 7 : index
    %c0_175 = arith.constant 0 : index
    %206 = vector.load %arg2[%c7_174, %c0_175] : memref<9x512xf32, #tpu.memory_space<vmem>>, vector<1x512xf32>
    %207 = vector.broadcast %206 : vector<1x512xf32> to vector<8x512xf32>
    %208 = arith.mulf %205, %207 : vector<8x512xf32>
    %cst_176 = arith.constant dense<0.000000e+00> : vector<8x512xf32>
    %209 = tpu.matmul %204, %208, %cst_176 {dimension_numbers = #tpu.dot_dimension_numbers<[1], [0], [0], [1], [0, 0, 1, 1], [], []>} : vector<8x8xf32>, vector<8x512xf32>, vector<8x512xf32> -> vector<8x512xf32>
    %210 = arith.addf %202, %209 : vector<8x512xf32>
    %c8_177 = arith.constant 8 : index
    %c0_178 = arith.constant 0 : index
    %c0_179 = arith.constant 0 : index
    %211 = vector.load %arg11[%c8_177, %c0_178, %c0_179] : memref<9x8x8xf32, #tpu.memory_space<vmem>>, vector<1x8x8xf32>
    %212 = vector.shape_cast %211 : vector<1x8x8xf32> to vector<8x8xf32>
    %c0_180 = arith.constant 0 : index
    %c145_181 = arith.constant 145 : index
    %213 = vector.load %arg23[%c0_180, %c145_181] : memref<32x768xf32, #tpu.memory_space<vmem>>, vector<8x512xf32>
    %c8_182 = arith.constant 8 : index
    %c0_183 = arith.constant 0 : index
    %214 = vector.load %arg2[%c8_182, %c0_183] : memref<9x512xf32, #tpu.memory_space<vmem>>, vector<1x512xf32>
    %215 = vector.broadcast %214 : vector<1x512xf32> to vector<8x512xf32>
    %216 = arith.mulf %213, %215 : vector<8x512xf32>
    %cst_184 = arith.constant dense<0.000000e+00> : vector<8x512xf32>
    %217 = tpu.matmul %212, %216, %cst_184 {dimension_numbers = #tpu.dot_dimension_numbers<[1], [0], [0], [1], [0, 0, 1, 1], [], []>} : vector<8x8xf32>, vector<8x512xf32>, vector<8x512xf32> -> vector<8x512xf32>
    %218 = arith.addf %210, %217 : vector<8x512xf32>
    %c0_185 = arith.constant 0 : index
    %c128_186 = arith.constant 128 : index
    %219 = vector.load %arg23[%c0_185, %c128_186] : memref<32x768xf32, #tpu.memory_space<vmem>>, vector<8x512xf32>
    tpu.vector_store %arg23[%c0_185, %c128_186], %218 {strides = array<i32>} : memref<32x768xf32, #tpu.memory_space<vmem>>, vector<8x512xf32>,
    %c0_187 = arith.constant 0 : index
    %c128_188 = arith.constant 128 : index
    %220 = vector.load %arg23[%c0_187, %c128_188] : memref<32x768xf32, #tpu.memory_space<vmem>>, vector<32x512xf32>
    %c0_189 = arith.constant 0 : index
    %c0_190 = arith.constant 0 : index
    %221 = vector.load %arg12[%c0_189, %c0_190] : memref<32x32xf32, #tpu.memory_space<vmem>>, vector<32x32xf32>
    %cst_191 = arith.constant dense<0.000000e+00> : vector<32x512xf32>
    %222 = tpu.matmul %221, %220, %cst_191 {dimension_numbers = #tpu.dot_dimension_numbers<[1], [0], [0], [1], [0, 0, 1, 1], [], []>} : vector<32x32xf32>, vector<32x512xf32>, vector<32x512xf32> -> vector<32x512xf32>
    %c0_192 = arith.constant 0 : index
    %c0_193 = arith.constant 0 : index
    %223 = vector.load %arg13[%c0_192, %c0_193] : memref<32x1xf32, #tpu.memory_space<vmem>>, vector<32x1xf32>
    %224 = vector.broadcast %223 : vector<32x1xf32> to vector<32x512xf32>
    %225 = arith.addf %222, %224 : vector<32x512xf32>
    %c0_194 = arith.constant 0 : index
    %c0_195 = arith.constant 0 : index
    %226 = vector.load %arg3[%c0_194, %c0_195] : memref<2x512xf32, #tpu.memory_space<vmem>>, vector<1x512xf32>
    %227 = vector.broadcast %226 : vector<1x512xf32> to vector<32x512xf32>
    %228 = arith.mulf %220, %227 : vector<32x512xf32>
    %cst_196 = arith.constant dense<0.000000e+00> : vector<32xf32>
    %229 = vector.multi_reduction <add>, %228, %cst_196 [1] : vector<32x512xf32> to vector<32xf32>
    %230 = vector.shape_cast %229 : vector<32xf32> to vector<32x1xf32>
    %cst_197 = arith.constant 3.906250e-03 : f32
    %231 = vector.broadcast %cst_197 : f32 to vector<32x1xf32>
    %232 = arith.mulf %230, %231 : vector<32x1xf32>
    %c0_198 = arith.constant 0 : index
    %c0_199 = arith.constant 0 : index
    %233 = vector.load %arg14[%c0_198, %c0_199] : memref<32x2xf32, #tpu.memory_space<vmem>>, vector<32x2xf32>
    %234 = vector.broadcast %232 : vector<32x1xf32> to vector<32x2xf32>
    %235 = arith.mulf %233, %234 : vector<32x2xf32>
    %cst_200 = arith.constant dense<0.000000e+00> : vector<2xf32>
    %236 = vector.multi_reduction <add>, %235, %cst_200 [0] : vector<32x2xf32> to vector<2xf32>
    %237 = vector.shape_cast %236 : vector<2xf32> to vector<1x2xf32>
    %c0_201 = arith.constant 0 : index
    %c0_202 = arith.constant 0 : index
    %238 = vector.load %arg15[%c0_201, %c0_202] : memref<1x2xf32, #tpu.memory_space<vmem>>, vector<1x2xf32>
    %239 = arith.addf %237, %238 : vector<1x2xf32>
    %cst_203 = arith.constant 0.000000e+00 : f32
    %240 = vector.broadcast %cst_203 : f32 to vector<1x2xf32>
    %241 = arith.maximumf %239, %240 : vector<1x2xf32>
    %c0_204 = arith.constant 0 : index
    %c0_205 = arith.constant 0 : index
    %242 = vector.load %arg16[%c0_204, %c0_205] : memref<32x2xf32, #tpu.memory_space<vmem>>, vector<32x2xf32>
    %243 = vector.broadcast %241 : vector<1x2xf32> to vector<32x2xf32>
    %244 = arith.mulf %242, %243 : vector<32x2xf32>
    %cst_206 = arith.constant dense<0.000000e+00> : vector<32xf32>
    %245 = vector.multi_reduction <add>, %244, %cst_206 [1] : vector<32x2xf32> to vector<32xf32>
    %246 = vector.shape_cast %245 : vector<32xf32> to vector<32x1xf32>
    %c0_207 = arith.constant 0 : index
    %c0_208 = arith.constant 0 : index
    %247 = vector.load %arg17[%c0_207, %c0_208] : memref<32x1xf32, #tpu.memory_space<vmem>>, vector<32x1xf32>
    %248 = arith.addf %246, %247 : vector<32x1xf32>
    %249 = arith.negf %248 : vector<32x1xf32>
    %250 = math.exp %249 : vector<32x1xf32>
    %cst_209 = arith.constant 1.000000e+00 : f32
    %251 = vector.broadcast %cst_209 : f32 to vector<32x1xf32>
    %252 = arith.addf %251, %250 : vector<32x1xf32>
    %253 = arith.divf %251, %252 : vector<32x1xf32>
    %254 = vector.broadcast %253 : vector<32x1xf32> to vector<32x512xf32>
    %255 = vector.broadcast %226 : vector<1x512xf32> to vector<32x512xf32>
    %256 = arith.mulf %254, %255 : vector<32x512xf32>
    %c1_210 = arith.constant 1 : index
    %c0_211 = arith.constant 0 : index
    %257 = vector.load %arg3[%c1_210, %c0_211] : memref<2x512xf32, #tpu.memory_space<vmem>>, vector<1x512xf32>
    %258 = vector.broadcast %257 : vector<1x512xf32> to vector<32x512xf32>
    %259 = arith.mulf %220, %258 : vector<32x512xf32>
    %cst_212 = arith.constant dense<0.000000e+00> : vector<32xf32>
    %260 = vector.multi_reduction <add>, %259, %cst_212 [1] : vector<32x512xf32> to vector<32xf32>
    %261 = vector.shape_cast %260 : vector<32xf32> to vector<32x1xf32>
    %cst_213 = arith.constant 3.906250e-03 : f32
    %262 = vector.broadcast %cst_213 : f32 to vector<32x1xf32>
    %263 = arith.mulf %261, %262 : vector<32x1xf32>
    %c0_214 = arith.constant 0 : index
    %c0_215 = arith.constant 0 : index
    %264 = vector.load %arg14[%c0_214, %c0_215] : memref<32x2xf32, #tpu.memory_space<vmem>>, vector<32x2xf32>
    %265 = vector.broadcast %263 : vector<32x1xf32> to vector<32x2xf32>
    %266 = arith.mulf %264, %265 : vector<32x2xf32>
    %cst_216 = arith.constant dense<0.000000e+00> : vector<2xf32>
    %267 = vector.multi_reduction <add>, %266, %cst_216 [0] : vector<32x2xf32> to vector<2xf32>
    %268 = vector.shape_cast %267 : vector<2xf32> to vector<1x2xf32>
    %c0_217 = arith.constant 0 : index
    %c0_218 = arith.constant 0 : index
    %269 = vector.load %arg15[%c0_217, %c0_218] : memref<1x2xf32, #tpu.memory_space<vmem>>, vector<1x2xf32>
    %270 = arith.addf %268, %269 : vector<1x2xf32>
    %cst_219 = arith.constant 0.000000e+00 : f32
    %271 = vector.broadcast %cst_219 : f32 to vector<1x2xf32>
    %272 = arith.maximumf %270, %271 : vector<1x2xf32>
    %c0_220 = arith.constant 0 : index
    %c0_221 = arith.constant 0 : index
    %273 = vector.load %arg16[%c0_220, %c0_221] : memref<32x2xf32, #tpu.memory_space<vmem>>, vector<32x2xf32>
    %274 = vector.broadcast %272 : vector<1x2xf32> to vector<32x2xf32>
    %275 = arith.mulf %273, %274 : vector<32x2xf32>
    %cst_222 = arith.constant dense<0.000000e+00> : vector<32xf32>
    %276 = vector.multi_reduction <add>, %275, %cst_222 [1] : vector<32x2xf32> to vector<32xf32>
    %277 = vector.shape_cast %276 : vector<32xf32> to vector<32x1xf32>
    %c0_223 = arith.constant 0 : index
    %c0_224 = arith.constant 0 : index
    %278 = vector.load %arg17[%c0_223, %c0_224] : memref<32x1xf32, #tpu.memory_space<vmem>>, vector<32x1xf32>
    %279 = arith.addf %277, %278 : vector<32x1xf32>
    %280 = arith.negf %279 : vector<32x1xf32>
    %281 = math.exp %280 : vector<32x1xf32>
    %cst_225 = arith.constant 1.000000e+00 : f32
    %282 = vector.broadcast %cst_225 : f32 to vector<32x1xf32>
    %283 = arith.addf %282, %281 : vector<32x1xf32>
    %284 = arith.divf %282, %283 : vector<32x1xf32>
    %285 = vector.broadcast %284 : vector<32x1xf32> to vector<32x512xf32>
    %286 = vector.broadcast %257 : vector<1x512xf32> to vector<32x512xf32>
    %287 = arith.mulf %285, %286 : vector<32x512xf32>
    %288 = arith.addf %256, %287 : vector<32x512xf32>
    %289 = arith.mulf %220, %288 : vector<32x512xf32>
    %290 = arith.mulf %225, %289 : vector<32x512xf32>
    %291 = arith.addf %220, %290 : vector<32x512xf32>
    %c0_226 = arith.constant 0 : index
    %c0_227 = arith.constant 0 : index
    %292 = vector.load %arg18[%c0_226, %c0_227] : memref<32x32xf32, #tpu.memory_space<vmem>>, vector<32x32xf32>
    %cst_228 = arith.constant dense<0.000000e+00> : vector<32x512xf32>
    %293 = tpu.matmul %292, %291, %cst_228 {dimension_numbers = #tpu.dot_dimension_numbers<[1], [0], [0], [1], [0, 0, 1, 1], [], []>} : vector<32x32xf32>, vector<32x512xf32>, vector<32x512xf32> -> vector<32x512xf32>
    %c0_229 = arith.constant 0 : index
    %c0_230 = arith.constant 0 : index
    %294 = vector.load %arg19[%c0_229, %c0_230] : memref<32x1xf32, #tpu.memory_space<vmem>>, vector<32x1xf32>
    %295 = vector.broadcast %294 : vector<32x1xf32> to vector<32x512xf32>
    %296 = arith.addf %293, %295 : vector<32x512xf32>
    %297 = arith.addf %77, %296 : vector<32x512xf32>
    %c0_231 = arith.constant 0 : index
    %c0_232 = arith.constant 0 : index
    %298 = vector.load %arg21[%c0_231, %c0_232] : memref<32x1xf32, #tpu.memory_space<vmem>>, vector<32x1xf32>
    %c0_233 = arith.constant 0 : index
    %c128_234 = arith.constant 128 : index
    %299 = vector.load %arg23[%c0_233, %c128_234] : memref<32x768xf32, #tpu.memory_space<vmem>>, vector<32x512xf32>
    tpu.vector_store %arg23[%c0_233, %c128_234], %297 {strides = array<i32>} : memref<32x768xf32, #tpu.memory_space<vmem>>, vector<32x512xf32>,
    %c0_235 = arith.constant 0 : index
    %c0_236 = arith.constant 0 : index
    %c0_237 = arith.constant 0 : index
    %300 = vector.load %arg20[%c0_235, %c0_236, %c0_237] : memref<9x32x32xf32, #tpu.memory_space<vmem>>, vector<1x32x32xf32>
    %301 = vector.shape_cast %300 : vector<1x32x32xf32> to vector<32x32xf32>
    %c0_238 = arith.constant 0 : index
    %c111_239 = arith.constant 111 : index
    %302 = vector.load %arg23[%c0_238, %c111_239] : memref<32x768xf32, #tpu.memory_space<vmem>>, vector<32x512xf32>
    %c0_240 = arith.constant 0 : index
    %c0_241 = arith.constant 0 : index
    %303 = vector.load %arg2[%c0_240, %c0_241] : memref<9x512xf32, #tpu.memory_space<vmem>>, vector<1x512xf32>
    %304 = vector.broadcast %303 : vector<1x512xf32> to vector<32x512xf32>
    %305 = arith.mulf %302, %304 : vector<32x512xf32>
    %cst_242 = arith.constant dense<0.000000e+00> : vector<32x512xf32>
    %306 = tpu.matmul %301, %305, %cst_242 {dimension_numbers = #tpu.dot_dimension_numbers<[1], [0], [0], [1], [0, 0, 1, 1], [], []>} : vector<32x32xf32>, vector<32x512xf32>, vector<32x512xf32> -> vector<32x512xf32>
    %c1_243 = arith.constant 1 : index
    %c0_244 = arith.constant 0 : index
    %c0_245 = arith.constant 0 : index
    %307 = vector.load %arg20[%c1_243, %c0_244, %c0_245] : memref<9x32x32xf32, #tpu.memory_space<vmem>>, vector<1x32x32xf32>
    %308 = vector.shape_cast %307 : vector<1x32x32xf32> to vector<32x32xf32>
    %c0_246 = arith.constant 0 : index
    %c112_247 = arith.constant 112 : index
    %309 = vector.load %arg23[%c0_246, %c112_247] : memref<32x768xf32, #tpu.memory_space<vmem>>, vector<32x512xf32>
    %c1_248 = arith.constant 1 : index
    %c0_249 = arith.constant 0 : index
    %310 = vector.load %arg2[%c1_248, %c0_249] : memref<9x512xf32, #tpu.memory_space<vmem>>, vector<1x512xf32>
    %311 = vector.broadcast %310 : vector<1x512xf32> to vector<32x512xf32>
    %312 = arith.mulf %309, %311 : vector<32x512xf32>
    %cst_250 = arith.constant dense<0.000000e+00> : vector<32x512xf32>
    %313 = tpu.matmul %308, %312, %cst_250 {dimension_numbers = #tpu.dot_dimension_numbers<[1], [0], [0], [1], [0, 0, 1, 1], [], []>} : vector<32x32xf32>, vector<32x512xf32>, vector<32x512xf32> -> vector<32x512xf32>
    %314 = arith.addf %306, %313 : vector<32x512xf32>
    %c2_251 = arith.constant 2 : index
    %c0_252 = arith.constant 0 : index
    %c0_253 = arith.constant 0 : index
    %315 = vector.load %arg20[%c2_251, %c0_252, %c0_253] : memref<9x32x32xf32, #tpu.memory_space<vmem>>, vector<1x32x32xf32>
    %316 = vector.shape_cast %315 : vector<1x32x32xf32> to vector<32x32xf32>
    %c0_254 = arith.constant 0 : index
    %c113_255 = arith.constant 113 : index
    %317 = vector.load %arg23[%c0_254, %c113_255] : memref<32x768xf32, #tpu.memory_space<vmem>>, vector<32x512xf32>
    %c2_256 = arith.constant 2 : index
    %c0_257 = arith.constant 0 : index
    %318 = vector.load %arg2[%c2_256, %c0_257] : memref<9x512xf32, #tpu.memory_space<vmem>>, vector<1x512xf32>
    %319 = vector.broadcast %318 : vector<1x512xf32> to vector<32x512xf32>
    %320 = arith.mulf %317, %319 : vector<32x512xf32>
    %cst_258 = arith.constant dense<0.000000e+00> : vector<32x512xf32>
    %321 = tpu.matmul %316, %320, %cst_258 {dimension_numbers = #tpu.dot_dimension_numbers<[1], [0], [0], [1], [0, 0, 1, 1], [], []>} : vector<32x32xf32>, vector<32x512xf32>, vector<32x512xf32> -> vector<32x512xf32>
    %322 = arith.addf %314, %321 : vector<32x512xf32>
    %c3_259 = arith.constant 3 : index
    %c0_260 = arith.constant 0 : index
    %c0_261 = arith.constant 0 : index
    %323 = vector.load %arg20[%c3_259, %c0_260, %c0_261] : memref<9x32x32xf32, #tpu.memory_space<vmem>>, vector<1x32x32xf32>
    %324 = vector.shape_cast %323 : vector<1x32x32xf32> to vector<32x32xf32>
    %c0_262 = arith.constant 0 : index
    %c127_263 = arith.constant 127 : index
    %325 = vector.load %arg23[%c0_262, %c127_263] : memref<32x768xf32, #tpu.memory_space<vmem>>, vector<32x512xf32>
    %c3_264 = arith.constant 3 : index
    %c0_265 = arith.constant 0 : index
    %326 = vector.load %arg2[%c3_264, %c0_265] : memref<9x512xf32, #tpu.memory_space<vmem>>, vector<1x512xf32>
    %327 = vector.broadcast %326 : vector<1x512xf32> to vector<32x512xf32>
    %328 = arith.mulf %325, %327 : vector<32x512xf32>
    %cst_266 = arith.constant dense<0.000000e+00> : vector<32x512xf32>
    %329 = tpu.matmul %324, %328, %cst_266 {dimension_numbers = #tpu.dot_dimension_numbers<[1], [0], [0], [1], [0, 0, 1, 1], [], []>} : vector<32x32xf32>, vector<32x512xf32>, vector<32x512xf32> -> vector<32x512xf32>
    %330 = arith.addf %322, %329 : vector<32x512xf32>
    %c4_267 = arith.constant 4 : index
    %c0_268 = arith.constant 0 : index
    %c0_269 = arith.constant 0 : index
    %331 = vector.load %arg20[%c4_267, %c0_268, %c0_269] : memref<9x32x32xf32, #tpu.memory_space<vmem>>, vector<1x32x32xf32>
    %332 = vector.shape_cast %331 : vector<1x32x32xf32> to vector<32x32xf32>
    %c0_270 = arith.constant 0 : index
    %c128_271 = arith.constant 128 : index
    %333 = vector.load %arg23[%c0_270, %c128_271] : memref<32x768xf32, #tpu.memory_space<vmem>>, vector<32x512xf32>
    %cst_272 = arith.constant dense<0.000000e+00> : vector<32x512xf32>
    %334 = tpu.matmul %332, %333, %cst_272 {dimension_numbers = #tpu.dot_dimension_numbers<[1], [0], [0], [1], [0, 0, 1, 1], [], []>} : vector<32x32xf32>, vector<32x512xf32>, vector<32x512xf32> -> vector<32x512xf32>
    %335 = arith.addf %330, %334 : vector<32x512xf32>
    %c5_273 = arith.constant 5 : index
    %c0_274 = arith.constant 0 : index
    %c0_275 = arith.constant 0 : index
    %336 = vector.load %arg20[%c5_273, %c0_274, %c0_275] : memref<9x32x32xf32, #tpu.memory_space<vmem>>, vector<1x32x32xf32>
    %337 = vector.shape_cast %336 : vector<1x32x32xf32> to vector<32x32xf32>
    %c0_276 = arith.constant 0 : index
    %c129_277 = arith.constant 129 : index
    %338 = vector.load %arg23[%c0_276, %c129_277] : memref<32x768xf32, #tpu.memory_space<vmem>>, vector<32x512xf32>
    %c5_278 = arith.constant 5 : index
    %c0_279 = arith.constant 0 : index
    %339 = vector.load %arg2[%c5_278, %c0_279] : memref<9x512xf32, #tpu.memory_space<vmem>>, vector<1x512xf32>
    %340 = vector.broadcast %339 : vector<1x512xf32> to vector<32x512xf32>
    %341 = arith.mulf %338, %340 : vector<32x512xf32>
    %cst_280 = arith.constant dense<0.000000e+00> : vector<32x512xf32>
    %342 = tpu.matmul %337, %341, %cst_280 {dimension_numbers = #tpu.dot_dimension_numbers<[1], [0], [0], [1], [0, 0, 1, 1], [], []>} : vector<32x32xf32>, vector<32x512xf32>, vector<32x512xf32> -> vector<32x512xf32>
    %343 = arith.addf %335, %342 : vector<32x512xf32>
    %c6_281 = arith.constant 6 : index
    %c0_282 = arith.constant 0 : index
    %c0_283 = arith.constant 0 : index
    %344 = vector.load %arg20[%c6_281, %c0_282, %c0_283] : memref<9x32x32xf32, #tpu.memory_space<vmem>>, vector<1x32x32xf32>
    %345 = vector.shape_cast %344 : vector<1x32x32xf32> to vector<32x32xf32>
    %c0_284 = arith.constant 0 : index
    %c143_285 = arith.constant 143 : index
    %346 = vector.load %arg23[%c0_284, %c143_285] : memref<32x768xf32, #tpu.memory_space<vmem>>, vector<32x512xf32>
    %c6_286 = arith.constant 6 : index
    %c0_287 = arith.constant 0 : index
    %347 = vector.load %arg2[%c6_286, %c0_287] : memref<9x512xf32, #tpu.memory_space<vmem>>, vector<1x512xf32>
    %348 = vector.broadcast %347 : vector<1x512xf32> to vector<32x512xf32>
    %349 = arith.mulf %346, %348 : vector<32x512xf32>
    %cst_288 = arith.constant dense<0.000000e+00> : vector<32x512xf32>
    %350 = tpu.matmul %345, %349, %cst_288 {dimension_numbers = #tpu.dot_dimension_numbers<[1], [0], [0], [1], [0, 0, 1, 1], [], []>} : vector<32x32xf32>, vector<32x512xf32>, vector<32x512xf32> -> vector<32x512xf32>
    %351 = arith.addf %343, %350 : vector<32x512xf32>
    %c7_289 = arith.constant 7 : index
    %c0_290 = arith.constant 0 : index
    %c0_291 = arith.constant 0 : index
    %352 = vector.load %arg20[%c7_289, %c0_290, %c0_291] : memref<9x32x32xf32, #tpu.memory_space<vmem>>, vector<1x32x32xf32>
    %353 = vector.shape_cast %352 : vector<1x32x32xf32> to vector<32x32xf32>
    %c0_292 = arith.constant 0 : index
    %c144_293 = arith.constant 144 : index
    %354 = vector.load %arg23[%c0_292, %c144_293] : memref<32x768xf32, #tpu.memory_space<vmem>>, vector<32x512xf32>
    %c7_294 = arith.constant 7 : index
    %c0_295 = arith.constant 0 : index
    %355 = vector.load %arg2[%c7_294, %c0_295] : memref<9x512xf32, #tpu.memory_space<vmem>>, vector<1x512xf32>
    %356 = vector.broadcast %355 : vector<1x512xf32> to vector<32x512xf32>
    %357 = arith.mulf %354, %356 : vector<32x512xf32>
    %cst_296 = arith.constant dense<0.000000e+00> : vector<32x512xf32>
    %358 = tpu.matmul %353, %357, %cst_296 {dimension_numbers = #tpu.dot_dimension_numbers<[1], [0], [0], [1], [0, 0, 1, 1], [], []>} : vector<32x32xf32>, vector<32x512xf32>, vector<32x512xf32> -> vector<32x512xf32>
    %359 = arith.addf %351, %358 : vector<32x512xf32>
    %c8_297 = arith.constant 8 : index
    %c0_298 = arith.constant 0 : index
    %c0_299 = arith.constant 0 : index
    %360 = vector.load %arg20[%c8_297, %c0_298, %c0_299] : memref<9x32x32xf32, #tpu.memory_space<vmem>>, vector<1x32x32xf32>
    %361 = vector.shape_cast %360 : vector<1x32x32xf32> to vector<32x32xf32>
    %c0_300 = arith.constant 0 : index
    %c145_301 = arith.constant 145 : index
    %362 = vector.load %arg23[%c0_300, %c145_301] : memref<32x768xf32, #tpu.memory_space<vmem>>, vector<32x512xf32>
    %c8_302 = arith.constant 8 : index
    %c0_303 = arith.constant 0 : index
    %363 = vector.load %arg2[%c8_302, %c0_303] : memref<9x512xf32, #tpu.memory_space<vmem>>, vector<1x512xf32>
    %364 = vector.broadcast %363 : vector<1x512xf32> to vector<32x512xf32>
    %365 = arith.mulf %362, %364 : vector<32x512xf32>
    %cst_304 = arith.constant dense<0.000000e+00> : vector<32x512xf32>
    %366 = tpu.matmul %361, %365, %cst_304 {dimension_numbers = #tpu.dot_dimension_numbers<[1], [0], [0], [1], [0, 0, 1, 1], [], []>} : vector<32x32xf32>, vector<32x512xf32>, vector<32x512xf32> -> vector<32x512xf32>
    %367 = arith.addf %359, %366 : vector<32x512xf32>
    %368 = vector.broadcast %298 : vector<32x1xf32> to vector<32x512xf32>
    %369 = arith.addf %367, %368 : vector<32x512xf32>
    %c0_305 = arith.constant 0 : index
    %c0_306 = arith.constant 0 : index
    %c0_307 = arith.constant 0 : index
    %370 = vector.load %arg22[%c0_305, %c0_306, %c0_307] : memref<1x32x512xf32, #tpu.memory_space<vmem>>, vector<1x32x512xf32>
    %371 = vector.shape_cast %370 : vector<1x32x512xf32> to vector<32x512xf32>
    %372 = vector.shape_cast %369 : vector<32x512xf32> to vector<1x32x512xf32>
    tpu.vector_store %arg22[%c0_305, %c0_306, %c0_307], %372 {strides = array<i32>} : memref<1x32x512xf32, #tpu.memory_space<vmem>>, vector<1x32x512xf32>,
    return
  }
  func.func @transform_0(%arg0: i32) -> (i32, i32, i32) {
    %c0_i32 = arith.constant 0 : i32
    %c0_i32_0 = arith.constant 0 : i32
    %c0_i32_1 = arith.constant 0 : i32
    return %arg0, %c0_i32, %c0_i32_0 : i32, i32, i32
  }
  func.func @transform_1(%arg0: i32) -> (i32, i32) {
    %c0_i32 = arith.constant 0 : i32
    %c0_i32_0 = arith.constant 0 : i32
    %c0_i32_1 = arith.constant 0 : i32
    return %c0_i32, %c0_i32_0 : i32, i32
  }
  func.func @transform_2(%arg0: i32) -> (i32, i32) {
    %c0_i32 = arith.constant 0 : i32
    %c0_i32_0 = arith.constant 0 : i32
    %c0_i32_1 = arith.constant 0 : i32
    return %c0_i32, %c0_i32_0 : i32, i32
  }
  func.func @transform_3(%arg0: i32) -> (i32, i32, i32) {
    %c0_i32 = arith.constant 0 : i32
    %c0_i32_0 = arith.constant 0 : i32
    %c0_i32_1 = arith.constant 0 : i32
    %c0_i32_2 = arith.constant 0 : i32
    return %c0_i32, %c0_i32_0, %c0_i32_1 : i32, i32, i32
  }
  func.func @transform_4(%arg0: i32) -> (i32, i32) {
    %c0_i32 = arith.constant 0 : i32
    %c0_i32_0 = arith.constant 0 : i32
    %c0_i32_1 = arith.constant 0 : i32
    return %c0_i32, %c0_i32_0 : i32, i32
  }
  func.func @transform_5(%arg0: i32) -> (i32, i32) {
    %c0_i32 = arith.constant 0 : i32
    %c0_i32_0 = arith.constant 0 : i32
    %c0_i32_1 = arith.constant 0 : i32
    return %c0_i32, %c0_i32_0 : i32, i32
  }
  func.func @transform_6(%arg0: i32) -> (i32, i32) {
    %c0_i32 = arith.constant 0 : i32
    %c0_i32_0 = arith.constant 0 : i32
    %c0_i32_1 = arith.constant 0 : i32
    return %c0_i32, %c0_i32_0 : i32, i32
  }
  func.func @transform_7(%arg0: i32) -> (i32, i32, i32) {
    %c0_i32 = arith.constant 0 : i32
    %c0_i32_0 = arith.constant 0 : i32
    %c0_i32_1 = arith.constant 0 : i32
    %c0_i32_2 = arith.constant 0 : i32
    return %c0_i32, %c0_i32_0, %c0_i32_1 : i32, i32, i32
  }
  func.func @transform_8(%arg0: i32) -> i32 {
    %c0_i32 = arith.constant 0 : i32
    %c0_i32_0 = arith.constant 0 : i32
    return %c0_i32 : i32
  }
  func.func @transform_9(%arg0: i32) -> i32 {
    %c0_i32 = arith.constant 0 : i32
    %c0_i32_0 = arith.constant 0 : i32
    return %c0_i32 : i32
  }
  func.func @transform_10(%arg0: i32) -> (i32, i32, i32) {
    %c0_i32 = arith.constant 0 : i32
    %c0_i32_0 = arith.constant 0 : i32
    %c0_i32_1 = arith.constant 0 : i32
    %c0_i32_2 = arith.constant 0 : i32
    return %c0_i32, %c0_i32_0, %c0_i32_1 : i32, i32, i32
  }
  func.func @transform_11(%arg0: i32) -> (i32, i32) {
    %c0_i32 = arith.constant 0 : i32
    %c0_i32_0 = arith.constant 0 : i32
    %c0_i32_1 = arith.constant 0 : i32
    return %c0_i32, %c0_i32_0 : i32, i32
  }
  func.func @transform_12(%arg0: i32) -> (i32, i32) {
    %c0_i32 = arith.constant 0 : i32
    %c0_i32_0 = arith.constant 0 : i32
    %c0_i32_1 = arith.constant 0 : i32
    return %c0_i32, %c0_i32_0 : i32, i32
  }
  func.func @transform_13(%arg0: i32) -> (i32, i32) {
    %c0_i32 = arith.constant 0 : i32
    %c0_i32_0 = arith.constant 0 : i32
    %c0_i32_1 = arith.constant 0 : i32
    return %c0_i32, %c0_i32_0 : i32, i32
  }
  func.func @transform_14(%arg0: i32) -> (i32, i32) {
    %c0_i32 = arith.constant 0 : i32
    %c0_i32_0 = arith.constant 0 : i32
    %c0_i32_1 = arith.constant 0 : i32
    return %c0_i32, %c0_i32_0 : i32, i32
  }
  func.func @transform_15(%arg0: i32) -> (i32, i32) {
    %c0_i32 = arith.constant 0 : i32
    %c0_i32_0 = arith.constant 0 : i32
    %c0_i32_1 = arith.constant 0 : i32
    return %c0_i32, %c0_i32_0 : i32, i32
  }
  func.func @transform_16(%arg0: i32) -> (i32, i32) {
    %c0_i32 = arith.constant 0 : i32
    %c0_i32_0 = arith.constant 0 : i32
    %c0_i32_1 = arith.constant 0 : i32
    return %c0_i32, %c0_i32_0 : i32, i32
  }
  func.func @transform_17(%arg0: i32) -> (i32, i32) {
    %c0_i32 = arith.constant 0 : i32
    %c0_i32_0 = arith.constant 0 : i32
    %c0_i32_1 = arith.constant 0 : i32
    return %c0_i32, %c0_i32_0 : i32, i32
  }
  func.func @transform_18(%arg0: i32) -> (i32, i32) {
    %c0_i32 = arith.constant 0 : i32
    %c0_i32_0 = arith.constant 0 : i32
    %c0_i32_1 = arith.constant 0 : i32
    return %c0_i32, %c0_i32_0 : i32, i32
  }
  func.func @transform_19(%arg0: i32) -> (i32, i32, i32) {
    %c0_i32 = arith.constant 0 : i32
    %c0_i32_0 = arith.constant 0 : i32
    %c0_i32_1 = arith.constant 0 : i32
    %c0_i32_2 = arith.constant 0 : i32
    return %c0_i32, %c0_i32_0, %c0_i32_1 : i32, i32, i32
  }
  func.func @transform_20(%arg0: i32) -> (i32, i32) {
    %c0_i32 = arith.constant 0 : i32
    %c0_i32_0 = arith.constant 0 : i32
    %c0_i32_1 = arith.constant 0 : i32
    return %c0_i32, %c0_i32_0 : i32, i32
  }
  func.func @transform_21(%arg0: i32) -> (i32, i32, i32) {
    %c0_i32 = arith.constant 0 : i32
    %c0_i32_0 = arith.constant 0 : i32
    %c0_i32_1 = arith.constant 0 : i32
    return %arg0, %c0_i32, %c0_i32_0 : i32, i32, i32
  }
}

</mosaic_0001>

<bundles_post_ra>
// kernel: totalgroup_forward.1
= control target key start
LH: loop header
LB: loop body
LE: loop exit
PB: predicated region body
PF: predicated region fallthrough
CT: control target
= control target key end

     0   :  { %s17290_s0 = inlined_call_operand.vmem [shape: f32[1,32,512], index: 0, kind: input, shape index: {}]   ;;  %s17291_s1 = inlined_call_operand.vmem [shape: f32[9,512], index: 1, kind: input, shape index: {}]   ;;  %s17292_s2 = inlined_call_operand.vmem [shape: f32[2,512], index: 2, kind: input, shape index: {}]   ;;  %s17293_s3 = inlined_call_operand.vmem [shape: f32[9,32,32], index: 3, kind: input, shape index: {}]   ;;  %s17294_s4 = inlined_call_operand.vmem [shape: f32[32,1], index: 4, kind: input, shape index: {}]   ;;  %s17295_s5 = inlined_call_operand.vmem [shape: f32[32,1], index: 5, kind: input, shape index: {}]   ;;  %s17296_s6 = inlined_call_operand.vmem [shape: f32[32,1], index: 6, kind: input, shape index: {}]   ;;  %s17297_s7 = inlined_call_operand.vmem [shape: f32[3,32,32], index: 7, kind: input, shape index: {}]   ;;  %s17298_s8 = inlined_call_operand.vmem [shape: f32[3], index: 8, kind: input, shape index: {}]   ;;  %s17299_s9 = inlined_call_operand.vmem [shape: f32[2], index: 9, kind: input, shape index: {}]   ;;  %s17300_s10 = inlined_call_operand.vmem [shape: f32[9,8,8], index: 10, kind: input, shape index: {}]   ;;  %s17301_s11 = inlined_call_operand.vmem [shape: f32[32,32], index: 11, kind: input, shape index: {}]   ;;  %s17302_s12 = inlined_call_operand.vmem [shape: f32[32,1], index: 12, kind: input, shape index: {}]   ;;  %s17303_s13 = inlined_call_operand.vmem [shape: f32[32,2], index: 13, kind: input, shape index: {}]   ;;  %s17304_s14 = inlined_call_operand.vmem [shape: f32[1,2], index: 14, kind: input, shape index: {}]   ;;  %s17305_s15 = inlined_call_operand.vmem [shape: f32[32,2], index: 15, kind: input, shape index: {}]   ;;  %s17306_s16 = inlined_call_operand.vmem [shape: f32[32,1], index: 16, kind: input, shape index: {}]   ;;  %s17307_s17 = inlined_call_operand.vmem [shape: f32[32,32], index: 17, kind: input, shape index: {}]   ;;  %s17308_s18 = inlined_call_operand.vmem [shape: f32[32,1], index: 18, kind: input, shape index: {}]   ;;  %s17309_s19 = inlined_call_operand.vmem [shape: f32[9,32,32], index: 19, kind: input, shape index: {}]   ;;  %s17310_s20 = inlined_call_operand.vmem [shape: f32[32,1], index: 20, kind: input, shape index: {}]   ;;  %s17311_s21 = inlined_call_operand.vmem [shape: f32[1,32,512], index: 21, kind: output, shape index: {}]  }
   0x1   :  { %17362 = sst [smem:[#allocation46_spill]] %s17290_s0 }
   0x2   :  { %17363 = sst [smem:[#allocation47_spill]] %s17291_s1 }
   0x3   :  { %17364 = sst [smem:[#allocation48_spill]] %s17292_s2 }
   0x4   :  { %17365 = sst [smem:[#allocation49_spill]] %s17293_s3 }
   0x5   :  { %17366 = sst [smem:[#allocation50_spill]] %s17294_s4 }
   0x6   :  { %17367 = sst [smem:[#allocation51_spill]] %s17295_s5 }
   0x7   :  { %26 = vsyncpa [#allocation4], 0  ;;  %s50_s26 = sshll.u32 %s17298_s8, 4  ;;  %s51_s26 = int_to_ptr.vmem [resolvable:$true] %s50_s26 }
   0x8   :  { %27 = vsyncpa [#allocation6], 0  ;;  %s60_s28 = sshll.u32 %s17299_s9, 4  ;;  %s12899_s29 = scalar_lea.vmem %s51_s26, 16  ;;  %s61_s28 = int_to_ptr.vmem [resolvable:$true] %s60_s28 }
   0x9   :  { %p12900_p0 = scmp.ne.s32.totalorder %s51_s26, %s12899_s29  ;;  %p12904_p1 = scmp.lt.s32.totalorder %s51_s26, %s51_s26 }
   0xa   :  { %p12905_p2 = scmp.lt.s32.totalorder %s12899_s29, %s12899_s29 }
   0xc   :  { %p12906_p3 = por %p12905_p2, %p12904_p1 }
   0xe   :  { %p12907_p4 = pnand %p12906_p3, %p12900_p0 }
  0x10   :  { %12910 = shalt.err (!%p12907_p4)
}
  0x11   :  { %s12927_s0 = smov [#allocation3]   ;;  %s12911_s4 = scalar_lea.vmem %s61_s28, 16 }
  0x12   :  { %53 = dma.vmem_to_smem %s51_s26, 16, %s12927_s0, [#allocation4]  }
  0x13   :  { %p12912_p5 = scmp.ne.s32.totalorder %s61_s28, %s12911_s4  ;;  %p12916_p6 = scmp.lt.s32.totalorder %s61_s28, %s61_s28 }
  0x14   :  { %p12917_p7 = scmp.lt.s32.totalorder %s12911_s4, %s12911_s4 }
  0x16   :  { %p12918_p8 = por %p12917_p7, %p12916_p6 }
  0x18   :  { %p12919_p9 = pnand %p12918_p8, %p12912_p5 }
  0x1a   :  { %12922 = shalt.err (!%p12919_p9)
}
  0x1b   :  { %s12928_s8 = smov [#allocation5]  }
  0x1c   :  { %63 = dma.vmem_to_smem %s61_s28, 16, %s12928_s8, [#allocation6]  }
  0x1d   :  { %12923 = dma.done.wait [#allocation4], 16  }
  0x1e   :  { %12924 = vsyncadd [#allocation4], 4294967280 }
  0x1f   :  { %12925 = dma.done.wait [#allocation6], 16  }
  0x20   :  { %12926 = vsyncadd [#allocation6], 4294967280 }
  0x21   :  { %92 = sfence }
  0x22   :  { %v163_v0 = vlaneseq  ;;  %s17368_s5 = sld [smem:[#allocation47_spill]]  ;;  %s12929_s22 = smov 112   ;;  %vm248_vm0 = vcmask 916480   ;;  %vm187_vm1 = vcmask 908288   ;;  %vm876_vm2 = vcmask 924672  }
  0x23   :  { %s12930_s24 = smov 111   ;;  %s12931_s26 = smov 113   ;;  %vm1236_vm3 = vcmask 1039360   ;;  %vm337_vm4 = vcmask 130048   ;;  %vm1325_vm5 = vcmask 7168   ;;  %vm965_vm6 = vcmask 121856  }
  0x24   :  { %v164_v1 = vshrl.u32 %v163_v0, 7  ;;  %s12932_s28 = smov 127   ;;  %s12933_s9 = smov 1   ;;  %vm621_vm7 = vcmask 138240   ;;  %vm370_vm8 = vcmask 261120  }
  0x25   :  { %s17320_s1 = smov 15   ;;  %s12935_s2 = smov 16  }
  0x26   :  { %v13059_v3 = vsub.s32 2, %v164_v1  ;;  %v13061_v4 = vsub.s32 0, %v164_v1  ;;  %v13063_v5 = vsub.s32 3, %v164_v1  ;;  %v13065_v6 = vsub.s32 1, %v164_v1  ;;  %s17373_s3 = sld [smem:[#allocation46_spill]]  ;;  %s17318_s4 = smov 17  }
  0x27   :  { %s17374_s25 = sld [smem:[#allocation49_spill]]  ;;  %s17376_s30 = sld [smem:[#allocation51_spill]] }
  0x28   :  { %v10917_v2 = vld [vmem:[%s17368_s5 + $0x1] ss:$8 sm:$0xf]  ;;  %17369 = vst [vmem:[#allocation9_spill] sm:$0xff] %v13059_v3  ;;  %17370 = vst [vmem:[#allocation10_spill] sm:$0xff] %v13061_v4  ;;  %s14842_s29 = sld [smem:[#allocation3 + $0x2]] }
  0x29   :  { %17371 = vst [vmem:[#allocation11_spill] sm:$0xff] %v13063_v5  ;;  %17372 = vst [vmem:[#allocation12_spill] sm:$0xff] %v13065_v6  ;;  %v235_v7 = vrot.slane %v10917_v2, %v13059_v3  ;;  %v227_v8 = vrot.slane %v10917_v2, %v13061_v4  ;;  %v239_v9 = vrot.slane %v10917_v2, %v13063_v5  ;;  %v161_v11 = vld [vmem:[%s17368_s5] ss:$8 sm:$0xf]  ;;  %s14915_s27 = sld [smem:[#allocation3]] }
  0x2a   :  { %v231_v10 = vrot.slane %v10917_v2, %v13065_v6  ;;  %v170_v12 = vrot.slane %v161_v11, %v13065_v6  ;;  %v166_v13 = vrot.slane %v161_v11, %v13061_v4  ;;  %v178_v14 = vrot.slane %v161_v11, %v13063_v5  ;;  %v10938_v16 = vld [vmem:[%s17368_s5 + $0x2] ss:$8 sm:$0xf]  ;;  %v10951_v21 = vld [vmem:[%s17368_s5 + $0x3] ss:$8 sm:$0xf] }
  0x2b   :  { %244 = vrot.lane.b32.xlu1 %v235_v7, %s12929_s22  ;;  %240 = vrot.lane.b32.xlu0 %v227_v8, %s12929_s22  ;;  %v174_v15 = vrot.slane %v161_v11, %v13059_v3  ;;  %v859_v17 = vrot.slane %v10938_v16, %v13065_v6  ;;  %v855_v18 = vrot.slane %v10938_v16, %v13061_v4  ;;  %v10976_v26 = vld [vmem:[%s17368_s5 + $0x5] ss:$8 sm:$0xf]  ;;  %v10989_v29 = vld [vmem:[%s17368_s5 + $0x6] ss:$8 sm:$0xf] }
  0x2c   :  { %v867_v19 = vrot.slane %v10938_v16, %v13063_v5  ;;  %v863_v20 = vrot.slane %v10938_v16, %v13059_v3  ;;  %v1219_v22 = vrot.slane %v10951_v21, %v13065_v6  ;;  %v1215_v23 = vrot.slane %v10951_v21, %v13061_v4  ;;  %v13123_v32 = vld [vmem:[%s17368_s5 + $0x7] ss:$8 sm:$0xf] }
  0x2d   :  { %v1223_v24 = vrot.slane %v10951_v21, %v13059_v3  ;;  %v1227_v25 = vrot.slane %v10951_v21, %v13063_v5  ;;  %v1806_v27 = vrot.slane %v10976_v26, %v13061_v4  ;;  %v1810_v28 = vrot.slane %v10976_v26, %v13065_v6  ;;  %v13147_v43 = vld [vmem:[%s17373_s3 + $0x20] sm:$0xff]  ;;  %v13152_v45 = vld [vmem:[%s17373_s3 + $0x28] sm:$0xff]  ;;  %v13157_v46 = vld [vmem:[%s17373_s3 + $0x10] sm:$0xff] }
  0x2e   :  { %v1814_v30 = vrot.slane %v10976_v26, %v13059_v3  ;;  %v2168_v31 = vrot.slane %v10989_v29, %v13065_v6  ;;  %v1818_v33 = vrot.slane %v10976_v26, %v13063_v5  ;;  %v2526_v34 = vrot.slane %v13123_v32, %v13065_v6  ;;  %v13162_v47 = vld [vmem:[%s17373_s3 + $0x18] sm:$0xff]  ;;  %v13189_v61 = vld [vmem:[%s17373_s3 + $0x40] sm:$0xff]  ;;  %v13194_v62 = vld [vmem:[%s17373_s3 + $0x48] sm:$0xff] }
  0x2f   :  { %246 = vrot.lane.b32.xlu1 %v239_v9, %s12929_s22  ;;  %242 = vrot.lane.b32.xlu0 %v231_v10, %s12929_s22  ;;  %v2164_v35 = vrot.slane %v10989_v29, %v13061_v4  ;;  %v2172_v36 = vrot.slane %v10989_v29, %v13059_v3  ;;  %v2176_v37 = vrot.slane %v10989_v29, %v13063_v5  ;;  %v13207_v9 = vld [vmem:[%s17373_s3 + $0x70] sm:$0xff]  ;;  %v13212_v10 = vld [vmem:[%s17373_s3 + $0x78] sm:$0xff] }
  0x30   :  { %v2522_v38 = vrot.slane %v13123_v32, %v13061_v4  ;;  %v2530_v39 = vrot.slane %v13123_v32, %v13059_v3 }
  0x33   :  { %181 = vrot.lane.b32.xlu1 %v170_v12, %s12930_s24  ;;  %179 = vrot.lane.b32.xlu0 %v166_v13, %s12930_s24 }
  0x37   :  { %185 = vrot.lane.b32.xlu1 %v178_v14, %s12930_s24  ;;  %183 = vrot.lane.b32.xlu0 %v174_v15, %s12930_s24 }
  0x3b   :  { %870 = vrot.lane.b32.xlu1 %v859_v17, %s12931_s26  ;;  %868 = vrot.lane.b32.xlu0 %v855_v18, %s12931_s26 }
  0x3f   :  { %874 = vrot.lane.b32.xlu1 %v867_v19, %s12931_s26  ;;  %872 = vrot.lane.b32.xlu0 %v863_v20, %s12931_s26 }
  0x43   :  { %1230 = vrot.lane.b32.xlu1 %v1219_v22, %s12932_s28  ;;  %1228 = vrot.lane.b32.xlu0 %v1215_v23, %s12932_s28 }
  0x47   :  { %1232 = vrot.lane.b32.xlu0 %v1223_v24, %s12932_s28  ;;  %1234 = vrot.lane.b32.xlu1 %v1227_v25, %s12932_s28 }
  0x4b   :  { %1819 = vrot.lane.b32.xlu1 %v1806_v27, %s12933_s9  ;;  %1821 = vrot.lane.b32.xlu0 %v1810_v28, %s12933_s9 }
  0x4f   :  { %1823 = vrot.lane.b32.xlu1 %v1814_v30, %s12933_s9  ;;  %2179 = vrot.lane.b32.xlu0 %v2168_v31, %s17320_s1  ;;  %v13250_v31 = vld [vmem:[%s17373_s3] sm:$0xff] }
  0x53   :  { %1825 = vrot.lane.b32.xlu1 %v1818_v33, %s12933_s9  ;;  %2537 = vrot.lane.b32.xlu0 %v2526_v34, %s12935_s2  ;;  %v13255_v33 = vld [vmem:[%s17373_s3 + $0x8] sm:$0xff] }
  0x57   :  { %2177 = vrot.lane.b32.xlu1 %v2164_v35, %s17320_s1 }
  0x5b   :  { %2181 = vrot.lane.b32.xlu1 %v2172_v36, %s17320_s1 }
  0x5f   :  { %2183 = vrot.lane.b32.xlu1 %v2176_v37, %s17320_s1 }
  0x63   :  { %2535 = vrot.lane.b32.xlu1 %v2522_v38, %s12935_s2  ;;  %v13269_v38 = vld [vmem:[%s17373_s3 + $0x68] sm:$0xff] }
  0x67   :  { %2539 = vrot.lane.b32.xlu1 %v2530_v39, %s12935_s2 }
  0x9d   :  { %v245_v40 = vpop.permute.xlu1 %244  ;;  %v241_v41 = vpop.permute.xlu0 %240 }
  0x9e   :  { %v257_v42 = vmul.f32 0.0, %v241_v41 }
  0xa0   :  { %v11938_v44 = vpack.i.bf16 %v257_v42, %v257_v42  ;;  %v13280_v42 = vld [vmem:[%s17373_s3 + $0x60] sm:$0xff] }
  0xa1   :  { %v13164_v48 = vpop.permute.xlu1 %246  ;;  %v243_v49 = vpop.permute.xlu0 %242 }
  0xa2   :  { %v13167_v50 = vsel %vm248_vm0, %v241_v41, %v243_v49  ;;  %v13170_v51 = vsel %vm248_vm0, %v243_v49, %v245_v40  ;;  %11939 = vrot.lane.b32.xlu1 %v11938_v44, %s12935_s2  ;;  %11934 = vrot.lane.b32.xlu0 %v11938_v44, %s12935_s2  ;;  %v13176_v52 = vsel %vm248_vm0, %v245_v40, %v13164_v48  ;;  %v13288_v49 = vld [vmem:[%s17373_s3 + $0x30] sm:$0xff] }
  0xa3   :  { %v263_v53 = vmul.f32 %v13167_v50, %v13147_v43  ;;  %v264_v54 = vmul.f32 %v13170_v51, %v13152_v45  ;;  %v260_v55 = vmul.f32 %v13176_v52, %v13157_v46  ;;  %v261_v56 = vmul.f32 %v13164_v48, %v13162_v47 }
  0xa4   :  { %v268_v7 = vmul.f32 %v13167_v50, %v13189_v61  ;;  %v269_v8 = vmul.f32 %v13170_v51, %v13194_v62  ;;  %v275_v11 = vmul.f32 %v13176_v52, %v13207_v9  ;;  %v276_v12 = vmul.f32 %v13164_v48, %v13212_v10 }
  0xa5   :  { %v182_v57 = vpop.permute.xlu1 %181  ;;  %v180_v58 = vpop.permute.xlu0 %179  ;;  %v11973_v59 = vpack.i.bf16 %v264_v54, %v263_v53  ;;  %v11978_v63 = vpack.i.bf16 %v261_v56, %v260_v55  ;;  %v258_v36 = vmul.f32 %v13167_v50, %v13250_v31  ;;  %v259_v37 = vmul.f32 %v13170_v51, %v13255_v33  ;;  %v13293_v53 = vld [vmem:[%s17373_s3 + $0x38] sm:$0xff] }
  0xa6   :  { %v196_v60 = vmul.f32 0.0, %v180_v58  ;;  %v11988_v15 = vpack.i.bf16 %v269_v8, %v268_v7  ;;  %v12003_v18 = vpack.i.bf16 %v276_v12, %v275_v11  ;;  %v13225_v19 = vsel %vm187_vm1, %v180_v58, %v182_v57 }
  0xa7   :  { %11974 = vrot.lane.b32.xlu1 %v11973_v59, %s12935_s2  ;;  %v202_v25 = vmul.f32 %v13225_v19, %v13147_v43  ;;  %v212_v44 = vmul.f32 %v13225_v19, %v13280_v42  ;;  %v11968_v54 = vpack.i.bf16 %v259_v37, %v258_v36  ;;  %v265_v55 = vmul.f32 %v13176_v52, %v13288_v49 }
  0xa8   :  { %v11943_v0 = vpack.i.bf16 %v196_v60, %v196_v60  ;;  %v266_v56 = vmul.f32 %v13164_v48, %v13293_v53  ;;  %v273_v7 = vmul.f32 %v13167_v50, %v13280_v42  ;;  %v274_v8 = vmul.f32 %v13170_v51, %v13269_v38  ;;  %v13332_v51 = vld [vmem:[%s17373_s3 + $0x50] sm:$0xff] }
  0xa9   :  { %v13197_v1 = vpop.permute.xlu1 %185  ;;  %v184_v2 = vpop.permute.xlu0 %183  ;;  %v17322_v37 = vmov 0.0  }
  0xaa   :  { %11944 = vrot.lane.b32.xlu0 %v11943_v0, %s17318_s4  ;;  %v13220_v16 = vsel %vm187_vm1, %v182_v57, %v184_v2  ;;  %v13233_v24 = vsel %vm187_vm1, %v184_v2, %v13197_v1  ;;  %v200_v30 = vmul.f32 %v13197_v1, %v13162_v47  ;;  %v215_v59 = vmul.f32 %v13197_v1, %v13212_v10 }
  0xab   :  { %11979 = vrot.lane.b32.xlu1 %v11978_v63, %s12935_s2  ;;  %v203_v23 = vmul.f32 %v13220_v16, %v13152_v45  ;;  %v199_v29 = vmul.f32 %v13233_v24, %v13157_v46  ;;  %v213_v40 = vmul.f32 %v13220_v16, %v13269_v38  ;;  %v214_v58 = vmul.f32 %v13233_v24, %v13207_v9 }
  0xac   :  { %v11983_v2 = vpack.i.bf16 %v266_v56, %v265_v55  ;;  %447 = vmatprep.mubr.f32.mxu0 %v17322_v37  ;;  %v205_v55 = vmul.f32 %v13197_v1, %v13293_v53  ;;  %536 = vmatprep.mubr.f32.mxu1 %v17322_v37 }
  0xad   :  { %v871_v13 = vpop.permute.xlu1 %870  ;;  %v869_v14 = vpop.permute.xlu0 %868  ;;  %v12013_v28 = vpack.i.bf16 %v203_v23, %v202_v25  ;;  %v12018_v39 = vpack.i.bf16 %v200_v30, %v199_v29  ;;  %v12033_v57 = vpack.i.bf16 %v213_v40, %v212_v44  ;;  %v12043_v11 = vpack.i.bf16 %v215_v59, %v214_v58 }
  0xae   :  { %v885_v17 = vmul.f32 0.0, %v869_v14  ;;  %11949 = vrot.lane.b32.xlu0 %v11943_v0, %s17318_s4  ;;  %v13311_v0 = vsel %vm876_vm2, %v869_v14, %v871_v13  ;;  %v11993_v14 = vpack.i.bf16 %v274_v8, %v273_v7 }
  0xaf   :  { %11989 = vrot.lane.b32.xlu1 %v11988_v15, %s12935_s2  ;;  %v891_v50 = vmul.f32 %v13311_v0, %v13147_v43  ;;  %v901_v40 = vmul.f32 %v13311_v0, %v13280_v42 }
  0xb0   :  { %v11953_v20 = vpack.i.bf16 %v885_v17, %v885_v17 }
  0xb1   :  { %v13227_v21 = vpop.permute.xlu1 %874  ;;  %v873_v22 = vpop.permute.xlu0 %872 }
  0xb2   :  { %11954 = vrot.lane.b32.xlu0 %v11953_v20, %s17320_s1  ;;  %v13306_v63 = vsel %vm876_vm2, %v871_v13, %v873_v22  ;;  %v13323_v17 = vsel %vm876_vm2, %v873_v22, %v13227_v21  ;;  %v13337_v13 = vld [vmem:[%s17373_s3 + $0x58] sm:$0xff]  ;;  %v889_v25 = vmul.f32 %v13227_v21, %v13162_v47  ;;  %v904_v58 = vmul.f32 %v13227_v21, %v13212_v10 }
  0xb3   :  { %12004 = vrot.lane.b32.xlu1 %v12003_v18, %s12935_s2  ;;  %v892_v12 = vmul.f32 %v13306_v63, %v13152_v45  ;;  %v270_v18 = vmul.f32 %v13176_v52, %v13332_v51  ;;  %v888_v23 = vmul.f32 %v13323_v17, %v13157_v46  ;;  %v198_v52 = vmul.f32 %v13220_v16, %v13255_v33 }
  0xb5   :  { %v13239_v26 = vpop.permute.xlu1 %1230  ;;  %v13241_v27 = vpop.permute.xlu0 %1228  ;;  %v12053_v22 = vpack.i.bf16 %v892_v12, %v891_v50  ;;  %v208_v12 = vmul.f32 %v13220_v16, %v13194_v62 }
  0xb6   :  { %v1245_v34 = vmul.f32 0.0, %v13241_v27  ;;  %11959 = vrot.lane.b32.xlu0 %v11953_v20, %s17320_s1  ;;  %v271_v20 = vmul.f32 %v13164_v48, %v13337_v13  ;;  %v902_v48 = vmul.f32 %v13306_v63, %v13269_v38  ;;  %v13386_v8 = vsel %vm1236_vm3, %v13241_v27, %v13239_v26 }
  0xb7   :  { %12014 = vrot.lane.b32.xlu1 %v12013_v28, %s17318_s4  ;;  %v1251_v16 = vmul.f32 %v13386_v8, %v13147_v43 }
  0xb8   :  { %v13260_v35 = vpack.i.bf16 %v1245_v34, %v1245_v34  ;;  %v11998_v29 = vpack.i.bf16 %v271_v20, %v270_v18  ;;  %v12058_v34 = vpack.i.bf16 %v889_v25, %v888_v23  ;;  %v12073_v56 = vpack.i.bf16 %v902_v48, %v901_v40 }
  0xb9   :  { %v13273_v41 = vpop.permute.xlu1 %1234  ;;  %v1233_v30 = vpop.permute.xlu0 %1232 }
  0xba   :  { %11964 = vrot.lane.b32.xlu0 %v13260_v35, %s12933_s9  ;;  %v13379_v7 = vsel %vm1236_vm3, %v13239_v26, %v1233_v30  ;;  %v13392_v50 = vsel %vm1236_vm3, %v1233_v30, %v13273_v41  ;;  %v207_v26 = vmul.f32 %v13225_v19, %v13189_v61  ;;  %v1249_v23 = vmul.f32 %v13273_v41, %v13162_v47 }
  0xbb   :  { %12019 = vrot.lane.b32.xlu1 %v12018_v39, %s17318_s4  ;;  %v197_v39 = vmul.f32 %v13225_v19, %v13250_v31  ;;  %v1252_v18 = vmul.f32 %v13379_v7, %v13152_v45  ;;  %v1248_v27 = vmul.f32 %v13392_v50, %v13157_v46 }
  0xbc   :  { %v12028_v25 = vpack.i.bf16 %v208_v12, %v207_v26  ;;  %v894_v26 = vmul.f32 %v13227_v21, %v13293_v53 }
  0xbd   :  { %v13303_v60 = vpop.permute.xlu1 %1819  ;;  %v12008_v44 = vpack.i.bf16 %v198_v52, %v197_v39  ;;  %v13373_v59 = vpop.permute.xlu0 %1821  ;;  %v210_v52 = vmul.f32 %v13197_v1, %v13337_v13  ;;  %v12093_v19 = vpack.i.bf16 %v1252_v18, %v1251_v16  ;;  %v12098_v39 = vpack.i.bf16 %v1249_v23, %v1248_v27 }
  0xbe   :  { %11969 = vrot.lane.b32.xlu0 %v11968_v54, %s12935_s2  ;;  %v204_v54 = vmul.f32 %v13233_v24, %v13288_v49  ;;  %v1262_v1 = vmul.f32 %v13379_v7, %v13269_v38  ;;  %v893_v18 = vmul.f32 %v13323_v17, %v13288_v49 }
  0xbf   :  { %12034 = vrot.lane.b32.xlu1 %v12033_v57, %s17318_s4  ;;  %v903_v57 = vmul.f32 %v13323_v17, %v13207_v9 }
  0xc1   :  { %v13319_v15 = vpop.permute.xlu1 %1823  ;;  %v13396_v20 = vpop.permute.xlu0 %2179 }
  0xc2   :  { %11984 = vrot.lane.b32.xlu0 %v11983_v2, %s12935_s2 }
  0xc3   :  { %12044 = vrot.lane.b32.xlu1 %v12043_v11, %s17318_s4  ;;  %v12023_v11 = vpack.i.bf16 %v205_v55, %v204_v54 }
  0xc5   :  { %v13347_v28 = vpop.permute.xlu1 %1825 }
  0xc6   :  { %11994 = vrot.lane.b32.xlu0 %v11993_v14, %s12935_s2  ;;  %v12083_v14 = vpack.i.bf16 %v904_v58, %v903_v57  ;;  %v1261_v58 = vmul.f32 %v13386_v8, %v13280_v42 }
  0xc7   :  { %12054 = vrot.lane.b32.xlu1 %v12053_v22, %s17320_s1 }
  0xc8   :  { %v12118_v16 = vpack.i.bf16 %v1262_v1, %v1261_v58  ;;  %v899_v1 = vmul.f32 %v13227_v21, %v13337_v13  ;;  %v13497_v21 = vsel %vm1325_vm5, %v13373_v59, %v13319_v15  ;;  %v1247_v58 = vmul.f32 %v13379_v7, %v13255_v33 }
  0xc9   :  { %v13355_v36 = vpop.permute.xlu1 %2177 }
  0xca   :  { %11999 = vrot.lane.b32.xlu0 %v11998_v29, %s12935_s2  ;;  %v209_v29 = vmul.f32 %v13233_v24, %v13332_v51  ;;  %v887_v24 = vmul.f32 %v13306_v63, %v13255_v33 }
  0xcb   :  { %12059 = vrot.lane.b32.xlu1 %v12058_v34, %s17320_s1  ;;  %v2538_v34 = vpop.permute.xlu0 %2537 }
  0xcc   :  { %v12038_v40 = vpack.i.bf16 %v210_v52, %v209_v29  ;;  %v1263_v29 = vmul.f32 %v13392_v50, %v13207_v9  ;;  %v1264_v52 = vmul.f32 %v13273_v41, %v13212_v10 }
  0xcd   :  { %v13375_v2 = vpop.permute.xlu1 %2181 }
  0xce   :  { %12009 = vrot.lane.b32.xlu0 %v12008_v44, %s17318_s4 }
  0xcf   :  { %12074 = vrot.lane.b32.xlu1 %v12073_v56, %s17320_s1  ;;  %v886_v56 = vmul.f32 %v13311_v0, %v13250_v31 }
  0xd1   :  { %v13398_v22 = vpop.permute.xlu1 %2183 }
  0xd2   :  { %12024 = vrot.lane.b32.xlu0 %v12023_v11, %s17318_s4 }
  0xd3   :  { %12084 = vrot.lane.b32.xlu1 %v12083_v14, %s17320_s1  ;;  %v12048_v14 = vpack.i.bf16 %v887_v24, %v886_v56  ;;  %v13483_v56 = vld [vmem:[%s17368_s5 + $0x20] ss:$8 sm:$0xf] }
  0xd5   :  { %v13414_v30 = vpop.permute.xlu1 %2535 }
  0xd6   :  { %12029 = vrot.lane.b32.xlu0 %v12028_v25, %s17318_s4  ;;  %v13419_v48 = vsel %vm337_vm4, %v13414_v30, %v2538_v34  ;;  %v2534_v25 = vrot.slane %v13123_v32, %v13063_v5  ;;  %v898_v32 = vmul.f32 %v13323_v17, %v13332_v51  ;;  %v13492_v17 = vsel %vm1325_vm5, %v13303_v60, %v13373_v59 }
  0xd7   :  { %12094 = vrot.lane.b32.xlu1 %v12093_v19, %s12933_s9  ;;  %v13430_v54 = vmul.f32 %v13419_v48, %v13269_v38  ;;  %v13434_v55 = vmul.f32 %v13419_v48, %v13194_v62  ;;  %v12063_v19 = vpack.i.bf16 %v894_v26, %v893_v18  ;;  %v2892_v18 = vrot.slane %v13483_v56, %v13063_v5 }
  0xd8   :  { %v1841_v26 = vmul.f32 %v13492_v17, %v13152_v45  ;;  %v1842_v59 = vmul.f32 %v13497_v21, %v13288_v49 }
  0xd9   :  { %v13426_v44 = vpop.permute.xlu1 %2539 }
  0xda   :  { %12039 = vrot.lane.b32.xlu0 %v12038_v40, %s17318_s4  ;;  %v13441_v57 = vsel %vm337_vm4, %v2538_v34, %v13426_v44  ;;  %v897_v34 = vmul.f32 %v13306_v63, %v13194_v62  ;;  %v12128_v40 = vpack.i.bf16 %v1264_v52, %v1263_v29  ;;  %v2884_v63 = vrot.slane %v13483_v56, %v13065_v6 }
  0xdb   :  { %12099 = vrot.lane.b32.xlu1 %v12098_v39, %s12933_s9  ;;  %v13448_v11 = vmul.f32 %v13441_v57, %v13207_v9  ;;  %v13452_v12 = vmul.f32 %v13441_v57, %v13332_v51  ;;  %v896_v39 = vmul.f32 %v13311_v0, %v13189_v61  ;;  %v12078_v0 = vpack.i.bf16 %v899_v1, %v898_v32 }
  0xdc   :  { %v1253_v29 = vmul.f32 %v13392_v50, %v13288_v49  ;;  %v1254_v52 = vmul.f32 %v13273_v41, %v13293_v53  ;;  %v1847_v1 = vmul.f32 %v13497_v21, %v13332_v51 }
  0xdd   :  { %v12258_v27 = vpack.i.bf16 %v13452_v12, %v13434_v55  ;;  %v12263_v23 = vpack.i.bf16 %v13448_v11, %v13430_v54  ;;  %v12068_v24 = vpack.i.bf16 %v897_v34, %v896_v39  ;;  %v12138_v34 = vpack.i.bf16 %v1842_v59, %v1841_v26 }
  0xde   :  { %12049 = vrot.lane.b32.xlu0 %v12048_v14, %s17320_s1  ;;  %v1246_v14 = vmul.f32 %v13386_v8, %v13250_v31 }
  0xdf   :  { %12119 = vrot.lane.b32.xlu1 %v12118_v16, %s12933_s9 }
  0xe0   :  { %v12088_v16 = vpack.i.bf16 %v1247_v58, %v1246_v14  ;;  %v1258_v58 = vmul.f32 %v13392_v50, %v13332_v51  ;;  %v1259_v14 = vmul.f32 %v13273_v41, %v13337_v13  ;;  %v13561_v41 = vsel %vm965_vm6, %v13396_v20, %v13375_v2 }
  0xe2   :  { %12064 = vrot.lane.b32.xlu0 %v12063_v19, %s17320_s1  ;;  %v13523_v19 = vmul.f32 0.0, %v13347_v28  ;;  %v12123_v59 = vpack.i.bf16 %v1259_v14, %v1258_v58  ;;  %v2208_v58 = vmul.f32 %v13355_v36, %v13280_v42 }
  0xe3   :  { %2541 = vrot.lane.b32.xlu1 %v2534_v25, %s12935_s2  ;;  %v13514_v25 = vsel %vm1325_vm5, %v13319_v15, %v13347_v28  ;;  %v1257_v15 = vmul.f32 %v13379_v7, %v13194_v62  ;;  %v1846_v28 = vmul.f32 %v13492_v17, %v13194_v62 }
  0xe4   :  { %v1838_v39 = vmul.f32 %v13514_v25, %v13162_v47  ;;  %v1853_v26 = vmul.f32 %v13514_v25, %v13212_v10 }
  0xe5   :  { %v12158_v7 = vpack.i.bf16 %v1847_v1, %v1846_v28  ;;  %v1840_v28 = vmul.f32 %v13303_v60, %v13147_v43 }
  0xe6   :  { %12069 = vrot.lane.b32.xlu0 %v12068_v24, %s17320_s1  ;;  %v1256_v24 = vmul.f32 %v13386_v8, %v13189_v61  ;;  %v12148_v32 = vpack.i.bf16 %v13523_v19, %v1838_v39  ;;  %v1850_v8 = vmul.f32 %v13303_v60, %v13280_v42  ;;  %v12178_v50 = vpack.i.bf16 %v13523_v19, %v1853_v26 }
  0xe7   :  { %12129 = vrot.lane.b32.xlu1 %v12128_v40, %s12933_s9  ;;  %v12103_v40 = vpack.i.bf16 %v1254_v52, %v1253_v29  ;;  %v2200_v52 = vmul.f32 %v13561_v41, %v13288_v49  ;;  %v1836_v39 = vmul.f32 %v13492_v17, %v13255_v33  ;;  %v1852_v26 = vmul.f32 %v13497_v21, %v13207_v9 }
  0xea   :  { %12079 = vrot.lane.b32.xlu0 %v12078_v0, %s17320_s1  ;;  %v1845_v0 = vmul.f32 %v13303_v60, %v13189_v61  ;;  %s17375_s1 = sld [smem:[#allocation50_spill]] }
  0xeb   :  { %2895 = vrot.lane.b32.xlu1 %v2884_v63, %s17318_s4  ;;  %v12108_v63 = vpack.i.bf16 %v1257_v15, %v1256_v24  ;;  %v13586_v15 = vmul.f32 0.0, %v13398_v22 }
  0xee   :  { %12089 = vrot.lane.b32.xlu0 %v12088_v16, %s12933_s9  ;;  %v13556_v16 = vsel %vm965_vm6, %v13355_v36, %v13396_v20  ;;  %v13575_v20 = vsel %vm965_vm6, %v13375_v2, %v13398_v22 }
  0xef   :  { %2899 = vrot.lane.b32.xlu1 %v2892_v18, %s17318_s4  ;;  %v12168_v18 = vpack.i.bf16 %v1850_v8, %v1845_v0  ;;  %v2199_v29 = vmul.f32 %v13556_v16, %v13152_v45  ;;  %v2196_v2 = vmul.f32 %v13575_v20, %v13162_v47  ;;  %v2204_v22 = vmul.f32 %v13556_v16, %v13194_v62 }
  0xf0   :  { %v1843_v0 = vmul.f32 %v13514_v25, %v13293_v53  ;;  %v2211_v14 = vmul.f32 %v13575_v20, %v13212_v10 }
  0xf1   :  { %v12188_v24 = vpack.i.bf16 %v2200_v52, %v2199_v29  ;;  %v12198_v1 = vpack.i.bf16 %v13586_v15, %v2196_v2 }
  0xf2   :  { %12104 = vrot.lane.b32.xlu0 %v12103_v40, %s12933_s9  ;;  %v1837_v40 = vmul.f32 %v13497_v21, %v13157_v46  ;;  %v12153_v62 = vpack.i.bf16 %v13523_v19, %v1843_v0 }
  0xf3   :  { %12139 = vrot.lane.b32.xlu1 %v12138_v34, %s12932_s28  ;;  %v2888_v34 = vrot.slane %v13483_v56, %v13059_v3 }
  0xf6   :  { %12109 = vrot.lane.b32.xlu0 %v12108_v63, %s12933_s9  ;;  %v2205_v63 = vmul.f32 %v13561_v41, %v13332_v51 }
  0xf7   :  { %12149 = vrot.lane.b32.xlu1 %v12148_v32, %s12932_s28  ;;  %v12133_v32 = vpack.i.bf16 %v1837_v40, %v1836_v39 }
  0xf8   :  { %v12208_v8 = vpack.i.bf16 %v2205_v63, %v2204_v22 }
  0xfa   :  { %12114 = vrot.lane.b32.xlu0 %v13260_v35, %s12933_s9  ;;  %v2880_v35 = vrot.slane %v13483_v56, %v13061_v4  ;;  %v1835_v56 = vmul.f32 %v13303_v60, %v13250_v31  ;;  %v2203_v60 = vmul.f32 %v13355_v36, %v13189_v61 }
  0xfb   :  { %12159 = vrot.lane.b32.xlu1 %v12158_v7, %s12932_s28 }
  0xfc   :  { %v12143_v7 = vpack.i.bf16 %v1840_v28, %v1835_v56  ;;  %v12218_v51 = vpack.i.bf16 %v2208_v58, %v2203_v60  ;;  %v2201_v28 = vmul.f32 %v13575_v20, %v13293_v53  ;;  %v2206_v58 = vmul.f32 %v13575_v20, %v13337_v13 }
  0xfe   :  { %12124 = vrot.lane.b32.xlu0 %v12123_v59, %s12933_s9  ;;  %v12228_v59 = vpack.i.bf16 %v13586_v15, %v2211_v14  ;;  %v12203_v63 = vpack.i.bf16 %v13586_v15, %v2201_v28 }
  0xff   :  { %12169 = vrot.lane.b32.xlu1 %v12168_v18, %s12932_s28  ;;  %v1851_v18 = vmul.f32 %v13492_v17, %v13269_v38  ;;  %v1848_v17 = vmul.f32 %v13514_v25, %v13337_v13 }
 0x101   :  { %v12163_v10 = vpack.i.bf16 %v1852_v26, %v1851_v18 }
 0x102   :  { %2893 = vrot.lane.b32.xlu0 %v2880_v35, %s17318_s4  ;;  %v2557_v35 = vmul.f32 %v13419_v48, %v13152_v45  ;;  %v2194_v45 = vmul.f32 %v13556_v16, %v13255_v33 }
 0x103   :  { %12179 = vrot.lane.b32.xlu1 %v12178_v50, %s12932_s28  ;;  %v2558_v50 = vmul.f32 %v13441_v57, %v13288_v49  ;;  %v2195_v49 = vmul.f32 %v13561_v41, %v13157_v46 }
 0x105   :  { %v12238_v21 = vpack.i.bf16 %v2558_v50, %v2557_v35  ;;  %v12183_v40 = vpack.i.bf16 %v2195_v49, %v2194_v45 }
 0x106   :  { %2897 = vrot.lane.b32.xlu0 %v2888_v34, %s17318_s4  ;;  %v12173_v34 = vpack.i.bf16 %v13523_v19, %v1848_v17  ;;  %v2198_v19 = vmul.f32 %v13355_v36, %v13147_v43 }
 0x107   :  { %12189 = vrot.lane.b32.xlu1 %v12188_v24, %s12931_s26  ;;  %v2193_v24 = vmul.f32 %v13355_v36, %v13250_v31  ;;  %v2209_v36 = vmul.f32 %v13556_v16, %v13269_v38  ;;  %v12223_v38 = vpack.i.bf16 %v13586_v15, %v2206_v58  ;;  %v2553_v16 = vmul.f32 %v13441_v57, %v13157_v46 }
 0x108   :  { %v2556_v15 = vmul.f32 %v13414_v30, %v13147_v43 }
 0x109   :  { %v12193_v56 = vpack.i.bf16 %v2198_v19, %v2193_v24 }
 0x10a   :  { %12134 = vrot.lane.b32.xlu0 %v12133_v32, %s12932_s28 }
 0x10b   :  { %12199 = vrot.lane.b32.xlu1 %v12198_v1, %s12931_s26 }
 0x10e   :  { %12144 = vrot.lane.b32.xlu0 %v12143_v7, %s12932_s28  ;;  %v2210_v7 = vmul.f32 %v13561_v41, %v13207_v9  ;;  %v2552_v9 = vmul.f32 %v13419_v48, %v13255_v33 }
 0x10f   :  { %12209 = vrot.lane.b32.xlu1 %v12208_v8, %s12931_s26 }
 0x110   :  { %v12213_v60 = vpack.i.bf16 %v2210_v7, %v2209_v36  ;;  %v12233_v26 = vpack.i.bf16 %v2553_v16, %v2552_v9 }
 0x112   :  { %12154 = vrot.lane.b32.xlu0 %v12153_v62, %s12932_s28 }
 0x113   :  { %12219 = vrot.lane.b32.xlu1 %v12218_v51, %s12931_s26 }
 0x114   :  { %v13625_v29 = vpop.permute.xlu1 %11939  ;;  %v11935_v52 = vpop.permute.xlu0 %11934 }
 0x115   :  { %v11937_v33 = vunpack.i.h.bf16 %v11935_v52  ;;  %v11936_v48 = vunpack.i.l.bf16 %v11935_v52  ;;  %v11941_v9 = vunpack.i.l.bf16 %v13625_v29 }
 0x116   :  { %12164 = vrot.lane.b32.xlu0 %v12163_v10, %s12932_s28 }
 0x117   :  { %12229 = vrot.lane.b32.xlu1 %v12228_v59, %s12931_s26  ;;  %v2551_v59 = vmul.f32 %v13414_v30, %v13250_v31 }
 0x119   :  { %v13636_v39 = vpop.permute.xlu1 %11974  ;;  %v12243_v49 = vpack.i.bf16 %v2556_v15, %v2551_v59 }
 0x11a   :  { %12174 = vrot.lane.b32.xlu0 %v12173_v34, %s12932_s28  ;;  %v11977_v20 = vunpack.i.h.bf16 %v13636_v39  ;;  %v11976_v14 = vunpack.i.l.bf16 %v13636_v39 }
 0x11b   :  { %12239 = vrot.lane.b32.xlu1 %v12238_v21, %s12929_s22 }
 0x11c   :  { %v13640_v25 = vpop.permute.xlu0 %11944  ;;  %v343_v21 = vsel %vm337_vm4, %v11976_v14, %v11977_v20  ;;  %v342_v31 = vsel %vm337_vm4, %v11937_v33, %v11976_v14 }
 0x11d   :  { %v11980_v2 = vpop.permute.xlu1 %11979 }
 0x11e   :  { %12184 = vrot.lane.b32.xlu0 %v12183_v40, %s12931_s26  ;;  %v11982_v50 = vunpack.i.h.bf16 %v11980_v2  ;;  %v11981_v10 = vunpack.i.l.bf16 %v11980_v2 }
 0x120   :  { %v13647_v32 = vpop.permute.xlu0 %11949  ;;  %v341_v2 = vsel %vm337_vm4, %v11981_v10, %v11982_v50 }
 0x121   :  { %v13651_v1 = vpop.permute.xlu1 %11989 }
 0x122   :  { %12194 = vrot.lane.b32.xlu0 %v12193_v56, %s12931_s26  ;;  %v11992_v19 = vunpack.i.h.bf16 %v13651_v1  ;;  %v11991_v56 = vunpack.i.l.bf16 %v13651_v1 }
 0x124   :  { %v13654_v22 = vpop.permute.xlu0 %11954  ;;  %v347_v59 = vsel %vm337_vm4, %v11991_v56, %v11992_v19  ;;  %v346_v15 = vsel %vm337_vm4, %v11941_v9, %v11991_v56 }
 0x125   :  { %v13661_v0 = vpop.permute.xlu1 %12004 }
 0x126   :  { %12204 = vrot.lane.b32.xlu0 %v12203_v63, %s12931_s26  ;;  %v12007_v1 = vunpack.i.h.bf16 %v13661_v0 }
 0x128   :  { %v13664_v8 = vpop.permute.xlu0 %11959 }
 0x129   :  { %v13668_v62 = vpop.permute.xlu1 %12014 }
 0x12a   :  { %12214 = vrot.lane.b32.xlu0 %v12213_v60, %s12931_s26 }
 0x12c   :  { %v13671_v51 = vpop.permute.xlu0 %11964 }
 0x12d   :  { %v13678_v41 = vpop.permute.xlu1 %12019 }
 0x12e   :  { %12224 = vrot.lane.b32.xlu0 %v12223_v38, %s12931_s26  ;;  %v11942_v38 = vunpack.i.h.bf16 %v13625_v29 }
 0x130   :  { %v11970_v18 = vpop.permute.xlu0 %11969 }
 0x131   :  { %v11972_v35 = vunpack.i.h.bf16 %v11970_v18  ;;  %v11971_v46 = vunpack.i.l.bf16 %v11970_v18  ;;  %v13687_v57 = vpop.permute.xlu1 %12034 }
 0x132   :  { %12234 = vrot.lane.b32.xlu0 %v12233_v26, %s12929_s22  ;;  %v12006_v26 = vunpack.i.l.bf16 %v13661_v0  ;;  %v12016_v0 = vunpack.i.l.bf16 %v13668_v62 }
 0x133   :  { %v339_v17 = vsel %vm337_vm4, %v11971_v46, %v11972_v35  ;;  %v338_v34 = vsel %vm337_vm4, %v11936_v48, %v11971_v46  ;;  %v340_v63 = vsel %vm337_vm4, %v11972_v35, %v11981_v10 }
 0x134   :  { %v11985_v45 = vpop.permute.xlu0 %11984  ;;  %v11232_v43 = vpack.c.bf16 %v343_v21, %v339_v17  ;;  %v11234_v52 = vpack.c.bf16 %v342_v31, %v338_v34  ;;  %v353_v17 = vsel %vm337_vm4, %v12006_v26, %v12007_v1  ;;  %v12017_v21 = vunpack.i.h.bf16 %v13668_v62 }
 0x135   :  { %v11987_v39 = vunpack.i.h.bf16 %v11985_v45  ;;  %v11986_v40 = vunpack.i.l.bf16 %v11985_v45  ;;  %v13694_v24 = vpop.permute.xlu1 %12044 }
 0x136   :  { %11233 = vmatprep.subr.bf16.mxu0 %v11232_v43  ;;  %12244 = vrot.lane.b32.xlu0 %v12243_v49, %s12929_s22  ;;  %v10913_v43 = vld [vmem:[%s17374_s25 + $0x20] sm:$0xff]  ;;  %v11947_v49 = vunpack.i.h.bf16 %v13640_v25 }
 0x137   :  { %11235 = vmatpush1.bf16.msra.mxu0 %v11234_v52  ;;  %v345_v28 = vsel %vm337_vm4, %v11986_v40, %v11987_v39  ;;  %v344_v36 = vsel %vm337_vm4, %v11977_v20, %v11986_v40 }
 0x138   :  { %v11995_v7 = vpop.permute.xlu0 %11994  ;;  %v11240_v60 = vpack.c.bf16 %v345_v28, %v341_v2  ;;  %v11242_v58 = vpack.c.bf16 %v344_v36, %v340_v63  ;;  %v11946_v2 = vunpack.i.l.bf16 %v13640_v25  ;;  %v626_v63 = vsel %vm621_vm7, %v11947_v49, %v12016_v0 }
 0x139   :  { %v11997_v16 = vunpack.i.h.bf16 %v11995_v7  ;;  %v11996_v14 = vunpack.i.l.bf16 %v11995_v7  ;;  %v13705_v18 = vpop.permute.xlu1 %12054  ;;  %v12021_v36 = vunpack.i.l.bf16 %v13678_v41  ;;  %v627_v25 = vsel %vm621_vm7, %v12016_v0, %v12017_v21 }
 0x13a   :  { %11241 = vmatprep.subr.bf16.mxu1 %v11240_v60 }
 0x13b   :  { %11243 = vmatpush1.bf16.msra.mxu1 %v11242_v58  ;;  %v351_v20 = vsel %vm337_vm4, %v11996_v14, %v11997_v16  ;;  %v350_v33 = vsel %vm337_vm4, %v11942_v38, %v11996_v14  ;;  %v352_v45 = vsel %vm337_vm4, %v11997_v16, %v12006_v26  ;;  %v10914_v58 = vld [vmem:[%s17374_s25 + $0x28] sm:$0xff]  ;;  %v12036_v26 = vunpack.i.l.bf16 %v13687_v57 }
 0x13c   :  { %v12000_v48 = vpop.permute.xlu0 %11999  ;;  %v11236_v29 = vpack.c.bf16 %v351_v20, %v347_v59  ;;  %v11238_v35 = vpack.c.bf16 %v350_v33, %v346_v15  ;;  %v12037_v20 = vunpack.i.h.bf16 %v13687_v57  ;;  %v11951_v57 = vunpack.i.l.bf16 %v13647_v32 }
 0x13d   :  { %v12002_v46 = vunpack.i.h.bf16 %v12000_v48  ;;  %v12001_v50 = vunpack.i.l.bf16 %v12000_v48  ;;  %v13713_v10 = vpop.permute.xlu1 %12059 }
 0x13e   :  { %11237 = vmatprep.subr.bf16.mxu0 %v11236_v29  ;;  %v10915_v29 = vld [vmem:[%s17374_s25 + $0x30] sm:$0xff] }
 0x13f   :  { %11239 = vmatpush1.bf16.msra.mxu0 %v11238_v35  ;;  %v349_v34 = vsel %vm337_vm4, %v12001_v50, %v12002_v46  ;;  %v348_v31 = vsel %vm337_vm4, %v11992_v19, %v12001_v50  ;;  %v12022_v19 = vunpack.i.h.bf16 %v13678_v41  ;;  %v11952_v35 = vunpack.i.h.bf16 %v13647_v32 }
 0x140   :  { %v12010_v52 = vpop.permute.xlu0 %12009  ;;  %v11244_v39 = vpack.c.bf16 %v353_v17, %v349_v34  ;;  %v11246_v40 = vpack.c.bf16 %v352_v45, %v348_v31  ;;  %v12046_v45 = vunpack.i.l.bf16 %v13694_v24  ;;  %v635_v32 = vsel %vm621_vm7, %v12036_v26, %v12037_v20 }
 0x141   :  { %v12012_v56 = vunpack.i.h.bf16 %v12010_v52  ;;  %v12011_v62 = vunpack.i.l.bf16 %v12010_v52  ;;  %v13726_v28 = vpop.permute.xlu1 %12074  ;;  %v625_v59 = vsel %vm621_vm7, %v12021_v36, %v12022_v19  ;;  %v634_v31 = vsel %vm621_vm7, %v11952_v35, %v12036_v26 }
 0x142   :  { %11245 = vmatprep.subr.bf16.mxu1 %v11244_v39  ;;  %10918 = vmatmul.mubr.msk.f32.vlgmr.msra.gmra.mrb[0].mxu0 %vm370_vm8, %v10913_v43  ;;  %v10916_v39 = vld [vmem:[%s17374_s25 + $0x38] sm:$0xff]  ;;  %v636_v19 = vsel %vm621_vm7, %v12037_v20, %v12046_v45 }
 0x143   :  { %v622_v7 = vsel %vm621_vm7, %v11946_v2, %v12011_v62  ;;  %11247 = vmatpush1.bf16.msra.mxu1 %v11246_v40  ;;  %v623_v60 = vsel %vm621_vm7, %v12011_v62, %v12012_v56  ;;  %453 = vmatprep.mubr.f32.mxu0 %v17322_v37  ;;  %v624_v15 = vsel %vm621_vm7, %v12012_v56, %v12021_v36  ;;  %v12056_v36 = vunpack.i.l.bf16 %v13705_v18 }
 0x144   :  { %v12025_v38 = vpop.permute.xlu0 %12024  ;;  %v11248_v9 = vpack.c.bf16 %v627_v25, %v623_v60  ;;  %v11250_v16 = vpack.c.bf16 %v626_v63, %v622_v7  ;;  %v12057_v7 = vunpack.i.h.bf16 %v13705_v18 }
 0x145   :  { %v12027_v41 = vunpack.i.h.bf16 %v12025_v38  ;;  %v12026_v14 = vunpack.i.l.bf16 %v12025_v38  ;;  %v13739_v1 = vpop.permute.xlu1 %12084  ;;  %v137_v38 = vld [vmem:[%s17374_s25] sm:$0xff] }
 0x146   :  { %11249 = vmatprep.subr.bf16.mxu0 %v11248_v9  ;;  %10919 = vmatmul.mubr.msk.f32.gmra.mrb[2].mxu0 %vm370_vm8, %v10914_v58  ;;  %v11957_v9 = vunpack.i.h.bf16 %v13654_v22  ;;  %v971_v35 = vsel %vm965_vm6, %v12056_v36, %v12057_v7 }
 0x147   :  { %v628_v33 = vsel %vm621_vm7, %v12017_v21, %v12026_v14  ;;  %11251 = vmatpush1.bf16.msra.mxu0 %v11250_v16  ;;  %v629_v48 = vsel %vm621_vm7, %v12026_v14, %v12027_v41  ;;  %10922 = vmatmul.mubr.msk.f32.vlgmr.msra.gmra.mrb[0].mxu1 %vm370_vm8, %v10913_v43  ;;  %v12047_v43 = vunpack.i.h.bf16 %v13694_v24  ;;  %v11956_v14 = vunpack.i.l.bf16 %v13654_v22 }
 0x148   :  { %v12030_v46 = vpop.permute.xlu0 %12029  ;;  %v11256_v50 = vpack.c.bf16 %v629_v48, %v625_v59  ;;  %v11258_v0 = vpack.c.bf16 %v628_v33, %v624_v15  ;;  %459 = vmatprep.mubr.f32.mxu0 %v17322_v37  ;;  %542 = vmatprep.mubr.f32.mxu1 %v17322_v37  ;;  %v970_v15 = vsel %vm965_vm6, %v11957_v9, %v12056_v36  ;;  %v12062_v33 = vunpack.i.h.bf16 %v13713_v10 }
 0x149   :  { %v12032_v17 = vunpack.i.h.bf16 %v12030_v46  ;;  %v12031_v21 = vunpack.i.l.bf16 %v12030_v46  ;;  %v13756_v34 = vpop.permute.xlu1 %12094  ;;  %v12061_v48 = vunpack.i.l.bf16 %v13713_v10  ;;  %v138_v46 = vld [vmem:[%s17374_s25 + $0x8] sm:$0xff]  ;;  %v11961_v36 = vunpack.i.l.bf16 %v13664_v8 }
 0x14a   :  { %11257 = vmatprep.subr.bf16.mxu1 %v11256_v50  ;;  %10920 = vmatmul.mubr.msk.f32.gmra.mrb[4].mxu0 %vm370_vm8, %v10915_v29  ;;  %v12087_v9 = vunpack.i.h.bf16 %v13739_v1 }
 0x14b   :  { %v630_v49 = vsel %vm621_vm7, %v11951_v57, %v12031_v21  ;;  %11259 = vmatpush1.bf16.msra.mxu1 %v11258_v0  ;;  %v631_v52 = vsel %vm621_vm7, %v12031_v21, %v12032_v17  ;;  %465 = vmatprep.mubr.f32.mxu0 %v17322_v37  ;;  %v11962_v57 = vunpack.i.h.bf16 %v13664_v8 }
 0x14c   :  { %v12040_v40 = vpop.permute.xlu0 %12039  ;;  %v11252_v2 = vpack.c.bf16 %v635_v32, %v631_v52  ;;  %10923 = vmatmul.mubr.msk.f32.gmra.mrb[2].mxu1 %vm370_vm8, %v10914_v58  ;;  %v11254_v56 = vpack.c.bf16 %v634_v31, %v630_v49  ;;  %v637_v58 = vsel %vm621_vm7, %v12046_v45, %v12047_v43  ;;  %v12076_v45 = vunpack.i.l.bf16 %v13726_v28 }
 0x14d   :  { %v12042_v62 = vunpack.i.h.bf16 %v12040_v40  ;;  %v12041_v24 = vunpack.i.l.bf16 %v12040_v40  ;;  %v13770_v63 = vpop.permute.xlu1 %12099  ;;  %548 = vmatprep.mubr.f32.mxu1 %v17322_v37  ;;  %v969_v52 = vsel %vm965_vm6, %v12061_v48, %v12062_v33  ;;  %v12077_v32 = vunpack.i.h.bf16 %v13726_v28 }
 0x14e   :  { %11253 = vmatprep.subr.bf16.mxu0 %v11252_v2  ;;  %10921 = vmatmul.mubr.msk.f32.gmra.mrb[6].mxu0 %vm370_vm8, %v10916_v39  ;;  %v12102_v54 = vunpack.i.h.bf16 %v13770_v63  ;;  %v12101_v11 = vunpack.i.l.bf16 %v13770_v63 }
 0x14f   :  { %v632_v60 = vsel %vm621_vm7, %v12032_v17, %v12041_v24  ;;  %11255 = vmatpush1.bf16.msra.mxu0 %v11254_v56  ;;  %v633_v25 = vsel %vm621_vm7, %v12041_v24, %v12042_v62  ;;  %730 = vmatprep.mubr.f32.mxu0 %v17322_v37 }
 0x150   :  { %v12050_v16 = vpop.permute.xlu0 %12049  ;;  %v11260_v41 = vpack.c.bf16 %v637_v58, %v633_v25  ;;  %10924 = vmatmul.mubr.msk.f32.gmra.mrb[4].mxu1 %vm370_vm8, %v10915_v29  ;;  %v11262_v18 = vpack.c.bf16 %v636_v19, %v632_v60  ;;  %v13832_v58 = vmul.f32 %v13414_v30, %v13189_v61  ;;  %v979_v61 = vsel %vm965_vm6, %v12076_v45, %v12077_v32 }
 0x151   :  { %v12052_v26 = vunpack.i.h.bf16 %v12050_v16  ;;  %v12051_v59 = vunpack.i.l.bf16 %v12050_v16  ;;  %v13787_v20 = vpop.permute.xlu1 %12119  ;;  %554 = vmatprep.mubr.f32.mxu1 %v17322_v37 }
 0x152   :  { %11261 = vmatprep.subr.bf16.mxu1 %v11260_v41  ;;  %10926 = vmatmul.mubr.msk.f32.vlgmr.msra.gmra.mrb[0].mxu0 %vm370_vm8, %v137_v38 }
 0x153   :  { %v966_v29 = vsel %vm965_vm6, %v11956_v14, %v12051_v59  ;;  %11263 = vmatpush1.bf16.msra.mxu1 %v11262_v18  ;;  %v967_v22 = vsel %vm965_vm6, %v12051_v59, %v12052_v26  ;;  %736 = vmatprep.mubr.f32.mxu0 %v17322_v37  ;;  %v140_v18 = vld [vmem:[%s17374_s25 + $0x18] sm:$0xff]  ;;  %v2566_v59 = vmul.f32 %v13414_v30, %v13280_v42  ;;  %v12097_v42 = vunpack.i.h.bf16 %v13756_v34 }
 0x154   :  { %v12065_v50 = vpop.permute.xlu0 %12064  ;;  %v11264_v0 = vpack.c.bf16 %v971_v35, %v967_v22  ;;  %10925 = vmatmul.mubr.msk.f32.gmra.mrb[6].mxu1 %vm370_vm8, %v10916_v39  ;;  %v11266_v10 = vpack.c.bf16 %v970_v15, %v966_v29  ;;  %v968_v39 = vsel %vm965_vm6, %v12052_v26, %v12061_v48  ;;  %v12096_v15 = vunpack.i.l.bf16 %v13756_v34 }
 0x155   :  { %v12067_v17 = vunpack.i.h.bf16 %v12065_v50  ;;  %v12066_v21 = vunpack.i.l.bf16 %v12065_v50  ;;  %v2542_v31 = vpop.permute.xlu1 %2541  ;;  %819 = vmatprep.mubr.f32.mxu1 %v17322_v37  ;;  %v11967_v22 = vunpack.i.h.bf16 %v13671_v51 }
 0x156   :  { %v13807_v43 = vsel %vm337_vm4, %v13426_v44, %v2542_v31  ;;  %v13809_v49 = vmul.f32 0.0, %v2542_v31  ;;  %11265 = vmatprep.subr.bf16.mxu0 %v11264_v0  ;;  %10927 = vmatmul.mubr.msk.f32.gmra.mrb[2].mxu0 %vm370_vm8, %v138_v46  ;;  %v139_v44 = vld [vmem:[%s17374_s25 + $0x10] sm:$0xff] }
 0x157   :  { %v972_v40 = vsel %vm965_vm6, %v12057_v7, %v12066_v21  ;;  %11267 = vmatpush1.bf16.msra.mxu0 %v11266_v10  ;;  %v973_v2 = vsel %vm965_vm6, %v12066_v21, %v12067_v17  ;;  %v2554_v24 = vmul.f32 %v13807_v43, %v13162_v47  ;;  %v2559_v19 = vmul.f32 %v13807_v43, %v13293_v53  ;;  %v10934_v17 = vld [vmem:[%s17374_s25 + $0x40] sm:$0xff] }
 0x158   :  { %v12070_v56 = vpop.permute.xlu0 %12069  ;;  %v11272_v62 = vpack.c.bf16 %v973_v2, %v969_v52  ;;  %10930 = vmatmul.mubr.msk.f32.vlgmr.msra.gmra.mrb[0].mxu1 %vm370_vm8, %v137_v38  ;;  %v11274_v28 = vpack.c.bf16 %v972_v40, %v968_v39  ;;  %742 = vmatprep.mubr.f32.mxu0 %v17322_v37  ;;  %v978_v47 = vsel %vm965_vm6, %v11962_v57, %v12076_v45  ;;  %v12086_v53 = vunpack.i.l.bf16 %v13739_v1 }
 0x159   :  { %v12072_v7 = vunpack.i.h.bf16 %v12070_v56  ;;  %v12071_v60 = vunpack.i.l.bf16 %v12070_v56  ;;  %v13826_v25 = vpop.permute.xlu1 %12129  ;;  %825 = vmatprep.mubr.f32.mxu1 %v17322_v37  ;;  %v12248_v38 = vpack.i.bf16 %v13809_v49, %v2554_v24  ;;  %v12253_v8 = vpack.i.bf16 %v13809_v49, %v2559_v19 }
 0x15a   :  { %11273 = vmatprep.subr.bf16.mxu1 %v11272_v62  ;;  %10928 = vmatmul.mubr.msk.f32.gmra.mrb[4].mxu0 %vm370_vm8, %v139_v44  ;;  %v980_v35 = vsel %vm965_vm6, %v12077_v32, %v12086_v53  ;;  %v2564_v50 = vmul.f32 %v13807_v43, %v13337_v13  ;;  %v12268_v10 = vpack.i.bf16 %v2566_v59, %v13832_v58  ;;  %v11966_v21 = vunpack.i.l.bf16 %v13671_v51  ;;  %v10935_v62 = vld [vmem:[%s17374_s25 + $0x48] sm:$0xff] }
 0x15b   :  { %v974_v16 = vsel %vm965_vm6, %v11961_v36, %v12071_v60  ;;  %11275 = vmatpush1.bf16.msra.mxu1 %v11274_v28  ;;  %v975_v41 = vsel %vm965_vm6, %v12071_v60, %v12072_v7  ;;  %748 = vmatprep.mubr.f32.mxu0 %v17322_v37  ;;  %v1330_v31 = vsel %vm1325_vm5, %v11967_v22, %v12096_v15  ;;  %v12122_v24 = vunpack.i.h.bf16 %v13787_v20  ;;  %v12884_v59 = vld [vmem:[%s17373_s3 + $0x28] sm:$0xff] }
 0x15c   :  { %12249 = vrot.lane.b32.xlu1 %v12248_v38, %s12929_s22  ;;  %12254 = vrot.lane.b32.xlu0 %v12253_v8, %s12929_s22  ;;  %v12080_v14 = vpop.permute.xlu0 %12079  ;;  %v11268_v26 = vpack.c.bf16 %v979_v61, %v975_v41  ;;  %v11270_v1 = vpack.c.bf16 %v978_v47, %v974_v16  ;;  %v12273_v45 = vpack.i.bf16 %v13809_v49, %v2564_v50  ;;  %v12121_v36 = vunpack.i.l.bf16 %v13787_v20  ;;  %v10936_v20 = vld [vmem:[%s17374_s25 + $0x50] sm:$0xff] }
 0x15d   :  { %v12082_v33 = vunpack.i.h.bf16 %v12080_v14  ;;  %v12081_v48 = vunpack.i.l.bf16 %v12080_v14  ;;  %v13852_v29 = vpop.permute.xlu1 %2895  ;;  %10931 = vmatmul.mubr.msk.f32.gmra.mrb[2].mxu1 %vm370_vm8, %v138_v46  ;;  %v981_v46 = vsel %vm965_vm6, %v12086_v53, %v12087_v9  ;;  %v1331_v32 = vsel %vm1325_vm5, %v12096_v15, %v12097_v42  ;;  %v12885_v15 = vld [vmem:[%s17373_s3 + $0x8] sm:$0xff] }
 0x15e   :  { %11269 = vmatprep.subr.bf16.mxu0 %v11268_v26  ;;  %10929 = vmatmul.mubr.msk.f32.gmra.mrb[6].mxu0 %vm370_vm8, %v140_v18  ;;  %v1329_v28 = vsel %vm1325_vm5, %v12101_v11, %v12102_v54  ;;  %v1339_v41 = vsel %vm1325_vm5, %v12121_v36, %v12122_v24  ;;  %v12131_v22 = vunpack.i.l.bf16 %v13826_v25  ;;  %v12887_v54 = vld [vmem:[%s17373_s3] sm:$0xff] }
 0x15f   :  { %v976_v30 = vsel %vm965_vm6, %v12072_v7, %v12081_v48  ;;  %11271 = vmatpush1.bf16.msra.mxu0 %v11270_v1  ;;  %831 = vmatprep.mubr.f32.mxu1 %v17322_v37  ;;  %v977_v0 = vsel %vm965_vm6, %v12081_v48, %v12082_v33  ;;  %v10937_v1 = vld [vmem:[%s17374_s25 + $0x58] sm:$0xff]  ;;  %v11296_v33 = vpack.c.bf16 %v12884_v59, %v12885_v15  ;;  %v12132_v48 = vunpack.i.h.bf16 %v13826_v25  ;;  %v10947_v25 = vld [vmem:[%s17374_s25 + $0x60] sm:$0xff] }
 0x160   :  { %12259 = vrot.lane.b32.xlu1 %v12258_v27, %s12929_s22  ;;  %12264 = vrot.lane.b32.xlu0 %v12263_v23, %s12929_s22  ;;  %v12090_v13 = vpop.permute.xlu0 %12089  ;;  %v11276_v34 = vpack.c.bf16 %v981_v46, %v977_v0  ;;  %v11278_v57 = vpack.c.bf16 %v980_v35, %v976_v30  ;;  %v13888_v23 = vld [vmem:[%s17373_s3 + $0x78] sm:$0xff] }
 0x161   :  { %v12092_v55 = vunpack.i.h.bf16 %v12090_v13  ;;  %v12091_v12 = vunpack.i.l.bf16 %v12090_v13  ;;  %v13879_v27 = vpop.permute.xlu1 %2899  ;;  %10932 = vmatmul.mubr.msk.f32.gmra.mrb[4].mxu1 %vm370_vm8, %v139_v44  ;;  %1074 = vmatprep.mubr.f32.mxu0 %v17322_v37  ;;  %v2569_v51 = vmul.f32 %v13888_v23, %v13807_v43 }
 0x162   :  { %11277 = vmatprep.subr.bf16.mxu1 %v11276_v34  ;;  %837 = vmatprep.mubr.f32.mxu1 %v17322_v37  ;;  %v1340_v34 = vsel %vm1325_vm5, %v12122_v24, %v12131_v22  ;;  %v14005_v24 = vld [vmem:[%s17373_s3 + $0x60] sm:$0xff] }
 0x163   :  { %v1326_v52 = vsel %vm1325_vm5, %v11966_v21, %v12091_v12  ;;  %11279 = vmatpush1.bf16.msra.mxu1 %v11278_v57  ;;  %10939 = vmatmul.mubr.msk.f32.vlgmr.msra.gmra.mrb[0].mxu0 %vm370_vm8, %v10934_v17  ;;  %v1327_v63 = vsel %vm1325_vm5, %v12091_v12, %v12092_v55  ;;  %v12278_v19 = vpack.i.bf16 %v13809_v49, %v2569_v51  ;;  %v12886_v12 = vld [vmem:[%s17373_s3 + $0x20] sm:$0xff]  ;;  %v12888_v51 = vld [vmem:[%s17373_s3 + $0x18] sm:$0xff] }
 0x164   :  { %12269 = vrot.lane.b32.xlu1 %v12268_v10, %s12929_s22  ;;  %12274 = vrot.lane.b32.xlu0 %v12273_v45, %s12929_s22  ;;  %v12105_v39 = vpop.permute.xlu0 %12104  ;;  %v11280_v43 = vpack.c.bf16 %v1331_v32, %v1327_v63  ;;  %v11282_v40 = vpack.c.bf16 %v1330_v31, %v1326_v52  ;;  %v1328_v7 = vsel %vm1325_vm5, %v12092_v55, %v12101_v11  ;;  %v12889_v45 = vld [vmem:[%s17373_s3 + $0x38] sm:$0xff]  ;;  %v13978_v32 = vld [vmem:[%s17373_s3 + $0x48] sm:$0xff] }
 0x165   :  { %v12107_v2 = vunpack.i.h.bf16 %v12105_v39  ;;  %v12106_v44 = vunpack.i.l.bf16 %v12105_v39  ;;  %v13900_v56 = vpop.permute.xlu1 %12139  ;;  %10933 = vmatmul.mubr.msk.f32.gmra.mrb[6].mxu1 %vm370_vm8, %v140_v18  ;;  %1080 = vmatprep.mubr.f32.mxu0 %v17322_v37  ;;  %v11298_v11 = vpack.c.bf16 %v12886_v12, %v12887_v54  ;;  %v11304_v52 = vpack.c.bf16 %v12889_v45, %v12888_v51  ;;  %v13983_v39 = vld [vmem:[%s17373_s3 + $0x68] sm:$0xff] }
 0x166   :  { %11281 = vmatprep.subr.bf16.mxu0 %v11280_v43  ;;  %1163 = vmatprep.mubr.f32.mxu1 %v17322_v37  ;;  %v11300_v43 = vpack.c.bf16 %v13983_v39, %v13978_v32 }
 0x167   :  { %v1332_v60 = vsel %vm1325_vm5, %v12097_v42, %v12106_v44  ;;  %11283 = vmatpush1.bf16.msra.mxu0 %v11282_v40  ;;  %v1333_v58 = vsel %vm1325_vm5, %v12106_v44, %v12107_v2  ;;  %v10948_v40 = vld [vmem:[%s17374_s25 + $0x68] sm:$0xff] }
 0x168   :  { %12279 = vrot.lane.b32.xlu1 %v12278_v19, %s12929_s22  ;;  %v12110_v47 = vpop.permute.xlu0 %12109  ;;  %10940 = vmatmul.mubr.msk.f32.gmra.mrb[2].mxu0 %vm370_vm8, %v10935_v62  ;;  %v11288_v53 = vpack.c.bf16 %v1333_v58, %v1329_v28  ;;  %v11290_v49 = vpack.c.bf16 %v1332_v60, %v1328_v7  ;;  %v12894_v28 = vld [vmem:[%s17373_s3 + $0x10] sm:$0xff]  ;;  %v12142_v60 = vunpack.i.h.bf16 %v13900_v56  ;;  %v12141_v58 = vunpack.i.l.bf16 %v13900_v56 }
 0x169   :  { %v12112_v38 = vunpack.i.h.bf16 %v12110_v47  ;;  %v12111_v8 = vunpack.i.l.bf16 %v12110_v47  ;;  %v13917_v9 = vpop.permute.xlu1 %12149  ;;  %10943 = vmatmul.mubr.msk.f32.vlgmr.msra.gmra.mrb[0].mxu1 %vm370_vm8, %v10934_v17  ;;  %1086 = vmatprep.mubr.f32.mxu0 %v17322_v37  ;;  %v1341_v17 = vsel %vm1325_vm5, %v12131_v22, %v12132_v48 }
 0x16a   :  { %11289 = vmatprep.subr.bf16.mxu1 %v11288_v53  ;;  %1169 = vmatprep.mubr.f32.mxu1 %v17322_v37 }
 0x16b   :  { %11291 = vmatpush1.bf16.msra.mxu1 %v11290_v49  ;;  %v1335_v16 = vsel %vm1325_vm5, %v12111_v8, %v12112_v38 }
 0x16c   :  { %v12115_v61 = vpop.permute.xlu0 %12114  ;;  %10941 = vmatmul.mubr.msk.f32.gmra.mrb[4].mxu0 %vm370_vm8, %v10936_v20  ;;  %v11284_v18 = vpack.c.bf16 %v1339_v41, %v1335_v16  ;;  %v10949_v16 = vld [vmem:[%s17374_s25 + $0x70] sm:$0xff] }
 0x16d   :  { %v12117_v14 = vunpack.i.h.bf16 %v12115_v61  ;;  %v12116_v26 = vunpack.i.l.bf16 %v12115_v61  ;;  %10944 = vmatmul.mubr.msk.f32.gmra.mrb[2].mxu1 %vm370_vm8, %v10935_v62  ;;  %1092 = vmatprep.mubr.f32.mxu0 %v17322_v37  ;;  %v13944_v42 = vpop.permute.xlu1 %12159  ;;  %v14000_v62 = vld [vmem:[%s17373_s3 + $0x40] sm:$0xff] }
 0x16e   :  { %11285 = vmatprep.subr.bf16.mxu0 %v11284_v18  ;;  %1175 = vmatprep.mubr.f32.mxu1 %v17322_v37  ;;  %v11302_v19 = vpack.c.bf16 %v14005_v24, %v14000_v62  ;;  %v14038_v18 = vld [vmem:[%s17373_s3 + $0x58] sm:$0xff] }
 0x16f   :  { %v1338_v35 = vsel %vm1325_vm5, %v12117_v14, %v12121_v36  ;;  %v1334_v50 = vsel %vm1325_vm5, %v12116_v26, %v12111_v8  ;;  %v12895_v36 = vld [vmem:[%s17373_s3 + $0x30] sm:$0xff]  ;;  %v11308_v14 = vpack.c.bf16 %v13888_v23, %v14038_v18 }
 0x170   :  { %v12125_v30 = vpop.permute.xlu0 %12124  ;;  %10942 = vmatmul.mubr.msk.f32.gmra.mrb[6].mxu0 %vm370_vm8, %v10937_v1  ;;  %v11286_v0 = vpack.c.bf16 %v1338_v35, %v1334_v50  ;;  %v11306_v7 = vpack.c.bf16 %v12895_v36, %v12894_v28  ;;  %v12897_v26 = vld [vmem:[%s17373_s3 + $0x70] sm:$0xff]  ;;  %v12152_v50 = vunpack.i.h.bf16 %v13917_v9 }
 0x171   :  { %v12127_v46 = vunpack.i.h.bf16 %v12125_v30  ;;  %v12126_v13 = vunpack.i.l.bf16 %v12125_v30  ;;  %10945 = vmatmul.mubr.msk.f32.gmra.mrb[4].mxu1 %vm370_vm8, %v10936_v20  ;;  %1434 = vmatprep.mubr.f32.mxu0 %v17322_v37  ;;  %v13971_v63 = vpop.permute.xlu1 %12169 }
 0x172   :  { %11287 = vmatpush1.bf16.msra.mxu0 %v11286_v0  ;;  %1181 = vmatprep.mubr.f32.mxu1 %v17322_v37 }
 0x173   :  { %v1336_v10 = vsel %vm1325_vm5, %v12112_v38, %v12126_v13  ;;  %v1337_v57 = vsel %vm1325_vm5, %v12126_v13, %v12127_v46  ;;  %11297 = vmatprep.subr.bf16.mxu0 %v11296_v33  ;;  %v10950_v46 = vld [vmem:[%s17374_s25 + $0x78] sm:$0xff]  ;;  %v12151_v13 = vunpack.i.l.bf16 %v13917_v9 }
 0x174   :  { %v13957_v21 = vpop.permute.xlu0 %2893  ;;  %v11292_v31 = vpack.c.bf16 %v1341_v17, %v1337_v57  ;;  %v11294_v55 = vpack.c.bf16 %v1340_v34, %v1336_v10 }
 0x175   :  { %10952 = vmatmul.mubr.msk.f32.vlgmr.msra.gmra.mrb[0].mxu0 %vm370_vm8, %v10947_v25  ;;  %10946 = vmatmul.mubr.msk.f32.gmra.mrb[6].mxu1 %vm370_vm8, %v10937_v1  ;;  %v13994_v2 = vsel %vm621_vm7, %v13957_v21, %v13852_v29  ;;  %v2909_v41 = vmul.f32 %v12887_v54, %v13957_v21  ;;  %v2914_v61 = vmul.f32 %v12886_v12, %v13957_v21  ;;  %v12898_v1 = vld [vmem:[%s17373_s3 + $0x50] sm:$0xff]  ;;  %s11059_s3 = sld [smem:[#allocation3 + $0x1]] }
 0x176   :  { %11293 = vmatprep.subr.bf16.mxu1 %v11292_v31  ;;  %1440 = vmatprep.mubr.f32.mxu0 %v17322_v37  ;;  %v2915_v8 = vmul.f32 %v12884_v59, %v13994_v2  ;;  %v2910_v20 = vmul.f32 %v12885_v15, %v13994_v2  ;;  %v11310_v59 = vpack.c.bf16 %v12897_v26, %v12898_v1  ;;  %v14049_v15 = vmul.f32 0.0, %v13879_v27 }
 0x177   :  { %11295 = vmatpush1.bf16.msra.mxu1 %v11294_v55  ;;  %1523 = vmatprep.mubr.f32.mxu1 %v17322_v37  ;;  %v12293_v34 = vpack.i.bf16 %v2914_v61, %v2909_v41 }
 0x178   :  { %v2898_v44 = vpop.permute.xlu0 %2897  ;;  %11299 = vmatpush1.bf16.msra.mxu0 %v11298_v11  ;;  %11305 = vmatprep.subr.bf16.mxu1 %v11304_v52  ;;  %v1918_v11 = vsel %vm1236_vm3, %v12151_v13, %v12152_v50  ;;  %v2919_v52 = vmul.f32 %v14000_v62, %v13957_v21 }
 0x179   :  { %v2902_v47 = vsel %vm621_vm7, %v13852_v29, %v2898_v44  ;;  %v14021_v53 = vsel %vm621_vm7, %v2898_v44, %v13879_v27  ;;  %10953 = vmatmul.mubr.msk.f32.gmra.mrb[2].mxu0 %vm370_vm8, %v10948_v40  ;;  %11301 = vmatprep.subr.bf16.mxu0 %v11300_v43  ;;  %v14030_v29 = vpop.permute.xlu1 %12179  ;;  %v1920_v27 = vsel %vm1236_vm3, %v12141_v58, %v12142_v60 }
 0x17a   :  { %v2911_v49 = vmul.f32 %v12894_v28, %v2902_v47  ;;  %v2916_v38 = vmul.f32 %v12895_v36, %v2902_v47  ;;  %10956 = vmatmul.mubr.msk.f32.vlgmr.msra.gmra.mrb[0].mxu1 %vm370_vm8, %v10947_v25  ;;  %1446 = vmatprep.mubr.f32.mxu0 %v17322_v37  ;;  %v2912_v33 = vmul.f32 %v12888_v51, %v14021_v53 }
 0x17b   :  { %1529 = vmatprep.mubr.f32.mxu1 %v17322_v37  ;;  %11307 = vmatpush1.bf16.msra.mxu1 %v11306_v7  ;;  %v2917_v25 = vmul.f32 %v12889_v45, %v14021_v53  ;;  %v2921_v57 = vmul.f32 %v12898_v1, %v2902_v47  ;;  %v2920_v51 = vmul.f32 %v13978_v32, %v13994_v2  ;;  %v10960_v45 = vld [vmem:[%s17374_s25 + $0x80] sm:$0xff]  ;;  %v12162_v32 = vunpack.i.h.bf16 %v13944_v42 }
 0x17c   :  { %v14052_v48 = vpop.permute.xlu0 %12134  ;;  %v12288_v22 = vpack.i.bf16 %v2916_v38, %v2915_v8  ;;  %v12283_v35 = vpack.i.bf16 %v2911_v49, %v2910_v20  ;;  %11303 = vmatpush1.bf16.msra.mxu0 %v11302_v19  ;;  %v12298_v31 = vpack.i.bf16 %v14049_v15, %v2912_v33  ;;  %11309 = vmatprep.subr.bf16.mxu1 %v11308_v14  ;;  %v12171_v49 = vunpack.i.l.bf16 %v13971_v63 }
 0x17d   :  { %v12137_v30 = vunpack.i.h.bf16 %v14052_v48  ;;  %v12136_v0 = vunpack.i.l.bf16 %v14052_v48  ;;  %10954 = vmatmul.mubr.msk.f32.gmra.mrb[4].mxu0 %vm370_vm8, %v10949_v16  ;;  %v14074_v12 = vpop.permute.xlu1 %12189  ;;  %v2924_v43 = vmul.f32 %v14005_v24, %v13957_v21  ;;  %v12308_v36 = vpack.i.bf16 %v2921_v57, %v2920_v51 }
 0x17e   :  { %12289 = vrot.lane.b32.xlu1 %v12288_v22, %s12930_s24  ;;  %12284 = vrot.lane.b32.xlu0 %v12283_v35, %s12930_s24  ;;  %v12303_v7 = vpack.i.bf16 %v14049_v15, %v2917_v25  ;;  %v12161_v21 = vunpack.i.l.bf16 %v13944_v42  ;;  %v2922_v38 = vmul.f32 %v14038_v18, %v14021_v53  ;;  %v2927_v8 = vmul.f32 %v13888_v23, %v14021_v53  ;;  %v10972_v42 = vld [vmem:[%s17374_s25 + $0xa0] sm:$0xff] }
 0x17f   :  { %10957 = vmatmul.mubr.msk.f32.gmra.mrb[2].mxu1 %vm370_vm8, %v10948_v40  ;;  %1452 = vmatprep.mubr.f32.mxu0 %v17322_v37  ;;  %v1916_v10 = vsel %vm1236_vm3, %v12136_v0, %v12137_v30  ;;  %v2926_v40 = vmul.f32 %v12897_v26, %v2902_v47  ;;  %v2925_v47 = vmul.f32 %v13983_v39, %v13994_v2  ;;  %v12172_v26 = vunpack.i.h.bf16 %v13971_v63  ;;  %v10962_v63 = vld [vmem:[%s17374_s25 + $0x90] sm:$0xff] }
 0x180   :  { %v12145_v17 = vpop.permute.xlu0 %12144  ;;  %1535 = vmatprep.mubr.f32.mxu1 %v17322_v37  ;;  %v11312_v55 = vpack.c.bf16 %v1920_v27, %v1916_v10  ;;  %11311 = vmatpush1.bf16.msra.mxu1 %v11310_v59  ;;  %v12318_v20 = vpack.i.bf16 %v2924_v43, %v2919_v52  ;;  %v1917_v41 = vsel %vm1236_vm3, %v12137_v30, %v12151_v13  ;;  %v12181_v33 = vunpack.i.l.bf16 %v14030_v29  ;;  %v10963_v10 = vld [vmem:[%s17374_s25 + $0x98] sm:$0xff] }
 0x181   :  { %v12147_v9 = vunpack.i.h.bf16 %v12145_v17  ;;  %v12146_v54 = vunpack.i.l.bf16 %v12145_v17  ;;  %10955 = vmatmul.mubr.msk.f32.gmra.mrb[6].mxu0 %vm370_vm8, %v10950_v46  ;;  %v14111_v39 = vpop.permute.xlu1 %12199  ;;  %v12313_v61 = vpack.i.bf16 %v2926_v40, %v2925_v47  ;;  %v1923_v56 = vsel %vm1236_vm3, %v12171_v49, %v12161_v21 }
 0x182   :  { %12299 = vrot.lane.b32.xlu1 %v12298_v31, %s12930_s24  ;;  %12294 = vrot.lane.b32.xlu0 %v12293_v34, %s12930_s24  ;;  %v1924_v48 = vsel %vm1236_vm3, %v12161_v21, %v12162_v32  ;;  %v12328_v35 = vpack.i.bf16 %v14049_v15, %v2927_v8  ;;  %v12323_v30 = vpack.i.bf16 %v14049_v15, %v2922_v38  ;;  %v12192_v34 = vunpack.i.h.bf16 %v14074_v12  ;;  %v118_v21 = vld [vmem:[%s17375_s1 + $0x8] sm:$0xff]  ;;  %v117_v8 = vld [vmem:[%s17375_s1] sm:$0xff] }
 0x183   :  { %v1919_v44 = vsel %vm1236_vm3, %v12147_v9, %v12141_v58  ;;  %v1915_v19 = vsel %vm1236_vm3, %v12146_v54, %v12136_v0  ;;  %10958 = vmatmul.mubr.msk.f32.gmra.mrb[4].mxu1 %vm370_vm8, %v10949_v16  ;;  %1645 = vmatprep.mubr.f32.mxu0 %v17322_v37  ;;  %v10961_v16 = vld [vmem:[%s17374_s25 + $0x88] sm:$0xff]  ;;  %v12191_v57 = vunpack.i.l.bf16 %v14074_v12  ;;  %v12938_v47 = vmov 0   ;;  %v3428_v12 = vld [vmem:[%s17376_s30] sm:$0xff] }
 0x184   :  { %v12155_v28 = vpop.permute.xlu0 %12154  ;;  %11313 = vmatprep.subr.bf16.mxu0 %v11312_v55  ;;  %1541 = vmatprep.mubr.f32.mxu1 %v17322_v37  ;;  %v11314_v62 = vpack.c.bf16 %v1919_v44, %v1915_v19 }
 0x185   :  { %v12157_v24 = vunpack.i.h.bf16 %v12155_v28  ;;  %v12156_v58 = vunpack.i.l.bf16 %v12155_v28  ;;  %10964 = vmatmul.mubr.msk.f32.vlgmr.msra.gmra.mrb[0].mxu0 %vm370_vm8, %v10960_v45  ;;  %v2278_v40 = vsel %vm876_vm2, %v12191_v57, %v12192_v34  ;;  %12334 = vset.pattern.permute.xlu1 %v12938_v47 }
 0x186   :  { %12309 = vrot.lane.b32.xlu1 %v12308_v36, %s12930_s24  ;;  %12304 = vrot.lane.b32.xlu0 %v12303_v7, %s12930_s24  ;;  %v12202_v36 = vunpack.i.h.bf16 %v14111_v39  ;;  %v12201_v7 = vunpack.i.l.bf16 %v14111_v39  ;;  %v119_v39 = vld [vmem:[%s17375_s1 + $0x10] sm:$0xff] }
 0x187   :  { %v1921_v2 = vsel %vm1236_vm3, %v12142_v60, %v12156_v58  ;;  %11315 = vmatpush1.bf16.msra.mxu0 %v11314_v62  ;;  %10959 = vmatmul.mubr.msk.f32.gmra.mrb[6].mxu1 %vm370_vm8, %v10950_v46  ;;  %v1922_v23 = vsel %vm1236_vm3, %v12156_v58, %v12157_v24  ;;  %v12182_v60 = vunpack.i.h.bf16 %v14030_v29  ;;  %v14139_v46 = vpop.permute.xlu1 %12209  ;;  %v10973_v62 = vld [vmem:[%s17374_s25 + $0xa8] sm:$0xff] }
 0x188   :  { %v12165_v53 = vpop.permute.xlu0 %12164  ;;  %1734 = vmatprep.mubr.f32.mxu1 %v17322_v37  ;;  %v11320_v18 = vpack.c.bf16 %v1922_v23, %v1918_v11  ;;  %v11322_v14 = vpack.c.bf16 %v1921_v2, %v1917_v41  ;;  %1651 = vmatprep.mubr.f32.mxu0 %v17322_v37  ;;  %v12212_v2 = vunpack.i.h.bf16 %v14139_v46  ;;  %v12211_v23 = vunpack.i.l.bf16 %v14139_v46 }
 0x189   :  { %v12167_v1 = vunpack.i.h.bf16 %v12165_v53  ;;  %v12166_v59 = vunpack.i.l.bf16 %v12165_v53  ;;  %10965 = vmatmul.mubr.msk.f32.gmra.mrb[2].mxu0 %vm370_vm8, %v10961_v16  ;;  %v1930_v15 = vsel %vm1236_vm3, %v12181_v33, %v12182_v60  ;;  %12333 = vset.pattern.permute.xlu0 %v12938_v47  ;;  %v2276_v53 = vsel %vm876_vm2, %v12201_v7, %v12202_v36 }
 0x18a   :  { %12319 = vrot.lane.b32.xlu1 %v12318_v20, %s12930_s24  ;;  %12314 = vrot.lane.b32.xlu0 %v12313_v61, %s12930_s24  ;;  %v10974_v61 = vld [vmem:[%s17374_s25 + $0xb0] sm:$0xff] }
 0x18b   :  { %v1927_v22 = vsel %vm1236_vm3, %v12172_v26, %v12166_v59  ;;  %11321 = vmatprep.subr.bf16.mxu1 %v11320_v18  ;;  %10968 = vmatmul.mubr.msk.f32.vlgmr.msra.gmra.mrb[0].mxu1 %vm370_vm8, %v10960_v45  ;;  %v1928_v29 = vsel %vm1236_vm3, %v12166_v59, %v12167_v1  ;;  %v1929_v17 = vsel %vm1236_vm3, %v12167_v1, %v12181_v33  ;;  %v14164_v52 = vpop.permute.xlu1 %12219  ;;  %v120_v33 = vld [vmem:[%s17375_s1 + $0x18] sm:$0xff]  ;;  %s12939_s1 = smov 126  }
 0x18c   :  { %11323 = vmatpush1.bf16.msra.mxu1 %v11322_v14  ;;  %v12175_v50 = vpop.permute.xlu0 %12174  ;;  %v11316_v0 = vpack.c.bf16 %v1928_v29, %v1924_v48  ;;  %v11318_v27 = vpack.c.bf16 %v1927_v22, %v1923_v56  ;;  %1657 = vmatprep.mubr.f32.mxu0 %v17322_v37  ;;  %v12221_v18 = vunpack.i.l.bf16 %v14164_v52  ;;  %v12222_v48 = vunpack.i.h.bf16 %v14164_v52 }
 0x18d   :  { %v12177_v13 = vunpack.i.h.bf16 %v12175_v50  ;;  %v12176_v25 = vunpack.i.l.bf16 %v12175_v50  ;;  %10966 = vmatmul.mubr.msk.f32.gmra.mrb[4].mxu0 %vm370_vm8, %v10962_v63  ;;  %1740 = vmatprep.mubr.f32.mxu1 %v17322_v37  ;;  %v2282_v50 = vsel %vm876_vm2, %v12211_v23, %v12212_v2 }
 0x18e   :  { %12329 = vrot.lane.b32.xlu1 %v12328_v35, %s12930_s24  ;;  %12324 = vrot.lane.b32.xlu0 %v12323_v30, %s12930_s24  ;;  %v10975_v30 = vld [vmem:[%s17374_s25 + $0xb8] sm:$0xff] }
 0x18f   :  { %v1925_v31 = vsel %vm1236_vm3, %v12162_v32, %v12176_v25  ;;  %11317 = vmatprep.subr.bf16.mxu0 %v11316_v0  ;;  %v1926_v55 = vsel %vm1236_vm3, %v12176_v25, %v12177_v13  ;;  %10969 = vmatmul.mubr.msk.f32.gmra.mrb[2].mxu1 %vm370_vm8, %v10961_v16  ;;  %v12230_v20 = vpop.permute.xlu1 %12229  ;;  %v2281_v0 = vsel %vm876_vm2, %v12221_v18, %v12211_v23 }
 0x190   :  { %11319 = vmatpush1.bf16.msra.mxu0 %v11318_v27  ;;  %v12185_v9 = vpop.permute.xlu0 %12184  ;;  %v11324_v54 = vpack.c.bf16 %v1930_v15, %v1926_v55  ;;  %v11326_v11 = vpack.c.bf16 %v1929_v17, %v1925_v31  ;;  %1663 = vmatprep.mubr.f32.mxu0 %v17322_v37  ;;  %v12232_v35 = vunpack.i.h.bf16 %v12230_v20  ;;  %v12231_v29 = vunpack.i.l.bf16 %v12230_v20  ;;  %v3468_v31 = vld [vmem:[%s17296_s6] sm:$0xff] }
 0x191   :  { %v12187_v51 = vunpack.i.h.bf16 %v12185_v9  ;;  %v12186_v45 = vunpack.i.l.bf16 %v12185_v9  ;;  %10967 = vmatmul.mubr.msk.f32.gmra.mrb[6].mxu0 %vm370_vm8, %v10963_v10  ;;  %1746 = vmatprep.mubr.f32.mxu1 %v17322_v37 }
 0x192   :  { %11325 = vmatprep.subr.bf16.mxu1 %v11324_v54  ;;  %2023 = vmatprep.mubr.f32.mxu0 %v17322_v37  ;;  %v2288_v9 = vsel %vm876_vm2, %v12231_v29, %v12232_v35 }
 0x193   :  { %11327 = vmatpush1.bf16.msra.mxu1 %v11326_v11  ;;  %v2274_v43 = vsel %vm876_vm2, %v12186_v45, %v12187_v51  ;;  %3234 = vperm.xlu1 %12334, %v118_v21   ;;  %v2275_v14 = vsel %vm876_vm2, %v12187_v51, %v12201_v7  ;;  %v14222_v27 = vpop.permute.xlu1 %12239 }
 0x194   :  { %v12195_v44 = vpop.permute.xlu0 %12194  ;;  %v11328_v19 = vpack.c.bf16 %v2278_v40, %v2274_v43  ;;  %10970 = vmatmul.mubr.msk.f32.gmra.mrb[4].mxu1 %vm370_vm8, %v10962_v63  ;;  %3229 = vperm.xlu0 %12333, %v117_v8   ;;  %v12242_v55 = vunpack.i.h.bf16 %v14222_v27  ;;  %v12241_v54 = vunpack.i.l.bf16 %v14222_v27 }
 0x195   :  { %v12197_v32 = vunpack.i.h.bf16 %v12195_v44  ;;  %v12196_v28 = vunpack.i.l.bf16 %v12195_v44  ;;  %1752 = vmatprep.mubr.f32.mxu1 %v17322_v37  ;;  %10977 = vmatmul.mubr.msk.f32.vlgmr.msra.gmra.mrb[0].mxu0 %vm370_vm8, %v10972_v42 }
 0x196   :  { %11329 = vmatprep.subr.bf16.mxu0 %v11328_v19  ;;  %2029 = vmatprep.mubr.f32.mxu0 %v17322_v37  ;;  %v2636_v7 = vsel %vm248_vm0, %v12241_v54, %v12242_v55 }
 0x197   :  { %v2277_v24 = vsel %vm876_vm2, %v12197_v32, %v12191_v57  ;;  %v2273_v58 = vsel %vm876_vm2, %v12196_v28, %v12186_v45  ;;  %3239 = vperm.xlu1 %12334, %v119_v39   ;;  %v3469_v32 = vld [vmem:[%s17296_s6 + $0x8] sm:$0xff]  ;;  %v3430_v28 = vld [vmem:[%s17376_s30 + $0x10] sm:$0xff] }
 0x198   :  { %v12205_v49 = vpop.permute.xlu0 %12204  ;;  %v11330_v38 = vpack.c.bf16 %v2277_v24, %v2273_v58  ;;  %10971 = vmatmul.mubr.msk.f32.gmra.mrb[6].mxu1 %vm370_vm8, %v10963_v10  ;;  %3244 = vperm.xlu0 %12333, %v120_v33   ;;  %v3429_v10 = vld [vmem:[%s17376_s30 + $0x8] sm:$0xff]  ;;  %v10987_v39 = vld [vmem:[%s17374_s25 + $0xd0] sm:$0xff] }
 0x199   :  { %v12207_v16 = vunpack.i.h.bf16 %v12205_v49  ;;  %v12206_v41 = vunpack.i.l.bf16 %v12205_v49  ;;  %2112 = vmatprep.mubr.f32.mxu1 %v17322_v37  ;;  %10978 = vmatmul.mubr.msk.f32.gmra.mrb[2].mxu0 %vm370_vm8, %v10973_v62  ;;  %v3431_v49 = vld [vmem:[%s17376_s30 + $0x18] sm:$0xff]  ;;  %s4456_s30 = sld [smem:[#allocation5]] }
 0x19a   :  { %11331 = vmatpush1.bf16.msra.mxu0 %v11330_v38  ;;  %2035 = vmatprep.mubr.f32.mxu0 %v17322_v37  ;;  %v3470_v38 = vld [vmem:[%s17296_s6 + $0x10] sm:$0xff] }
 0x19b   :  { %v2279_v26 = vsel %vm876_vm2, %v12192_v34, %v12206_v41  ;;  %v2280_v1 = vsel %vm876_vm2, %v12206_v41, %v12207_v16  ;;  %3434 = vperm.xlu1 %12334, %v3428_v12   ;;  %v11024_v16 = vld [vmem:[%s17368_s5 + $0x1] ss:$8 sm:$0xf] }
 0x19c   :  { %v12215_v59 = vpop.permute.xlu0 %12214  ;;  %v11336_v56 = vpack.c.bf16 %v2280_v1, %v2276_v53  ;;  %10981 = vmatmul.mubr.msk.f32.vlgmr.msra.gmra.mrb[0].mxu1 %vm370_vm8, %v10972_v42  ;;  %v11338_v60 = vpack.c.bf16 %v2279_v26, %v2275_v14  ;;  %v10985_v42 = vld [vmem:[%s17374_s25 + $0xc0] sm:$0xff]  ;;  %3439 = vperm.xlu0 %12333, %v3429_v10   ;;  %v3553_v23 = vrot.slane %v11024_v16, %v13061_v4  ;;  %v10988_v53 = vld [vmem:[%s17374_s25 + $0xd8] sm:$0xff] }
 0x19d   :  { %v12217_v63 = vunpack.i.h.bf16 %v12215_v59  ;;  %v12216_v22 = vunpack.i.l.bf16 %v12215_v59  ;;  %10979 = vmatmul.mubr.msk.f32.gmra.mrb[4].mxu0 %vm370_vm8, %v10974_v61  ;;  %2118 = vmatprep.mubr.f32.mxu1 %v17322_v37  ;;  %v3561_v18 = vrot.slane %v11024_v16, %v13059_v3  ;;  %v11049_v14 = vld [vmem:[%s17368_s5 + $0x7] ss:$8 sm:$0xf]  ;;  %v3565_v26 = vrot.slane %v11024_v16, %v13063_v5 }
 0x19e   :  { %11337 = vmatprep.subr.bf16.mxu1 %v11336_v56  ;;  %2041 = vmatprep.mubr.f32.mxu0 %v17322_v37  ;;  %v4109_v1 = vrot.slane %v11049_v14, %v13061_v4  ;;  %v4113_v59 = vrot.slane %v11049_v14, %v13065_v6  ;;  %v4117_v56 = vrot.slane %v11049_v14, %v13059_v3 }
 0x19f   :  { %v2285_v46 = vsel %vm876_vm2, %v12222_v48, %v12216_v22  ;;  %11339 = vmatpush1.bf16.msra.mxu1 %v11338_v60  ;;  %v2286_v13 = vsel %vm876_vm2, %v12216_v22, %v12217_v63  ;;  %v2287_v11 = vsel %vm876_vm2, %v12217_v63, %v12231_v29  ;;  %3474 = vperm.xlu1 %12334, %v3468_v31  }
 0x1a0   :  { %v12225_v25 = vpop.permute.xlu0 %12224  ;;  %v11332_v34 = vpack.c.bf16 %v2286_v13, %v2282_v50  ;;  %v11334_v15 = vpack.c.bf16 %v2285_v46, %v2281_v0  ;;  %10982 = vmatmul.mubr.msk.f32.gmra.mrb[2].mxu1 %vm370_vm8, %v10973_v62  ;;  %v10986_v62 = vld [vmem:[%s17374_s25 + $0xc8] sm:$0xff]  ;;  %3479 = vperm.xlu0 %12333, %v3469_v32   ;;  %v4121_v60 = vrot.slane %v11049_v14, %v13063_v5 }
 0x1a1   :  { %v12227_v57 = vunpack.i.h.bf16 %v12225_v25  ;;  %v12226_v17 = vunpack.i.l.bf16 %v12225_v25  ;;  %10980 = vmatmul.mubr.msk.f32.gmra.mrb[6].mxu0 %vm370_vm8, %v10975_v30  ;;  %2124 = vmatprep.mubr.f32.mxu1 %v17322_v37 }
 0x1a2   :  { %11333 = vmatprep.subr.bf16.mxu0 %v11332_v34  ;;  %2381 = vmatprep.mubr.f32.mxu0 %v17322_v37 }
 0x1a3   :  { %v2283_v51 = vsel %vm876_vm2, %v12212_v2, %v12226_v17  ;;  %11335 = vmatpush1.bf16.msra.mxu0 %v11334_v15  ;;  %v2284_v45 = vsel %vm876_vm2, %v12226_v17, %v12227_v57  ;;  %3444 = vperm.xlu1 %12334, %v3430_v28   ;;  %v3471_v2 = vld [vmem:[%s17296_s6 + $0x18] sm:$0xff]  ;;  %v10998_v28 = vld [vmem:[%s17374_s25 + $0xe0] sm:$0xff]  ;;  %s11062_s6 = sld [smem:[#allocation5 + $0x1]] }
 0x1a4   :  { %v14245_v52 = vpop.permute.xlu0 %12234  ;;  %v11340_v43 = vpack.c.bf16 %v2288_v9, %v2284_v45  ;;  %v11342_v40 = vpack.c.bf16 %v2287_v11, %v2283_v51  ;;  %10983 = vmatmul.mubr.msk.f32.gmra.mrb[4].mxu1 %vm370_vm8, %v10974_v61  ;;  %3449 = vperm.xlu0 %12333, %v3431_v49   ;;  %v3557_v61 = vrot.slane %v11024_v16, %v13065_v6  ;;  %v11000_v49 = vld [vmem:[%s17374_s25 + $0xf0] sm:$0xff] }
 0x1a5   :  { %v12237_v44 = vunpack.i.h.bf16 %v14245_v52  ;;  %v12236_v19 = vunpack.i.l.bf16 %v14245_v52  ;;  %2130 = vmatprep.mubr.f32.mxu1 %v17322_v37 }
 0x1a6   :  { %11341 = vmatprep.subr.bf16.mxu1 %v11340_v43  ;;  %10990 = vmatmul.mubr.msk.f32.vlgmr.msra.gmra.mrb[0].mxu0 %vm370_vm8, %v10985_v42 }
 0x1a7   :  { %11343 = vmatpush1.bf16.msra.mxu1 %v11342_v40  ;;  %v2632_v36 = vsel %vm248_vm0, %v12236_v19, %v12237_v44  ;;  %2387 = vmatprep.mubr.f32.mxu0 %v17322_v37 }
 0x1a8   :  { %v12245_v21 = vpop.permute.xlu0 %12244  ;;  %v11344_v24 = vpack.c.bf16 %v2636_v7, %v2632_v36  ;;  %10984 = vmatmul.mubr.msk.f32.gmra.mrb[6].mxu1 %vm370_vm8, %v10975_v30  ;;  %3484 = vperm.xlu1 %12334, %v3470_v38   ;;  %v11001_v38 = vld [vmem:[%s17374_s25 + $0xf8] sm:$0xff] }
 0x1a9   :  { %v12247_v58 = vunpack.i.h.bf16 %v12245_v21  ;;  %v12246_v47 = vunpack.i.l.bf16 %v12245_v21  ;;  %2470 = vmatprep.mubr.f32.mxu1 %v17322_v37  ;;  %3489 = vperm.xlu0 %12333, %v3471_v2  }
 0x1aa   :  { %11345 = vmatprep.subr.bf16.mxu0 %v11344_v24  ;;  %10991 = vmatmul.mubr.msk.f32.gmra.mrb[2].mxu0 %vm370_vm8, %v10986_v62 }
 0x1ab   :  { %v2635_v8 = vsel %vm248_vm0, %v12247_v58, %v12241_v54  ;;  %v2631_v20 = vsel %vm248_vm0, %v12246_v47, %v12236_v19  ;;  %2393 = vmatprep.mubr.f32.mxu0 %v17322_v37  ;;  %v10999_v47 = vld [vmem:[%s17374_s25 + $0xe8] sm:$0xff] }
 0x1ac   :  { %v11346_v41 = vpack.c.bf16 %v2635_v8, %v2631_v20  ;;  %10994 = vmatmul.mubr.msk.f32.vlgmr.msra.gmra.mrb[0].mxu1 %vm370_vm8, %v10985_v42  ;;  %3566 = vrot.lane.b32.xlu1 %v3553_v23, %s12929_s22 }
 0x1ad   :  { %2476 = vmatprep.mubr.f32.mxu1 %v17322_v37  ;;  %3568 = vrot.lane.b32.xlu0 %v3557_v61, %s12929_s22 }
 0x1ae   :  { %11347 = vmatpush1.bf16.msra.mxu0 %v11346_v41 }
 0x1af   :  { %10992 = vmatmul.mubr.msk.f32.gmra.mrb[4].mxu0 %vm370_vm8, %v10987_v39 }
 0x1b0   :  { %10995 = vmatmul.mubr.msk.f32.gmra.mrb[2].mxu1 %vm370_vm8, %v10986_v62  ;;  %2399 = vmatprep.mubr.f32.mxu0 %v17322_v37 }
 0x1b1   :  { %2482 = vmatprep.mubr.f32.mxu1 %v17322_v37  ;;  %3570 = vrot.lane.b32.xlu1 %v3561_v18, %s12929_s22 }
 0x1b2   :  { %3572 = vrot.lane.b32.xlu0 %v3565_v26, %s12929_s22 }
 0x1b3   :  { %10993 = vmatmul.mubr.msk.f32.gmra.mrb[6].mxu0 %vm370_vm8, %v10988_v53 }
 0x1b4   :  { %10996 = vmatmul.mubr.msk.f32.gmra.mrb[4].mxu1 %vm370_vm8, %v10987_v39  ;;  %2739 = vmatprep.mubr.f32.mxu0 %v17322_v37 }
 0x1b5   :  { %2488 = vmatprep.mubr.f32.mxu1 %v17322_v37  ;;  %4122 = vrot.lane.b32.xlu1 %v4109_v1, %s12935_s2 }
 0x1b6   :  { %4124 = vrot.lane.b32.xlu0 %v4113_v59, %s12935_s2 }
 0x1b8   :  { %10997 = vmatmul.mubr.msk.f32.gmra.mrb[6].mxu1 %vm370_vm8, %v10988_v53 }
 0x1b9   :  { %2828 = vmatprep.mubr.f32.mxu1 %v17322_v37  ;;  %4126 = vrot.lane.b32.xlu1 %v4117_v56, %s12935_s2 }
 0x1ba   :  { %4128 = vrot.lane.b32.xlu0 %v4121_v60, %s12935_s2 }
 0x1ce   :  { %v12250_v33 = vpop.permute.xlu1 %12249  ;;  %v12255_v48 = vpop.permute.xlu0 %12254 }
 0x1cf   :  { %v12252_v63 = vunpack.i.h.bf16 %v12250_v33  ;;  %v12251_v22 = vunpack.i.l.bf16 %v12250_v33  ;;  %v12257_v12 = vunpack.i.h.bf16 %v12255_v48  ;;  %v12256_v35 = vunpack.i.l.bf16 %v12255_v48 }
 0x1d1   :  { %v2633_v29 = vsel %vm248_vm0, %v12237_v44, %v12251_v22  ;;  %v2637_v50 = vsel %vm248_vm0, %v12242_v55, %v12256_v35  ;;  %v2634_v30 = vsel %vm248_vm0, %v12251_v22, %v12252_v63  ;;  %v2638_v0 = vsel %vm248_vm0, %v12256_v35, %v12257_v12 }
 0x1d2   :  { %v12260_v46 = vpop.permute.xlu1 %12259  ;;  %v12265_v13 = vpop.permute.xlu0 %12264  ;;  %v11352_v25 = vpack.c.bf16 %v2638_v0, %v2634_v30  ;;  %v11354_v34 = vpack.c.bf16 %v2637_v50, %v2633_v29 }
 0x1d3   :  { %v12262_v15 = vunpack.i.h.bf16 %v12260_v46  ;;  %v12261_v10 = vunpack.i.l.bf16 %v12260_v46  ;;  %v12267_v57 = vunpack.i.h.bf16 %v12265_v13  ;;  %v12266_v17 = vunpack.i.l.bf16 %v12265_v13 }
 0x1d4   :  { %11353 = vmatprep.subr.bf16.mxu1 %v11352_v25 }
 0x1d5   :  { %11355 = vmatpush1.bf16.msra.mxu1 %v11354_v34  ;;  %v2640_v31 = vsel %vm248_vm0, %v12261_v10, %v12262_v15  ;;  %v2644_v27 = vsel %vm248_vm0, %v12266_v17, %v12267_v57 }
 0x1d6   :  { %v12270_v9 = vpop.permute.xlu1 %12269  ;;  %v12275_v55 = vpop.permute.xlu0 %12274  ;;  %v11348_v54 = vpack.c.bf16 %v2644_v27, %v2640_v31 }
 0x1d7   :  { %v12272_v11 = vunpack.i.h.bf16 %v12270_v9  ;;  %v12271_v51 = vunpack.i.l.bf16 %v12270_v9  ;;  %v12277_v52 = vunpack.i.h.bf16 %v12275_v55  ;;  %v12276_v43 = vunpack.i.l.bf16 %v12275_v55 }
 0x1d8   :  { %11349 = vmatprep.subr.bf16.mxu0 %v11348_v54 }
 0x1d9   :  { %v2639_v45 = vsel %vm248_vm0, %v12271_v51, %v12261_v10  ;;  %v2643_v42 = vsel %vm248_vm0, %v12272_v11, %v12266_v17  ;;  %v2641_v36 = vsel %vm248_vm0, %v12262_v15, %v12276_v43  ;;  %v2642_v62 = vsel %vm248_vm0, %v12276_v43, %v12277_v52 }
 0x1da   :  { %v12280_v40 = vpop.permute.xlu1 %12279  ;;  %v11350_v44 = vpack.c.bf16 %v2643_v42, %v2639_v45 }
 0x1db   :  { %v12282_v19 = vunpack.i.h.bf16 %v12280_v40  ;;  %v12281_v32 = vunpack.i.l.bf16 %v12280_v40 }
 0x1dc   :  { %11351 = vmatpush1.bf16.msra.mxu0 %v11350_v44 }
 0x1dd   :  { %v2645_v7 = vsel %vm248_vm0, %v12267_v57, %v12281_v32  ;;  %v2646_v21 = vsel %vm248_vm0, %v12281_v32, %v12282_v19 }
 0x1de   :  { %v11356_v24 = vpack.c.bf16 %v2646_v21, %v2642_v62  ;;  %v11358_v58 = vpack.c.bf16 %v2645_v7, %v2641_v36  ;;  %v11011_v36 = vld [vmem:[%s17374_s25 + $0x100] sm:$0xff] }
 0x1df   :  { %11003 = vmatmul.mubr.msk.f32.vlgmr.msra.gmra.mrb[0].mxu0 %vm370_vm8, %v10998_v28 }
 0x1e0   :  { %11357 = vmatprep.subr.bf16.mxu1 %v11356_v24  ;;  %2745 = vmatprep.mubr.f32.mxu0 %v17322_v37 }
 0x1e1   :  { %11359 = vmatpush1.bf16.msra.mxu1 %v11358_v58  ;;  %v11012_v58 = vld [vmem:[%s17374_s25 + $0x108] sm:$0xff] }
 0x1e3   :  { %11004 = vmatmul.mubr.msk.f32.gmra.mrb[2].mxu0 %vm370_vm8, %v10999_v47 }
 0x1e4   :  { %11007 = vmatmul.mubr.msk.f32.vlgmr.msra.gmra.mrb[0].mxu1 %vm370_vm8, %v10998_v28  ;;  %2751 = vmatprep.mubr.f32.mxu0 %v17322_v37 }
 0x1e5   :  { %2834 = vmatprep.mubr.f32.mxu1 %v17322_v37 }
 0x1e7   :  { %11005 = vmatmul.mubr.msk.f32.gmra.mrb[4].mxu0 %vm370_vm8, %v11000_v49 }
 0x1e8   :  { %11008 = vmatmul.mubr.msk.f32.gmra.mrb[2].mxu1 %vm370_vm8, %v10999_v47  ;;  %2757 = vmatprep.mubr.f32.mxu0 %v17322_v37  ;;  %v11013_v47 = vld [vmem:[%s17374_s25 + $0x110] sm:$0xff] }
 0x1e9   :  { %2840 = vmatprep.mubr.f32.mxu1 %v17322_v37 }
 0x1eb   :  { %11006 = vmatmul.mubr.msk.f32.gmra.mrb[6].mxu0 %vm370_vm8, %v11001_v38 }
 0x1ec   :  { %11009 = vmatmul.mubr.msk.f32.gmra.mrb[4].mxu1 %vm370_vm8, %v11000_v49  ;;  %3097 = vmatprep.mubr.f32.mxu0 %v17322_v37  ;;  %v11014_v49 = vld [vmem:[%s17374_s25 + $0x118] sm:$0xff] }
 0x1ed   :  { %2846 = vmatprep.mubr.f32.mxu1 %v17322_v37 }
 0x1f0   :  { %v12290_v8 = vpop.permute.xlu1 %12289  ;;  %v12285_v20 = vpop.permute.xlu0 %12284  ;;  %11010 = vmatmul.mubr.msk.f32.gmra.mrb[6].mxu1 %vm370_vm8, %v11001_v38 }
 0x1f1   :  { %v12292_v16 = vunpack.i.h.bf16 %v12290_v8  ;;  %v12291_v41 = vunpack.i.l.bf16 %v12290_v8  ;;  %v12287_v39 = vunpack.i.h.bf16 %v12285_v20  ;;  %v12286_v2 = vunpack.i.l.bf16 %v12285_v20  ;;  %3186 = vmatprep.mubr.f32.mxu1 %v17322_v37 }
 0x1f3   :  { %v2990_v23 = vsel %vm187_vm1, %v12286_v2, %v12287_v39  ;;  %v2994_v53 = vsel %vm187_vm1, %v12291_v41, %v12292_v16 }
 0x1f4   :  { %v12300_v61 = vpop.permute.xlu1 %12299  ;;  %v12295_v18 = vpop.permute.xlu0 %12294  ;;  %v11360_v14 = vpack.c.bf16 %v2994_v53, %v2990_v23 }
 0x1f5   :  { %v12297_v26 = vunpack.i.h.bf16 %v12295_v18  ;;  %v12296_v1 = vunpack.i.l.bf16 %v12295_v18  ;;  %v12302_v59 = vunpack.i.h.bf16 %v12300_v61  ;;  %v12301_v56 = vunpack.i.l.bf16 %v12300_v61 }
 0x1f6   :  { %11361 = vmatprep.subr.bf16.mxu0 %v11360_v14 }
 0x1f7   :  { %v2993_v60 = vsel %vm187_vm1, %v12297_v26, %v12291_v41  ;;  %v2989_v33 = vsel %vm187_vm1, %v12296_v1, %v12286_v2  ;;  %v2991_v29 = vsel %vm187_vm1, %v12287_v39, %v12301_v56  ;;  %v2992_v50 = vsel %vm187_vm1, %v12301_v56, %v12302_v59 }
 0x1f8   :  { %v12310_v48 = vpop.permute.xlu1 %12309  ;;  %v12305_v63 = vpop.permute.xlu0 %12304  ;;  %v11362_v22 = vpack.c.bf16 %v2993_v60, %v2989_v33 }
 0x1f9   :  { %v12307_v12 = vunpack.i.h.bf16 %v12305_v63  ;;  %v12306_v35 = vunpack.i.l.bf16 %v12305_v63  ;;  %v12312_v30 = vunpack.i.h.bf16 %v12310_v48  ;;  %v12311_v0 = vunpack.i.l.bf16 %v12310_v48 }
 0x1fa   :  { %11363 = vmatpush1.bf16.msra.mxu0 %v11362_v22 }
 0x1fb   :  { %v2995_v46 = vsel %vm187_vm1, %v12292_v16, %v12306_v35  ;;  %v2996_v13 = vsel %vm187_vm1, %v12306_v35, %v12307_v12  ;;  %v2998_v54 = vsel %vm187_vm1, %v12311_v0, %v12312_v30 }
 0x1fc   :  { %v12320_v25 = vpop.permute.xlu1 %12319  ;;  %v12315_v34 = vpop.permute.xlu0 %12314  ;;  %v11368_v15 = vpack.c.bf16 %v2996_v13, %v2992_v50  ;;  %v11370_v10 = vpack.c.bf16 %v2995_v46, %v2991_v29 }
 0x1fd   :  { %v12322_v57 = vunpack.i.h.bf16 %v12320_v25  ;;  %v12321_v17 = vunpack.i.l.bf16 %v12320_v25  ;;  %v12317_v31 = vunpack.i.h.bf16 %v12315_v34  ;;  %v12316_v27 = vunpack.i.l.bf16 %v12315_v34 }
 0x1fe   :  { %11369 = vmatprep.subr.bf16.mxu1 %v11368_v15 }
 0x1ff   :  { %v2997_v9 = vsel %vm187_vm1, %v12321_v17, %v12311_v0  ;;  %v3001_v55 = vsel %vm187_vm1, %v12322_v57, %v12316_v27  ;;  %11371 = vmatpush1.bf16.msra.mxu1 %v11370_v10  ;;  %v3002_v11 = vsel %vm187_vm1, %v12316_v27, %v12317_v31 }
 0x200   :  { %v12330_v51 = vpop.permute.xlu1 %12329  ;;  %v12325_v45 = vpop.permute.xlu0 %12324  ;;  %v11364_v42 = vpack.c.bf16 %v3002_v11, %v2998_v54  ;;  %v11366_v52 = vpack.c.bf16 %v3001_v55, %v2997_v9 }
 0x201   :  { %v12332_v43 = vunpack.i.h.bf16 %v12330_v51  ;;  %v12331_v40 = vunpack.i.l.bf16 %v12330_v51  ;;  %v12327_v44 = vunpack.i.h.bf16 %v12325_v45  ;;  %v12326_v19 = vunpack.i.l.bf16 %v12325_v45 }
 0x202   :  { %11365 = vmatprep.subr.bf16.mxu0 %v11364_v42 }
 0x203   :  { %v3003_v32 = vsel %vm187_vm1, %v12317_v31, %v12331_v40  ;;  %v2999_v28 = vsel %vm187_vm1, %v12312_v30, %v12326_v19  ;;  %11367 = vmatpush1.bf16.msra.mxu0 %v11366_v52  ;;  %v3000_v7 = vsel %vm187_vm1, %v12326_v19, %v12327_v44  ;;  %v3004_v62 = vsel %vm187_vm1, %v12331_v40, %v12332_v43 }
 0x204   :  { %v11372_v21 = vpack.c.bf16 %v3004_v62, %v3000_v7  ;;  %v11374_v24 = vpack.c.bf16 %v3003_v32, %v2999_v28 }
 0x206   :  { %11016 = vmatmul.mubr.msk.f32.vlgmr.msra.gmra.mrb[0].mxu0 %vm370_vm8, %v11011_v36  ;;  %11373 = vmatprep.subr.bf16.mxu1 %v11372_v21 }
 0x207   :  { %11375 = vmatpush1.bf16.msra.mxu1 %v11374_v24  ;;  %3103 = vmatprep.mubr.f32.mxu0 %v17322_v37 }
 0x20a   :  { %11017 = vmatmul.mubr.msk.f32.gmra.mrb[2].mxu0 %vm370_vm8, %v11012_v58  ;;  %11020 = vmatmul.mubr.msk.f32.vlgmr.msra.gmra.mrb[0].mxu1 %vm370_vm8, %v11011_v36 }
 0x20b   :  { %3109 = vmatprep.mubr.f32.mxu0 %v17322_v37  ;;  %3192 = vmatprep.mubr.f32.mxu1 %v17322_v37 }
 0x20e   :  { %11018 = vmatmul.mubr.msk.f32.gmra.mrb[4].mxu0 %vm370_vm8, %v11013_v47  ;;  %11021 = vmatmul.mubr.msk.f32.gmra.mrb[2].mxu1 %vm370_vm8, %v11012_v58 }
 0x20f   :  { %3115 = vmatprep.mubr.f32.mxu0 %v17322_v37  ;;  %3198 = vmatprep.mubr.f32.mxu1 %v17322_v37 }
 0x212   :  { %11019 = vmatmul.mubr.msk.f32.gmra.mrb[6].mxu0 %vm370_vm8, %v11014_v49  ;;  %11022 = vmatmul.mubr.msk.f32.gmra.mrb[4].mxu1 %vm370_vm8, %v11013_v47  ;;  %v3235_v38 = vpop.permute.xlu1 %3234 }
 0x213   :  { %3204 = vmatprep.mubr.f32.mxu1 %v17322_v37  ;;  %3683 = vmatprep.mubr.f32.mxu0 %v17322_v37  ;;  %v3230_v14 = vpop.permute.xlu0 %3229 }
 0x216   :  { %11023 = vmatmul.mubr.msk.f32.gmra.mrb[6].mxu1 %vm370_vm8, %v11014_v49  ;;  %v3240_v8 = vpop.permute.xlu1 %3239 }
 0x217   :  { %3772 = vmatprep.mubr.f32.mxu1 %v17322_v37  ;;  %v3245_v0 = vpop.permute.xlu0 %3244 }
 0x21a   :  { %v14411_v20 = vpop.permute.xlu1 %3434 }
 0x21e   :  { %v14413_v16 = vpop.permute.xlu1 %3474 }
 0x222   :  { %v14415_v41 = vpop.permute.xlu1 %3444 }
 0x227   :  { %v14417_v39 = vpop.permute.xlu1 %3484 }
 0x22b   :  { %v14419_v2 = vpop.permute.xlu1 %3566 }
 0x22c   :  { %v3582_v23 = vmul.f32 0.0, %v14419_v2 }
 0x22e   :  { %v12340_v53 = vpack.i.bf16 %v3582_v23, %v3582_v23 }
 0x230   :  { %12336 = vrot.lane.b32.xlu1 %v12340_v53, %s12935_s2  ;;  %12341 = vrot.lane.b32.xlu0 %v12340_v53, %s12935_s2 }
 0x2d9   :  { %v3099_v61 = vpop.f32.mrb[0].mxu0 }
 0x2da   :  { %v3101_v18 = vpop.f32.mrb[1].mxu0  ;;  %v14428_v22 = vadd.f32 %v3230_v14, %v3099_v61 }
 0x2db   :  { %v14432_v50 = vadd.f32 %v3230_v14, %v3101_v18 }
 0x2dc   :  { %17379 = vst [vmem:[#allocation15_spill] sm:$0xff] %v14428_v22 }
 0x2dd   :  { %v3105_v26 = vpop.f32.mrb[2].mxu0  ;;  %v3188_v1 = vpop.f32.mrb[0].mxu1  ;;  %17381 = vst [vmem:[#allocation17_spill] sm:$0xff] %v14432_v50 }
 0x2de   :  { %v3107_v59 = vpop.f32.mrb[3].mxu0  ;;  %v3190_v56 = vpop.f32.mrb[1].mxu1  ;;  %v14424_v60 = vadd.f32 %v3235_v38, %v3105_v26  ;;  %v14444_v57 = vadd.f32 %v3230_v14, %v3188_v1 }
 0x2df   :  { %v14426_v33 = vadd.f32 %v3235_v38, %v3107_v59  ;;  %v14451_v54 = vadd.f32 %v3230_v14, %v3190_v56 }
 0x2e0   :  { %17377 = vst [vmem:[#allocation13_spill] sm:$0xff] %v14424_v60  ;;  %v3263_v46 = vadd.f32 %v14424_v60, %v14428_v22  ;;  %17385 = vst [vmem:[#allocation21_spill] sm:$0xff] %v14444_v57 }
 0x2e1   :  { %17378 = vst [vmem:[#allocation14_spill] sm:$0xff] %v14426_v33  ;;  %v3111_v48 = vpop.f32.mrb[4].mxu0  ;;  %v3194_v63 = vpop.f32.mrb[2].mxu1  ;;  %v3272_v25 = vadd.f32 %v14426_v33, %v14432_v50  ;;  %17388 = vst [vmem:[#allocation24_spill] sm:$0xff] %v14451_v54 }
 0x2e2   :  { %v14430_v12 = vadd.f32 %v3240_v8, %v3111_v48  ;;  %v3113_v35 = vpop.f32.mrb[5].mxu0  ;;  %v3196_v29 = vpop.f32.mrb[3].mxu1  ;;  %v14438_v13 = vadd.f32 %v3235_v38, %v3194_v63 }
 0x2e3   :  { %v14434_v30 = vadd.f32 %v3240_v8, %v3113_v35  ;;  %v14442_v34 = vadd.f32 %v3235_v38, %v3196_v29 }
 0x2e4   :  { %17380 = vst [vmem:[#allocation16_spill] sm:$0xff] %v14430_v12  ;;  %17383 = vst [vmem:[#allocation19_spill] sm:$0xff] %v14438_v13  ;;  %v3264_v17 = vadd.f32 %v3263_v46, %v14430_v12  ;;  %v3281_v42 = vadd.f32 %v14438_v13, %v14444_v57 }
 0x2e5   :  { %17382 = vst [vmem:[#allocation18_spill] sm:$0xff] %v14434_v30  ;;  %17384 = vst [vmem:[#allocation20_spill] sm:$0xff] %v14442_v34  ;;  %v3117_v15 = vpop.f32.mrb[6].mxu0  ;;  %v3200_v10 = vpop.f32.mrb[4].mxu1  ;;  %v3273_v11 = vadd.f32 %v3272_v25, %v14434_v30  ;;  %v3290_v43 = vadd.f32 %v14442_v34, %v14451_v54 }
 0x2e6   :  { %v14447_v31 = vadd.f32 %v3245_v0, %v3117_v15  ;;  %v14449_v27 = vadd.f32 %v3240_v8, %v3200_v10  ;;  %v3119_v9 = vpop.f32.mrb[7].mxu0  ;;  %v3202_v55 = vpop.f32.mrb[5].mxu1 }
 0x2e7   :  { %v14454_v51 = vadd.f32 %v3245_v0, %v3119_v9  ;;  %v14456_v45 = vadd.f32 %v3240_v8, %v3202_v55 }
 0x2e8   :  { %17386 = vst [vmem:[#allocation22_spill] sm:$0xff] %v14447_v31  ;;  %17387 = vst [vmem:[#allocation23_spill] sm:$0xff] %v14449_v27  ;;  %v3265_v52 = vadd.f32 %v3264_v17, %v14447_v31  ;;  %v3282_v32 = vadd.f32 %v3281_v42, %v14449_v27 }
 0x2e9   :  { %17389 = vst [vmem:[#allocation25_spill] sm:$0xff] %v14454_v51  ;;  %17390 = vst [vmem:[#allocation26_spill] sm:$0xff] %v14456_v45  ;;  %v3274_v40 = vadd.f32 %v3273_v11, %v14454_v51  ;;  %v3206_v44 = vpop.f32.mrb[6].mxu1  ;;  %v3291_v62 = vadd.f32 %v3290_v43, %v14456_v45 }
 0x2ea   :  { %v3266_v19 = vrot.slane %v3265_v52, 4  ;;  %v14465_v28 = vadd.f32 %v3245_v0, %v3206_v44  ;;  %v3208_v36 = vpop.f32.mrb[7].mxu1 }
 0x2eb   :  { %v3275_v7 = vrot.slane %v3274_v40, 4  ;;  %v14468_v21 = vadd.f32 %v3245_v0, %v3208_v36 }
 0x2ec   :  { %17391 = vst [vmem:[#allocation27_spill] sm:$0xff] %v14465_v28  ;;  %v3267_v24 = vadd.f32 %v3266_v19, %v3265_v52  ;;  %v3283_v58 = vadd.f32 %v3282_v32, %v14465_v28 }
 0x2ed   :  { %17392 = vst [vmem:[#allocation28_spill] sm:$0xff] %v14468_v21  ;;  %v3276_v47 = vadd.f32 %v3275_v7, %v3274_v40  ;;  %v3292_v49 = vadd.f32 %v3291_v62, %v14468_v21 }
 0x2ee   :  { %v3268_v38 = vrot.slane %v3267_v24, 2  ;;  %v3284_v8 = vrot.slane %v3283_v58, 4 }
 0x2ef   :  { %v3277_v23 = vrot.slane %v3276_v47, 2  ;;  %v3293_v53 = vrot.slane %v3292_v49, 4 }
 0x2f0   :  { %v3269_v61 = vadd.f32 %v3268_v38, %v3267_v24  ;;  %v3285_v18 = vadd.f32 %v3284_v8, %v3283_v58 }
 0x2f1   :  { %v3278_v14 = vadd.f32 %v3277_v23, %v3276_v47  ;;  %v3294_v26 = vadd.f32 %v3293_v53, %v3292_v49 }
 0x2f2   :  { %v3270_v1 = vrot.slane %v3269_v61, 1  ;;  %v3286_v59 = vrot.slane %v3285_v18, 2 }
 0x2f3   :  { %v3279_v56 = vrot.slane %v3278_v14, 1  ;;  %v3295_v48 = vrot.slane %v3294_v26, 2 }
 0x2f4   :  { %v3271_v63 = vadd.f32 %v3270_v1, %v3269_v61  ;;  %v3287_v35 = vadd.f32 %v3286_v59, %v3285_v18 }
 0x2f5   :  { %v3280_v29 = vadd.f32 %v3279_v56, %v3278_v14  ;;  %v3296_v0 = vadd.f32 %v3295_v48, %v3294_v26 }
 0x2f6   :  { %v3300_v46 = vmul.f32 0.03125, %v3271_v63  ;;  %v3288_v15 = vrot.slane %v3287_v35, 1 }
 0x2f7   :  { %v3301_v25 = vmul.f32 0.03125, %v3280_v29  ;;  %v3297_v55 = vrot.slane %v3296_v0, 1 }
 0x2f8   :  { %v14473_v10 = vsub.f32 %v14428_v22, %v3300_v46  ;;  %v14476_v17 = vsub.f32 %v14424_v60, %v3300_v46  ;;  %v14479_v9 = vsub.f32 %v14430_v12, %v3300_v46  ;;  %v14491_v43 = vsub.f32 %v14447_v31, %v3300_v46 }
 0x2f9   :  { %v14482_v11 = vsub.f32 %v14432_v50, %v3301_v25  ;;  %v14485_v42 = vsub.f32 %v14426_v33, %v3301_v25  ;;  %v14488_v52 = vsub.f32 %v14434_v30, %v3301_v25  ;;  %v14498_v19 = vsub.f32 %v14454_v51, %v3301_v25 }
 0x2fa   :  { %v3320_v40 = vmul.f32 %v14473_v10, %v14473_v10  ;;  %v3324_v44 = vmul.f32 %v14476_v17, %v14476_v17  ;;  %v3328_v7 = vmul.f32 %v14479_v9, %v14479_v9  ;;  %v3289_v24 = vadd.f32 %v3288_v15, %v3287_v35 }
 0x2fb   :  { %v3321_v32 = vmul.f32 %v14482_v11, %v14482_v11  ;;  %v3325_v36 = vmul.f32 %v14485_v42, %v14485_v42  ;;  %v3298_v58 = vadd.f32 %v3297_v55, %v3296_v0  ;;  %v3329_v47 = vmul.f32 %v14488_v52, %v14488_v52 }
 0x2fc   :  { %v3336_v62 = vadd.f32 %v3324_v44, %v3320_v40  ;;  %v3332_v38 = vmul.f32 %v14491_v43, %v14491_v43  ;;  %v3302_v23 = vmul.f32 0.03125, %v3289_v24  ;;  %v3333_v61 = vmul.f32 %v14498_v19, %v14498_v19 }
 0x2fd   :  { %v3345_v49 = vadd.f32 %v3325_v36, %v3321_v32  ;;  %v3303_v53 = vmul.f32 0.03125, %v3298_v58 }
 0x2fe   :  { %v3337_v8 = vadd.f32 %v3336_v62, %v3328_v7  ;;  %v14513_v26 = vsub.f32 %v14444_v57, %v3302_v23  ;;  %v14516_v1 = vsub.f32 %v14438_v13, %v3302_v23  ;;  %v14519_v59 = vsub.f32 %v14449_v27, %v3302_v23 }
 0x2ff   :  { %v3346_v18 = vadd.f32 %v3345_v49, %v3329_v47  ;;  %v14522_v48 = vsub.f32 %v14465_v28, %v3302_v23  ;;  %v14525_v63 = vsub.f32 %v14451_v54, %v3303_v53  ;;  %v14528_v35 = vsub.f32 %v14442_v34, %v3303_v53 }
 0x300   :  { %v3338_v14 = vadd.f32 %v3337_v8, %v3332_v38  ;;  %v3322_v0 = vmul.f32 %v14513_v26, %v14513_v26  ;;  %v3326_v46 = vmul.f32 %v14516_v1, %v14516_v1  ;;  %v3330_v15 = vmul.f32 %v14519_v59, %v14519_v59 }
 0x301   :  { %v3347_v56 = vadd.f32 %v3346_v18, %v3333_v61  ;;  %v14537_v55 = vsub.f32 %v14456_v45, %v3303_v53  ;;  %v14540_v40 = vsub.f32 %v14468_v21, %v3303_v53  ;;  %v3323_v36 = vmul.f32 %v14525_v63, %v14525_v63 }
 0x302   :  { %v3339_v29 = vrot.slane %v3338_v14, 4  ;;  %v3354_v32 = vadd.f32 %v3326_v46, %v3322_v0  ;;  %v3327_v7 = vmul.f32 %v14528_v35, %v14528_v35  ;;  %v3334_v24 = vmul.f32 %v14522_v48, %v14522_v48 }
 0x303   :  { %v3348_v25 = vrot.slane %v3347_v56, 4  ;;  %v3331_v49 = vmul.f32 %v14537_v55, %v14537_v55  ;;  %v3335_v61 = vmul.f32 %v14540_v40, %v14540_v40  ;;  %v15053_v57 = vstv %s11062_s6 }
 0x304   :  { %v3340_v44 = vadd.f32 %v3339_v29, %v3338_v14  ;;  %v3355_v47 = vadd.f32 %v3354_v32, %v3330_v15  ;;  %v3363_v38 = vadd.f32 %v3327_v7, %v3323_v36 }
 0x305   :  { %v3349_v62 = vadd.f32 %v3348_v25, %v3347_v56 }
 0x306   :  { %v3341_v58 = vrot.slane %v3340_v44, 2  ;;  %v3356_v53 = vadd.f32 %v3355_v47, %v3334_v24  ;;  %v3364_v18 = vadd.f32 %v3363_v38, %v3331_v49 }
 0x307   :  { %v3350_v8 = vrot.slane %v3349_v62, 2 }
 0x308   :  { %v3342_v23 = vadd.f32 %v3341_v58, %v3340_v44  ;;  %v3357_v0 = vrot.slane %v3356_v53, 4  ;;  %v3365_v56 = vadd.f32 %v3364_v18, %v3335_v61 }
 0x309   :  { %v3351_v14 = vadd.f32 %v3350_v8, %v3349_v62 }
 0x30a   :  { %v3343_v29 = vrot.slane %v3342_v23, 1  ;;  %v3358_v37 = vadd.f32 %v3357_v0, %v3356_v53  ;;  %v3366_v51 = vrot.slane %v3365_v56, 4 }
 0x30b   :  { %v3352_v46 = vrot.slane %v3351_v14, 1 }
 0x30c   :  { %v3344_v25 = vadd.f32 %v3343_v29, %v3342_v23  ;;  %v3359_v21 = vrot.slane %v3358_v37, 2  ;;  %v3367_v28 = vadd.f32 %v3366_v51, %v3365_v56 }
 0x30d   :  { %v3353_v15 = vadd.f32 %v3352_v46, %v3351_v14 }
 0x30e   :  { %v3372_v32 = vmul.f32 0.03125, %v3344_v25  ;;  %v3360_v44 = vadd.f32 %v3359_v21, %v3358_v37  ;;  %v3368_v24 = vrot.slane %v3367_v28, 2  ;;  %v14552_v21 = vpop.permute.xlu0 %3439 }
 0x30f   :  { %v3373_v36 = vmul.f32 0.03125, %v3353_v15 }
 0x310   :  { %v3376_v7 = vadd.f32 1e-05, %v3372_v32  ;;  %v3361_v47 = vrot.slane %v3360_v44, 1  ;;  %v3369_v62 = vadd.f32 %v3368_v24, %v3367_v28 }
 0x311   :  { %v3377_v58 = vadd.f32 1e-05, %v3373_v36 }
 0x312   :  { %12835 = vrsqrt.f32 %v3376_v7  ;;  %v3362_v49 = vadd.f32 %v3361_v47, %v3360_v44  ;;  %v3370_v38 = vrot.slane %v3369_v62, 1  ;;  %vm3382_vm9 = vcmp.eq.f32.partialorder %v3376_v7, inf  ;;  %v14554_v32 = vpop.permute.xlu0 %3479 }
 0x313   :  { %12837 = vrsqrt.f32 %v3377_v58  ;;  %v3385_v0 = vand.u32 2147483648, %v3376_v7  ;;  %vm3384_vm10 = vcmp.eq.f32.partialorder %v3376_v7, 0.0  ;;  %vm3389_vm11 = vcmp.eq.f32.partialorder %v3377_v58, inf }
 0x314   :  { %v3374_v8 = vmul.f32 0.03125, %v3362_v49  ;;  %v3371_v61 = vadd.f32 %v3370_v38, %v3369_v62  ;;  %v3392_v28 = vand.u32 2147483648, %v3377_v58  ;;  %vm3391_vm12 = vcmp.eq.f32.partialorder %v3377_v58, 0.0 }
 0x316   :  { %v3378_v23 = vadd.f32 1e-05, %v3374_v8  ;;  %v3375_v53 = vmul.f32 0.03125, %v3371_v61  ;;  %v14556_v38 = vpop.permute.xlu0 %3449 }
 0x318   :  { %12839 = vrsqrt.f32 %v3378_v23  ;;  %v3379_v51 = vadd.f32 1e-05, %v3375_v53  ;;  %vm3396_vm13 = vcmp.eq.f32.partialorder %v3378_v23, inf  ;;  %v3399_v24 = vand.u32 2147483648, %v3378_v23 }
 0x319   :  { %vm3398_vm14 = vcmp.eq.f32.partialorder %v3378_v23, 0.0 }
 0x31a   :  { %12841 = vrsqrt.f32 %v3379_v51  ;;  %vm3403_vm15 = vcmp.eq.f32.partialorder %v3379_v51, inf }
 0x31c   :  { %v12836_v18 = vpop.eup %12835 }
 0x31d   :  { %v12838_v14 = vpop.eup %12837  ;;  %v3381_v29 = vmul.f32 %v12836_v18, %v3376_v7 }
 0x31e   :  { %v3388_v37 = vmul.f32 %v12838_v14, %v3377_v58 }
 0x31f   :  { %v3383_v56 = vsel %vm3382_vm9, %v3376_v7, %v3381_v29  ;;  %vm3405_vm9 = vcmp.eq.f32.partialorder %v3379_v51, 0.0 }
 0x320   :  { %v3386_v46 = vsel %vm3384_vm10, %v3385_v0, %v3383_v56  ;;  %v3390_v25 = vsel %vm3389_vm11, %v3377_v58, %v3388_v37  ;;  %vm4804_vm10 = vcmask 1031168   ;;  %vm5132_vm11 = vcmask 64512  }
 0x321   :  { %12843 = vrcp.f32 %v3386_v46  ;;  %v3393_v15 = vsel %vm3391_vm12, %v3392_v28, %v3390_v25  ;;  %vm7188_vm12 = vcmask 15360  }
 0x322   :  { %12845 = vrcp.f32 %v3393_v15  ;;  %v12840_v36 = vpop.eup %12839 }
 0x323   :  { %v3395_v44 = vmul.f32 %v12840_v36, %v3378_v23 }
 0x324   :  { %v12842_v62 = vpop.eup %12841 }
 0x325   :  { %v3397_v47 = vsel %vm3396_vm13, %v3378_v23, %v3395_v44  ;;  %v3402_v23 = vmul.f32 %v12842_v62, %v3379_v51 }
 0x326   :  { %v3400_v49 = vsel %vm3398_vm14, %v3399_v24, %v3397_v47 }
 0x327   :  { %12847 = vrcp.f32 %v3400_v49  ;;  %v3404_v44 = vsel %vm3403_vm15, %v3379_v51, %v3402_v23 }
 0x32b   :  { %v12844_v7 = vpop.eup %12843 }
 0x32c   :  { %v12846_v8 = vpop.eup %12845  ;;  %v3409_v58 = vmul.f32 %v12844_v7, %v14473_v10  ;;  %v3416_v61 = vmul.f32 %v12844_v7, %v14476_v17  ;;  %v3420_v53 = vmul.f32 %v12844_v7, %v14479_v9  ;;  %v3424_v18 = vmul.f32 %v12844_v7, %v14491_v43  ;;  %v14568_v10 = vpop.permute.xlu1 %3570 }
 0x32d   :  { %v3411_v14 = vmul.f32 %v12846_v8, %v14482_v11  ;;  %v3417_v29 = vmul.f32 %v12846_v8, %v14485_v42  ;;  %v3421_v56 = vmul.f32 %v12846_v8, %v14488_v52  ;;  %v3425_v28 = vmul.f32 %v12846_v8, %v14498_v19  ;;  %v14574_v42 = vpop.permute.xlu0 %3489 }
 0x32e   :  { %v3452_v0 = vmul.f32 %v14411_v20, %v3409_v58  ;;  %v3456_v37 = vmul.f32 %v14552_v21, %v3416_v61  ;;  %v3460_v17 = vmul.f32 %v14415_v41, %v3420_v53  ;;  %v3464_v9 = vmul.f32 %v14556_v38, %v3424_v18 }
 0x32f   :  { %v3453_v43 = vmul.f32 %v14411_v20, %v3411_v14  ;;  %v3457_v11 = vmul.f32 %v14552_v21, %v3417_v29  ;;  %v3406_v19 = vand.u32 2147483648, %v3379_v51  ;;  %v3461_v15 = vmul.f32 %v14415_v41, %v3421_v56 }
 0x330   :  { %v14583_v25 = vadd.f32 %v14413_v16, %v3452_v0  ;;  %v3465_v36 = vmul.f32 %v14556_v38, %v3425_v28  ;;  %v14588_v24 = vadd.f32 %v14554_v32, %v3456_v37  ;;  %v14591_v47 = vadd.f32 %v14417_v39, %v3460_v17  ;;  %v14596_v7 = vpop.permute.xlu1 %4122 }
 0x331   :  { %v14577_v46 = vadd.f32 %v14413_v16, %v3453_v43  ;;  %v14580_v52 = vadd.f32 %v14554_v32, %v3457_v11  ;;  %v14594_v62 = vadd.f32 %v14574_v42, %v3464_v9  ;;  %v3407_v49 = vsel %vm3405_vm9, %v3406_v19, %v3404_v44  ;;  %v12848_v8 = vpop.eup %12847  ;;  %v3569_v58 = vpop.permute.xlu0 %3568 }
 0x332   :  { %12849 = vrcp.f32 %v3407_v49  ;;  %v14601_v51 = vadd.f32 %v14417_v39, %v3461_v15  ;;  %v14604_v53 = vadd.f32 %v14574_v42, %v3465_v36  ;;  %v4148_v18 = vmul.f32 %v14596_v7, %v14591_v47 }
 0x333   :  { %v11376_v61 = vpack.c.bf16 %v14580_v52, %v14577_v46  ;;  %v4153_v14 = vmul.f32 %v14596_v7, %v14594_v62  ;;  %v4138_v29 = vmul.f32 %v14596_v7, %v14583_v25  ;;  %v4143_v23 = vmul.f32 %v14596_v7, %v14588_v24 }
 0x334   :  { %v3413_v0 = vmul.f32 %v12848_v8, %v14513_v26  ;;  %v3418_v37 = vmul.f32 %v12848_v8, %v14516_v1  ;;  %v14618_v56 = vsel %vm248_vm0, %v14419_v2, %v3569_v58  ;;  %v14622_v28 = vsel %vm248_vm0, %v3569_v58, %v14568_v10 }
 0x335   :  { %11377 = vmatprep.subr.bf16.mxu0 %v11376_v61  ;;  %v3588_v17 = vmul.f32 %v14618_v56, %v14588_v24  ;;  %v3589_v9 = vmul.f32 %v14622_v28, %v14580_v52  ;;  %v12350_v43 = vpack.i.bf16 %v4153_v14, %v4148_v18  ;;  %v12345_v11 = vpack.i.bf16 %v4143_v23, %v4138_v29 }
 0x336   :  { %v3583_v26 = vmul.f32 %v14618_v56, %v14583_v25  ;;  %v3584_v1 = vmul.f32 %v14622_v28, %v14577_v46  ;;  %v11378_v2 = vpack.c.bf16 %v14588_v24, %v14583_v25  ;;  %v11380_v19 = vpack.c.bf16 %v14604_v53, %v14601_v51 }
 0x337   :  { %12351 = vrot.lane.b32.xlu0 %v12350_v43, %s12929_s22  ;;  %12346 = vrot.lane.b32.xlu1 %v12345_v11, %s12929_s22  ;;  %v3454_v15 = vmul.f32 %v14411_v20, %v3413_v0  ;;  %v3458_v36 = vmul.f32 %v14552_v21, %v3418_v37  ;;  %v12360_v44 = vpack.i.bf16 %v3589_v9, %v3588_v17  ;;  %v3573_v43 = vpop.permute.xlu0 %3572 }
 0x338   :  { %11379 = vmatpush1.bf16.msra.mxu0 %v11378_v2  ;;  %v3422_v58 = vmul.f32 %v12848_v8, %v14519_v59  ;;  %v3426_v61 = vmul.f32 %v12848_v8, %v14522_v48  ;;  %v11382_v18 = vpack.c.bf16 %v14594_v62, %v14591_v47  ;;  %v12355_v14 = vpack.i.bf16 %v3584_v1, %v3583_v26  ;;  %v11025_v48 = vld [vmem:[%s17297_s7 + $0x20] sm:$0xff] }
 0x339   :  { %11381 = vmatprep.subr.bf16.mxu0 %v11380_v19  ;;  %v14650_v17 = vadd.f32 %v14413_v16, %v3454_v15  ;;  %v14653_v59 = vadd.f32 %v14554_v32, %v3458_v36  ;;  %v3576_v8 = vsel %vm248_vm0, %v14568_v10, %v3573_v43  ;;  %v17393_v2 = vmov 0.0  }
 0x33a   :  { %v3462_v9 = vmul.f32 %v14415_v41, %v3422_v58  ;;  %v3466_v11 = vmul.f32 %v14556_v38, %v3426_v61  ;;  %v3594_v58 = vmul.f32 %v14622_v28, %v14601_v51 }
 0x33b   :  { %12361 = vrot.lane.b32.xlu0 %v12360_v44, %s12935_s2  ;;  %12356 = vrot.lane.b32.xlu1 %v12355_v14, %s12935_s2  ;;  %v3585_v10 = vmul.f32 %v3576_v8, %v14650_v17  ;;  %v11386_v44 = vpack.c.bf16 %v14653_v59, %v14650_v17  ;;  %v4125_v61 = vpop.permute.xlu0 %4124  ;;  %v3598_v14 = vmul.f32 %v14618_v56, %v14594_v62 }
 0x33c   :  { %v12850_v49 = vpop.eup %12849  ;;  %11383 = vmatpush1.bf16.msra.mxu0 %v11382_v18  ;;  %v14691_v15 = vadd.f32 %v14417_v39, %v3462_v9  ;;  %v14694_v36 = vadd.f32 %v14574_v42, %v3466_v11 }
 0x33d   :  { %v3415_v29 = vmul.f32 %v12850_v49, %v14525_v63  ;;  %v3419_v23 = vmul.f32 %v12850_v49, %v14528_v35  ;;  %v3423_v0 = vmul.f32 %v12850_v49, %v14537_v55  ;;  %v3427_v37 = vmul.f32 %v12850_v49, %v14540_v40 }
 0x33e   :  { %v3593_v49 = vmul.f32 %v14618_v56, %v14591_v47  ;;  %v3600_v56 = vmul.f32 %v3576_v8, %v14694_v36  ;;  %v3595_v9 = vmul.f32 %v3576_v8, %v14691_v15 }
 0x33f   :  { %v3455_v63 = vmul.f32 %v14411_v20, %v3415_v29  ;;  %v3459_v35 = vmul.f32 %v14552_v21, %v3419_v23  ;;  %v3463_v55 = vmul.f32 %v14415_v41, %v3423_v0  ;;  %v3467_v40 = vmul.f32 %v14556_v38, %v3427_v37  ;;  %11029 = vmatmul.mubr.msk.f32.vlgmr.msra.gmra.mrb[8].mxu0 %vm370_vm8, %v11025_v48  ;;  %v4127_v0 = vpop.permute.xlu1 %4126 }
 0x340   :  { %3689 = vmatprep.mubr.f32.mxu0 %v17393_v2  ;;  %v3590_v41 = vmul.f32 %v3576_v8, %v14653_v59  ;;  %v3599_v29 = vmul.f32 %v14622_v28, %v14604_v53  ;;  %v11390_v37 = vpack.c.bf16 %v14694_v36, %v14691_v15 }
 0x341   :  { %v14668_v26 = vadd.f32 %v14413_v16, %v3455_v63  ;;  %v14671_v1 = vadd.f32 %v14554_v32, %v3459_v35  ;;  %v14675_v20 = vadd.f32 %v14417_v39, %v3463_v55  ;;  %v14678_v21 = vadd.f32 %v14574_v42, %v3467_v40  ;;  %v11026_v16 = vld [vmem:[%s17297_s7 + $0x28] sm:$0xff]  ;;  %v11027_v42 = vld [vmem:[%s17297_s7 + $0x30] sm:$0xff]  ;;  %v11028_v35 = vld [vmem:[%s17297_s7 + $0x38] sm:$0xff] }
 0x342   :  { %v12375_v63 = vpack.i.bf16 %v3594_v58, %v3593_v49  ;;  %v4131_v55 = vsel %vm337_vm4, %v4125_v61, %v4127_v0  ;;  %v12380_v40 = vpack.i.bf16 %v3599_v29, %v3598_v14 }
 0x343   :  { %v11384_v32 = vpack.c.bf16 %v14671_v1, %v14668_v26  ;;  %v3586_v38 = vmul.f32 %v3573_v43, %v14668_v26  ;;  %v3591_v19 = vmul.f32 %v3573_v43, %v14671_v1  ;;  %11030 = vmatmul.mubr.msk.f32.gmra.mrb[10].mxu0 %vm370_vm8, %v11026_v16  ;;  %v11388_v39 = vpack.c.bf16 %v14678_v21, %v14675_v20 }
 0x344   :  { %3695 = vmatprep.mubr.f32.mxu0 %v17393_v2  ;;  %v3601_v28 = vmul.f32 %v3573_v43, %v14678_v21  ;;  %v3596_v11 = vmul.f32 %v3573_v43, %v14675_v20  ;;  %v4140_v8 = vmul.f32 %v4131_v55, %v14650_v17  ;;  %v4155_v29 = vmul.f32 %v4131_v55, %v14694_v36 }
 0x345   :  { %11385 = vmatprep.subr.bf16.mxu1 %v11384_v32  ;;  %v12365_v18 = vpack.i.bf16 %v3586_v38, %v3585_v10  ;;  %v12370_v23 = vpack.i.bf16 %v3591_v19, %v3590_v41  ;;  %v4129_v10 = vpop.permute.xlu0 %4128  ;;  %v4130_v41 = vsel %vm337_vm4, %v14596_v7, %v4125_v61  ;;  %v4145_v32 = vmul.f32 %v4131_v55, %v14653_v59 }
 0x346   :  { %11387 = vmatpush1.bf16.msra.mxu1 %v11386_v44  ;;  %v12390_v38 = vpack.i.bf16 %v3601_v28, %v3600_v56  ;;  %v4132_v43 = vsel %vm337_vm4, %v4127_v0, %v4129_v10  ;;  %v12385_v19 = vpack.i.bf16 %v3596_v11, %v3595_v9  ;;  %v4144_v7 = vmul.f32 %v4130_v41, %v14580_v52  ;;  %v11061_v28 = vld [vmem:[%s17368_s5 + $0x5] ss:$8 sm:$0xf] }
 0x347   :  { %11389 = vmatprep.subr.bf16.mxu1 %v11388_v39  ;;  %12366 = vrot.lane.b32.xlu0 %v12365_v18, %s12935_s2  ;;  %v4139_v44 = vmul.f32 %v4130_v41, %v14577_v46  ;;  %v4141_v49 = vmul.f32 %v4132_v43, %v14668_v26  ;;  %v4146_v61 = vmul.f32 %v4132_v43, %v14671_v1 }
 0x348   :  { %12371 = vrot.lane.b32.xlu1 %v12370_v23, %s12935_s2  ;;  %11031 = vmatmul.mubr.msk.f32.gmra.mrb[12].mxu0 %vm370_vm8, %v11027_v42  ;;  %v12400_v58 = vpack.i.bf16 %v4145_v32, %v4144_v7  ;;  %v4150_v18 = vmul.f32 %v4131_v55, %v14691_v15  ;;  %v4154_v0 = vmul.f32 %v4130_v41, %v14604_v53 }
 0x349   :  { %3701 = vmatprep.mubr.f32.mxu0 %v17393_v2  ;;  %v12395_v39 = vpack.i.bf16 %v4140_v8, %v4139_v44  ;;  %v4678_v9 = vrot.slane %v11061_v28, %v13065_v6  ;;  %v4686_v11 = vrot.slane %v11061_v28, %v13063_v5 }
 0x34a   :  { %11391 = vmatpush1.bf16.msra.mxu1 %v11390_v37  ;;  %v4156_v37 = vmul.f32 %v4132_v43, %v14678_v21  ;;  %v12420_v56 = vpack.i.bf16 %v4155_v29, %v4154_v0 }
 0x34b   :  { %12376 = vrot.lane.b32.xlu0 %v12375_v63, %s12935_s2 }
 0x34c   :  { %12381 = vrot.lane.b32.xlu1 %v12380_v40, %s12935_s2  ;;  %11032 = vmatmul.mubr.msk.f32.gmra.mrb[14].mxu0 %vm370_vm8, %v11028_v35 }
 0x34d   :  { %11033 = vmatmul.mubr.msk.f32.vlgmr.msra.gmra.mrb[8].mxu1 %vm370_vm8, %v11025_v48  ;;  %3965 = vmatprep.mubr.f32.mxu0 %v17393_v2  ;;  %v4142_v48 = vmul.f32 0.0, %v4129_v10  ;;  %v4682_v10 = vrot.slane %v11061_v28, %v13059_v3 }
 0x34e   :  { %3778 = vmatprep.mubr.f32.mxu1 %v17393_v2 }
 0x34f   :  { %12391 = vrot.lane.b32.xlu0 %v12390_v38, %s12935_s2  ;;  %v12405_v14 = vpack.i.bf16 %v4142_v48, %v4141_v49  ;;  %v12410_v23 = vpack.i.bf16 %v4142_v48, %v4146_v61  ;;  %v12430_v55 = vpack.i.bf16 %v4142_v48, %v4156_v37  ;;  %v12342_v61 = vpop.permute.xlu0 %12341 }
 0x350   :  { %12386 = vrot.lane.b32.xlu1 %v12385_v19, %s12935_s2  ;;  %v14784_v19 = vstv %s11059_s3 }
 0x351   :  { %11034 = vmatmul.mubr.msk.f32.gmra.mrb[10].mxu1 %vm370_vm8, %v11026_v16  ;;  %v4149_v16 = vmul.f32 %v4130_v41, %v14601_v51  ;;  %v11058_v41 = vld [vmem:[%s17368_s5 + $0x3] ss:$8 sm:$0xf]  ;;  %v4553_v7 = vmul.f32 %v14784_v19, %v14577_v46  ;;  %v4552_v44 = vmul.f32 %v14784_v19, %v14583_v25  ;;  %v4554_v49 = vmul.f32 %v14784_v19, %v14650_v17 }
 0x352   :  { %3784 = vmatprep.mubr.f32.mxu1 %v17393_v2  ;;  %v4484_v32 = vrot.slane %v11058_v41, %v13065_v6  ;;  %v4480_v38 = vrot.slane %v11058_v41, %v13061_v4  ;;  %v4492_v8 = vrot.slane %v11058_v41, %v13063_v5 }
 0x353   :  { %12401 = vrot.lane.b32.xlu0 %v12400_v58, %s12929_s22  ;;  %v12415_v63 = vpack.i.bf16 %v4150_v18, %v4149_v16  ;;  %v12337_v58 = vpop.permute.xlu1 %12336 }
 0x354   :  { %12396 = vrot.lane.b32.xlu1 %v12395_v39, %s12929_s22  ;;  %v12339_v29 = vunpack.i.h.bf16 %v12337_v58  ;;  %v12338_v37 = vunpack.i.l.bf16 %v12337_v58 }
 0x355   :  { %11035 = vmatmul.mubr.msk.f32.gmra.mrb[12].mxu1 %vm370_vm8, %v11027_v42  ;;  %v4151_v42 = vmul.f32 %v4132_v43, %v14675_v20  ;;  %v4488_v43 = vrot.slane %v11058_v41, %v13059_v3 }
 0x356   :  { %3790 = vmatprep.mubr.f32.mxu1 %v17393_v2 }
 0x357   :  { %12406 = vrot.lane.b32.xlu0 %v12405_v14, %s12929_s22  ;;  %v12425_v40 = vpack.i.bf16 %v4142_v48, %v4151_v42  ;;  %v4555_v48 = vmul.f32 %v14784_v19, %v14668_v26 }
 0x358   :  { %12411 = vrot.lane.b32.xlu1 %v12410_v23, %s12929_s22 }
 0x359   :  { %11036 = vmatmul.mubr.msk.f32.gmra.mrb[14].mxu1 %vm370_vm8, %v11028_v35  ;;  %v4674_v35 = vrot.slane %v11061_v28, %v13061_v4 }
 0x35a   :  { %4054 = vmatprep.mubr.f32.mxu1 %v17393_v2 }
 0x35b   :  { %12416 = vrot.lane.b32.xlu0 %v12415_v63, %s12929_s22 }
 0x35c   :  { %12421 = vrot.lane.b32.xlu1 %v12420_v56, %s12929_s22 }
 0x35f   :  { %12431 = vrot.lane.b32.xlu0 %v12430_v55, %s12929_s22 }
 0x360   :  { %12426 = vrot.lane.b32.xlu1 %v12425_v40, %s12929_s22 }
 0x363   :  { %4689 = vrot.lane.b32.xlu0 %v4678_v9, %s12933_s9 }
 0x364   :  { %4687 = vrot.lane.b32.xlu1 %v4674_v35, %s12933_s9 }
 0x367   :  { %4693 = vrot.lane.b32.xlu0 %v4686_v11, %s12933_s9 }
 0x368   :  { %4691 = vrot.lane.b32.xlu1 %v4682_v10, %s12933_s9 }
 0x36b   :  { %4495 = vrot.lane.b32.xlu0 %v4484_v32, %s12932_s28 }
 0x36c   :  { %4493 = vrot.lane.b32.xlu1 %v4480_v38, %s12932_s28 }
 0x36f   :  { %4499 = vrot.lane.b32.xlu0 %v4492_v8, %s12932_s28 }
 0x370   :  { %4497 = vrot.lane.b32.xlu1 %v4488_v43, %s12932_s28 }
 0x373   :  { %4586 = vrot.lane.b32.xlu0 %v4553_v7, %s12932_s28 }
 0x374   :  { %4584 = vrot.lane.b32.xlu1 %v4552_v44, %s12932_s28  ;;  %v12343_v44 = vunpack.i.l.bf16 %v12342_v61 }
 0x378   :  { %4588 = vrot.lane.b32.xlu1 %v4554_v49, %s12932_s28 }
 0x37c   :  { %4590 = vrot.lane.b32.xlu1 %v4555_v48, %s12932_s28 }
 0x3a9   :  { %v14800_v39 = vpop.permute.xlu0 %12351  ;;  %v14802_v18 = vpop.permute.xlu1 %12346 }
 0x3ad   :  { %v12362_v14 = vpop.permute.xlu0 %12361  ;;  %v12357_v0 = vpop.permute.xlu1 %12356 }
 0x3ae   :  { %v12364_v23 = vunpack.i.h.bf16 %v12362_v14  ;;  %v12363_v16 = vunpack.i.l.bf16 %v12362_v14  ;;  %v12359_v63 = vunpack.i.h.bf16 %v12357_v0  ;;  %v12358_v42 = vunpack.i.l.bf16 %v12357_v0 }
 0x3b0   :  { %v3861_v56 = vsel %vm337_vm4, %v12339_v29, %v12363_v16  ;;  %v3862_v28 = vsel %vm337_vm4, %v12363_v16, %v12364_v23  ;;  %v3857_v55 = vsel %vm337_vm4, %v12338_v37, %v12358_v42  ;;  %v3858_v40 = vsel %vm337_vm4, %v12358_v42, %v12359_v63 }
 0x3b1   :  { %v11392_v9 = vpack.c.bf16 %v3862_v28, %v3858_v40  ;;  %v11394_v35 = vpack.c.bf16 %v3861_v56, %v3857_v55  ;;  %v12344_v42 = vunpack.i.h.bf16 %v12342_v61 }
 0x3b3   :  { %11393 = vmatprep.subr.bf16.mxu0 %v11392_v9 }
 0x3b4   :  { %11395 = vmatpush1.bf16.msra.mxu0 %v11394_v35 }
 0x3b9   :  { %v12367_v11 = vpop.permute.xlu0 %12366 }
 0x3ba   :  { %v12369_v10 = vunpack.i.h.bf16 %v12367_v11  ;;  %v12368_v41 = vunpack.i.l.bf16 %v12367_v11  ;;  %v12372_v32 = vpop.permute.xlu1 %12371 }
 0x3bb   :  { %v12374_v38 = vunpack.i.h.bf16 %v12372_v32  ;;  %v12373_v8 = vunpack.i.l.bf16 %v12372_v32 }
 0x3bc   :  { %v3859_v43 = vsel %vm337_vm4, %v12359_v63, %v12368_v41  ;;  %v3860_v7 = vsel %vm337_vm4, %v12368_v41, %v12369_v10 }
 0x3bd   :  { %v3863_v49 = vsel %vm337_vm4, %v12364_v23, %v12373_v8  ;;  %v12377_v48 = vpop.permute.xlu0 %12376  ;;  %v3864_v58 = vsel %vm337_vm4, %v12373_v8, %v12374_v38 }
 0x3be   :  { %v12379_v14 = vunpack.i.h.bf16 %v12377_v48  ;;  %v12378_v29 = vunpack.i.l.bf16 %v12377_v48  ;;  %v12382_v16 = vpop.permute.xlu1 %12381  ;;  %v11400_v0 = vpack.c.bf16 %v3864_v58, %v3860_v7  ;;  %v11402_v37 = vpack.c.bf16 %v3863_v49, %v3859_v43  ;;  %v3524_v58 = vld [vmem:[%s17297_s7] sm:$0xff] }
 0x3bf   :  { %v12384_v56 = vunpack.i.h.bf16 %v12382_v16  ;;  %v12383_v28 = vunpack.i.l.bf16 %v12382_v16  ;;  %v12349_v7 = vunpack.i.h.bf16 %v14802_v18 }
 0x3c0   :  { %v3865_v55 = vsel %vm337_vm4, %v12343_v44, %v12378_v29  ;;  %11401 = vmatprep.subr.bf16.mxu1 %v11400_v0  ;;  %v3866_v63 = vsel %vm337_vm4, %v12378_v29, %v12379_v14 }
 0x3c1   :  { %v3869_v40 = vsel %vm337_vm4, %v12344_v42, %v12383_v28  ;;  %11403 = vmatpush1.bf16.msra.mxu1 %v11402_v37  ;;  %v12392_v23 = vpop.permute.xlu0 %12391  ;;  %v3870_v9 = vsel %vm337_vm4, %v12383_v28, %v12384_v56 }
 0x3c2   :  { %v12394_v35 = vunpack.i.h.bf16 %v12392_v23  ;;  %v12393_v11 = vunpack.i.l.bf16 %v12392_v23  ;;  %v12387_v10 = vpop.permute.xlu1 %12386  ;;  %v11396_v41 = vpack.c.bf16 %v3870_v9, %v3866_v63  ;;  %v11398_v32 = vpack.c.bf16 %v3869_v40, %v3865_v55 }
 0x3c3   :  { %v12389_v38 = vunpack.i.h.bf16 %v12387_v10  ;;  %v12388_v61 = vunpack.i.l.bf16 %v12387_v10 }
 0x3c4   :  { %v3871_v8 = vsel %vm337_vm4, %v12384_v56, %v12393_v11  ;;  %11397 = vmatprep.subr.bf16.mxu0 %v11396_v41  ;;  %v3872_v43 = vsel %vm337_vm4, %v12393_v11, %v12394_v35  ;;  %v12348_v56 = vunpack.i.l.bf16 %v14802_v18 }
 0x3c5   :  { %v3867_v44 = vsel %vm337_vm4, %v12379_v14, %v12388_v61  ;;  %11399 = vmatpush1.bf16.msra.mxu0 %v11398_v32  ;;  %v12402_v49 = vpop.permute.xlu0 %12401  ;;  %v3868_v48 = vsel %vm337_vm4, %v12388_v61, %v12389_v38  ;;  %v3525_v61 = vld [vmem:[%s17297_s7 + $0x8] sm:$0xff] }
 0x3c6   :  { %v12404_v29 = vunpack.i.h.bf16 %v12402_v49  ;;  %v12403_v16 = vunpack.i.l.bf16 %v12402_v49  ;;  %v12397_v0 = vpop.permute.xlu1 %12396  ;;  %v11404_v37 = vpack.c.bf16 %v3872_v43, %v3868_v48  ;;  %v11406_v42 = vpack.c.bf16 %v3871_v8, %v3867_v44 }
 0x3c7   :  { %v12399_v28 = vunpack.i.h.bf16 %v12397_v0  ;;  %v12398_v55 = vunpack.i.l.bf16 %v12397_v0 }
 0x3c8   :  { %v4222_v63 = vsel %vm248_vm0, %v12349_v7, %v12403_v16  ;;  %11405 = vmatprep.subr.bf16.mxu1 %v11404_v37  ;;  %11037 = vmatmul.mubr.msk.f32.vlgmr.msra.gmra.mrb[8].mxu0 %vm370_vm8, %v3524_v58  ;;  %v4223_v14 = vsel %vm248_vm0, %v12403_v16, %v12404_v29  ;;  %v12353_v7 = vunpack.i.l.bf16 %v14800_v39 }
 0x3c9   :  { %v4218_v40 = vsel %vm248_vm0, %v12348_v56, %v12398_v55  ;;  %11407 = vmatpush1.bf16.msra.mxu1 %v11406_v42  ;;  %v12407_v23 = vpop.permute.xlu0 %12406  ;;  %v4219_v9 = vsel %vm248_vm0, %v12398_v55, %v12399_v28  ;;  %3971 = vmatprep.mubr.f32.mxu0 %v17393_v2  ;;  %v12354_v56 = vunpack.i.h.bf16 %v14800_v39 }
 0x3ca   :  { %v12409_v35 = vunpack.i.h.bf16 %v12407_v23  ;;  %v12408_v11 = vunpack.i.l.bf16 %v12407_v23  ;;  %v12412_v18 = vpop.permute.xlu1 %12411  ;;  %v11408_v10 = vpack.c.bf16 %v4223_v14, %v4219_v9  ;;  %v11410_v41 = vpack.c.bf16 %v4222_v63, %v4218_v40 }
 0x3cb   :  { %v12414_v32 = vunpack.i.h.bf16 %v12412_v18  ;;  %v12413_v38 = vunpack.i.l.bf16 %v12412_v18 }
 0x3cc   :  { %v4220_v8 = vsel %vm248_vm0, %v12399_v28, %v12408_v11  ;;  %11041 = vmatmul.mubr.msk.f32.vlgmr.msra.gmra.mrb[8].mxu1 %vm370_vm8, %v3524_v58  ;;  %11409 = vmatprep.subr.bf16.mxu0 %v11408_v10  ;;  %v4221_v43 = vsel %vm248_vm0, %v12408_v11, %v12409_v35 }
 0x3cd   :  { %v4224_v44 = vsel %vm248_vm0, %v12404_v29, %v12413_v38  ;;  %11411 = vmatpush1.bf16.msra.mxu0 %v11410_v41  ;;  %v12417_v49 = vpop.permute.xlu0 %12416  ;;  %4060 = vmatprep.mubr.f32.mxu1 %v17393_v2  ;;  %v4225_v48 = vsel %vm248_vm0, %v12413_v38, %v12414_v32  ;;  %v3526_v29 = vld [vmem:[%s17297_s7 + $0x10] sm:$0xff]  ;;  %v3527_v38 = vld [vmem:[%s17297_s7 + $0x18] sm:$0xff] }
 0x3ce   :  { %v12419_v16 = vunpack.i.h.bf16 %v12417_v49  ;;  %v12418_v0 = vunpack.i.l.bf16 %v12417_v49  ;;  %v12422_v37 = vpop.permute.xlu1 %12421  ;;  %11038 = vmatmul.mubr.msk.f32.gmra.mrb[10].mxu0 %vm370_vm8, %v3525_v61  ;;  %v11416_v42 = vpack.c.bf16 %v4225_v48, %v4221_v43  ;;  %v11418_v58 = vpack.c.bf16 %v4224_v44, %v4220_v8 }
 0x3cf   :  { %v12424_v28 = vunpack.i.h.bf16 %v12422_v37  ;;  %v12423_v55 = vunpack.i.l.bf16 %v12422_v37  ;;  %3977 = vmatprep.mubr.f32.mxu0 %v17393_v2  ;;  %v14870_v37 = vstv %s14842_s29  ;;  %s17400_s29 = smov 17  }
 0x3d0   :  { %v4226_v63 = vsel %vm248_vm0, %v12353_v7, %v12418_v0  ;;  %11042 = vmatmul.mubr.msk.f32.gmra.mrb[10].mxu1 %vm370_vm8, %v3525_v61  ;;  %11417 = vmatprep.subr.bf16.mxu1 %v11416_v42  ;;  %v4227_v14 = vsel %vm248_vm0, %v12418_v0, %v12419_v16 }
 0x3d1   :  { %v4230_v40 = vsel %vm248_vm0, %v12354_v56, %v12423_v55  ;;  %11419 = vmatpush1.bf16.msra.mxu1 %v11418_v58  ;;  %v12432_v23 = vpop.permute.xlu0 %12431  ;;  %4066 = vmatprep.mubr.f32.mxu1 %v17393_v2  ;;  %v4231_v39 = vsel %vm248_vm0, %v12423_v55, %v12424_v28  ;;  %v11045_v58 = vld [vmem:[%s17297_s7 + $0x40] sm:$0xff] }
 0x3d2   :  { %v12434_v9 = vunpack.i.h.bf16 %v12432_v23  ;;  %v12433_v35 = vunpack.i.l.bf16 %v12432_v23  ;;  %v12427_v11 = vpop.permute.xlu1 %12426  ;;  %11039 = vmatmul.mubr.msk.f32.gmra.mrb[12].mxu0 %vm370_vm8, %v3526_v29  ;;  %v11412_v18 = vpack.c.bf16 %v4231_v39, %v4227_v14  ;;  %v11414_v10 = vpack.c.bf16 %v4230_v40, %v4226_v63 }
 0x3d3   :  { %v12429_v41 = vunpack.i.h.bf16 %v12427_v11  ;;  %v12428_v32 = vunpack.i.l.bf16 %v12427_v11  ;;  %3983 = vmatprep.mubr.f32.mxu0 %v17393_v2 }
 0x3d4   :  { %v4232_v61 = vsel %vm248_vm0, %v12424_v28, %v12433_v35  ;;  %11043 = vmatmul.mubr.msk.f32.gmra.mrb[12].mxu1 %vm370_vm8, %v3526_v29  ;;  %11413 = vmatprep.subr.bf16.mxu0 %v11412_v18  ;;  %v4233_v8 = vsel %vm248_vm0, %v12433_v35, %v12434_v9  ;;  %v11046_v18 = vld [vmem:[%s17297_s7 + $0x48] sm:$0xff] }
 0x3d5   :  { %v4228_v43 = vsel %vm248_vm0, %v12419_v16, %v12428_v32  ;;  %11415 = vmatpush1.bf16.msra.mxu0 %v11414_v10  ;;  %v4690_v7 = vpop.permute.xlu0 %4689  ;;  %4072 = vmatprep.mubr.f32.mxu1 %v17393_v2  ;;  %v4229_v44 = vsel %vm248_vm0, %v12428_v32, %v12429_v41 }
 0x3d6   :  { %v14866_v49 = vpop.permute.xlu1 %4687  ;;  %11040 = vmatmul.mubr.msk.f32.gmra.mrb[14].mxu0 %vm370_vm8, %v3527_v38  ;;  %v11420_v48 = vpack.c.bf16 %v4233_v8, %v4229_v44  ;;  %v11422_v0 = vpack.c.bf16 %v4232_v61, %v4228_v43 }
 0x3d7   :  { %v14874_v42 = vsel %vm1325_vm5, %v14866_v49, %v4690_v7  ;;  %v4703_v16 = vmul.f32 %v14866_v49, %v14583_v25  ;;  %4326 = vmatprep.mubr.f32.mxu0 %v17393_v2 }
 0x3d8   :  { %11044 = vmatmul.mubr.msk.f32.gmra.mrb[14].mxu1 %vm370_vm8, %v3527_v38  ;;  %11421 = vmatprep.subr.bf16.mxu1 %v11420_v48  ;;  %v4704_v56 = vmul.f32 %v14874_v42, %v14577_v46  ;;  %v4709_v28 = vmul.f32 %v14874_v42, %v14580_v52  ;;  %v4714_v55 = vmul.f32 %v14874_v42, %v14601_v51 }
 0x3d9   :  { %11423 = vmatpush1.bf16.msra.mxu1 %v11422_v0  ;;  %v4694_v29 = vpop.permute.xlu0 %4693  ;;  %v4724_v63 = vmul.f32 %v14870_v37, %v4703_v16  ;;  %4415 = vmatprep.mubr.f32.mxu1 %v17393_v2  ;;  %v11047_v0 = vld [vmem:[%s17297_s7 + $0x50] sm:$0xff] }
 0x3da   :  { %v4707_v14 = vmul.f32 0.0, %v4694_v29  ;;  %v4692_v40 = vpop.permute.xlu1 %4691  ;;  %v4725_v23 = vmul.f32 %v14870_v37, %v4704_v56  ;;  %11050 = vmatmul.mubr.msk.f32.vlgmr.msra.gmra.mrb[8].mxu0 %vm370_vm8, %v11045_v58  ;;  %v14894_v39 = vmul.f32 %v14870_v37, %v4709_v28  ;;  %v14897_v9 = vmul.f32 %v14870_v37, %v4714_v55  ;;  %v11064_v16 = vld [vmem:[%s17368_s5 + $0x1] ss:$8 sm:$0xf] }
 0x3db   :  { %v4696_v35 = vsel %vm1325_vm5, %v4690_v7, %v4692_v40  ;;  %v4697_v11 = vsel %vm1325_vm5, %v4692_v40, %v4694_v29  ;;  %4764 = vrot.lane.b32.xlu0 %v4724_v63, %s12939_s1  ;;  %4332 = vmatprep.mubr.f32.mxu0 %v17393_v2  ;;  %v5075_v29 = vrot.slane %v11064_v16, %v13061_v4 }
 0x3dc   :  { %v4705_v10 = vmul.f32 %v4696_v35, %v14650_v17  ;;  %v4710_v41 = vmul.f32 %v4696_v35, %v14653_v59  ;;  %4766 = vrot.lane.b32.xlu1 %v4725_v23, %s12939_s1  ;;  %v14910_v32 = vmul.f32 %v14870_v37, %v4707_v14  ;;  %11054 = vmatmul.mubr.msk.f32.vlgmr.msra.gmra.mrb[8].mxu1 %vm370_vm8, %v11045_v58  ;;  %v11048_v23 = vld [vmem:[%s17297_s7 + $0x58] sm:$0xff]  ;;  %s17399_s7 = smov 15  }
 0x3dd   :  { %v4496_v38 = vpop.permute.xlu0 %4495  ;;  %v4706_v61 = vmul.f32 %v4697_v11, %v14668_v26  ;;  %v4711_v8 = vmul.f32 %v4697_v11, %v14671_v1  ;;  %4421 = vmatprep.mubr.f32.mxu1 %v17393_v2  ;;  %v4715_v44 = vmul.f32 %v4696_v35, %v14691_v15  ;;  %v4716_v48 = vmul.f32 %v4697_v11, %v14675_v20 }
 0x3de   :  { %v14917_v43 = vpop.permute.xlu1 %4493  ;;  %v4726_v7 = vmul.f32 %v14870_v37, %v4705_v10  ;;  %11051 = vmatmul.mubr.msk.f32.gmra.mrb[10].mxu0 %vm370_vm8, %v11046_v18  ;;  %v14932_v58 = vmul.f32 %v14870_v37, %v4710_v41  ;;  %v5087_v30 = vrot.slane %v11064_v16, %v13063_v5 }
 0x3df   :  { %4338 = vmatprep.mubr.f32.mxu0 %v17393_v2  ;;  %v4727_v55 = vmul.f32 %v14870_v37, %v4706_v61  ;;  %v14945_v63 = vmul.f32 %v14870_v37, %v4711_v8  ;;  %v4501_v14 = vsel %vm1236_vm3, %v14917_v43, %v4496_v38  ;;  %v14958_v10 = vmul.f32 %v14870_v37, %v4716_v48 }
 0x3e0   :  { %4768 = vrot.lane.b32.xlu0 %v4726_v7, %s12939_s1  ;;  %11055 = vmatmul.mubr.msk.f32.gmra.mrb[10].mxu1 %vm370_vm8, %v11046_v18  ;;  %v14955_v18 = vmul.f32 %v14870_v37, %v4715_v44  ;;  %v4719_v61 = vmul.f32 %v14874_v42, %v14604_v53  ;;  %v4720_v8 = vmul.f32 %v4696_v35, %v14694_v36  ;;  %v14972_v44 = vstv %s14915_s27 }
 0x3e1   :  { %v14936_v56 = vpop.permute.xlu0 %4499  ;;  %4772 = vrot.lane.b32.xlu1 %v14910_v32, %s12939_s1  ;;  %4427 = vmatprep.mubr.f32.mxu1 %v17393_v2  ;;  %v4721_v7 = vmul.f32 %v4697_v11, %v14678_v21  ;;  %v4515_v48 = vmul.f32 %v4501_v14, %v14588_v24  ;;  %v5083_v11 = vrot.slane %v11064_v16, %v13059_v3 }
 0x3e2   :  { %v4498_v28 = vpop.permute.xlu1 %4497  ;;  %11052 = vmatmul.mubr.msk.f32.gmra.mrb[12].mxu0 %vm370_vm8, %v11047_v0  ;;  %v14990_v45 = vmul.f32 %v14870_v37, %v4719_v61  ;;  %v15000_v12 = vmul.f32 %v14870_v37, %v4720_v8 }
 0x3e3   :  { %v4502_v40 = vsel %vm1236_vm3, %v4496_v38, %v4498_v28  ;;  %4344 = vmatprep.mubr.f32.mxu0 %v17393_v2  ;;  %v14962_v41 = vsel %vm1236_vm3, %v4498_v28, %v14936_v56  ;;  %v5079_v38 = vrot.slane %v11064_v16, %v13065_v6 }
 0x3e4   :  { %4770 = vrot.lane.b32.xlu0 %v4727_v55, %s12939_s1  ;;  %11056 = vmatmul.mubr.msk.f32.gmra.mrb[12].mxu1 %vm370_vm8, %v11047_v0  ;;  %v4516_v28 = vmul.f32 %v4502_v40, %v14580_v52  ;;  %v4520_v55 = vmul.f32 %v4501_v14, %v14591_v47  ;;  %v4517_v42 = vmul.f32 %v14962_v41, %v14653_v59 }
 0x3e5   :  { %4433 = vmatprep.mubr.f32.mxu1 %v17393_v2  ;;  %v4521_v35 = vmul.f32 %v4502_v40, %v14601_v51  ;;  %5088 = vrot.lane.b32.xlu1 %v5075_v29, %s12929_s22  ;;  %v4525_v0 = vmul.f32 %v4501_v14, %v14594_v62  ;;  %v4522_v31 = vmul.f32 %v14962_v41, %v14691_v15  ;;  %v14997_v29 = vld [vmem:[%s17368_s5] ss:$8 sm:$0xf]  ;;  %v4587_v60 = vpop.permute.xlu0 %4586 }
 0x3e6   :  { %11053 = vmatmul.mubr.msk.f32.gmra.mrb[14].mxu0 %vm370_vm8, %v11048_v23  ;;  %v4526_v27 = vmul.f32 %v4502_v40, %v14604_v53  ;;  %v4527_v16 = vmul.f32 %v14962_v41, %v14694_v36  ;;  %v15013_v61 = vmul.f32 %v14972_v44, %v4516_v28  ;;  %v5034_v8 = vrot.slane %v14997_v29, %v13061_v4 }
 0x3e7   :  { %5200 = vmatprep.mubr.f32.mxu0 %v17393_v2  ;;  %v15019_v34 = vmul.f32 %v14972_v44, %v4517_v42  ;;  %v15025_v33 = vmul.f32 %v14972_v44, %v4521_v35  ;;  %v15031_v28 = vmul.f32 %v14972_v44, %v4522_v31  ;;  %v4509_v35 = vmul.f32 0.0, %v14917_v43 }
 0x3e8   :  { %5090 = vrot.lane.b32.xlu0 %v5079_v38, %s12929_s22  ;;  %11057 = vmatmul.mubr.msk.f32.gmra.mrb[14].mxu1 %vm370_vm8, %v11048_v23  ;;  %v15004_v38 = vmul.f32 %v14870_v37, %v4721_v7  ;;  %v15010_v23 = vmul.f32 %v14972_v44, %v4515_v48  ;;  %v15022_v7 = vmul.f32 %v14972_v44, %v4520_v55 }
 0x3e9   :  { %5271 = vmatprep.mubr.f32.mxu1 %v17393_v2  ;;  %5092 = vrot.lane.b32.xlu1 %v5083_v11, %s12929_s22  ;;  %17394 = vst [vmem:[#allocation29_spill] sm:$0xff] %v15025_v33  ;;  %v5038_v48 = vrot.slane %v14997_v29, %v13065_v6  ;;  %17395 = vst [vmem:[#allocation30_spill] sm:$0xff] %v15031_v28  ;;  %v15034_v11 = vmul.f32 %v14972_v44, %v4525_v0 }
 0x3ea   :  { %v15037_v42 = vmul.f32 %v14972_v44, %v4526_v27  ;;  %v15040_v55 = vmul.f32 %v14972_v44, %v4527_v16  ;;  %v4510_v31 = vmul.f32 %v4501_v14, %v14583_v25  ;;  %v15047_v0 = vmul.f32 %v14972_v44, %v4509_v35 }
 0x3eb   :  { %17396 = vst [vmem:[#allocation31_spill] sm:$0xff] %v15034_v11  ;;  %v4511_v16 = vmul.f32 %v4502_v40, %v14577_v46  ;;  %v4512_v40 = vmul.f32 %v14962_v41, %v14650_v17 }
 0x3ec   :  { %5094 = vrot.lane.b32.xlu0 %v5087_v30, %s12929_s22  ;;  %17397 = vst [vmem:[#allocation32_spill] sm:$0xff] %v15037_v42  ;;  %17398 = vst [vmem:[#allocation33_spill] sm:$0xff] %v15040_v55  ;;  %v4585_v30 = vpop.permute.xlu1 %4584  ;;  %v4513_v55 = vmul.f32 %v14936_v56, %v14668_v26 }
 0x3ed   :  { %5047 = vrot.lane.b32.xlu1 %v5034_v8, %s12930_s24  ;;  %v4616_v54 = vsel %vm1236_vm3, %v4585_v30, %v4587_v60  ;;  %v4531_v8 = vmul.f32 %v14972_v44, %v4510_v31  ;;  %v4532_v31 = vmul.f32 %v14972_v44, %v4511_v16 }
 0x3ee   :  { %v4534_v33 = vmul.f32 %v14972_v44, %v4513_v55  ;;  %v5046_v55 = vrot.slane %v14997_v29, %v13063_v5 }
 0x3ef   :  { %v4649_v50 = vadd.f32 %v4616_v54, %v4531_v8 }
 0x3f0   :  { %5049 = vrot.lane.b32.xlu0 %v5038_v48, %s12930_s24  ;;  %v4589_v13 = vpop.permute.xlu1 %4588  ;;  %v4648_v48 = vadd.f32 %v4585_v30, %v15047_v0 }
 0x3f1   :  { %v4617_v35 = vsel %vm1236_vm3, %v4587_v60, %v4589_v13 }
 0x3f2   :  { %v4650_v28 = vadd.f32 %v4617_v35, %v4532_v31 }
 0x3f4   :  { %v4591_v27 = vpop.permute.xlu1 %4590 }
 0x3f5   :  { %v4618_v60 = vsel %vm1236_vm3, %v4589_v13, %v4591_v27 }
 0x44d   :  { %v4765_v43 = vpop.permute.xlu0 %4764 }
 0x44e   :  { %v4841_v22 = vadd.f32 %v4765_v43, %v4648_v48  ;;  %v4767_v14 = vpop.permute.xlu1 %4766 }
 0x44f   :  { %v4805_v42 = vsel %vm4804_vm10, %v4765_v43, %v4767_v14  ;;  %v4533_v43 = vmul.f32 %v14972_v44, %v4512_v40 }
 0x450   :  { %v4863_v30 = vadd.f32 %v15053_v57, %v4841_v22  ;;  %v4842_v11 = vadd.f32 %v4805_v42, %v4649_v50  ;;  %v4652_v50 = vadd.f32 %v4591_v27, %v4534_v33  ;;  %v5042_v33 = vrot.slane %v14997_v29, %v13059_v3  ;;  %v11070_v27 = vld [vmem:[%s17368_s5 + $0x2] ss:$8 sm:$0xf] }
 0x451   :  { %v4651_v22 = vadd.f32 %v4618_v60, %v4533_v43  ;;  %v5453_v40 = vrot.slane %v11070_v27, %v13061_v4  ;;  %v5465_v29 = vrot.slane %v11070_v27, %v13063_v5  ;;  %v11074_v60 = vld [vmem:[%s17368_s5 + $0x3] ss:$8 sm:$0xf] }
 0x452   :  { %v4864_v54 = vadd.f32 %v15053_v57, %v4842_v11  ;;  %v4769_v8 = vpop.permute.xlu0 %4768  ;;  %4903 = vrot.lane.b32.xlu0 %v4863_v30, %s12933_s9  ;;  %v5670_v43 = vrot.slane %v11074_v60, %v13065_v6 }
 0x453   :  { %v4806_v48 = vsel %vm4804_vm10, %v4767_v14, %v4769_v8  ;;  %v4773_v16 = vpop.permute.xlu1 %4772 }
 0x454   :  { %v4843_v41 = vadd.f32 %v4806_v48, %v4650_v28  ;;  %4905 = vrot.lane.b32.xlu1 %v4864_v54, %s12933_s9  ;;  %v5457_v54 = vrot.slane %v11070_v27, %v13065_v6  ;;  %v5666_v48 = vrot.slane %v11074_v60, %v13061_v4 }
 0x456   :  { %v4865_v42 = vadd.f32 %v15053_v57, %v4843_v41  ;;  %v4771_v11 = vpop.permute.xlu0 %4770  ;;  %v5674_v41 = vrot.slane %v11074_v60, %v13059_v3 }
 0x457   :  { %v4807_v35 = vsel %vm4804_vm10, %v4769_v8, %v4771_v11  ;;  %v4808_v31 = vsel %vm4804_vm10, %v4771_v11, %v4773_v16  ;;  %v5461_v8 = vrot.slane %v11070_v27, %v13059_v3  ;;  %v5678_v16 = vrot.slane %v11074_v60, %v13063_v5 }
 0x458   :  { %v4844_v13 = vadd.f32 %v4807_v35, %v4651_v22  ;;  %v4845_v30 = vadd.f32 %v4808_v31, %v4652_v50  ;;  %4907 = vrot.lane.b32.xlu0 %v4865_v42, %s12933_s9  ;;  %v11081_v22 = vld [vmem:[%s17368_s5 + $0x5] ss:$8 sm:$0xf]  ;;  %v11085_v31 = vld [vmem:[%s17368_s5 + $0x6] ss:$8 sm:$0xf] }
 0x459   :  { %v6035_v50 = vrot.slane %v11081_v22, %v13061_v4  ;;  %v6039_v42 = vrot.slane %v11081_v22, %v13065_v6  ;;  %v6043_v11 = vrot.slane %v11081_v22, %v13059_v3  ;;  %v6047_v35 = vrot.slane %v11081_v22, %v13063_v5 }
 0x45a   :  { %v4866_v14 = vadd.f32 %v15053_v57, %v4844_v13  ;;  %v4867_v28 = vadd.f32 %v15053_v57, %v4845_v30  ;;  %v6248_v13 = vrot.slane %v11085_v31, %v13061_v4  ;;  %v6252_v30 = vrot.slane %v11085_v31, %v13065_v6 }
 0x45c   :  { %4909 = vrot.lane.b32.xlu1 %v4866_v14, %s12933_s9  ;;  %4911 = vrot.lane.b32.xlu0 %v4867_v28, %s12933_s9  ;;  %v6256_v14 = vrot.slane %v11085_v31, %v13059_v3  ;;  %v6260_v28 = vrot.slane %v11085_v31, %v13063_v5 }
 0x460   :  { %5051 = vrot.lane.b32.xlu1 %v5042_v33, %s12930_s24  ;;  %5053 = vrot.lane.b32.xlu0 %v5046_v55, %s12930_s24  ;;  %v11089_v33 = vld [vmem:[%s17368_s5 + $0x7] ss:$8 sm:$0xf] }
 0x461   :  { %v6461_v55 = vrot.slane %v11089_v33, %v13061_v4  ;;  %v6465_v27 = vrot.slane %v11089_v33, %v13065_v6 }
 0x464   :  { %5466 = vrot.lane.b32.xlu1 %v5453_v40, %s12931_s26  ;;  %5468 = vrot.lane.b32.xlu0 %v5457_v54, %s12931_s26  ;;  %v6469_v40 = vrot.slane %v11089_v33, %v13059_v3  ;;  %v6473_v54 = vrot.slane %v11089_v33, %v13063_v5 }
 0x468   :  { %5470 = vrot.lane.b32.xlu1 %v5461_v8, %s12931_s26  ;;  %5472 = vrot.lane.b32.xlu0 %v5465_v29, %s12931_s26  ;;  %v5089_v8 = vpop.permute.xlu1 %5088  ;;  %v11093_v29 = vld [vmem:[%s17368_s5 + $0x20] ss:$8 sm:$0xf] }
 0x469   :  { %v5104_v60 = vmul.f32 0.0, %v5089_v8 }
 0x46c   :  { %5679 = vrot.lane.b32.xlu1 %v5666_v48, %s12932_s28  ;;  %5681 = vrot.lane.b32.xlu0 %v5670_v43, %s12932_s28  ;;  %v6674_v48 = vrot.slane %v11093_v29, %v13061_v4  ;;  %v6682_v43 = vrot.slane %v11093_v29, %v13059_v3 }
 0x470   :  { %5683 = vrot.lane.b32.xlu1 %v5674_v41, %s12932_s28  ;;  %5685 = vrot.lane.b32.xlu0 %v5678_v16, %s12932_s28  ;;  %v6678_v41 = vrot.slane %v11093_v29, %v13065_v6  ;;  %v6686_v16 = vrot.slane %v11093_v29, %v13063_v5 }
 0x474   :  { %6048 = vrot.lane.b32.xlu1 %v6035_v50, %s12933_s9  ;;  %6050 = vrot.lane.b32.xlu0 %v6039_v42, %s12933_s9 }
 0x478   :  { %6052 = vrot.lane.b32.xlu1 %v6043_v11, %s12933_s9  ;;  %6054 = vrot.lane.b32.xlu0 %v6047_v35, %s12933_s9  ;;  %v4457_v11 = vstv %s4456_s30  ;;  %s17421_s30 = sld [smem:[#allocation48_spill]] }
 0x47c   :  { %6261 = vrot.lane.b32.xlu1 %v6248_v13, %s17399_s7  ;;  %6263 = vrot.lane.b32.xlu0 %v6252_v30, %s17399_s7 }
 0x480   :  { %6265 = vrot.lane.b32.xlu1 %v6256_v14, %s17399_s7  ;;  %6267 = vrot.lane.b32.xlu0 %v6260_v28, %s17399_s7 }
 0x484   :  { %6474 = vrot.lane.b32.xlu1 %v6461_v55, %s12935_s2  ;;  %6476 = vrot.lane.b32.xlu0 %v6465_v27, %s12935_s2 }
 0x488   :  { %6478 = vrot.lane.b32.xlu1 %v6469_v40, %s12935_s2  ;;  %6480 = vrot.lane.b32.xlu0 %v6473_v54, %s12935_s2  ;;  %v15157_v40 = vpop.permute.xlu0 %5090 }
 0x48c   :  { %6687 = vrot.lane.b32.xlu0 %v6674_v48, %s17400_s29  ;;  %5114 = vrot.lane.b32.xlu1 %v5104_v60, %s12935_s2  ;;  %v5095_v3 = vpop.permute.xlu0 %5094 }
 0x490   :  { %6691 = vrot.lane.b32.xlu0 %v6682_v43, %s17400_s29  ;;  %6689 = vrot.lane.b32.xlu1 %v6678_v41, %s17400_s29  ;;  %v5093_v41 = vpop.permute.xlu1 %5092 }
 0x494   :  { %6693 = vrot.lane.b32.xlu1 %v6686_v16, %s17400_s29 }
 0x4ad   :  { %v4328_v22 = vpop.f32.mrb[8].mxu0 }
 0x4ae   :  { %v4330_v50 = vpop.f32.mrb[9].mxu0 }
 0x4af   :  { %v4417_v42 = vpop.f32.mrb[8].mxu1 }
 0x4b0   :  { %v4419_v35 = vpop.f32.mrb[9].mxu1 }
 0x4b1   :  { %v4334_v31 = vpop.f32.mrb[10].mxu0 }
 0x4b2   :  { %v15151_v13 = vadd.f32 %v4457_v11, %v4334_v31  ;;  %v4336_v30 = vpop.f32.mrb[11].mxu0 }
 0x4b3   :  { %v15153_v14 = vadd.f32 %v4457_v11, %v4336_v30  ;;  %v4423_v28 = vpop.f32.mrb[10].mxu1 }
 0x4b4   :  { %17401 = vst [vmem:[#allocation34_spill] sm:$0xff] %v15151_v13  ;;  %v15155_v33 = vadd.f32 %v4457_v11, %v4423_v28  ;;  %v4425_v55 = vpop.f32.mrb[11].mxu1 }
 0x4b5   :  { %17402 = vst [vmem:[#allocation35_spill] sm:$0xff] %v15153_v14  ;;  %v4340_v27 = vpop.f32.mrb[12].mxu0  ;;  %v15159_v54 = vadd.f32 %v4457_v11, %v4425_v55 }
 0x4b6   :  { %17403 = vst [vmem:[#allocation36_spill] sm:$0xff] %v15155_v33  ;;  %v15161_v29 = vadd.f32 %v4457_v11, %v4340_v27  ;;  %v4342_v60 = vpop.f32.mrb[13].mxu0 }
 0x4b7   :  { %17404 = vst [vmem:[#allocation37_spill] sm:$0xff] %v15159_v54  ;;  %v15163_v48 = vadd.f32 %v4457_v11, %v4342_v60  ;;  %v4429_v43 = vpop.f32.mrb[12].mxu1 }
 0x4b8   :  { %17405 = vst [vmem:[#allocation38_spill] sm:$0xff] %v15161_v29  ;;  %v15165_v16 = vadd.f32 %v4457_v11, %v4429_v43  ;;  %v4431_v31 = vpop.f32.mrb[13].mxu1  ;;  %v5050_v29 = vpop.permute.xlu0 %5049  ;;  %v4458_v43 = vadd.f32 %v4457_v11, %v4328_v22 }
 0x4b9   :  { %17406 = vst [vmem:[#allocation39_spill] sm:$0xff] %v15163_v48  ;;  %v4346_v30 = vpop.f32.mrb[14].mxu0  ;;  %v15167_v5 = vadd.f32 %v4457_v11, %v4431_v31  ;;  %v5048_v48 = vpop.permute.xlu1 %5047 }
 0x4ba   :  { %17407 = vst [vmem:[#allocation40_spill] sm:$0xff] %v15165_v16  ;;  %v15169_v28 = vadd.f32 %v4457_v11, %v4346_v30  ;;  %v4348_v4 = vpop.f32.mrb[15].mxu0 }
 0x4bb   :  { %17408 = vst [vmem:[#allocation41_spill] sm:$0xff] %v15167_v5  ;;  %v15171_v6 = vadd.f32 %v4457_v11, %v4348_v4  ;;  %v4435_v55 = vpop.f32.mrb[14].mxu1  ;;  %v5096_v4 = vsel %vm248_vm0, %v5089_v8, %v15157_v40 }
 0x4bc   :  { %17409 = vst [vmem:[#allocation42_spill] sm:$0xff] %v15169_v28  ;;  %v15173_v27 = vadd.f32 %v4457_v11, %v4435_v55  ;;  %v4437_v54 = vpop.f32.mrb[15].mxu1 }
 0x4bd   :  { %17410 = vst [vmem:[#allocation43_spill] sm:$0xff] %v15171_v6  ;;  %v15175_v60 = vadd.f32 %v4457_v11, %v4437_v54  ;;  %v4461_v54 = vadd.f32 %v4457_v11, %v4419_v35 }
 0x4be   :  { %17411 = vst [vmem:[#allocation44_spill] sm:$0xff] %v15173_v27  ;;  %v4460_v27 = vadd.f32 %v4457_v11, %v4417_v42  ;;  %v5098_v42 = vsel %vm248_vm0, %v5093_v41, %v5095_v3 }
 0x4bf   :  { %17412 = vst [vmem:[#allocation45_spill] sm:$0xff] %v15175_v60 }
 0x4c4   :  { %v4904_v16 = vpop.permute.xlu0 %4903 }
 0x4c6   :  { %v4906_v33 = vpop.permute.xlu1 %4905 }
 0x4c7   :  { %v4943_v31 = vsel %vm1325_vm5, %v4904_v16, %v4906_v33 }
 0x4c8   :  { %v4975_v5 = vmul.f32 %v4943_v31, %v4458_v43 }
 0x4ca   :  { %v15179_v30 = vadd.f32 %v4975_v5, %v14583_v25  ;;  %v4908_v28 = vpop.permute.xlu0 %4907  ;;  %v4459_v25 = vadd.f32 %v4457_v11, %v4330_v50 }
 0x4cb   :  { %v4944_v5 = vsel %vm1325_vm5, %v4906_v33, %v4908_v28 }
 0x4cc   :  { %v5105_v55 = vmul.f32 %v5096_v4, %v15179_v30  ;;  %v4976_v14 = vmul.f32 %v4944_v5, %v4459_v25 }
 0x4ce   :  { %v4912_v60 = vpop.permute.xlu0 %4911  ;;  %v4910_v6 = vpop.permute.xlu1 %4909  ;;  %5116 = vrot.lane.b32.xlu1 %v5105_v55, %s12935_s2  ;;  %v15202_v50 = vadd.f32 %v4976_v14, %v14577_v46 }
 0x4cf   :  { %v4945_v22 = vsel %vm1325_vm5, %v4908_v28, %v4910_v6  ;;  %v4946_v16 = vsel %vm1325_vm5, %v4910_v6, %v4912_v60 }
 0x4d0   :  { %v4977_v43 = vmul.f32 %v4945_v22, %v4460_v27  ;;  %v4978_v31 = vmul.f32 %v4946_v16, %v4461_v54  ;;  %v5097_v16 = vsel %vm248_vm0, %v15157_v40, %v5093_v41 }
 0x4d1   :  { %v5106_v46 = vmul.f32 %v5097_v16, %v15202_v50 }
 0x4d2   :  { %v15189_v13 = vadd.f32 %v4977_v43, %v14650_v17  ;;  %v5054_v8 = vpop.permute.xlu0 %5053  ;;  %v5052_v4 = vpop.permute.xlu1 %5051  ;;  %v15194_v55 = vadd.f32 %v4978_v31, %v14668_v26  ;;  %v5055_v17 = vsel %vm187_vm1, %v5048_v48, %v5050_v29 }
 0x4d3   :  { %v5057_v35 = vsel %vm187_vm1, %v5052_v4, %v5054_v8  ;;  %v5064_v26 = vmul.f32 %v5055_v17, %v15179_v30  ;;  %v5056_v28 = vsel %vm187_vm1, %v5050_v29, %v5052_v4  ;;  %v5063_v29 = vmul.f32 0.0, %v5048_v48 }
 0x4d4   :  { %v5066_v6 = vmul.f32 %v5057_v35, %v15189_v13  ;;  %v5107_v27 = vmul.f32 %v5098_v42, %v15189_v13  ;;  %v5108_v11 = vmul.f32 %v5095_v3, %v15194_v55  ;;  %v5065_v43 = vmul.f32 %v5056_v28, %v15202_v50 }
 0x4d5   :  { %v5067_v48 = vmul.f32 %v5054_v8, %v15194_v55 }
 0x4d6   :  { %v5469_v60 = vpop.permute.xlu0 %5468  ;;  %v5467_v33 = vpop.permute.xlu1 %5466  ;;  %5120 = vrot.lane.b32.xlu0 %v5107_v27, %s12935_s2  ;;  %5289 = vrot.lane.b32.xlu1 %v5066_v6, %s17400_s29 }
 0x4d7   :  { %v5474_v14 = vsel %vm876_vm2, %v5467_v33, %v5469_v60  ;;  %v5482_v40 = vmul.f32 0.0, %v5467_v33 }
 0x4d8   :  { %v5483_v5 = vmul.f32 %v5474_v14, %v15179_v30 }
 0x4da   :  { %v5473_v54 = vpop.permute.xlu0 %5472  ;;  %v5471_v22 = vpop.permute.xlu1 %5470  ;;  %5122 = vrot.lane.b32.xlu1 %v5108_v11, %s12935_s2  ;;  %5285 = vrot.lane.b32.xlu0 %v5064_v26, %s17400_s29 }
 0x4db   :  { %v5476_v25 = vsel %vm876_vm2, %v5471_v22, %v5473_v54  ;;  %v5486_v27 = vmul.f32 %v5473_v54, %v15194_v55  ;;  %v5475_v17 = vsel %vm876_vm2, %v5469_v60, %v5471_v22 }
 0x4dc   :  { %v5485_v41 = vmul.f32 %v5476_v25, %v15189_v13  ;;  %v5484_v33 = vmul.f32 %v5475_v17, %v15202_v50 }
 0x4de   :  { %v5682_v3 = vpop.permute.xlu0 %5681  ;;  %v5680_v31 = vpop.permute.xlu1 %5679  ;;  %5118 = vrot.lane.b32.xlu0 %v5106_v46, %s12935_s2  ;;  %5287 = vrot.lane.b32.xlu1 %v5065_v43, %s17400_s29 }
 0x4df   :  { %v5687_v43 = vsel %vm1236_vm3, %v5680_v31, %v5682_v3  ;;  %v5695_v14 = vmul.f32 0.0, %v5680_v31 }
 0x4e0   :  { %v5696_v60 = vmul.f32 %v5687_v43, %v15179_v30 }
 0x4e2   :  { %v5686_v4 = vpop.permute.xlu0 %5685  ;;  %v5684_v42 = vpop.permute.xlu1 %5683  ;;  %5283 = vrot.lane.b32.xlu0 %v5063_v29, %s17400_s29  ;;  %5494 = vrot.lane.b32.xlu1 %v5483_v5, %s17399_s7 }
 0x4e3   :  { %v5688_v11 = vsel %vm1236_vm3, %v5682_v3, %v5684_v42  ;;  %v5689_v8 = vsel %vm1236_vm3, %v5684_v42, %v5686_v4  ;;  %v5699_v42 = vmul.f32 %v5686_v4, %v15194_v55 }
 0x4e4   :  { %v5697_v16 = vmul.f32 %v5688_v11, %v15202_v50  ;;  %v5698_v54 = vmul.f32 %v5689_v8, %v15189_v13 }
 0x4e6   :  { %v6051_v35 = vpop.permute.xlu0 %6050  ;;  %v6049_v6 = vpop.permute.xlu1 %6048  ;;  %5498 = vrot.lane.b32.xlu0 %v5485_v41, %s17399_s7  ;;  %5492 = vrot.lane.b32.xlu1 %v5482_v40, %s17399_s7 }
 0x4e7   :  { %v6064_v29 = vmul.f32 %v6049_v6, %v15179_v30  ;;  %v6056_v40 = vsel %vm1325_vm5, %v6049_v6, %v6051_v35 }
 0x4e8   :  { %v6065_v31 = vmul.f32 %v6056_v40, %v15202_v50 }
 0x4ea   :  { %v6055_v26 = vpop.permute.xlu0 %6054  ;;  %v6053_v28 = vpop.permute.xlu1 %6052  ;;  %5291 = vrot.lane.b32.xlu0 %v5067_v48, %s17400_s29  ;;  %5500 = vrot.lane.b32.xlu1 %v5486_v27, %s17399_s7 }
 0x4eb   :  { %v6068_v5 = vmul.f32 0.0, %v6055_v26  ;;  %v6057_v41 = vsel %vm1325_vm5, %v6051_v35, %v6053_v28  ;;  %v6058_v8 = vsel %vm1325_vm5, %v6053_v28, %v6055_v26 }
 0x4ec   :  { %v6066_v27 = vmul.f32 %v6057_v41, %v15189_v13 }
 0x4ee   :  { %v6262_v46 = vpop.permute.xlu1 %6261  ;;  %5496 = vrot.lane.b32.xlu0 %v5484_v33, %s17399_s7  ;;  %5709 = vrot.lane.b32.xlu1 %v5697_v16, %s12933_s9  ;;  %v6264_v22 = vpop.permute.xlu0 %6263 }
 0x4ef   :  { %v6277_v4 = vmul.f32 %v6262_v46, %v15179_v30 }
 0x4f2   :  { %5707 = vrot.lane.b32.xlu0 %v5696_v60, %s12933_s9  ;;  %5711 = vrot.lane.b32.xlu1 %v5698_v54, %s12933_s9  ;;  %v6266_v3 = vpop.permute.xlu1 %6265  ;;  %v6268_v25 = vpop.permute.xlu0 %6267 }
 0x4f3   :  { %v6270_v11 = vsel %vm965_vm6, %v6264_v22, %v6266_v3  ;;  %v6281_v33 = vmul.f32 0.0, %v6268_v25  ;;  %v6271_v60 = vsel %vm965_vm6, %v6266_v3, %v6268_v25 }
 0x4f4   :  { %v6279_v35 = vmul.f32 %v6270_v11, %v15189_v13 }
 0x4f6   :  { %5705 = vrot.lane.b32.xlu0 %v5695_v14, %s12933_s9  ;;  %6074 = vrot.lane.b32.xlu1 %v6064_v29, %s12932_s28  ;;  %v6475_v48 = vpop.permute.xlu1 %6474  ;;  %v6477_v17 = vpop.permute.xlu0 %6476  ;;  %v6067_v14 = vmul.f32 %v6058_v8, %v15194_v55  ;;  %v6280_v29 = vmul.f32 %v6271_v60, %v15194_v55  ;;  %v4558_v60 = vmul.f32 %v14784_v19, %v14653_v59 }
 0x4f7   :  { %v6490_v43 = vmul.f32 %v6475_v48, %v15179_v30  ;;  %v6482_v40 = vsel %vm337_vm4, %v6475_v48, %v6477_v17 }
 0x4f8   :  { %v6491_v28 = vmul.f32 %v6482_v40, %v15202_v50  ;;  %v4561_v40 = vmul.f32 %v14784_v19, %v14601_v51 }
 0x4fa   :  { %5713 = vrot.lane.b32.xlu0 %v5699_v42, %s12933_s9  ;;  %6082 = vrot.lane.b32.xlu1 %v6068_v5, %s12932_s28  ;;  %v6479_v6 = vpop.permute.xlu1 %6478  ;;  %v6481_v16 = vpop.permute.xlu0 %6480  ;;  %v6269_v42 = vsel %vm965_vm6, %v6262_v46, %v6264_v22 }
 0x4fb   :  { %v6278_v26 = vmul.f32 %v6269_v42, %v15202_v50  ;;  %v6483_v25 = vsel %vm337_vm4, %v6477_v17, %v6479_v6  ;;  %v6494_v41 = vmul.f32 0.0, %v6481_v16  ;;  %v6484_v17 = vsel %vm337_vm4, %v6479_v6, %v6481_v16 }
 0x4fc   :  { %v6492_v46 = vmul.f32 %v6483_v25, %v15189_v13  ;;  %v4556_v6 = vmul.f32 %v14784_v19, %v14588_v24  ;;  %v4562_v42 = vmul.f32 %v14784_v19, %v14691_v15  ;;  %v4565_v25 = vmul.f32 %v14784_v19, %v14604_v53 }
 0x4fe   :  { %6078 = vrot.lane.b32.xlu0 %v6066_v27, %s12932_s28  ;;  %6076 = vrot.lane.b32.xlu1 %v6065_v31, %s12932_s28  ;;  %v15259_v54 = vpop.permute.xlu1 %5114  ;;  %v6688_v5 = vpop.permute.xlu0 %6687 }
 0x4ff   :  { %v6703_v27 = vmul.f32 %v6688_v5, %v15179_v30 }
 0x502   :  { %6287 = vrot.lane.b32.xlu0 %v6277_v4, %s12931_s26  ;;  %6291 = vrot.lane.b32.xlu1 %v6279_v35, %s12931_s26  ;;  %v6690_v3 = vpop.permute.xlu1 %6689  ;;  %v6692_v31 = vpop.permute.xlu0 %6691  ;;  %v6493_v35 = vmul.f32 %v6484_v17, %v15194_v55 }
 0x503   :  { %v6696_v22 = vsel %vm621_vm7, %v6690_v3, %v6692_v31 }
 0x504   :  { %v6705_v11 = vmul.f32 %v6696_v22, %v15189_v13 }
 0x506   :  { %6295 = vrot.lane.b32.xlu0 %v6281_v33, %s12931_s26  ;;  %6500 = vrot.lane.b32.xlu1 %v6490_v43, %s12929_s22  ;;  %v6694_v48 = vpop.permute.xlu1 %6693  ;;  %v6695_v43 = vsel %vm621_vm7, %v6688_v5, %v6690_v3  ;;  %v4559_v5 = vmul.f32 %v14784_v19, %v14671_v1  ;;  %v4563_v3 = vmul.f32 %v14784_v19, %v14675_v20 }
 0x507   :  { %v6697_v4 = vsel %vm621_vm7, %v6692_v31, %v6694_v48  ;;  %v6704_v8 = vmul.f32 %v6695_v43, %v15202_v50  ;;  %v6707_v16 = vmul.f32 0.0, %v6694_v48  ;;  %v4713_v31 = vmul.f32 %v14866_v49, %v14591_v47 }
 0x508   :  { %v6706_v33 = vmul.f32 %v6697_v4, %v15194_v55 }
 0x50a   :  { %6080 = vrot.lane.b32.xlu0 %v6067_v14, %s12932_s28  ;;  %6293 = vrot.lane.b32.xlu1 %v6280_v29, %s12931_s26  ;;  %v4557_v14 = vmul.f32 %v14784_v19, %v14580_v52  ;;  %v4560_v29 = vmul.f32 %v14784_v19, %v14591_v47 }
 0x50e   :  { %6289 = vrot.lane.b32.xlu0 %v6278_v26, %s12931_s26  ;;  %6502 = vrot.lane.b32.xlu1 %v6491_v28, %s12929_s22  ;;  %v4708_v26 = vmul.f32 %v14866_v49, %v14588_v24 }
 0x510   :  { %v4729_v28 = vmul.f32 %v14870_v37, %v4708_v26 }
 0x512   :  { %6504 = vrot.lane.b32.xlu0 %v6492_v46, %s12929_s22  ;;  %6508 = vrot.lane.b32.xlu1 %v6494_v41, %s12929_s22  ;;  %v4566_v41 = vmul.f32 %v14784_v19, %v14694_v36  ;;  %v4567_v46 = vmul.f32 %v14784_v19, %v14678_v21 }
 0x516   :  { %6713 = vrot.lane.b32.xlu0 %v6703_v27, %s12930_s24  ;;  %6717 = vrot.lane.b32.xlu1 %v6705_v11, %s12930_s24 }
 0x51a   :  { %6506 = vrot.lane.b32.xlu0 %v6493_v35, %s12929_s22  ;;  %6719 = vrot.lane.b32.xlu1 %v6706_v33, %s12930_s24 }
 0x51e   :  { %6715 = vrot.lane.b32.xlu0 %v6704_v8, %s12930_s24  ;;  %4592 = vrot.lane.b32.xlu1 %v4556_v6, %s12932_s28  ;;  %v5023_v8 = vld [vmem:[%s17300_s10] sm:$0xff] }
 0x522   :  { %6721 = vrot.lane.b32.xlu0 %v6707_v16, %s12930_s24  ;;  %4596 = vrot.lane.b32.xlu1 %v4558_v60, %s12932_s28 }
 0x526   :  { %4594 = vrot.lane.b32.xlu0 %v4557_v14, %s12932_s28  ;;  %4600 = vrot.lane.b32.xlu1 %v4560_v29, %s12932_s28 }
 0x52a   :  { %4598 = vrot.lane.b32.xlu0 %v4559_v5, %s12932_s28  ;;  %4604 = vrot.lane.b32.xlu1 %v4562_v42, %s12932_s28 }
 0x52e   :  { %4602 = vrot.lane.b32.xlu0 %v4561_v40, %s12932_s28  ;;  %4776 = vrot.lane.b32.xlu1 %v14894_v39, %s12939_s1  ;;  %v4564_v39 = vmul.f32 %v14784_v19, %v14594_v62 }
 0x532   :  { %4774 = vrot.lane.b32.xlu0 %v4729_v28, %s12939_s1  ;;  %4606 = vrot.lane.b32.xlu1 %v4563_v3, %s12932_s28  ;;  %v11069_v28 = vld [vmem:[%s17300_s10 + $0x10] sm:$0xff] }
 0x536   :  { %4778 = vrot.lane.b32.xlu0 %v14932_v58, %s12939_s1  ;;  %4610 = vrot.lane.b32.xlu1 %v4565_v25, %s12932_s28  ;;  %v4734_v58 = vmul.f32 %v14870_v37, %v4713_v31 }
 0x53a   :  { %4608 = vrot.lane.b32.xlu0 %v4564_v39, %s12932_s28  ;;  %4780 = vrot.lane.b32.xlu1 %v14945_v63, %s12939_s1 }
 0x53e   :  { %4612 = vrot.lane.b32.xlu0 %v4566_v41, %s12932_s28  ;;  %4786 = vrot.lane.b32.xlu1 %v14897_v9, %s12939_s1  ;;  %v4718_v9 = vmul.f32 %v14866_v49, %v14594_v62 }
 0x540   :  { %v5117_v63 = vpop.permute.xlu1 %5116  ;;  %v4739_v11 = vmul.f32 %v14870_v37, %v4718_v9 }
 0x541   :  { %v5124_v37 = vsel %vm337_vm4, %v15259_v54, %v5117_v63 }
 0x542   :  { %4784 = vrot.lane.b32.xlu0 %v4734_v58, %s12939_s1  ;;  %4614 = vrot.lane.b32.xlu1 %v4567_v46, %s12932_s28  ;;  %v11073_v46 = vld [vmem:[%s17300_s10 + $0x18] sm:$0xff] }
 0x546   :  { %4788 = vrot.lane.b32.xlu0 %v14955_v18, %s12939_s1  ;;  %4790 = vrot.lane.b32.xlu1 %v14958_v10, %s12939_s1 }
 0x548   :  { %v5121_v22 = vpop.permute.xlu0 %5120  ;;  %v5290_v48 = vpop.permute.xlu1 %5289 }
 0x54a   :  { %4782 = vrot.lane.b32.xlu0 %v14910_v32, %s12939_s1  ;;  %4796 = vrot.lane.b32.xlu1 %v14990_v45, %s12939_s1  ;;  %v11063_v45 = vld [vmem:[%s17300_s10 + $0x8] sm:$0xff] }
 0x54c   :  { %v5123_v19 = vpop.permute.xlu1 %5122  ;;  %v5286_v27 = vpop.permute.xlu0 %5285 }
 0x54d   :  { %v5127_v18 = vsel %vm337_vm4, %v5121_v22, %v5123_v19 }
 0x54e   :  { %5207 = vmatprep.subr.mxu1 %v5127_v18  ;;  %4794 = vrot.lane.b32.xlu0 %v4739_v11, %s12939_s1 }
 0x54f   :  { %4792 = vrot.lane.b32.xlu1 %v14910_v32, %s12939_s1 }
 0x550   :  { %v5119_v10 = vpop.permute.xlu0 %5118  ;;  %v5288_v49 = vpop.permute.xlu1 %5287 }
 0x551   :  { %v5125_v17 = vsel %vm337_vm4, %v5117_v63, %v5119_v10  ;;  %v5126_v4 = vsel %vm337_vm4, %v5119_v10, %v5121_v22  ;;  %v5294_v33 = vsel %vm621_vm7, %v5286_v27, %v5288_v49 }
 0x552   :  { %4798 = vrot.lane.b32.xlu0 %v15000_v12, %s12939_s1  ;;  %5136 = vmatprep.subr.mxu0 %v5125_v17 }
 0x553   :  { %5208 = vmatpush1.msra.mxu1 %v5126_v4  ;;  %4802 = vrot.lane.b32.xlu1 %v14910_v32, %s12939_s1 }
 0x554   :  { %5137 = vmatpush1.msra.mxu0 %v5124_v37  ;;  %v5284_v35 = vpop.permute.xlu0 %5283  ;;  %v5495_v43 = vpop.permute.xlu1 %5494  ;;  %11066 = vmatmul.mubr.msk.f32.vlgmr.msra.gmra.mrb[16].mxu1 %vm5132_vm11, %v11063_v45 }
 0x555   :  { %11065 = vmatmul.mubr.msk.f32.vlgmr.msra.gmra.mrb[16].mxu0 %vm5132_vm11, %v11063_v45  ;;  %v5293_v12 = vsel %vm621_vm7, %v5284_v35, %v5286_v27  ;;  %5304 = vmatprep.subr.mxu0 %v5294_v33 }
 0x556   :  { %4800 = vrot.lane.b32.xlu0 %v15004_v38, %s12939_s1  ;;  %5305 = vmatpush1.msra.mxu0 %v5293_v12  ;;  %v5295_v38 = vsel %vm621_vm7, %v5288_v49, %v5290_v48  ;;  %v11080_v49 = vld [vmem:[%s17300_s10 + $0x28] sm:$0xff] }
 0x557   :  { %5368 = vmatprep.mubr.f32.mxu0 %v17393_v2  ;;  %5439 = vmatprep.mubr.f32.mxu1 %v17393_v2 }
 0x558   :  { %v5499_v32 = vpop.permute.xlu0 %5498  ;;  %v5493_v54 = vpop.permute.xlu1 %5492 }
 0x559   :  { %v5502_v26 = vsel %vm965_vm6, %v5493_v54, %v5495_v43 }
 0x55c   :  { %v5292_v6 = vpop.permute.xlu0 %5291  ;;  %v5501_v16 = vpop.permute.xlu1 %5500 }
 0x55d   :  { %11067 = vmatmul.mubr.msk.f32.vlgmr.msra.gmra.mrb[16].mxu0 %vm5132_vm11, %v5023_v8  ;;  %v5296_v60 = vsel %vm621_vm7, %v5290_v48, %v5292_v6  ;;  %v5505_v14 = vsel %vm965_vm6, %v5499_v32, %v5501_v16 }
 0x55e   :  { %5375 = vmatprep.subr.mxu1 %v5296_v60  ;;  %5577 = vmatprep.mubr.f32.mxu0 %v17393_v2 }
 0x55f   :  { %5376 = vmatpush1.msra.mxu1 %v5295_v38 }
 0x560   :  { %v5497_v29 = vpop.permute.xlu0 %5496  ;;  %11068 = vmatmul.mubr.msk.f32.vlgmr.msra.gmra.mrb[16].mxu1 %vm5132_vm11, %v5023_v8  ;;  %5584 = vmatprep.subr.mxu1 %v5505_v14  ;;  %v5710_v5 = vpop.permute.xlu1 %5709  ;;  %v11084_v8 = vld [vmem:[%s17300_s10 + $0x30] sm:$0xff] }
 0x561   :  { %v5503_v42 = vsel %vm965_vm6, %v5495_v43, %v5497_v29  ;;  %v5504_v40 = vsel %vm965_vm6, %v5497_v29, %v5499_v32  ;;  %5648 = vmatprep.mubr.f32.mxu1 %v17393_v2 }
 0x562   :  { %5513 = vmatprep.subr.mxu0 %v5503_v42  ;;  %5585 = vmatpush1.msra.mxu1 %v5504_v40 }
 0x563   :  { %5514 = vmatpush1.msra.mxu0 %v5502_v26 }
 0x564   :  { %v5708_v3 = vpop.permute.xlu0 %5707  ;;  %v5712_v25 = vpop.permute.xlu1 %5711 }
 0x565   :  { %11071 = vmatmul.mubr.msk.f32.vlgmr.msra.gmra.mrb[16].mxu0 %vm5132_vm11, %v11069_v28  ;;  %v5716_v39 = vsel %vm1325_vm5, %v5708_v3, %v5710_v5  ;;  %v5717_v9 = vsel %vm1325_vm5, %v5710_v5, %v5712_v25  ;;  %v11088_v5 = vld [vmem:[%s17300_s10 + $0x38] sm:$0xff] }
 0x566   :  { %5726 = vmatprep.subr.mxu0 %v5716_v39  ;;  %5790 = vmatprep.mubr.f32.mxu0 %v17393_v2 }
 0x568   :  { %v5706_v41 = vpop.permute.xlu0 %5705  ;;  %11072 = vmatmul.mubr.msk.f32.vlgmr.msra.gmra.mrb[16].mxu1 %vm5132_vm11, %v11069_v28  ;;  %v6075_v31 = vpop.permute.xlu1 %6074 }
 0x569   :  { %v5715_v58 = vsel %vm1325_vm5, %v5706_v41, %v5708_v3  ;;  %5861 = vmatprep.mubr.f32.mxu1 %v17393_v2 }
 0x56a   :  { %5727 = vmatpush1.msra.mxu0 %v5715_v58 }
 0x56b   :  { %5877 = vmatprep.subr.mxu0 %v15202_v50 }
 0x56c   :  { %v5714_v63 = vpop.permute.xlu0 %5713  ;;  %v6083_v22 = vpop.permute.xlu1 %6082 }
 0x56d   :  { %11075 = vmatmul.mubr.msk.f32.vlgmr.msra.gmra.mrb[16].mxu0 %vm5132_vm11, %v11073_v46  ;;  %v5718_v48 = vsel %vm1325_vm5, %v5712_v25, %v5714_v63 }
 0x56e   :  { %5878 = vmatpush1.msra.mxu0 %v15179_v30  ;;  %5797 = vmatprep.subr.mxu1 %v5718_v48  ;;  %v11077_v30 = vld [vmem:[%s17300_s10 + $0x20] sm:$0xff] }
 0x56f   :  { %5798 = vmatpush1.msra.mxu1 %v5717_v9  ;;  %5941 = vmatprep.mubr.f32.mxu0 %v17393_v2 }
 0x570   :  { %v6079_v19 = vpop.permute.xlu0 %6078  ;;  %11076 = vmatmul.mubr.msk.f32.vlgmr.msra.gmra.mrb[16].mxu1 %vm5132_vm11, %v11073_v46  ;;  %5948 = vmatprep.subr.mxu1 %v15194_v55  ;;  %v6077_v50 = vpop.permute.xlu1 %6076 }
 0x571   :  { %5949 = vmatpush1.msra.mxu1 %v15189_v13  ;;  %v6085_v27 = vsel %vm1236_vm3, %v6077_v50, %v6079_v19  ;;  %6012 = vmatprep.mubr.f32.mxu1 %v17393_v2  ;;  %v6084_v10 = vsel %vm1236_vm3, %v6075_v31, %v6077_v50  ;;  %v11092_v31 = vld [vmem:[%s17300_s10 + $0x40] sm:$0xff] }
 0x572   :  { %6095 = vmatprep.subr.mxu0 %v6085_v27 }
 0x574   :  { %v6288_v11 = vpop.permute.xlu0 %6287  ;;  %v6292_v18 = vpop.permute.xlu1 %6291 }
 0x575   :  { %11078 = vmatmul.mubr.msk.f32.vlgmr.msra.gmra.mrb[16].mxu0 %vm5132_vm11, %v11077_v30 }
 0x576   :  { %6096 = vmatpush1.msra.mxu0 %v6084_v10  ;;  %6159 = vmatprep.mubr.f32.mxu0 %v17393_v2 }
 0x578   :  { %v6296_v55 = vpop.permute.xlu0 %6295  ;;  %11079 = vmatmul.mubr.msk.f32.vlgmr.msra.gmra.mrb[16].mxu1 %vm5132_vm11, %v11077_v30  ;;  %v6501_v13 = vpop.permute.xlu1 %6500 }
 0x579   :  { %6230 = vmatprep.mubr.f32.mxu1 %v17393_v2 }
 0x57c   :  { %v6081_v17 = vpop.permute.xlu0 %6080  ;;  %v6294_v4 = vpop.permute.xlu1 %6293 }
 0x57d   :  { %11082 = vmatmul.mubr.msk.f32.vlgmr.msra.gmra.mrb[16].mxu0 %vm5132_vm11, %v11080_v49  ;;  %v6087_v45 = vsel %vm1236_vm3, %v6081_v17, %v6083_v22  ;;  %v6086_v37 = vsel %vm1236_vm3, %v6079_v19, %v6081_v17  ;;  %v6300_v35 = vsel %vm876_vm2, %v6294_v4, %v6296_v55  ;;  %v6299_v12 = vsel %vm876_vm2, %v6292_v18, %v6294_v4 }
 0x57e   :  { %6166 = vmatprep.subr.mxu1 %v6087_v45  ;;  %6372 = vmatprep.mubr.f32.mxu0 %v17393_v2 }
 0x57f   :  { %6167 = vmatpush1.msra.mxu1 %v6086_v37 }
 0x580   :  { %v6290_v33 = vpop.permute.xlu0 %6289  ;;  %11083 = vmatmul.mubr.msk.f32.vlgmr.msra.gmra.mrb[16].mxu1 %vm5132_vm11, %v11080_v49  ;;  %6379 = vmatprep.subr.mxu1 %v6300_v35  ;;  %v6503_v43 = vpop.permute.xlu1 %6502 }
 0x581   :  { %6380 = vmatpush1.msra.mxu1 %v6299_v12  ;;  %v6298_v32 = vsel %vm876_vm2, %v6290_v33, %v6292_v18  ;;  %v6297_v54 = vsel %vm876_vm2, %v6288_v11, %v6290_v33  ;;  %6443 = vmatprep.mubr.f32.mxu1 %v17393_v2  ;;  %v6510_v38 = vsel %vm248_vm0, %v6501_v13, %v6503_v43 }
 0x582   :  { %6308 = vmatprep.subr.mxu0 %v6298_v32 }
 0x583   :  { %6309 = vmatpush1.msra.mxu0 %v6297_v54 }
 0x584   :  { %v6505_v6 = vpop.permute.xlu0 %6504  ;;  %v6509_v16 = vpop.permute.xlu1 %6508 }
 0x585   :  { %11086 = vmatmul.mubr.msk.f32.vlgmr.msra.gmra.mrb[16].mxu0 %vm5132_vm11, %v11084_v8  ;;  %v6511_v60 = vsel %vm248_vm0, %v6503_v43, %v6505_v6 }
 0x586   :  { %6521 = vmatprep.subr.mxu0 %v6511_v60  ;;  %6585 = vmatprep.mubr.f32.mxu0 %v17393_v2 }
 0x587   :  { %6522 = vmatpush1.msra.mxu0 %v6510_v38 }
 0x588   :  { %v6714_v14 = vpop.permute.xlu0 %6713  ;;  %11087 = vmatmul.mubr.msk.f32.vlgmr.msra.gmra.mrb[16].mxu1 %vm5132_vm11, %v11084_v8  ;;  %v6718_v29 = vpop.permute.xlu1 %6717 }
 0x589   :  { %6656 = vmatprep.mubr.f32.mxu1 %v17393_v2 }
 0x58c   :  { %v6507_v42 = vpop.permute.xlu0 %6506  ;;  %v6720_v40 = vpop.permute.xlu1 %6719 }
 0x58d   :  { %11090 = vmatmul.mubr.msk.f32.vlgmr.msra.gmra.mrb[16].mxu0 %vm5132_vm11, %v11088_v5  ;;  %v6513_v26 = vsel %vm248_vm0, %v6507_v42, %v6509_v16  ;;  %v6512_v28 = vsel %vm248_vm0, %v6505_v6, %v6507_v42  ;;  %v6725_v22 = vsel %vm187_vm1, %v6718_v29, %v6720_v40 }
 0x58e   :  { %6592 = vmatprep.subr.mxu1 %v6513_v26  ;;  %6798 = vmatprep.mubr.f32.mxu0 %v17393_v2 }
 0x58f   :  { %6593 = vmatpush1.msra.mxu1 %v6512_v28 }
 0x590   :  { %v6716_v3 = vpop.permute.xlu0 %6715  ;;  %11091 = vmatmul.mubr.msk.f32.vlgmr.msra.gmra.mrb[16].mxu1 %vm5132_vm11, %v11088_v5  ;;  %v4593_v25 = vpop.permute.xlu1 %4592 }
 0x591   :  { %v6724_v39 = vsel %vm187_vm1, %v6716_v3, %v6718_v29  ;;  %v6723_v41 = vsel %vm187_vm1, %v6714_v14, %v6716_v3  ;;  %6869 = vmatprep.mubr.f32.mxu1 %v17393_v2  ;;  %v4653_v18 = vadd.f32 %v4593_v25, %v15047_v0 }
 0x592   :  { %6734 = vmatprep.subr.mxu0 %v6724_v39 }
 0x593   :  { %6735 = vmatpush1.msra.mxu0 %v6723_v41  ;;  %v4518_v41 = vmul.f32 %v14936_v56, %v14671_v1 }
 0x594   :  { %v6722_v58 = vpop.permute.xlu0 %6721  ;;  %v4597_v46 = vpop.permute.xlu1 %4596 }
 0x595   :  { %11094 = vmatmul.mubr.msk.f32.vlgmr.msra.gmra.mrb[16].mxu0 %vm5132_vm11, %v11092_v31  ;;  %v6726_v63 = vsel %vm187_vm1, %v6720_v40, %v6722_v58 }
 0x596   :  { %6805 = vmatprep.subr.mxu1 %v6726_v63  ;;  %7004 = vmatprep.mubr.f32.mxu0 %v17393_v2  ;;  %v17413_v63 = vld [vmem:[#allocation29_spill] sm:$0xff] }
 0x597   :  { %6806 = vmatpush1.msra.mxu1 %v6725_v22 }
 0x598   :  { %v4595_v48 = vpop.permute.xlu0 %4594  ;;  %11095 = vmatmul.mubr.msk.f32.vlgmr.msra.gmra.mrb[16].mxu1 %vm5132_vm11, %v11092_v31  ;;  %v4601_v9 = vpop.permute.xlu1 %4600 }
 0x599   :  { %7093 = vmatprep.mubr.f32.mxu1 %v17393_v2  ;;  %v4619_v11 = vsel %vm1236_vm3, %v4593_v25, %v4595_v48  ;;  %v4620_v49 = vsel %vm1236_vm3, %v4595_v48, %v4597_v46  ;;  %v4658_v40 = vadd.f32 %v4601_v9, %v15047_v0 }
 0x59a   :  { %v4654_v10 = vadd.f32 %v4619_v11, %v15010_v23  ;;  %v4655_v35 = vadd.f32 %v4620_v49, %v15013_v61  ;;  %v4539_v11 = vmul.f32 %v14972_v44, %v4518_v41  ;;  %v4523_v49 = vmul.f32 %v14936_v56, %v14675_v20 }
 0x59c   :  { %v4599_v19 = vpop.permute.xlu0 %4598  ;;  %v4605_v50 = vpop.permute.xlu1 %4604 }
 0x59d   :  { %v4621_v32 = vsel %vm1236_vm3, %v4597_v46, %v4599_v19 }
 0x59e   :  { %v4656_v8 = vadd.f32 %v4621_v32, %v15019_v34 }
 0x5a0   :  { %v4603_v27 = vpop.permute.xlu0 %4602  ;;  %v4777_v30 = vpop.permute.xlu1 %4776 }
 0x5a1   :  { %v4622_v42 = vsel %vm1236_vm3, %v4601_v9, %v4603_v27  ;;  %v4623_v3 = vsel %vm1236_vm3, %v4603_v27, %v4605_v50 }
 0x5a2   :  { %v4659_v34 = vadd.f32 %v4622_v42, %v15022_v7  ;;  %v4660_v22 = vadd.f32 %v4623_v3, %v17413_v63 }
 0x5a4   :  { %v4775_v55 = vpop.permute.xlu0 %4774  ;;  %v15467_v13 = vpop.permute.xlu1 %4606 }
 0x5a5   :  { %v4809_v17 = vsel %vm4804_vm10, %v4775_v55, %v4777_v30  ;;  %v4846_v4 = vadd.f32 %v4775_v55, %v4653_v18  ;;  %v4624_v58 = vsel %vm1236_vm3, %v4605_v50, %v15467_v13  ;;  %v17414_v18 = vld [vmem:[#allocation30_spill] sm:$0xff]  ;;  %v4657_v50 = vadd.f32 %v4599_v19, %v4539_v11  ;;  %v17415_v19 = vld [vmem:[#allocation31_spill] sm:$0xff] }
 0x5a6   :  { %v4847_v45 = vadd.f32 %v4809_v17, %v4654_v10  ;;  %v4661_v10 = vadd.f32 %v4624_v58, %v17414_v18  ;;  %v17417_v58 = vld [vmem:[#allocation33_spill] sm:$0xff] }
 0x5a7   :  { %v4868_v37 = vadd.f32 %v15053_v57, %v4846_v4 }
 0x5a8   :  { %v4869_v33 = vadd.f32 %v15053_v57, %v4847_v45  ;;  %v4779_v43 = vpop.permute.xlu0 %4778  ;;  %v4611_v12 = vpop.permute.xlu1 %4610 }
 0x5a9   :  { %v4810_v23 = vsel %vm4804_vm10, %v4777_v30, %v4779_v43  ;;  %4913 = vrot.lane.b32.xlu0 %v4868_v37, %s12933_s9 }
 0x5aa   :  { %v4848_v54 = vadd.f32 %v4810_v23, %v4655_v35  ;;  %4915 = vrot.lane.b32.xlu1 %v4869_v33, %s12933_s9  ;;  %v4544_v23 = vmul.f32 %v14972_v44, %v4523_v49 }
 0x5ac   :  { %v4870_v6 = vadd.f32 %v15053_v57, %v4848_v54  ;;  %v4609_v16 = vpop.permute.xlu0 %4608  ;;  %v4781_v60 = vpop.permute.xlu1 %4780 }
 0x5ad   :  { %v4811_v61 = vsel %vm4804_vm10, %v4779_v43, %v4781_v60  ;;  %v4625_v35 = vsel %vm1236_vm3, %v4609_v16, %v4611_v12  ;;  %v4663_v32 = vadd.f32 %v4609_v16, %v15047_v0  ;;  %v4662_v0 = vadd.f32 %v15467_v13, %v4544_v23  ;;  %v11108_v23 = vld [vmem:[%s17421_s30 + $0x1] ss:$2 sm:$0xf] }
 0x5ae   :  { %v4849_v38 = vadd.f32 %v4811_v61, %v4656_v8  ;;  %4917 = vrot.lane.b32.xlu0 %v4870_v6, %s12933_s9  ;;  %v4664_v54 = vadd.f32 %v4625_v35, %v17415_v19 }
 0x5b0   :  { %v4871_v14 = vadd.f32 %v15053_v57, %v4849_v38  ;;  %v4613_v29 = vpop.permute.xlu0 %4612  ;;  %v4787_v5 = vpop.permute.xlu1 %4786 }
 0x5b1   :  { %v4626_v38 = vsel %vm1236_vm3, %v4611_v12, %v4613_v29 }
 0x5b2   :  { %4919 = vrot.lane.b32.xlu1 %v4871_v14, %s12933_s9  ;;  %v4528_v14 = vmul.f32 %v14936_v56, %v14678_v21 }
 0x5b4   :  { %v4785_v26 = vpop.permute.xlu0 %4784  ;;  %v4615_v28 = vpop.permute.xlu1 %4614  ;;  %v4549_v13 = vmul.f32 %v14972_v44, %v4528_v14 }
 0x5b5   :  { %v4813_v25 = vsel %vm4804_vm10, %v4785_v26, %v4787_v5  ;;  %v4851_v39 = vadd.f32 %v4785_v26, %v4658_v40  ;;  %v17416_v26 = vld [vmem:[#allocation32_spill] sm:$0xff] }
 0x5b6   :  { %v4852_v31 = vadd.f32 %v4813_v25, %v4659_v34  ;;  %v4665_v12 = vadd.f32 %v4626_v38, %v17416_v26  ;;  %v4667_v63 = vadd.f32 %v4615_v28, %v4549_v13 }
 0x5b7   :  { %v4873_v46 = vadd.f32 %v15053_v57, %v4851_v39  ;;  %v4627_v39 = vsel %vm1236_vm3, %v4613_v29, %v4615_v28 }
 0x5b8   :  { %v4874_v7 = vadd.f32 %v15053_v57, %v4852_v31  ;;  %v4789_v48 = vpop.permute.xlu0 %4788  ;;  %v4791_v9 = vpop.permute.xlu1 %4790 }
 0x5b9   :  { %v4814_v27 = vsel %vm4804_vm10, %v4787_v5, %v4789_v48  ;;  %v4815_v30 = vsel %vm4804_vm10, %v4789_v48, %v4791_v9  ;;  %4923 = vrot.lane.b32.xlu0 %v4873_v46, %s12933_s9  ;;  %v4666_v46 = vadd.f32 %v4627_v39, %v17417_v58 }
 0x5ba   :  { %v4853_v55 = vadd.f32 %v4814_v27, %v4660_v22  ;;  %4925 = vrot.lane.b32.xlu1 %v4874_v7, %s12933_s9  ;;  %v4854_v4 = vadd.f32 %v4815_v30, %v4661_v10 }
 0x5bc   :  { %v4875_v17 = vadd.f32 %v15053_v57, %v4853_v55  ;;  %v4783_v45 = vpop.permute.xlu0 %4782  ;;  %v4797_v37 = vpop.permute.xlu1 %4796  ;;  %v4876_v8 = vadd.f32 %v15053_v57, %v4854_v4 }
 0x5bd   :  { %v4812_v33 = vsel %vm4804_vm10, %v4781_v60, %v4783_v45  ;;  %v17418_v45 = vld [vmem:[#allocation35_spill] sm:$0xff] }
 0x5be   :  { %v4850_v43 = vadd.f32 %v4812_v33, %v4657_v50  ;;  %4927 = vrot.lane.b32.xlu0 %v4875_v17, %s12933_s9  ;;  %v17419_v33 = vld [vmem:[#allocation34_spill] sm:$0xff] }
 0x5c0   :  { %v4872_v6 = vadd.f32 %v15053_v57, %v4850_v43  ;;  %v4795_v61 = vpop.permute.xlu0 %4794 }
 0x5c1   :  { %v4817_v60 = vsel %vm4804_vm10, %v4795_v61, %v4797_v37  ;;  %v4856_v5 = vadd.f32 %v4795_v61, %v4663_v32  ;;  %v4793_v42 = vpop.permute.xlu1 %4792  ;;  %v7118_v61 = vld [vmem:[%s17421_s30] ss:$2 sm:$0xf] }
 0x5c2   :  { %v4857_v16 = vadd.f32 %v4817_v60, %v4664_v54  ;;  %v4816_v40 = vsel %vm4804_vm10, %v4791_v9, %v4793_v42  ;;  %4921 = vrot.lane.b32.xlu1 %v4872_v6, %s12933_s9  ;;  %4929 = vrot.lane.b32.xlu0 %v4876_v8, %s12933_s9  ;;  %v17422_v8 = vld [vmem:[#allocation12_spill] sm:$0xff]  ;;  %v17424_v60 = vld [vmem:[#allocation10_spill] sm:$0xff] }
 0x5c3   :  { %v4878_v34 = vadd.f32 %v15053_v57, %v4856_v5  ;;  %v4855_v56 = vadd.f32 %v4816_v40, %v4662_v0  ;;  %v15553_v6 = vrot.slane %v11108_v23, %v17422_v8  ;;  %v15562_v5 = vrot.slane %v11108_v23, %v17424_v60 }
 0x5c4   :  { %v4879_v3 = vadd.f32 %v15053_v57, %v4857_v16  ;;  %v4799_v25 = vpop.permute.xlu0 %4798  ;;  %v15565_v42 = vrot.slane %v7118_v61, %v17422_v8  ;;  %v17426_v16 = vld [vmem:[#allocation9_spill] sm:$0xff] }
 0x5c5   :  { %v4818_v41 = vsel %vm4804_vm10, %v4797_v37, %v4799_v25  ;;  %v4877_v22 = vadd.f32 %v15053_v57, %v4855_v56  ;;  %v4803_v48 = vpop.permute.xlu1 %4802  ;;  %v15572_v40 = vrot.slane %v11108_v23, %v17426_v16  ;;  %v15579_v26 = vrot.slane %v7118_v61, %v17426_v16  ;;  %v17428_v56 = vld [vmem:[#allocation39_spill] sm:$0xff] }
 0x5c6   :  { %v4858_v31 = vadd.f32 %v4818_v41, %v4665_v12  ;;  %4933 = vrot.lane.b32.xlu1 %v4878_v34, %s12933_s9  ;;  %4935 = vrot.lane.b32.xlu0 %v4879_v3, %s12933_s9  ;;  %v17427_v12 = vld [vmem:[#allocation11_spill] sm:$0xff] }
 0x5c7   :  { %v15582_v3 = vrot.slane %v11108_v23, %v17427_v12  ;;  %v17433_v23 = vld [vmem:[#allocation41_spill] sm:$0xff] }
 0x5c8   :  { %v4880_v7 = vadd.f32 %v15053_v57, %v4858_v31  ;;  %v4801_v9 = vpop.permute.xlu0 %4800  ;;  %v15590_v31 = vrot.slane %v7118_v61, %v17427_v12 }
 0x5c9   :  { %v4819_v29 = vsel %vm4804_vm10, %v4799_v25, %v4801_v9  ;;  %v4820_v27 = vsel %vm4804_vm10, %v4801_v9, %v4803_v48  ;;  %v17430_v9 = vld [vmem:[#allocation40_spill] sm:$0xff] }
 0x5ca   :  { %v4859_v30 = vadd.f32 %v4819_v29, %v4666_v46  ;;  %v4860_v44 = vadd.f32 %v4820_v27, %v4667_v63  ;;  %4937 = vrot.lane.b32.xlu1 %v4880_v7, %s12933_s9  ;;  %4931 = vrot.lane.b32.xlu0 %v4877_v22, %s12933_s9  ;;  %v17429_v46 = vld [vmem:[#allocation38_spill] sm:$0xff]  ;;  %v17431_v27 = vld [vmem:[#allocation37_spill] sm:$0xff] }
 0x5cc   :  { %v4881_v11 = vadd.f32 %v15053_v57, %v4859_v30  ;;  %v4882_v28 = vadd.f32 %v15053_v57, %v4860_v44  ;;  %v17420_v57 = vld [vmem:[#allocation36_spill] sm:$0xff] }
 0x5ce   :  { %4939 = vrot.lane.b32.xlu1 %v4881_v11, %s12933_s9  ;;  %4941 = vrot.lane.b32.xlu0 %v4882_v28, %s12933_s9 }
 0x61b   :  { %v4914_v18 = vpop.permute.xlu0 %4913 }
 0x61c   :  { %v4916_v10 = vpop.permute.xlu1 %4915 }
 0x61d   :  { %v4947_v17 = vsel %vm1325_vm5, %v4914_v18, %v4916_v10 }
 0x61e   :  { %v4979_v43 = vmul.f32 %v4947_v17, %v17419_v33 }
 0x620   :  { %v4918_v55 = vpop.permute.xlu0 %4917  ;;  %v15559_v38 = vadd.f32 %v4979_v43, %v14588_v24  ;;  %v15576_v24 = vrot.slane %v7118_v61, %v17424_v60 }
 0x621   :  { %v4948_v49 = vsel %vm1325_vm5, %v4916_v10, %v4918_v55 }
 0x622   :  { %v4980_v37 = vmul.f32 %v4948_v49, %v17418_v45  ;;  %17423 = vst [vmem:[#allocation29_spill] sm:$0xff] %v15559_v38  ;;  %v7324_v13 = vmul.f32 %v15562_v5, %v15559_v38  ;;  %v7144_v44 = vmul.f32 %v15576_v24, %v15559_v38 }
 0x624   :  { %v4920_v50 = vpop.permute.xlu1 %4919  ;;  %v15550_v19 = vadd.f32 %v4980_v37, %v14580_v52 }
 0x625   :  { %v4949_v4 = vsel %vm1325_vm5, %v4918_v55, %v4920_v50 }
 0x626   :  { %v4981_v32 = vmul.f32 %v4949_v4, %v17420_v57  ;;  %v7145_v58 = vmul.f32 %v15565_v42, %v15550_v19 }
 0x628   :  { %v15568_v52 = vadd.f32 %v4981_v32, %v14653_v59  ;;  %v7325_v59 = vmul.f32 %v15553_v6, %v15550_v19 }
 0x62a   :  { %17425 = vst [vmem:[#allocation30_spill] sm:$0xff] %v15568_v52  ;;  %v7326_v48 = vmul.f32 %v15572_v40, %v15568_v52  ;;  %v7146_v11 = vmul.f32 %v15579_v26, %v15568_v52  ;;  %v7341_v28 = vadd.f32 %v7325_v59, %v7324_v13 }
 0x62b   :  { %v4924_v35 = vpop.permute.xlu0 %4923 }
 0x62c   :  { %v4926_v54 = vpop.permute.xlu1 %4925  ;;  %v7342_v17 = vadd.f32 %v7341_v28, %v7326_v48  ;;  %v17435_v48 = vld [vmem:[#allocation42_spill] sm:$0xff] }
 0x62d   :  { %v4951_v34 = vsel %vm1325_vm5, %v4924_v35, %v4926_v54 }
 0x62e   :  { %v4983_v63 = vmul.f32 %v4951_v34, %v17429_v46 }
 0x630   :  { %v4928_v14 = vpop.permute.xlu0 %4927  ;;  %v15612_v49 = vadd.f32 %v4983_v63, %v14591_v47 }
 0x631   :  { %v4952_v0 = vsel %vm1325_vm5, %v4926_v54, %v4928_v14 }
 0x632   :  { %v4984_v25 = vmul.f32 %v4952_v0, %v17428_v56  ;;  %v7148_v32 = vmul.f32 %v15576_v24, %v15612_v49 }
 0x634   :  { %v4930_v39 = vpop.permute.xlu0 %4929  ;;  %v4922_v41 = vpop.permute.xlu1 %4921  ;;  %v15606_v18 = vadd.f32 %v4984_v25, %v14601_v51 }
 0x635   :  { %v4953_v22 = vsel %vm1325_vm5, %v4928_v14, %v4930_v39  ;;  %v4950_v7 = vsel %vm1325_vm5, %v4920_v50, %v4922_v41  ;;  %v7161_v50 = vadd.f32 %v7145_v58, %v7144_v44 }
 0x636   :  { %v4985_v29 = vmul.f32 %v4953_v22, %v17430_v9  ;;  %v4982_v30 = vmul.f32 %v4950_v7, %v17431_v27  ;;  %17432 = vst [vmem:[#allocation31_spill] sm:$0xff] %v15606_v18  ;;  %v7329_v43 = vmul.f32 %v15553_v6, %v15606_v18  ;;  %v7149_v47 = vmul.f32 %v15565_v42, %v15606_v18  ;;  %v17436_v27 = vld [vmem:[#allocation43_spill] sm:$0xff] }
 0x637   :  { %v7162_v51 = vadd.f32 %v7161_v50, %v7146_v11  ;;  %v17437_v11 = vld [vmem:[#allocation44_spill] sm:$0xff] }
 0x638   :  { %v15609_v10 = vadd.f32 %v4982_v30, %v14671_v1  ;;  %v4936_v55 = vpop.permute.xlu0 %4935  ;;  %v15615_v4 = vadd.f32 %v4985_v29, %v14691_v15  ;;  %v7328_v15 = vmul.f32 %v15562_v5, %v15612_v49  ;;  %v7166_v59 = vadd.f32 %v7149_v47, %v7148_v32  ;;  %v4934_v46 = vpop.permute.xlu1 %4933 }
 0x639   :  { %v4955_v22 = vsel %vm1325_vm5, %v4934_v46, %v4936_v55 }
 0x63a   :  { %v7327_v45 = vmul.f32 %v15582_v3, %v15609_v10  ;;  %v7147_v37 = vmul.f32 %v15590_v31, %v15609_v10  ;;  %v7330_v61 = vmul.f32 %v15572_v40, %v15615_v4  ;;  %v7150_v14 = vmul.f32 %v15579_v26, %v15615_v4 }
 0x63b   :  { %v7346_v34 = vadd.f32 %v7329_v43, %v7328_v15  ;;  %v4987_v9 = vmul.f32 %v4955_v22, %v17435_v48 }
 0x63c   :  { %v4932_v35 = vpop.permute.xlu0 %4931  ;;  %v7343_v33 = vadd.f32 %v7342_v17, %v7327_v45  ;;  %v7163_v1 = vadd.f32 %v7162_v51, %v7147_v37  ;;  %v7167_v41 = vadd.f32 %v7166_v59, %v7150_v14  ;;  %v4938_v63 = vpop.permute.xlu1 %4937  ;;  %v17438_v37 = vld [vmem:[#allocation45_spill] sm:$0xff] }
 0x63d   :  { %v4954_v57 = vsel %vm1325_vm5, %v4930_v39, %v4932_v35  ;;  %v7347_v25 = vadd.f32 %v7346_v34, %v7330_v61  ;;  %v4956_v7 = vsel %vm1325_vm5, %v4936_v55, %v4938_v63  ;;  %v15649_v50 = vadd.f32 %v4987_v9, %v14594_v62 }
 0x63e   :  { %v4986_v54 = vmul.f32 %v4954_v57, %v17433_v23  ;;  %7344 = vadd.xlane.f32.xlu1 %v7343_v33  ;;  %7164 = vadd.xlane.f32.xlu0 %v7163_v1  ;;  %v4988_v30 = vmul.f32 %v4956_v7, %v17436_v27 }
 0x63f   :  { %v7332_v33 = vmul.f32 %v15562_v5, %v15649_v50  ;;  %v11430_v7 = vpack.c.bf16 %v15649_v50, %v15612_v49 }
 0x640   :  { %v15636_v0 = vadd.f32 %v4986_v54, %v14675_v20  ;;  %v4940_v20 = vpop.permute.xlu1 %4939  ;;  %v4942_v44 = vpop.permute.xlu0 %4941  ;;  %v15653_v45 = vadd.f32 %v4988_v30, %v14604_v53 }
 0x641   :  { %v4957_v29 = vsel %vm1325_vm5, %v4938_v63, %v4940_v20  ;;  %v4958_v17 = vsel %vm1325_vm5, %v4940_v20, %v4942_v44 }
 0x642   :  { %17434 = vst [vmem:[#allocation32_spill] sm:$0xff] %v15636_v0  ;;  %v7331_v56 = vmul.f32 %v15582_v3, %v15636_v0  ;;  %v7151_v39 = vmul.f32 %v15590_v31, %v15636_v0  ;;  %v4989_v28 = vmul.f32 %v4957_v29, %v17437_v11  ;;  %v4990_v51 = vmul.f32 %v4958_v17, %v17438_v37 }
 0x643   :  { %v11428_v53 = vpack.c.bf16 %v15653_v45, %v15606_v18  ;;  %v7153_v32 = vmul.f32 %v15565_v42, %v15653_v45  ;;  %v7333_v14 = vmul.f32 %v15553_v6, %v15653_v45 }
 0x644   :  { %v7348_v13 = vadd.f32 %v7347_v25, %v7331_v56  ;;  %v7168_v58 = vadd.f32 %v7167_v41, %v7151_v39  ;;  %v15657_v55 = vadd.f32 %v4989_v28, %v14694_v36  ;;  %v7152_v36 = vmul.f32 %v15576_v24, %v15649_v50  ;;  %v6900_v28 = vld [vmem:[%s17301_s11] sm:$0xff] }
 0x645   :  { %v15682_v23 = vadd.f32 %v4990_v51, %v14678_v21  ;;  %v7351_v29 = vadd.f32 %v7333_v14, %v7332_v33  ;;  %v7181_v14 = vld [vmem:[%s17303_s13 + $0x8] sm:$0xff] }
 0x646   :  { %7349 = vadd.xlane.f32.xlu1 %v7348_v13  ;;  %7169 = vadd.xlane.f32.xlu0 %v7168_v58  ;;  %v7334_v34 = vmul.f32 %v15572_v40, %v15657_v55  ;;  %v7154_v39 = vmul.f32 %v15579_v26, %v15657_v55  ;;  %v7171_v20 = vadd.f32 %v7153_v32, %v7152_v36  ;;  %v6903_v36 = vld [vmem:[%s17301_s11 + $0x18] sm:$0xff] }
 0x647   :  { %17439 = vst [vmem:[#allocation33_spill] sm:$0xff] %v15682_v23  ;;  %v11436_v48 = vpack.c.bf16 %v15682_v23, %v15636_v0  ;;  %v11438_v17 = vpack.c.bf16 %v15657_v55, %v15615_v4  ;;  %v7155_v37 = vmul.f32 %v15590_v31, %v15682_v23  ;;  %v7335_v51 = vmul.f32 %v15582_v3, %v15682_v23 }
 0x648   :  { %v7172_v30 = vadd.f32 %v7171_v20, %v7154_v39  ;;  %v7352_v11 = vadd.f32 %v7351_v29, %v7334_v34  ;;  %v7180_v39 = vld [vmem:[%s17303_s13] sm:$0xff]  ;;  %v7183_v29 = vld [vmem:[%s17303_s13 + $0x18] sm:$0xff] }
 0x64a   :  { %v7173_v33 = vadd.f32 %v7172_v30, %v7155_v37 }
 0x668   :  { %v15659_v35 = vpop.f32.mrb[16].mxu0 }
 0x669   :  { %v7140_v1 = vmul.f32 %v15576_v24, %v15659_v35  ;;  %v7320_v62 = vmul.f32 %v15562_v5, %v15659_v35  ;;  %v15667_v43 = vpop.f32.mrb[17].mxu0  ;;  %v11426_v61 = vpack.c.bf16 %v15559_v38, %v15659_v35 }
 0x66a   :  { %v7141_v47 = vmul.f32 %v15565_v42, %v15667_v43  ;;  %v7321_v57 = vmul.f32 %v15553_v6, %v15667_v43  ;;  %v11424_v15 = vpack.c.bf16 %v15550_v19, %v15667_v43 }
 0x66b   :  { %v15684_v54 = vpop.f32.mrb[16].mxu1 }
 0x66c   :  { %17440 = vst [vmem:[#allocation35_spill] sm:$0xff] %v15684_v54  ;;  %11425 = vmatprep.subr.bf16.mxu0 %v11424_v15  ;;  %v15692_v59 = vpop.f32.mrb[17].mxu1  ;;  %v7322_v56 = vmul.f32 %v15572_v40, %v15684_v54  ;;  %v7336_v25 = vadd.f32 %v7321_v57, %v7320_v62  ;;  %v7142_v21 = vmul.f32 %v15579_v26, %v15684_v54  ;;  %v6901_v62 = vld [vmem:[%s17301_s11 + $0x8] sm:$0xff] }
 0x66d   :  { %11427 = vmatpush1.bf16.msra.mxu0 %v11426_v61  ;;  %v11432_v41 = vpack.c.bf16 %v15609_v10, %v15692_v59  ;;  %v7323_v13 = vmul.f32 %v15582_v3, %v15692_v59  ;;  %v7143_v58 = vmul.f32 %v15590_v31, %v15692_v59  ;;  %v7156_v46 = vadd.f32 %v7141_v47, %v7140_v1 }
 0x66e   :  { %11429 = vmatprep.subr.bf16.mxu0 %v11428_v53  ;;  %v11434_v63 = vpack.c.bf16 %v15568_v52, %v15684_v54  ;;  %v7337_v22 = vadd.f32 %v7336_v25, %v7322_v56  ;;  %v7353_v1 = vadd.f32 %v7352_v11, %v7335_v51  ;;  %v6902_v53 = vld [vmem:[%s17301_s11 + $0x10] sm:$0xff] }
 0x66f   :  { %11433 = vmatprep.subr.bf16.mxu1 %v11432_v41  ;;  %v7157_v9 = vadd.f32 %v7156_v46, %v7142_v21  ;;  %v7182_v25 = vld [vmem:[%s17303_s13 + $0x10] sm:$0xff] }
 0x670   :  { %11435 = vmatpush1.bf16.msra.mxu1 %v11434_v63  ;;  %v7338_v27 = vadd.f32 %v7337_v22, %v7323_v13 }
 0x671   :  { %11431 = vmatpush1.bf16.msra.mxu0 %v11430_v7  ;;  %11437 = vmatprep.subr.bf16.mxu1 %v11436_v48  ;;  %v7158_v44 = vadd.f32 %v7157_v9, %v7143_v58 }
 0x672   :  { %7339 = vadd.xlane.f32.xlu0 %v7338_v27 }
 0x673   :  { %7159 = vadd.xlane.f32.xlu1 %v7158_v44 }
 0x674   :  { %11439 = vmatpush1.bf16.msra.mxu1 %v11438_v17  ;;  %11096 = vmatmul.mubr.msk.f32.vlgmr.msra.gmra.mrb[18].mxu0 %vm370_vm8, %v6900_v28 }
 0x675   :  { %7010 = vmatprep.mubr.f32.mxu0 %v17393_v2 }
 0x676   :  { %7174 = vadd.xlane.f32.xlu0 %v7173_v33 }
 0x677   :  { %7354 = vadd.xlane.f32.xlu1 %v7353_v1  ;;  %11100 = vmatmul.mubr.msk.f32.vlgmr.msra.gmra.mrb[18].mxu1 %vm370_vm8, %v6900_v28 }
 0x678   :  { %7099 = vmatprep.mubr.f32.mxu1 %v17393_v2  ;;  %11097 = vmatmul.mubr.msk.f32.gmra.mrb[20].mxu0 %vm370_vm8, %v6901_v62 }
 0x679   :  { %7016 = vmatprep.mubr.f32.mxu0 %v17393_v2 }
 0x67b   :  { %11101 = vmatmul.mubr.msk.f32.gmra.mrb[20].mxu1 %vm370_vm8, %v6901_v62 }
 0x67c   :  { %7105 = vmatprep.mubr.f32.mxu1 %v17393_v2  ;;  %11098 = vmatmul.mubr.msk.f32.gmra.mrb[22].mxu0 %vm370_vm8, %v6902_v53 }
 0x67d   :  { %7022 = vmatprep.mubr.f32.mxu0 %v17393_v2 }
 0x67f   :  { %11102 = vmatmul.mubr.msk.f32.gmra.mrb[22].mxu1 %vm370_vm8, %v6902_v53 }
 0x680   :  { %7111 = vmatprep.mubr.f32.mxu1 %v17393_v2  ;;  %11099 = vmatmul.mubr.msk.f32.gmra.mrb[24].mxu0 %vm370_vm8, %v6903_v36 }
 0x681   :  { %7631 = vmatprep.mubr.f32.mxu0 %v17393_v2 }
 0x683   :  { %11103 = vmatmul.mubr.msk.f32.gmra.mrb[24].mxu1 %vm370_vm8, %v6903_v36 }
 0x684   :  { %7720 = vmatprep.mubr.f32.mxu1 %v17393_v2 }
 0x6cb   :  { %v7345_v47 = vpop.xlane.xlu1 %7344  ;;  %v7165_v57 = vpop.xlane.xlu0 %7164 }
 0x6cc   :  { %v7357_v61 = vmul.f32 0.00390625, %v7345_v47  ;;  %v7177_v34 = vmul.f32 0.00390625, %v7165_v57 }
 0x6ce   :  { %v7361_v13 = vmul.f32 %v7357_v61, %v7181_v14  ;;  %v7185_v63 = vmul.f32 %v7181_v14, %v7177_v34 }
 0x6d0   :  { %v7365_v30 = vsel %vm7188_vm12, %v7361_v13, 0.0  ;;  %v7190_v17 = vsel %vm7188_vm12, %v7185_v63, 0.0 }
 0x6d3   :  { %v7350_v15 = vpop.xlane.xlu1 %7349  ;;  %v7170_v32 = vpop.xlane.xlu0 %7169 }
 0x6d4   :  { %v7358_v56 = vmul.f32 0.00390625, %v7350_v15  ;;  %v7178_v21 = vmul.f32 0.00390625, %v7170_v32 }
 0x6d6   :  { %v7362_v20 = vmul.f32 %v7358_v56, %v7182_v25  ;;  %v7186_v48 = vmul.f32 %v7182_v25, %v7178_v21 }
 0x6d8   :  { %v7367_v1 = vsel %vm7188_vm12, %v7362_v20, 0.0  ;;  %v7192_v36 = vsel %vm7188_vm12, %v7186_v48, 0.0  ;;  %v7202_v20 = vld [vmem:[%s17304_s14] sm:$0x1] }
 0x6ff   :  { %v7340_v41 = vpop.xlane.xlu0 %7339 }
 0x700   :  { %v7356_v58 = vmul.f32 0.00390625, %v7340_v41  ;;  %v7160_v46 = vpop.xlane.xlu1 %7159 }
 0x701   :  { %v7176_v22 = vmul.f32 0.00390625, %v7160_v46 }
 0x702   :  { %v7360_v7 = vmul.f32 %v7356_v58, %v7180_v39 }
 0x703   :  { %v7184_v9 = vmul.f32 %v7180_v39, %v7176_v22  ;;  %v7175_v27 = vpop.xlane.xlu0 %7174 }
 0x704   :  { %v7364_v44 = vsel %vm7188_vm12, %v7360_v7, 0.0  ;;  %v7355_v11 = vpop.xlane.xlu1 %7354  ;;  %v7179_v28 = vmul.f32 0.00390625, %v7175_v27 }
 0x705   :  { %v7366_v37 = vadd.f32 %v7365_v30, %v7364_v44  ;;  %v7189_v51 = vsel %vm7188_vm12, %v7184_v9, 0.0  ;;  %v7359_v33 = vmul.f32 0.00390625, %v7355_v11  ;;  %v7206_v44 = vld [vmem:[%s17305_s15 + $0x8] sm:$0xff]  ;;  %v7205_v11 = vld [vmem:[%s17305_s15] sm:$0xff] }
 0x706   :  { %v7191_v62 = vadd.f32 %v7190_v17, %v7189_v51  ;;  %v7187_v53 = vmul.f32 %v7183_v29, %v7179_v28 }
 0x707   :  { %v7368_v47 = vadd.f32 %v7367_v1, %v7366_v37  ;;  %v7363_v57 = vmul.f32 %v7359_v33, %v7183_v29 }
 0x708   :  { %v7193_v15 = vadd.f32 %v7192_v36, %v7191_v62  ;;  %v7194_v32 = vsel %vm7188_vm12, %v7187_v53, 0.0  ;;  %v7208_v36 = vld [vmem:[%s17305_s15 + $0x18] sm:$0xff] }
 0x709   :  { %v7369_v61 = vsel %vm7188_vm12, %v7363_v57, 0.0 }
 0x70a   :  { %v7370_v14 = vadd.f32 %v7369_v61, %v7368_v47  ;;  %v7195_v34 = vadd.f32 %v7194_v32, %v7193_v15  ;;  %v7207_v47 = vld [vmem:[%s17305_s15 + $0x10] sm:$0xff] }
 0x70c   :  { %v7371_v56 = vrot.slane %v7370_v14, 4  ;;  %v7196_v25 = vrot.slane %v7195_v34, 4 }
 0x70e   :  { %v7372_v21 = vadd.f32 %v7371_v56, %v7370_v14  ;;  %v7197_v39 = vadd.f32 %v7196_v25, %v7195_v34 }
 0x710   :  { %v7373_v41 = vrot.slane %v7372_v21, 2  ;;  %v7198_v13 = vrot.slane %v7197_v39, 2 }
 0x712   :  { %v7374_v58 = vadd.f32 %v7373_v41, %v7372_v21  ;;  %v7199_v46 = vadd.f32 %v7198_v13, %v7197_v39  ;;  %v6904_v41 = vld [vmem:[%s17302_s12] sm:$0xff]  ;;  %v6905_v13 = vld [vmem:[%s17302_s12 + $0x8] sm:$0xff] }
 0x714   :  { %v7375_v63 = vrot.slane %v7374_v58, 1  ;;  %v7200_v22 = vrot.slane %v7199_v46, 1 }
 0x716   :  { %v7376_v7 = vadd.f32 %v7375_v63, %v7374_v58  ;;  %v7201_v48 = vadd.f32 %v7200_v22, %v7199_v46 }
 0x718   :  { %v7203_v9 = vadd.f32 %v7202_v20, %v7201_v48  ;;  %v7377_v29 = vadd.f32 %v7376_v7, %v7202_v20 }
 0x71a   :  { %v7204_v27 = vmax.f32 %v7203_v9, 0.0  ;;  %v7378_v30 = vmax.f32 %v7377_v29, 0.0  ;;  %v7230_v29 = vld [vmem:[%s17306_s16 + $0x8] sm:$0xff] }
 0x71c   :  { %v7212_v28 = vrot.slane %v7204_v27, %v17424_v60  ;;  %v7382_v17 = vrot.slane %v7378_v30, %v17424_v60  ;;  %v7229_v27 = vld [vmem:[%s17306_s16] sm:$0xff] }
 0x71e   :  { %v7214_v37 = vmul.f32 %v7212_v28, %v7206_v44  ;;  %v7213_v51 = vmul.f32 %v7212_v28, %v7205_v11  ;;  %v7384_v62 = vmul.f32 %v7382_v17, %v7206_v44  ;;  %v7383_v53 = vmul.f32 %v7382_v17, %v7205_v11 }
 0x71f   :  { %v7216_v32 = vmul.f32 %v7212_v28, %v7208_v36  ;;  %v7215_v61 = vmul.f32 %v7212_v28, %v7207_v47  ;;  %v7386_v56 = vmul.f32 %v7382_v17, %v7208_v36  ;;  %v7385_v25 = vmul.f32 %v7382_v17, %v7207_v47  ;;  %v7231_v36 = vld [vmem:[%s17306_s16 + $0x10] sm:$0xff] }
 0x720   :  { %v7220_v33 = vsel %vm7188_vm12, %v7214_v37, 0.0  ;;  %v7217_v1 = vsel %vm7188_vm12, %v7213_v51, 0.0  ;;  %v7390_v57 = vsel %vm7188_vm12, %v7384_v62, 0.0  ;;  %v7387_v15 = vsel %vm7188_vm12, %v7383_v53, 0.0  ;;  %v7232_v53 = vld [vmem:[%s17306_s16 + $0x18] sm:$0xff] }
 0x721   :  { %7221 = vadd.xlane.f32.xlu1 %v7220_v33  ;;  %7218 = vadd.xlane.f32.xlu0 %v7217_v1  ;;  %v7226_v14 = vsel %vm7188_vm12, %v7216_v32, 0.0  ;;  %v7223_v34 = vsel %vm7188_vm12, %v7215_v61, 0.0  ;;  %v7396_v21 = vsel %vm7188_vm12, %v7386_v56, 0.0  ;;  %v7393_v39 = vsel %vm7188_vm12, %v7385_v25, 0.0 }
 0x725   :  { %7391 = vadd.xlane.f32.xlu1 %v7390_v57  ;;  %7388 = vadd.xlane.f32.xlu0 %v7387_v15 }
 0x729   :  { %7227 = vadd.xlane.f32.xlu1 %v7226_v14  ;;  %7224 = vadd.xlane.f32.xlu0 %v7223_v34 }
 0x72d   :  { %7397 = vadd.xlane.f32.xlu1 %v7396_v21  ;;  %7394 = vadd.xlane.f32.xlu0 %v7393_v39 }
 0x73e   :  { %6910 = vperm.xlu1 %12334, %v6904_v41  }
 0x743   :  { %6915 = vperm.xlu0 %12333, %v6905_v13  }
 0x747   :  { %v15797_v58 = vpop.f32.mrb[18].mxu0 }
 0x748   :  { %v15803_v22 = vpop.f32.mrb[19].mxu0 }
 0x74a   :  { %v15799_v46 = vpop.f32.mrb[18].mxu1 }
 0x74b   :  { %v15801_v63 = vpop.f32.mrb[19].mxu1  ;;  %v15805_v20 = vpop.f32.mrb[20].mxu0 }
 0x74c   :  { %v15811_v9 = vpop.f32.mrb[21].mxu0 }
 0x74e   :  { %v15807_v7 = vpop.f32.mrb[20].mxu1 }
 0x74f   :  { %v15809_v48 = vpop.f32.mrb[21].mxu1 }
 0x7ae   :  { %v7222_v30 = vpop.xlane.xlu1 %7221  ;;  %v7219_v44 = vpop.xlane.xlu0 %7218 }
 0x7af   :  { %v7234_v11 = vadd.f32 %v7230_v29, %v7222_v30  ;;  %v7233_v28 = vadd.f32 %v7229_v27, %v7219_v44 }
 0x7b1   :  { %v11105_v17 = vmul.f32 -1.442695, %v7234_v11  ;;  %v11104_v37 = vmul.f32 -1.442695, %v7233_v28 }
 0x7b2   :  { %v7392_v51 = vpop.xlane.xlu1 %7391  ;;  %v7389_v33 = vpop.xlane.xlu0 %7388 }
 0x7b3   :  { %12851 = vpow2.f32 %v11105_v17  ;;  %v7400_v1 = vadd.f32 %v7392_v51, %v7230_v29  ;;  %v7399_v62 = vadd.f32 %v7389_v33, %v7229_v27 }
 0x7b4   :  { %12853 = vpow2.f32 %v11104_v37 }
 0x7b5   :  { %v11110_v47 = vmul.f32 -1.442695, %v7400_v1  ;;  %v11109_v57 = vmul.f32 -1.442695, %v7399_v62 }
 0x7b6   :  { %v7228_v15 = vpop.xlane.xlu1 %7227  ;;  %v7225_v32 = vpop.xlane.xlu0 %7224 }
 0x7b7   :  { %12855 = vpow2.f32 %v11110_v47  ;;  %v7236_v61 = vadd.f32 %v7232_v53, %v7228_v15  ;;  %v7235_v14 = vadd.f32 %v7231_v36, %v7225_v32 }
 0x7b8   :  { %12857 = vpow2.f32 %v11109_v57 }
 0x7b9   :  { %v11107_v34 = vmul.f32 -1.442695, %v7236_v61  ;;  %v11106_v56 = vmul.f32 -1.442695, %v7235_v14 }
 0x7ba   :  { %v7398_v25 = vpop.xlane.xlu1 %7397  ;;  %v7395_v21 = vpop.xlane.xlu0 %7394 }
 0x7bb   :  { %12859 = vpow2.f32 %v11107_v34  ;;  %v7402_v39 = vadd.f32 %v7398_v25, %v7232_v53  ;;  %v7401_v41 = vadd.f32 %v7395_v21, %v7231_v36 }
 0x7bc   :  { %12861 = vpow2.f32 %v11106_v56 }
 0x7bd   :  { %v12852_v13 = vpop.eup %12851  ;;  %v11112_v29 = vmul.f32 -1.442695, %v7402_v39  ;;  %v11111_v44 = vmul.f32 -1.442695, %v7401_v41  ;;  %v6907_v41 = vld [vmem:[%s17302_s12 + $0x18] sm:$0xff] }
 0x7be   :  { %v12854_v27 = vpop.eup %12853  ;;  %v7250_v30 = vadd.f32 1.0, %v12852_v13  ;;  %v6906_v13 = vld [vmem:[%s17302_s12 + $0x10] sm:$0xff] }
 0x7bf   :  { %v7249_v11 = vadd.f32 1.0, %v12854_v27  ;;  %12863 = vpow2.f32 %v11112_v29  ;;  %v15831_v29 = vpop.f32.mrb[22].mxu0  ;;  %v15833_v27 = vpop.f32.mrb[22].mxu1 }
 0x7c0   :  { %12865 = vrcp.f32 %v7250_v30  ;;  %v7532_v30 = vld [vmem:[%s17308_s18 + $0x8] sm:$0xff] }
 0x7c1   :  { %v12856_v28 = vpop.eup %12855  ;;  %12867 = vrcp.f32 %v7249_v11  ;;  %v15840_v11 = vpop.f32.mrb[23].mxu1 }
 0x7c2   :  { %v12858_v17 = vpop.eup %12857  ;;  %v7416_v37 = vadd.f32 1.0, %v12856_v28  ;;  %12869 = vpow2.f32 %v11111_v44  ;;  %v15838_v44 = vpop.f32.mrb[23].mxu0 }
 0x7c3   :  { %v7415_v51 = vadd.f32 1.0, %v12858_v17  ;;  %v15842_v28 = vpop.f32.mrb[24].mxu0  ;;  %v15844_v17 = vpop.f32.mrb[24].mxu1 }
 0x7c4   :  { %12871 = vrcp.f32 %v7416_v37  ;;  %v7531_v37 = vld [vmem:[%s17308_s18] sm:$0xff] }
 0x7c5   :  { %v12860_v33 = vpop.eup %12859  ;;  %12873 = vrcp.f32 %v7415_v51  ;;  %v15849_v51 = vpop.f32.mrb[25].mxu1 }
 0x7c6   :  { %v12862_v1 = vpop.eup %12861  ;;  %v7252_v62 = vadd.f32 1.0, %v12860_v33  ;;  %v7534_v33 = vld [vmem:[%s17308_s18 + $0x18] sm:$0xff] }
 0x7c7   :  { %v7251_v53 = vadd.f32 1.0, %v12862_v1  ;;  %v15854_v1 = vpop.f32.mrb[25].mxu0 }
 0x7c8   :  { %12875 = vrcp.f32 %v7252_v62  ;;  %v7533_v62 = vld [vmem:[%s17308_s18 + $0x10] sm:$0xff] }
 0x7c9   :  { %v12864_v36 = vpop.eup %12863  ;;  %12877 = vrcp.f32 %v7251_v53  ;;  %v11125_v53 = vld [vmem:[%s17368_s5 + $0x1] ss:$8 sm:$0xf] }
 0x7ca   :  { %v12866_v47 = vpop.eup %12865  ;;  %v7418_v57 = vadd.f32 1.0, %v12864_v36  ;;  %v7869_v36 = vrot.slane %v11125_v53, %v17424_v60 }
 0x7cb   :  { %v12868_v15 = vpop.eup %12867  ;;  %7268 = vperm.xlu1 %12334, %v12866_v47   ;;  %v7877_v47 = vrot.slane %v11125_v53, %v17426_v16 }
 0x7cc   :  { %v12870_v32 = vpop.eup %12869  ;;  %12879 = vrcp.f32 %v7418_v57  ;;  %7263 = vperm.xlu0 %12333, %v12868_v15   ;;  %v7805_v57 = vld [vmem:[%s17368_s5] ss:$8 sm:$0xf] }
 0x7cd   :  { %v7417_v61 = vadd.f32 1.0, %v12870_v32  ;;  %v7810_v15 = vrot.slane %v7805_v57, %v17424_v60  ;;  %v7818_v32 = vrot.slane %v7805_v57, %v17426_v16 }
 0x7ce   :  { %v12872_v14 = vpop.eup %12871 }
 0x7cf   :  { %v12874_v34 = vpop.eup %12873  ;;  %12881 = vrcp.f32 %v7417_v61  ;;  %v11146_v61 = vld [vmem:[%s17368_s5 + $0x2] ss:$8 sm:$0xf] }
 0x7d0   :  { %7434 = vperm.xlu0 %12333, %v12872_v14   ;;  %7429 = vperm.xlu1 %12334, %v12874_v34   ;;  %v8492_v14 = vrot.slane %v11146_v61, %v17424_v60  ;;  %v7873_v34 = vrot.slane %v11125_v53, %v17422_v8 }
 0x7d2   :  { %v12876_v56 = vpop.eup %12875 }
 0x7d3   :  { %v12878_v25 = vpop.eup %12877 }
 0x7d4   :  { %7278 = vperm.xlu0 %12333, %v12876_v56   ;;  %7273 = vperm.xlu1 %12334, %v12878_v25   ;;  %v11159_v56 = vld [vmem:[%s17368_s5 + $0x3] ss:$8 sm:$0xf]  ;;  %v8500_v25 = vrot.slane %v11146_v61, %v17426_v16 }
 0x7d6   :  { %v12880_v21 = vpop.eup %12879 }
 0x7d8   :  { %7444 = vperm.xlu0 %12333, %v12880_v21   ;;  %v7881_v21 = vrot.slane %v11125_v53, %v17427_v12  ;;  %v8861_v53 = vrot.slane %v11159_v56, %v17427_v12 }
 0x7d9   :  { %v12882_v39 = vpop.eup %12881 }
 0x7da   :  { %7439 = vperm.xlu1 %12334, %v12882_v39   ;;  %v8849_v39 = vrot.slane %v11159_v56, %v17424_v60 }
 0x7dc   :  { %6925 = vperm.xlu0 %12333, %v6907_v41   ;;  %v7814_v41 = vrot.slane %v7805_v57, %v17422_v8 }
 0x7de   :  { %6920 = vperm.xlu1 %12334, %v6906_v13   ;;  %v8857_v13 = vrot.slane %v11159_v56, %v17426_v16 }
 0x7e0   :  { %7542 = vperm.xlu0 %12333, %v7532_v30   ;;  %v7822_v30 = vrot.slane %v7805_v57, %v17427_v12 }
 0x7e2   :  { %7537 = vperm.xlu1 %12334, %v7531_v37   ;;  %v8496_v37 = vrot.slane %v11146_v61, %v17422_v8 }
 0x7e4   :  { %7552 = vperm.xlu0 %12333, %v7534_v33   ;;  %v8504_v33 = vrot.slane %v11146_v61, %v17427_v12 }
 0x7e6   :  { %7547 = vperm.xlu1 %12334, %v7533_v62   ;;  %v8853_v62 = vrot.slane %v11159_v56, %v17422_v8 }
 0x7e8   :  { %7884 = vrot.lane.b32.xlu0 %v7873_v34, %s12929_s22 }
 0x7ea   :  { %7882 = vrot.lane.b32.xlu1 %v7869_v36, %s12929_s22  ;;  %v6911_v36 = vpop.permute.xlu1 %6910 }
 0x7eb   :  { %v7098_v61 = vadd.f32 %v15801_v63, %v6911_v36  ;;  %v7009_v34 = vadd.f32 %v15803_v22, %v6911_v36 }
 0x7ec   :  { %7888 = vrot.lane.b32.xlu0 %v7881_v21, %s12929_s22 }
 0x7ee   :  { %7886 = vrot.lane.b32.xlu1 %v7877_v47, %s12929_s22  ;;  %v6916_v47 = vpop.permute.xlu0 %6915 }
 0x7ef   :  { %v15915_v56 = vadd.f32 %v15807_v7, %v6916_v47  ;;  %v7104_v21 = vadd.f32 %v15809_v48, %v6916_v47 }
 0x7f0   :  { %7825 = vrot.lane.b32.xlu0 %v7814_v41, %s12930_s24 }
 0x7f1   :  { %17443 = vst [vmem:[#allocation39_spill] sm:$0xff] %v15915_v56 }
 0x7f2   :  { %7823 = vrot.lane.b32.xlu1 %v7810_v15, %s12930_s24 }
 0x7f4   :  { %7829 = vrot.lane.b32.xlu0 %v7822_v30, %s12930_s24 }
 0x7f6   :  { %7827 = vrot.lane.b32.xlu1 %v7818_v32, %s12930_s24  ;;  %v15904_v32 = vadd.f32 %v15797_v58, %v6911_v36 }
 0x7f8   :  { %8507 = vrot.lane.b32.xlu0 %v8496_v37, %s12931_s26 }
 0x7fa   :  { %8505 = vrot.lane.b32.xlu1 %v8492_v14, %s12931_s26  ;;  %v15907_v14 = vadd.f32 %v15799_v46, %v6911_v36 }
 0x7fc   :  { %8511 = vrot.lane.b32.xlu0 %v8504_v33, %s12931_s26  ;;  %17441 = vst [vmem:[#allocation34_spill] sm:$0xff] %v15907_v14 }
 0x7fe   :  { %8509 = vrot.lane.b32.xlu1 %v8500_v25, %s12931_s26  ;;  %v15912_v25 = vadd.f32 %v15805_v20, %v6916_v47 }
 0x800   :  { %8864 = vrot.lane.b32.xlu0 %v8853_v62, %s12932_s28  ;;  %17442 = vst [vmem:[#allocation36_spill] sm:$0xff] %v15912_v25 }
 0x802   :  { %8862 = vrot.lane.b32.xlu1 %v8849_v39, %s12932_s28  ;;  %v7015_v39 = vadd.f32 %v15811_v9, %v6916_v47 }
 0x804   :  { %8868 = vrot.lane.b32.xlu0 %v8861_v53, %s12932_s28 }
 0x806   :  { %8866 = vrot.lane.b32.xlu1 %v8857_v13, %s12932_s28 }
 0x84a   :  { %v7269_v57 = vpop.permute.xlu1 %7268 }
 0x84b   :  { %v7264_v15 = vpop.permute.xlu0 %7263  ;;  %v7285_v58 = vmul.f32 %v7269_v57, %v15576_v24  ;;  %v7286_v41 = vmul.f32 %v7269_v57, %v15565_v42  ;;  %v7287_v46 = vmul.f32 %v7269_v57, %v15579_v26  ;;  %v7288_v63 = vmul.f32 %v7269_v57, %v15590_v31 }
 0x84c   :  { %v7281_v22 = vmul.f32 %v7264_v15, %v15576_v24  ;;  %v7282_v20 = vmul.f32 %v7264_v15, %v15565_v42  ;;  %v7283_v13 = vmul.f32 %v7264_v15, %v15579_v26  ;;  %v7284_v7 = vmul.f32 %v7264_v15, %v15590_v31 }
 0x84f   :  { %v7430_v30 = vpop.permute.xlu1 %7429  ;;  %v7435_v48 = vpop.permute.xlu0 %7434 }
 0x850   :  { %v7447_v9 = vmul.f32 %v7430_v30, %v15562_v5  ;;  %v7448_v37 = vmul.f32 %v7430_v30, %v15553_v6  ;;  %v7449_v33 = vmul.f32 %v7430_v30, %v15572_v40  ;;  %v7450_v62 = vmul.f32 %v7430_v30, %v15582_v3 }
 0x851   :  { %v7451_v53 = vmul.f32 %v7435_v48, %v15562_v5  ;;  %v7452_v36 = vmul.f32 %v7435_v48, %v15553_v6  ;;  %v7453_v47 = vmul.f32 %v7435_v48, %v15572_v40  ;;  %v7454_v57 = vmul.f32 %v7435_v48, %v15582_v3 }
 0x852   :  { %v7463_v12 = vadd.f32 %v7447_v9, %v7281_v22  ;;  %v7464_v15 = vadd.f32 %v7448_v37, %v7282_v20  ;;  %v7465_v8 = vadd.f32 %v7449_v33, %v7283_v13  ;;  %v7466_v16 = vadd.f32 %v7450_v62, %v7284_v7 }
 0x853   :  { %v7467_v60 = vadd.f32 %v7451_v53, %v7285_v58  ;;  %v7468_v2 = vadd.f32 %v7452_v36, %v7286_v41  ;;  %v7469_v23 = vadd.f32 %v7453_v47, %v7287_v46  ;;  %v7470_v0 = vadd.f32 %v7454_v57, %v7288_v63  ;;  %v7274_v18 = vpop.permute.xlu1 %7273  ;;  %v7279_v56 = vpop.permute.xlu0 %7278 }
 0x854   :  { %v15936_v30 = vmul.f32 %v7463_v12, %v15659_v35  ;;  %v15939_v14 = vmul.f32 %v7465_v8, %v15684_v54  ;;  %v7289_v25 = vmul.f32 %v7274_v18, %v15576_v24  ;;  %v7290_v48 = vmul.f32 %v7274_v18, %v15565_v42 }
 0x855   :  { %v7483_v22 = vmul.f32 %v7467_v60, %v15559_v38  ;;  %v7485_v20 = vmul.f32 %v7469_v23, %v15568_v52  ;;  %v7291_v58 = vmul.f32 %v7274_v18, %v15579_v26  ;;  %v7292_v41 = vmul.f32 %v7274_v18, %v15590_v31 }
 0x856   :  { %v7293_v46 = vmul.f32 %v7279_v56, %v15576_v24  ;;  %v7295_v12 = vmul.f32 %v7279_v56, %v15579_v26  ;;  %v7296_v63 = vmul.f32 %v7279_v56, %v15590_v31  ;;  %v7294_v8 = vmul.f32 %v7279_v56, %v15565_v42 }
 0x857   :  { %v7445_v13 = vpop.permute.xlu0 %7444  ;;  %v7480_v7 = vmul.f32 %v7464_v15, %v15667_v43  ;;  %v7484_v9 = vmul.f32 %v7468_v2, %v15550_v19  ;;  %v7482_v60 = vmul.f32 %v7466_v16, %v15692_v59  ;;  %v7486_v23 = vmul.f32 %v7470_v0, %v15609_v10 }
 0x858   :  { %v7459_v37 = vmul.f32 %v7445_v13, %v15562_v5  ;;  %v7461_v18 = vmul.f32 %v7445_v13, %v15572_v40  ;;  %v7462_v24 = vmul.f32 %v7445_v13, %v15582_v3  ;;  %v7460_v26 = vmul.f32 %v7445_v13, %v15553_v6 }
 0x859   :  { %v7440_v31 = vpop.permute.xlu1 %7439  ;;  %v7496_v33 = vmul.f32 %v7480_v7, %v7009_v34  ;;  %v7500_v42 = vmul.f32 %v7484_v9, %v7015_v39  ;;  %v7498_v56 = vmul.f32 %v7482_v60, %v7098_v61  ;;  %v7502_v62 = vmul.f32 %v7486_v23, %v7104_v21  ;;  %v17444_v9 = vld [vmem:[#allocation36_spill] sm:$0xff]  ;;  %v17445_v23 = vld [vmem:[#allocation34_spill] sm:$0xff] }
 0x85a   :  { %v7455_v53 = vmul.f32 %v7440_v31, %v15562_v5  ;;  %v7456_v2 = vmul.f32 %v7440_v31, %v15553_v6  ;;  %v7457_v16 = vmul.f32 %v7440_v31, %v15572_v40  ;;  %v7458_v0 = vmul.f32 %v7440_v31, %v15582_v3  ;;  %v17448_v31 = vld [vmem:[#allocation29_spill] sm:$0xff] }
 0x85b   :  { %v7475_v36 = vadd.f32 %v7459_v37, %v7293_v46  ;;  %v7477_v47 = vadd.f32 %v7461_v18, %v7295_v12  ;;  %v7478_v57 = vadd.f32 %v7462_v24, %v7296_v63  ;;  %v6926_v15 = vpop.permute.xlu0 %6925  ;;  %v7476_v52 = vadd.f32 %v7460_v26, %v7294_v8  ;;  %v17446_v37 = vld [vmem:[#allocation39_spill] sm:$0xff] }
 0x85c   :  { %v7471_v54 = vadd.f32 %v7455_v53, %v7289_v25  ;;  %v7472_v13 = vadd.f32 %v7456_v2, %v7290_v48  ;;  %v7473_v38 = vadd.f32 %v7457_v16, %v7291_v58  ;;  %v7474_v34 = vadd.f32 %v7458_v0, %v7292_v41  ;;  %v17447_v18 = vld [vmem:[#allocation31_spill] sm:$0xff]  ;;  %v17452_v53 = vld [vmem:[#allocation33_spill] sm:$0xff] }
 0x85d   :  { %v6921_v39 = vpop.permute.xlu1 %6920  ;;  %v7491_v61 = vmul.f32 %v7475_v36, %v15649_v50  ;;  %v7493_v5 = vmul.f32 %v7477_v47, %v15657_v55  ;;  %v7025_v6 = vadd.f32 %v15842_v28, %v6926_v15  ;;  %v7114_v40 = vadd.f32 %v15844_v17, %v6926_v15 }
 0x85e   :  { %v7487_v3 = vmul.f32 %v7471_v54, %v15612_v49  ;;  %v7489_v21 = vmul.f32 %v7473_v38, %v15615_v4  ;;  %v7019_v46 = vadd.f32 %v15831_v29, %v6921_v39  ;;  %v7021_v25 = vadd.f32 %v15838_v44, %v6921_v39 }
 0x85f   :  { %v7108_v48 = vadd.f32 %v15833_v27, %v6921_v39  ;;  %v7110_v58 = vadd.f32 %v15840_v11, %v6921_v39  ;;  %v7116_v41 = vadd.f32 %v15849_v51, %v6926_v15  ;;  %v7507_v12 = vmul.f32 %v7491_v61, %v7025_v6 }
 0x860   :  { %v7503_v63 = vmul.f32 %v7487_v3, %v7019_v46  ;;  %v7509_v8 = vmul.f32 %v7493_v5, %v7114_v40  ;;  %v7027_v28 = vadd.f32 %v15854_v1, %v6926_v15  ;;  %v7492_v17 = vmul.f32 %v7476_v52, %v15653_v45  ;;  %v11184_v3 = vld [vmem:[%s17368_s5 + $0x5] ss:$8 sm:$0xf] }
 0x861   :  { %v7505_v54 = vmul.f32 %v7489_v21, %v7108_v48  ;;  %v7512_v38 = vadd.f32 %v7496_v33, %v15667_v43  ;;  %v7516_v29 = vadd.f32 %v7500_v42, %v15550_v19  ;;  %v7514_v44 = vadd.f32 %v7498_v56, %v15692_v59  ;;  %v15979_v7 = vpop.permute.xlu1 %7537  ;;  %v17449_v33 = vld [vmem:[#allocation35_spill] sm:$0xff]  ;;  %v7528_v46 = vld [vmem:[%s17307_s17 + $0x8] sm:$0xff] }
 0x862   :  { %v7508_v27 = vmul.f32 %v7492_v17, %v7027_v28  ;;  %v7518_v11 = vadd.f32 %v7502_v62, %v15609_v10  ;;  %v7495_v51 = vmul.f32 %v15936_v30, %v15904_v32  ;;  %v7499_v60 = vmul.f32 %v7483_v22, %v17444_v9  ;;  %v17450_v30 = vld [vmem:[#allocation30_spill] sm:$0xff] }
 0x863   :  { %v11440_v1 = vpack.c.bf16 %v7516_v29, %v7512_v38  ;;  %v7497_v52 = vmul.f32 %v15939_v14, %v17445_v23  ;;  %v7501_v43 = vmul.f32 %v7485_v20, %v17446_v37  ;;  %v7488_v19 = vmul.f32 %v7472_v13, %v17447_v18  ;;  %v17451_v14 = vld [vmem:[#allocation32_spill] sm:$0xff] }
 0x864   :  { %v7524_v59 = vadd.f32 %v7508_v27, %v15653_v45  ;;  %v11448_v24 = vpack.c.bf16 %v7518_v11, %v7514_v44  ;;  %v7511_v26 = vadd.f32 %v7495_v51, %v15659_v35  ;;  %v7515_v10 = vadd.f32 %v7499_v60, %v17448_v31  ;;  %v7530_v29 = vld [vmem:[%s17307_s17 + $0x18] sm:$0xff]  ;;  %v17457_v51 = vld [vmem:[#allocation11_spill] sm:$0xff] }
 0x865   :  { %11441 = vmatprep.subr.bf16.mxu0 %v11440_v1  ;;  %v7513_v32 = vadd.f32 %v7497_v52, %v17449_v33  ;;  %v7517_v22 = vadd.f32 %v7501_v43, %v17450_v30  ;;  %v15994_v42 = vpop.permute.xlu1 %7547  ;;  %v7504_v56 = vmul.f32 %v7488_v19, %v7021_v25  ;;  %v7490_v62 = vmul.f32 %v7474_v34, %v17451_v14  ;;  %v17454_v25 = vld [vmem:[#allocation10_spill] sm:$0xff]  ;;  %v7543_v43 = vpop.permute.xlu0 %7542 }
 0x866   :  { %11449 = vmatprep.subr.bf16.mxu1 %v11448_v24  ;;  %v11442_v20 = vpack.c.bf16 %v7515_v10, %v7511_v26  ;;  %v7494_v2 = vmul.f32 %v7478_v57, %v17452_v53  ;;  %v7519_v45 = vadd.f32 %v7503_v63, %v15612_v49  ;;  %v7523_v35 = vadd.f32 %v7507_v12, %v15649_v50  ;;  %v7529_v12 = vld [vmem:[%s17307_s17 + $0x10] sm:$0xff] }
 0x867   :  { %v11450_v16 = vpack.c.bf16 %v7517_v22, %v7513_v32  ;;  %v7520_v0 = vadd.f32 %v7504_v56, %v17447_v18  ;;  %v7506_v36 = vmul.f32 %v7490_v62, %v7110_v58  ;;  %v7521_v47 = vadd.f32 %v7505_v54, %v15615_v4  ;;  %v7527_v4 = vld [vmem:[%s17307_s17] sm:$0xff]  ;;  %v17456_v54 = vld [vmem:[#allocation12_spill] sm:$0xff] }
 0x868   :  { %11443 = vmatpush1.bf16.msra.mxu0 %v11442_v20  ;;  %v7510_v15 = vmul.f32 %v7494_v2, %v7116_v41  ;;  %v11446_v13 = vpack.c.bf16 %v7523_v35, %v7519_v45  ;;  %v7525_v39 = vadd.f32 %v7509_v8, %v15657_v55  ;;  %v17453_v21 = vmov 0.0   ;;  %v17455_v8 = vld [vmem:[#allocation9_spill] sm:$0xff]  ;;  %v17458_v2 = vld [vmem:[#allocation15_spill] sm:$0xff] }
 0x869   :  { %11451 = vmatpush1.bf16.msra.mxu1 %v11450_v16  ;;  %v11444_v34 = vpack.c.bf16 %v7524_v59, %v7520_v0  ;;  %v7522_v61 = vadd.f32 %v7506_v36, %v17451_v14  ;;  %v16004_v57 = vpop.permute.xlu1 %7882  ;;  %v9437_v48 = vrot.slane %v11184_v3, %v17454_v25  ;;  %v9445_v28 = vrot.slane %v11184_v3, %v17455_v8  ;;  %v11197_v27 = vld [vmem:[%s17368_s5 + $0x6] ss:$8 sm:$0xf]  ;;  %v16076_v18 = vpop.permute.xlu0 %7552 }
 0x86a   :  { %v7526_v49 = vadd.f32 %v7510_v15, %v17452_v53  ;;  %v11454_v50 = vpack.c.bf16 %v7525_v39, %v7521_v47  ;;  %v7898_v5 = vmul.f32 0.0, %v16004_v57  ;;  %v9441_v38 = vrot.slane %v11184_v3, %v17456_v54  ;;  %v17459_v0 = vld [vmem:[#allocation17_spill] sm:$0xff] }
 0x86b   :  { %11445 = vmatprep.subr.bf16.mxu0 %v11444_v34  ;;  %v9449_v9 = vrot.slane %v11184_v3, %v17457_v51  ;;  %v9794_v60 = vrot.slane %v11197_v27, %v17454_v25  ;;  %v9802_v23 = vrot.slane %v11197_v27, %v17455_v8  ;;  %v9798_v52 = vrot.slane %v11197_v27, %v17456_v54 }
 0x86c   :  { %v11452_v6 = vpack.c.bf16 %v7526_v49, %v7522_v61  ;;  %11447 = vmatpush1.bf16.msra.mxu0 %v11446_v13  ;;  %v12440_v40 = vpack.i.bf16 %v7898_v5, %v7898_v5  ;;  %v9806_v37 = vrot.slane %v11197_v27, %v17457_v51 }
 0x86d   :  { %v16011_v55 = vpop.permute.xlu1 %7886  ;;  %v7885_v19 = vpop.permute.xlu0 %7884 }
 0x86e   :  { %11453 = vmatprep.subr.bf16.mxu1 %v11452_v6  ;;  %12436 = vrot.lane.b32.xlu1 %v12440_v40, %s12935_s2  ;;  %v16103_v13 = vsel %vm248_vm0, %v16004_v57, %v7885_v19  ;;  %v16107_v39 = vsel %vm248_vm0, %v7885_v19, %v16011_v55 }
 0x86f   :  { %11455 = vmatpush1.bf16.msra.mxu1 %v11454_v50  ;;  %11113 = vmatmul.mubr.msk.f32.vlgmr.msra.gmra.mrb[26].mxu0 %vm370_vm8, %v7527_v4  ;;  %v17460_v50 = vld [vmem:[#allocation21_spill] sm:$0xff] }
 0x870   :  { %7637 = vmatprep.mubr.f32.mxu0 %v17453_v21  ;;  %12441 = vrot.lane.b32.xlu0 %v12440_v40, %s12935_s2  ;;  %v17461_v40 = vld [vmem:[#allocation24_spill] sm:$0xff] }
 0x871   :  { %v16024_v58 = vpop.permute.xlu1 %7823  ;;  %v16078_v59 = vpop.permute.xlu0 %7888 }
 0x872   :  { %11117 = vmatmul.mubr.msk.f32.vlgmr.msra.gmra.mrb[26].mxu1 %vm370_vm8, %v7527_v4  ;;  %v7839_v41 = vmul.f32 0.0, %v16024_v58  ;;  %v16122_v57 = vsel %vm248_vm0, %v16011_v55, %v16078_v59 }
 0x873   :  { %7726 = vmatprep.mubr.f32.mxu1 %v17453_v21  ;;  %11114 = vmatmul.mubr.msk.f32.gmra.mrb[28].mxu0 %vm370_vm8, %v7528_v46 }
 0x874   :  { %7643 = vmatprep.mubr.f32.mxu0 %v17453_v21  ;;  %v12445_v63 = vpack.i.bf16 %v7839_v41, %v7839_v41  ;;  %9450 = vrot.lane.b32.xlu0 %v9437_v48, %s12933_s9 }
 0x875   :  { %v16036_v17 = vpop.permute.xlu1 %7827  ;;  %v7826_v24 = vpop.permute.xlu0 %7825 }
 0x876   :  { %11118 = vmatmul.mubr.msk.f32.gmra.mrb[28].mxu1 %vm370_vm8, %v7528_v46  ;;  %12446 = vrot.lane.b32.xlu1 %v12445_v63, %s17400_s29  ;;  %v16133_v48 = vsel %vm187_vm1, %v7826_v24, %v16036_v17 }
 0x877   :  { %7732 = vmatprep.mubr.f32.mxu1 %v17453_v21  ;;  %11115 = vmatmul.mubr.msk.f32.gmra.mrb[30].mxu0 %vm370_vm8, %v7529_v12 }
 0x878   :  { %7649 = vmatprep.mubr.f32.mxu0 %v17453_v21  ;;  %9454 = vrot.lane.b32.xlu0 %v9445_v28, %s12933_s9 }
 0x879   :  { %v16048_v44 = vpop.permute.xlu1 %8505  ;;  %v16080_v26 = vpop.permute.xlu0 %7829 }
 0x87a   :  { %11119 = vmatmul.mubr.msk.f32.gmra.mrb[30].mxu1 %vm370_vm8, %v7529_v12  ;;  %9452 = vrot.lane.b32.xlu1 %v9441_v38, %s12933_s9  ;;  %v8521_v11 = vmul.f32 0.0, %v16048_v44  ;;  %v16138_v41 = vsel %vm187_vm1, %v16036_v17, %v16080_v26 }
 0x87b   :  { %7738 = vmatprep.mubr.f32.mxu1 %v17453_v21  ;;  %11116 = vmatmul.mubr.msk.f32.gmra.mrb[32].mxu0 %vm370_vm8, %v7530_v29 }
 0x87c   :  { %12451 = vrot.lane.b32.xlu0 %v12445_v63, %s17400_s29  ;;  %8086 = vmatprep.mubr.f32.mxu0 %v17453_v21  ;;  %v16063_v1 = vpack.i.bf16 %v8521_v11, %v8521_v11 }
 0x87d   :  { %v8508_v31 = vpop.permute.xlu0 %8507  ;;  %v8510_v10 = vpop.permute.xlu1 %8509 }
 0x87e   :  { %11120 = vmatmul.mubr.msk.f32.gmra.mrb[32].mxu1 %vm370_vm8, %v7530_v29  ;;  %9456 = vrot.lane.b32.xlu1 %v9449_v9, %s12933_s9  ;;  %v16143_v28 = vsel %vm876_vm2, %v8508_v31, %v8510_v10 }
 0x87f   :  { %8175 = vmatprep.mubr.f32.mxu1 %v17453_v21 }
 0x880   :  { %9807 = vrot.lane.b32.xlu0 %v9794_v60, %s17399_s7 }
 0x881   :  { %v16082_v33 = vpop.permute.xlu0 %8511  ;;  %v16084_v32 = vpop.permute.xlu1 %8862 }
 0x882   :  { %12456 = vrot.lane.b32.xlu1 %v16063_v1, %s17399_s7 }
 0x884   :  { %9811 = vrot.lane.b32.xlu0 %v9802_v23, %s17399_s7 }
 0x885   :  { %v16086_v30 = vpop.permute.xlu0 %8864  ;;  %v16088_v22 = vpop.permute.xlu1 %8866 }
 0x886   :  { %9809 = vrot.lane.b32.xlu1 %v9798_v52, %s17399_s7 }
 0x889   :  { %v16092_v53 = vpop.permute.xlu0 %8868 }
 0x88a   :  { %9813 = vrot.lane.b32.xlu1 %v9806_v37, %s17399_s7 }
 0x8e0   :  { %v16109_v34 = vpop.permute.xlu1 %12436 }
 0x8e2   :  { %v16149_v11 = vpop.permute.xlu0 %12441 }
 0x8e8   :  { %v16153_v52 = vpop.permute.xlu1 %12446 }
 0x942   :  { %v7633_v56 = vpop.f32.mrb[26].mxu0 }
 0x943   :  { %v7634_v14 = vadd.f32 %v7633_v56, %v15979_v7  ;;  %v7635_v62 = vpop.f32.mrb[27].mxu0 }
 0x944   :  { %v7636_v20 = vadd.f32 %v7635_v62, %v15979_v7  ;;  %v16161_v62 = vsel %vm876_vm2, %v16048_v44, %v8508_v31  ;;  %v17464_v31 = vld [vmem:[#allocation14_spill] sm:$0xff] }
 0x945   :  { %v16095_v45 = vadd.f32 %v7634_v14, %v17458_v2  ;;  %v7722_v35 = vpop.f32.mrb[26].mxu1 }
 0x946   :  { %v7723_v16 = vadd.f32 %v7722_v35, %v15979_v7  ;;  %v16099_v36 = vadd.f32 %v7636_v20, %v17459_v0  ;;  %v7724_v47 = vpop.f32.mrb[27].mxu1  ;;  %v7639_v15 = vpop.f32.mrb[28].mxu0  ;;  %v16165_v20 = vsel %vm876_vm2, %v8510_v10, %v16082_v33  ;;  %v17462_v35 = vld [vmem:[#allocation13_spill] sm:$0xff] }
 0x947   :  { %v7725_v61 = vadd.f32 %v7724_v47, %v15979_v7  ;;  %v7641_v49 = vpop.f32.mrb[29].mxu0  ;;  %v7899_v6 = vmul.f32 %v16103_v13, %v16095_v45  ;;  %v16129_v7 = vsel %vm187_vm1, %v16024_v58, %v7826_v24  ;;  %v7640_v38 = vadd.f32 %v7639_v15, %v7543_v43  ;;  %v17463_v15 = vld [vmem:[#allocation19_spill] sm:$0xff] }
 0x948   :  { %v16113_v5 = vadd.f32 %v7723_v16, %v17460_v50  ;;  %v7900_v4 = vmul.f32 %v16107_v39, %v16099_v36  ;;  %v7840_v27 = vmul.f32 %v16129_v7, %v16095_v45  ;;  %v7642_v9 = vadd.f32 %v7641_v49, %v7543_v43  ;;  %v17465_v50 = vld [vmem:[#allocation20_spill] sm:$0xff] }
 0x949   :  { %v16125_v3 = vadd.f32 %v7725_v61, %v17461_v40  ;;  %v7728_v46 = vpop.f32.mrb[28].mxu1  ;;  %v7841_v23 = vmul.f32 %v16133_v48, %v16099_v36  ;;  %v16169_v16 = vadd.f32 %v7640_v38, %v17462_v35  ;;  %v8522_v47 = vmul.f32 %v16161_v62, %v16095_v45  ;;  %v16191_v38 = vpop.permute.xlu0 %9450 }
 0x94a   :  { %v7730_v12 = vpop.f32.mrb[29].mxu1  ;;  %v7645_v55 = vpop.f32.mrb[30].mxu0  ;;  %v7901_v63 = vmul.f32 %v16122_v57, %v16113_v5  ;;  %v7729_v17 = vadd.f32 %v7728_v46, %v7543_v43  ;;  %v12460_v60 = vpack.i.bf16 %v7900_v4, %v7899_v6  ;;  %v7842_v56 = vmul.f32 %v16138_v41, %v16113_v5 }
 0x94b   :  { %v7647_v58 = vpop.f32.mrb[31].mxu0  ;;  %v7902_v29 = vmul.f32 %v16078_v59, %v16125_v3  ;;  %v7731_v37 = vadd.f32 %v7730_v12, %v7543_v43  ;;  %v7843_v14 = vmul.f32 %v16080_v26, %v16125_v3  ;;  %v16178_v61 = vadd.f32 %v7642_v9, %v17464_v31 }
 0x94c   :  { %12461 = vrot.lane.b32.xlu1 %v12460_v60, %s12935_s2  ;;  %v16175_v44 = vadd.f32 %v7729_v17, %v17463_v15  ;;  %v12470_v10 = vpack.i.bf16 %v7841_v23, %v7840_v27  ;;  %v8523_v49 = vmul.f32 %v16143_v28, %v16099_v36  ;;  %v8524_v46 = vmul.f32 %v16165_v20, %v16113_v5 }
 0x94d   :  { %v7734_v19 = vpop.f32.mrb[30].mxu1  ;;  %v12465_v24 = vpack.i.bf16 %v7902_v29, %v7901_v63  ;;  %v16183_v6 = vadd.f32 %v7731_v37, %v17465_v50  ;;  %v12475_v40 = vpack.i.bf16 %v7843_v14, %v7842_v56  ;;  %v8525_v12 = vmul.f32 %v16082_v33, %v16125_v3  ;;  %v16193_v29 = vpop.permute.xlu1 %9452 }
 0x94e   :  { %v7736_v2 = vpop.f32.mrb[31].mxu1  ;;  %v7651_v43 = vpop.f32.mrb[32].mxu0  ;;  %v12480_v27 = vpack.i.bf16 %v8523_v49, %v8522_v47  ;;  %v7904_v17 = vmul.f32 %v16103_v13, %v16169_v16  ;;  %v7905_v9 = vmul.f32 %v16107_v39, %v16178_v61  ;;  %v7906_v23 = vmul.f32 %v16122_v57, %v16175_v44 }
 0x94f   :  { %12466 = vrot.lane.b32.xlu0 %v12465_v24, %s12935_s2  ;;  %v7653_v0 = vpop.f32.mrb[33].mxu0  ;;  %v12485_v60 = vpack.i.bf16 %v8525_v12, %v8524_v46  ;;  %v7907_v37 = vmul.f32 %v16078_v59, %v16183_v6  ;;  %v7646_v24 = vadd.f32 %v7645_v55, %v15994_v42  ;;  %v7735_v56 = vadd.f32 %v7734_v19, %v15994_v42  ;;  %v16217_v19 = vpop.permute.xlu0 %9454  ;;  %v17467_v46 = vld [vmem:[#allocation23_spill] sm:$0xff] }
 0x950   :  { %12471 = vrot.lane.b32.xlu1 %v12470_v10, %s17400_s29  ;;  %v7737_v14 = vadd.f32 %v7736_v2, %v15994_v42  ;;  %v12490_v35 = vpack.i.bf16 %v7905_v9, %v7904_v17  ;;  %v7845_v47 = vmul.f32 %v16129_v7, %v16169_v16  ;;  %v7846_v15 = vmul.f32 %v16133_v48, %v16178_v61  ;;  %v17466_v2 = vld [vmem:[#allocation16_spill] sm:$0xff] }
 0x951   :  { %v7740_v4 = vpop.f32.mrb[32].mxu1  ;;  %v7648_v31 = vadd.f32 %v7647_v58, %v15994_v42  ;;  %v12495_v10 = vpack.i.bf16 %v7907_v37, %v7906_v23  ;;  %v7847_v49 = vmul.f32 %v16138_v41, %v16175_v44  ;;  %v7848_v55 = vmul.f32 %v16080_v26, %v16183_v6  ;;  %v16219_v50 = vpop.permute.xlu1 %9456  ;;  %v17468_v42 = vld [vmem:[#allocation26_spill] sm:$0xff] }
 0x952   :  { %v7742_v63 = vpop.f32.mrb[33].mxu1  ;;  %v16226_v12 = vadd.f32 %v7735_v56, %v17467_v46  ;;  %v16230_v58 = vadd.f32 %v7737_v14, %v17468_v42  ;;  %v8527_v17 = vmul.f32 %v16161_v62, %v16169_v16  ;;  %v8528_v9 = vmul.f32 %v16143_v28, %v16178_v61  ;;  %v17470_v42 = vld [vmem:[#allocation22_spill] sm:$0xff] }
 0x953   :  { %12476 = vrot.lane.b32.xlu0 %v12475_v40, %s17400_s29  ;;  %v16223_v40 = vadd.f32 %v7646_v24, %v17466_v2  ;;  %v12505_v37 = vpack.i.bf16 %v7848_v55, %v7847_v49  ;;  %v8529_v24 = vmul.f32 %v16165_v20, %v16175_v44  ;;  %v8530_v56 = vmul.f32 %v16082_v33, %v16183_v6 }
 0x954   :  { %12481 = vrot.lane.b32.xlu1 %v12480_v27, %s17399_s7  ;;  %v12500_v27 = vpack.i.bf16 %v7846_v15, %v7845_v47  ;;  %v7652_v14 = vadd.f32 %v7651_v43, %v16076_v18  ;;  %v16247_v47 = vpop.permute.xlu0 %12451  ;;  %v7911_v49 = vmul.f32 %v16122_v57, %v16226_v12  ;;  %v7912_v55 = vmul.f32 %v16078_v59, %v16230_v58 }
 0x955   :  { %v16249_v15 = vpop.permute.xlu1 %12456  ;;  %v7654_v2 = vadd.f32 %v7653_v0, %v16076_v18  ;;  %v12515_v43 = vpack.i.bf16 %v8530_v56, %v8529_v24  ;;  %v7852_v0 = vmul.f32 %v16138_v41, %v16226_v12  ;;  %v17473_v24 = vld [vmem:[#allocation25_spill] sm:$0xff] }
 0x957   :  { %12486 = vrot.lane.b32.xlu0 %v12485_v60, %s17399_s7  ;;  %v17469_v60 = vld [vmem:[#allocation18_spill] sm:$0xff]  ;;  %v16277_v56 = vadd.f32 %v7654_v2, %v17473_v24 }
 0x958   :  { %12491 = vrot.lane.b32.xlu1 %v12490_v35, %s12935_s2  ;;  %v16237_v23 = vadd.f32 %v7648_v31, %v17469_v60  ;;  %v7741_v35 = vadd.f32 %v7740_v4, %v16076_v18  ;;  %v7743_v31 = vadd.f32 %v7742_v63, %v16076_v18  ;;  %v7909_v4 = vmul.f32 %v16103_v13, %v16223_v40 }
 0x959   :  { %v16263_v63 = vadd.f32 %v7652_v14, %v17470_v42  ;;  %v12525_v18 = vpack.i.bf16 %v7912_v55, %v7911_v49  ;;  %v7915_v42 = vmul.f32 %v16107_v39, %v16277_v56 }
 0x95a   :  { %v7910_v46 = vmul.f32 %v16107_v39, %v16237_v23  ;;  %v16309_v39 = vsel %vm1236_vm3, %v16086_v30, %v16088_v22  ;;  %v8533_v24 = vmul.f32 %v16143_v28, %v16237_v23 }
 0x95b   :  { %12496 = vrot.lane.b32.xlu0 %v12495_v10, %s12935_s2  ;;  %v12510_v10 = vpack.i.bf16 %v8528_v9, %v8527_v17  ;;  %v17472_v9 = vld [vmem:[#allocation28_spill] sm:$0xff] }
 0x95c   :  { %12501 = vrot.lane.b32.xlu1 %v12500_v27, %s17400_s29  ;;  %v17471_v27 = vld [vmem:[#allocation27_spill] sm:$0xff]  ;;  %v16270_v60 = vadd.f32 %v7743_v31, %v17472_v9  ;;  %v12520_v14 = vpack.i.bf16 %v7910_v46, %v7909_v4  ;;  %v9810_v31 = vpop.permute.xlu1 %9809  ;;  %v7914_v46 = vmul.f32 %v16103_v13, %v16263_v63  ;;  %v8535_v13 = vmul.f32 %v16082_v33, %v16230_v58 }
 0x95d   :  { %v16266_v17 = vadd.f32 %v7741_v35, %v17471_v27  ;;  %v7850_v35 = vmul.f32 %v16129_v7, %v16223_v40  ;;  %v16300_v27 = vsel %vm1236_vm3, %v16084_v32, %v16086_v30 }
 0x95e   :  { %v7917_v2 = vmul.f32 %v16078_v59, %v16270_v60  ;;  %v8534_v59 = vmul.f32 %v16165_v20, %v16226_v12 }
 0x95f   :  { %12506 = vrot.lane.b32.xlu0 %v12505_v37, %s17400_s29  ;;  %v7853_v37 = vmul.f32 %v16080_v26, %v16230_v58  ;;  %v7916_v55 = vmul.f32 %v16122_v57, %v16266_v17 }
 0x960   :  { %12511 = vrot.lane.b32.xlu1 %v12510_v10, %s17399_s7  ;;  %v7851_v10 = vmul.f32 %v16133_v48, %v16237_v23  ;;  %v9814_v9 = vpop.permute.xlu1 %9813  ;;  %v12555_v30 = vpack.i.bf16 %v8535_v13, %v8534_v59  ;;  %v8884_v13 = vmul.f32 %v16300_v27, %v16169_v16 }
 0x961   :  { %v12535_v49 = vpack.i.bf16 %v7853_v37, %v7852_v0  ;;  %v12540_v0 = vpack.i.bf16 %v7915_v42, %v7914_v46  ;;  %v8532_v37 = vmul.f32 %v16161_v62, %v16223_v40 }
 0x962   :  { %v12530_v4 = vpack.i.bf16 %v7851_v10, %v7850_v35 }
 0x963   :  { %12516 = vrot.lane.b32.xlu0 %v12515_v43, %s17399_s7  ;;  %v16283_v43 = vpop.permute.xlu0 %9807 }
 0x964   :  { %12526 = vrot.lane.b32.xlu1 %v12525_v18, %s12935_s2  ;;  %v12550_v18 = vpack.i.bf16 %v7917_v2, %v7916_v55  ;;  %v8880_v55 = vmul.f32 %v16309_v39, %v16099_v36 }
 0x967   :  { %12521 = vrot.lane.b32.xlu0 %v12520_v14, %s12935_s2  ;;  %v9812_v57 = vpop.permute.xlu0 %9811  ;;  %v16318_v14 = vsel %vm965_vm6, %v16283_v43, %v9810_v31 }
 0x968   :  { %12536 = vrot.lane.b32.xlu1 %v12535_v49, %s17400_s29  ;;  %v16321_v35 = vsel %vm965_vm6, %v9810_v31, %v9812_v57  ;;  %v16324_v10 = vsel %vm965_vm6, %v9812_v57, %v9814_v9  ;;  %v8879_v49 = vmul.f32 %v16300_v27, %v16095_v45  ;;  %v16333_v2 = vmul.f32 %v16318_v14, %v16277_v56 }
 0x969   :  { %v12545_v31 = vpack.i.bf16 %v8533_v24, %v8532_v37  ;;  %v16339_v46 = vmul.f32 %v16321_v35, %v16266_v17  ;;  %v16343_v42 = vmul.f32 %v16324_v10, %v16270_v60  ;;  %v8872_v57 = vsel %vm1236_vm3, %v16088_v22, %v16092_v53 }
 0x96a   :  { %v12565_v59 = vpack.i.bf16 %v8880_v55, %v8879_v49  ;;  %v8881_v37 = vmul.f32 %v8872_v57, %v16113_v5  ;;  %v8882_v22 = vmul.f32 %v16092_v53, %v16125_v3  ;;  %v7858_v49 = vmul.f32 %v16080_v26, %v16270_v60 }
 0x96b   :  { %12531 = vrot.lane.b32.xlu0 %v12530_v4, %s17400_s29  ;;  %v16335_v4 = vmul.f32 0.0, %v9814_v9  ;;  %v12740_v9 = vpack.i.bf16 %v16339_v46, %v16333_v2  ;;  %v8887_v26 = vmul.f32 %v16092_v53, %v16183_v6 }
 0x96c   :  { %12551 = vrot.lane.b32.xlu1 %v12550_v18, %s12935_s2  ;;  %v12570_v55 = vpack.i.bf16 %v8882_v22, %v8881_v37  ;;  %v7856_v18 = vmul.f32 %v16133_v48, %v16277_v56 }
 0x96f   :  { %12541 = vrot.lane.b32.xlu0 %v12540_v0, %s12935_s2  ;;  %v8885_v0 = vmul.f32 %v16309_v39, %v16178_v61 }
 0x970   :  { %12556 = vrot.lane.b32.xlu1 %v12555_v30, %s17399_s7  ;;  %v7857_v30 = vmul.f32 %v16138_v41, %v16266_v17  ;;  %v8886_v41 = vmul.f32 %v8872_v57, %v16175_v44 }
 0x971   :  { %v12575_v24 = vpack.i.bf16 %v8885_v0, %v8884_v13 }
 0x972   :  { %v12585_v0 = vpack.i.bf16 %v8887_v26, %v8886_v41 }
 0x973   :  { %12546 = vrot.lane.b32.xlu0 %v12545_v31, %s17399_s7  ;;  %v7855_v31 = vmul.f32 %v16129_v7, %v16263_v63  ;;  %v11210_v7 = vld [vmem:[%s17368_s5 + $0x7] ss:$8 sm:$0xf] }
 0x974   :  { %12566 = vrot.lane.b32.xlu1 %v12565_v59, %s12933_s9  ;;  %v12590_v59 = vpack.i.bf16 %v7858_v49, %v7857_v30  ;;  %v10163_v37 = vrot.slane %v11210_v7, %v17457_v51  ;;  %v10159_v22 = vrot.slane %v11210_v7, %v17455_v8  ;;  %v8540_v30 = vmul.f32 %v16082_v33, %v16270_v60 }
 0x975   :  { %v12580_v13 = vpack.i.bf16 %v7856_v18, %v7855_v31  ;;  %v10151_v18 = vrot.slane %v11210_v7, %v17454_v25  ;;  %v8537_v49 = vmul.f32 %v16161_v62, %v16263_v63  ;;  %v8889_v33 = vmul.f32 %v16300_v27, %v16223_v40 }
 0x976   :  { %v8890_v62 = vmul.f32 %v16309_v39, %v16237_v23 }
 0x977   :  { %12561 = vrot.lane.b32.xlu0 %v16063_v1, %s17399_s7  ;;  %v8878_v1 = vmul.f32 0.0, %v16084_v32  ;;  %v10155_v32 = vrot.slane %v11210_v7, %v17456_v54 }
 0x978   :  { %12576 = vrot.lane.b32.xlu1 %v12575_v24, %s12933_s9  ;;  %v8539_v24 = vmul.f32 %v16165_v20, %v16266_v17  ;;  %v12605_v41 = vpack.i.bf16 %v8890_v62, %v8889_v33 }
 0x979   :  { %v12595_v48 = vpack.i.bf16 %v8878_v1, %v8878_v1  ;;  %v8891_v1 = vmul.f32 %v8872_v57, %v16226_v12 }
 0x97a   :  { %v12610_v31 = vpack.i.bf16 %v8540_v30, %v8539_v24 }
 0x97b   :  { %12571 = vrot.lane.b32.xlu0 %v12570_v55, %s12933_s9  ;;  %v8538_v55 = vmul.f32 %v16143_v28, %v16277_v56  ;;  %v11223_v28 = vld [vmem:[%s17368_s5 + $0x20] ss:$8 sm:$0xf] }
 0x97c   :  { %12591 = vrot.lane.b32.xlu1 %v12590_v59, %s17400_s29  ;;  %v8892_v59 = vmul.f32 %v16092_v53, %v16230_v58  ;;  %v10508_v26 = vrot.slane %v11223_v28, %v17454_v25  ;;  %v10516_v7 = vrot.slane %v11223_v28, %v17455_v8  ;;  %v9459_v25 = vsel %vm1325_vm5, %v16193_v29, %v16217_v19 }
 0x97d   :  { %v12600_v20 = vpack.i.bf16 %v8538_v55, %v8537_v49  ;;  %v8894_v8 = vmul.f32 %v16300_v27, %v16263_v63  ;;  %v10520_v27 = vrot.slane %v11223_v28, %v17457_v51  ;;  %v9473_v30 = vmul.f32 %v9459_v25, %v16175_v44 }
 0x97e   :  { %v9470_v49 = vmul.f32 0.0, %v16219_v50 }
 0x97f   :  { %12581 = vrot.lane.b32.xlu0 %v12580_v13, %s17400_s29  ;;  %v12615_v13 = vpack.i.bf16 %v8892_v59, %v8891_v1  ;;  %v9466_v59 = vmul.f32 %v16191_v38, %v16095_v45 }
 0x980   :  { %12596 = vrot.lane.b32.xlu1 %v12595_v48, %s12933_s9 }
 0x983   :  { %12586 = vrot.lane.b32.xlu0 %v12585_v0, %s12933_s9  ;;  %v10512_v0 = vrot.slane %v11223_v28, %v17456_v54  ;;  %v9478_v28 = vmul.f32 %v9459_v25, %v16226_v12 }
 0x984   :  { %10166 = vrot.lane.b32.xlu1 %v10155_v32, %s12935_s2  ;;  %v8896_v32 = vmul.f32 %v8872_v57, %v16266_v17  ;;  %v9468_v57 = vmul.f32 %v9459_v25, %v16113_v5 }
 0x987   :  { %10164 = vrot.lane.b32.xlu0 %v10151_v18, %s12935_s2  ;;  %v8897_v18 = vmul.f32 %v16092_v53, %v16270_v60 }
 0x988   :  { %10170 = vrot.lane.b32.xlu1 %v10163_v37, %s12935_s2  ;;  %v9458_v37 = vsel %vm1325_vm5, %v16191_v38, %v16193_v29  ;;  %v9460_v29 = vsel %vm1325_vm5, %v16217_v19, %v16219_v50 }
 0x989   :  { %v12630_v54 = vpack.i.bf16 %v8897_v18, %v8896_v32  ;;  %v9467_v53 = vmul.f32 %v9458_v37, %v16099_v36  ;;  %v9472_v24 = vmul.f32 %v9458_v37, %v16178_v61  ;;  %v9469_v55 = vmul.f32 %v9460_v29, %v16125_v3 }
 0x98a   :  { %v9474_v51 = vmul.f32 %v9460_v29, %v16183_v6  ;;  %v9477_v62 = vmul.f32 %v9458_v37, %v16237_v23  ;;  %v9476_v32 = vmul.f32 %v16191_v38, %v16223_v40 }
 0x98b   :  { %10168 = vrot.lane.b32.xlu0 %v10159_v22, %s12935_s2  ;;  %v12645_v19 = vpack.i.bf16 %v9473_v30, %v9472_v24  ;;  %v12640_v1 = vpack.i.bf16 %v9470_v49, %v9469_v55  ;;  %v9484_v30 = vmul.f32 %v9460_v29, %v16270_v60 }
 0x98c   :  { %12611 = vrot.lane.b32.xlu1 %v12610_v31, %s17399_s7  ;;  %v9471_v31 = vmul.f32 %v16191_v38, %v16169_v16  ;;  %v12650_v33 = vpack.i.bf16 %v9470_v49, %v9474_v51  ;;  %v9836_v51 = vmul.f32 %v16324_v10, %v16230_v58 }
 0x98e   :  { %v12655_v50 = vpack.i.bf16 %v9471_v31, %v9466_v59  ;;  %v9483_v31 = vmul.f32 %v9459_v25, %v16266_v17  ;;  %v12715_v25 = vpack.i.bf16 %v16335_v4, %v9836_v51 }
 0x98f   :  { %12601 = vrot.lane.b32.xlu0 %v12600_v20, %s17399_s7  ;;  %v9479_v20 = vmul.f32 %v9460_v29, %v16230_v58  ;;  %v9835_v29 = vmul.f32 %v16321_v35, %v16226_v12 }
 0x990   :  { %12616 = vrot.lane.b32.xlu1 %v12615_v13, %s12933_s9  ;;  %v9825_v13 = vmul.f32 %v16321_v35, %v16113_v5 }
 0x993   :  { %12606 = vrot.lane.b32.xlu0 %v12605_v41, %s12933_s9  ;;  %v12665_v41 = vpack.i.bf16 %v9470_v49, %v9479_v20 }
 0x994   :  { %10521 = vrot.lane.b32.xlu1 %v10508_v26, %s17400_s29  ;;  %v9824_v26 = vmul.f32 %v16318_v14, %v16099_v36 }
 0x996   :  { %v12675_v18 = vpack.i.bf16 %v9825_v13, %v9824_v26 }
 0x997   :  { %12621 = vrot.lane.b32.xlu0 %v12595_v48, %s12933_s9  ;;  %v8895_v48 = vmul.f32 %v16309_v39, %v16277_v56  ;;  %v12635_v39 = vpack.i.bf16 %v9468_v57, %v9467_v53 }
 0x998   :  { %10525 = vrot.lane.b32.xlu1 %v10516_v7, %s17400_s29  ;;  %v12660_v7 = vpack.i.bf16 %v9478_v28, %v9477_v62 }
 0x999   :  { %v12625_v22 = vpack.i.bf16 %v8895_v48, %v8894_v8  ;;  %v9829_v8 = vmul.f32 %v16318_v14, %v16178_v61  ;;  %v9830_v48 = vmul.f32 %v16321_v35, %v16175_v44 }
 0x99b   :  { %10523 = vrot.lane.b32.xlu0 %v10512_v0, %s17400_s29  ;;  %v9481_v0 = vmul.f32 %v16191_v38, %v16263_v63  ;;  %v12685_v57 = vpack.i.bf16 %v9830_v48, %v9829_v8 }
 0x99c   :  { %12631 = vrot.lane.b32.xlu1 %v12630_v54, %s12933_s9  ;;  %v9826_v54 = vmul.f32 %v16324_v10, %v16125_v3 }
 0x99d   :  { %v12670_v53 = vpack.i.bf16 %v9481_v0, %v9476_v32  ;;  %v12438_v32 = vunpack.i.l.bf16 %v16109_v34 }
 0x99e   :  { %v12680_v38 = vpack.i.bf16 %v16335_v4, %v9826_v54 }
 0x99f   :  { %12626 = vrot.lane.b32.xlu0 %v12625_v22, %s12933_s9  ;;  %v9828_v22 = vmul.f32 %v16283_v43, %v16169_v16 }
 0x9a0   :  { %12636 = vrot.lane.b32.xlu1 %v12635_v39, %s12932_s28  ;;  %v9823_v39 = vmul.f32 %v16283_v43, %v16095_v45 }
 0x9a2   :  { %v12695_v24 = vpack.i.bf16 %v9828_v22, %v9823_v39 }
 0x9a3   :  { %10527 = vrot.lane.b32.xlu0 %v10520_v27, %s17400_s29  ;;  %v9831_v27 = vmul.f32 %v16324_v10, %v16183_v6 }
 0x9a4   :  { %12646 = vrot.lane.b32.xlu1 %v12645_v19, %s12932_s28  ;;  %v9482_v19 = vmul.f32 %v9458_v37, %v16277_v56 }
 0x9a5   :  { %v12690_v55 = vpack.i.bf16 %v16335_v4, %v9831_v27 }
 0x9a6   :  { %v12700_v59 = vpack.i.bf16 %v9483_v31, %v9482_v19 }
 0x9a7   :  { %12641 = vrot.lane.b32.xlu0 %v12640_v1, %s12932_s28  ;;  %v12710_v1 = vpack.i.bf16 %v9470_v49, %v9484_v30  ;;  %v9838_v49 = vmul.f32 %v16283_v43, %v16263_v63 }
 0x9a8   :  { %12656 = vrot.lane.b32.xlu1 %v12655_v50, %s12932_s28  ;;  %v9834_v50 = vmul.f32 %v16318_v14, %v16237_v23  ;;  %v9833_v14 = vmul.f32 %v16283_v43, %v16223_v40  ;;  %v12439_v43 = vunpack.i.h.bf16 %v16109_v34 }
 0x9aa   :  { %v12720_v62 = vpack.i.bf16 %v9838_v49, %v9833_v14 }
 0x9ab   :  { %12651 = vrot.lane.b32.xlu0 %v12650_v33, %s12932_s28  ;;  %v12705_v33 = vpack.i.bf16 %v9835_v29, %v9834_v50 }
 0x9ac   :  { %12666 = vrot.lane.b32.xlu1 %v12665_v41, %s12932_s28 }
 0x9af   :  { %12661 = vrot.lane.b32.xlu0 %v12660_v7, %s12932_s28 }
 0x9b0   :  { %12676 = vrot.lane.b32.xlu1 %v12675_v18, %s12931_s26 }
 0x9b3   :  { %12671 = vrot.lane.b32.xlu0 %v12670_v53, %s12932_s28 }
 0x9b4   :  { %12686 = vrot.lane.b32.xlu1 %v12685_v57, %s12931_s26 }
 0x9b7   :  { %12681 = vrot.lane.b32.xlu0 %v12680_v38, %s12931_s26 }
 0x9b8   :  { %12696 = vrot.lane.b32.xlu1 %v12695_v24, %s12931_s26 }
 0x9bb   :  { %12691 = vrot.lane.b32.xlu0 %v12690_v55, %s12931_s26 }
 0x9bc   :  { %12711 = vrot.lane.b32.xlu1 %v12710_v1, %s12932_s28 }
 0x9be   :  { %v12462_v37 = vpop.permute.xlu1 %12461 }
 0x9bf   :  { %12701 = vrot.lane.b32.xlu0 %v12700_v59, %s12932_s28  ;;  %v12464_v41 = vunpack.i.h.bf16 %v12462_v37  ;;  %v12463_v26 = vunpack.i.l.bf16 %v12462_v37 }
 0x9c0   :  { %12716 = vrot.lane.b32.xlu1 %v12715_v25, %s12931_s26 }
 0x9c1   :  { %v12467_v20 = vpop.permute.xlu0 %12466  ;;  %v7978_v53 = vsel %vm337_vm4, %v12438_v32, %v12463_v26  ;;  %v7979_v38 = vsel %vm337_vm4, %v12463_v26, %v12464_v41 }
 0x9c2   :  { %v16509_v35 = vpop.permute.xlu1 %12471  ;;  %v12469_v7 = vunpack.i.h.bf16 %v12467_v20  ;;  %v12468_v0 = vunpack.i.l.bf16 %v12467_v20 }
 0x9c3   :  { %12706 = vrot.lane.b32.xlu0 %v12705_v33, %s12931_s26 }
 0x9c4   :  { %v7980_v27 = vsel %vm337_vm4, %v12464_v41, %v12468_v0  ;;  %v7981_v30 = vsel %vm337_vm4, %v12468_v0, %v12469_v7 }
 0x9c5   :  { %v16511_v10 = vpop.permute.xlu0 %12476 }
 0x9c6   :  { %v16514_v28 = vpop.permute.xlu1 %12481  ;;  %v12479_v14 = vunpack.i.h.bf16 %v16511_v10 }
 0x9c7   :  { %12721 = vrot.lane.b32.xlu0 %v12720_v62, %s12931_s26  ;;  %v12478_v62 = vunpack.i.l.bf16 %v16511_v10 }
 0x9c9   :  { %v16516_v13 = vpop.permute.xlu0 %12486 }
 0x9ca   :  { %v12492_v18 = vpop.permute.xlu1 %12491 }
 0x9cb   :  { %v12494_v48 = vunpack.i.h.bf16 %v12492_v18  ;;  %v12493_v54 = vunpack.i.l.bf16 %v12492_v18 }
 0x9cd   :  { %v12497_v8 = vpop.permute.xlu0 %12496  ;;  %v7982_v39 = vsel %vm337_vm4, %v12439_v43, %v12493_v54  ;;  %v7983_v24 = vsel %vm337_vm4, %v12493_v54, %v12494_v48  ;;  %v12444_v43 = vunpack.i.h.bf16 %v16149_v11  ;;  %v12473_v54 = vunpack.i.l.bf16 %v16509_v35 }
 0x9ce   :  { %v12499_v57 = vunpack.i.h.bf16 %v12497_v8  ;;  %v12498_v22 = vunpack.i.l.bf16 %v12497_v8  ;;  %v11458_v34 = vpack.c.bf16 %v7982_v39, %v7978_v53  ;;  %v16527_v19 = vpop.permute.xlu1 %12501  ;;  %v11456_v31 = vpack.c.bf16 %v7983_v24, %v7979_v38 }
 0x9cf   :  { %v12443_v8 = vunpack.i.l.bf16 %v16149_v11 }
 0x9d0   :  { %v7984_v55 = vsel %vm337_vm4, %v12494_v48, %v12498_v22  ;;  %v7985_v1 = vsel %vm337_vm4, %v12498_v22, %v12499_v57  ;;  %11457 = vmatprep.subr.bf16.mxu0 %v11456_v31  ;;  %v12474_v48 = vunpack.i.h.bf16 %v16509_v35  ;;  %v12504_v57 = vunpack.i.h.bf16 %v16527_v19 }
 0x9d1   :  { %v11466_v51 = vpack.c.bf16 %v7984_v55, %v7980_v27  ;;  %v12507_v59 = vpop.permute.xlu0 %12506  ;;  %v11464_v50 = vpack.c.bf16 %v7985_v1, %v7981_v30  ;;  %11459 = vmatpush1.bf16.msra.mxu0 %v11458_v34  ;;  %v12503_v22 = vunpack.i.l.bf16 %v16527_v19  ;;  %v8263_v30 = vsel %vm621_vm7, %v12478_v62, %v12479_v14 }
 0x9d2   :  { %v16530_v29 = vpop.permute.xlu1 %12511  ;;  %v12509_v41 = vunpack.i.h.bf16 %v12507_v59  ;;  %v12508_v26 = vunpack.i.l.bf16 %v12507_v59 }
 0x9d3   :  { %11465 = vmatprep.subr.bf16.mxu1 %v11464_v50 }
 0x9d4   :  { %11467 = vmatpush1.bf16.msra.mxu1 %v11466_v51  ;;  %v8267_v55 = vsel %vm621_vm7, %v12508_v26, %v12509_v41 }
 0x9d5   :  { %v16532_v37 = vpop.permute.xlu0 %12516 }
 0x9d6   :  { %v12527_v25 = vpop.permute.xlu1 %12526 }
 0x9d7   :  { %v12529_v32 = vunpack.i.h.bf16 %v12527_v25  ;;  %v12528_v18 = vunpack.i.l.bf16 %v12527_v25 }
 0x9d9   :  { %v12522_v20 = vpop.permute.xlu0 %12521  ;;  %v7989_v35 = vsel %vm337_vm4, %v12528_v18, %v12529_v32  ;;  %v12449_v32 = vunpack.i.h.bf16 %v16153_v52 }
 0x9da   :  { %v16534_v33 = vpop.permute.xlu1 %12536  ;;  %v12524_v7 = vunpack.i.h.bf16 %v12522_v20  ;;  %v12523_v0 = vunpack.i.l.bf16 %v12522_v20 }
 0x9dc   :  { %v7986_v11 = vsel %vm337_vm4, %v12443_v8, %v12523_v0  ;;  %v7988_v34 = vsel %vm337_vm4, %v12524_v7, %v12528_v18  ;;  %v7987_v41 = vsel %vm337_vm4, %v12523_v0, %v12524_v7  ;;  %v8265_v8 = vsel %vm621_vm7, %v12503_v22, %v12504_v57 }
 0x9dd   :  { %v16536_v49 = vpop.permute.xlu0 %12531  ;;  %v8266_v18 = vsel %vm621_vm7, %v12504_v57, %v12508_v26  ;;  %v8262_v7 = vsel %vm621_vm7, %v12474_v48, %v12478_v62  ;;  %v8264_v0 = vsel %vm621_vm7, %v12449_v32, %v12503_v22  ;;  %v12453_v22 = vunpack.i.l.bf16 %v16247_v47 }
 0x9de   :  { %v12552_v53 = vpop.permute.xlu1 %12551  ;;  %v11482_v57 = vpack.c.bf16 %v8266_v18, %v8262_v7  ;;  %v12488_v18 = vunpack.i.l.bf16 %v16516_v13 }
 0x9df   :  { %v12554_v38 = vunpack.i.h.bf16 %v12552_v53  ;;  %v12553_v27 = vunpack.i.l.bf16 %v12552_v53  ;;  %v11480_v53 = vpack.c.bf16 %v8267_v55, %v8263_v30 }
 0x9e1   :  { %v12542_v10 = vpop.permute.xlu0 %12541  ;;  %v7993_v31 = vsel %vm337_vm4, %v12553_v27, %v12554_v38  ;;  %v11121_v38 = vld [vmem:[%s17309_s19 + $0x20] sm:$0xff] }
 0x9e2   :  { %v12544_v39 = vunpack.i.h.bf16 %v12542_v10  ;;  %v12543_v24 = vunpack.i.l.bf16 %v12542_v10  ;;  %v16554_v51 = vpop.permute.xlu1 %12556  ;;  %v11468_v50 = vpack.c.bf16 %v7993_v31, %v7989_v35  ;;  %v8261_v10 = vsel %vm621_vm7, %v12473_v54, %v12474_v48 }
 0x9e3   :  { %v11472_v26 = vpack.c.bf16 %v8265_v8, %v8261_v10  ;;  %v12534_v35 = vunpack.i.h.bf16 %v16536_v49  ;;  %v12533_v31 = vunpack.i.l.bf16 %v16536_v49 }
 0x9e4   :  { %v7990_v1 = vsel %vm337_vm4, %v12444_v43, %v12543_v24  ;;  %v7992_v19 = vsel %vm337_vm4, %v12544_v39, %v12553_v27  ;;  %v7991_v59 = vsel %vm337_vm4, %v12543_v24, %v12544_v39  ;;  %11469 = vmatprep.subr.bf16.mxu1 %v11468_v50  ;;  %v12448_v27 = vunpack.i.l.bf16 %v16153_v52  ;;  %v11122_v52 = vld [vmem:[%s17309_s19 + $0x28] sm:$0xff] }
 0x9e5   :  { %v11462_v25 = vpack.c.bf16 %v7990_v1, %v7986_v11  ;;  %v11470_v20 = vpack.c.bf16 %v7992_v19, %v7988_v34  ;;  %v16557_v14 = vpop.permute.xlu0 %12546  ;;  %v11460_v43 = vpack.c.bf16 %v7991_v59, %v7987_v41  ;;  %v12519_v11 = vunpack.i.h.bf16 %v16532_v37 }
 0x9e6   :  { %v16570_v39 = vpop.permute.xlu1 %12566  ;;  %v8260_v30 = vsel %vm621_vm7, %v12448_v27, %v12473_v54  ;;  %v12454_v54 = vunpack.i.h.bf16 %v16247_v47  ;;  %v12518_v34 = vunpack.i.l.bf16 %v16532_v37  ;;  %v12539_v1 = vunpack.i.h.bf16 %v16534_v33  ;;  %v11123_v47 = vld [vmem:[%s17309_s19 + $0x30] sm:$0xff] }
 0x9e7   :  { %11471 = vmatpush1.bf16.msra.mxu1 %v11470_v20  ;;  %11461 = vmatprep.subr.bf16.mxu0 %v11460_v43  ;;  %v11474_v55 = vpack.c.bf16 %v8264_v0, %v8260_v30  ;;  %v12538_v19 = vunpack.i.l.bf16 %v16534_v33  ;;  %v12459_v59 = vunpack.i.h.bf16 %v16249_v15  ;;  %v12489_v37 = vunpack.i.h.bf16 %v16516_v13 }
 0x9e8   :  { %11481 = vmatprep.subr.bf16.mxu1 %v11480_v53  ;;  %11463 = vmatpush1.bf16.msra.mxu0 %v11462_v25  ;;  %v12484_v50 = vunpack.i.h.bf16 %v16514_v28  ;;  %v12483_v25 = vunpack.i.l.bf16 %v16514_v28  ;;  %v12514_v20 = vunpack.i.h.bf16 %v16530_v29  ;;  %v12513_v33 = vunpack.i.l.bf16 %v16530_v29  ;;  %v11124_v29 = vld [vmem:[%s17309_s19 + $0x38] sm:$0xff] }
 0x9e9   :  { %v16572_v24 = vpop.permute.xlu0 %12561  ;;  %11473 = vmatprep.subr.bf16.mxu0 %v11472_v26  ;;  %v8608_v28 = vsel %vm965_vm6, %v12518_v34, %v12519_v11  ;;  %v8268_v10 = vsel %vm621_vm7, %v12453_v22, %v12533_v31  ;;  %v8271_v27 = vsel %vm621_vm7, %v12538_v19, %v12539_v1  ;;  %v8269_v11 = vsel %vm621_vm7, %v12533_v31, %v12534_v35 }
 0x9ea   :  { %11130 = vmatmul.mubr.msk.f32.vlgmr.msra.gmra.mrb[34].mxu1 %vm370_vm8, %v11121_v38  ;;  %v16581_v62 = vpop.permute.xlu1 %12576  ;;  %v8606_v1 = vsel %vm965_vm6, %v12513_v33, %v12514_v20  ;;  %v12559_v31 = vunpack.i.h.bf16 %v16554_v51 }
 0x9eb   :  { %11483 = vmatpush1.bf16.msra.mxu1 %v11482_v57  ;;  %8181 = vmatprep.mubr.f32.mxu1 %v17453_v21 }
 0x9ec   :  { %11126 = vmatmul.mubr.msk.f32.vlgmr.msra.gmra.mrb[34].mxu0 %vm370_vm8, %v11121_v38  ;;  %v8270_v38 = vsel %vm621_vm7, %v12534_v35, %v12538_v19  ;;  %v8604_v19 = vsel %vm965_vm6, %v12488_v18, %v12489_v37  ;;  %v8607_v35 = vsel %vm965_vm6, %v12514_v20, %v12518_v34  ;;  %v8603_v34 = vsel %vm965_vm6, %v12484_v50, %v12488_v18 }
 0x9ed   :  { %11475 = vmatpush1.bf16.msra.mxu0 %v11474_v55  ;;  %v16583_v48 = vpop.permute.xlu0 %12571  ;;  %8092 = vmatprep.mubr.f32.mxu0 %v17453_v21 }
 0x9ee   :  { %11131 = vmatmul.mubr.msk.f32.gmra.mrb[36].mxu1 %vm370_vm8, %v11122_v52  ;;  %v12592_v49 = vpop.permute.xlu1 %12591 }
 0x9ef   :  { %8187 = vmatprep.mubr.f32.mxu1 %v17453_v21  ;;  %v12594_v8 = vunpack.i.h.bf16 %v12592_v49  ;;  %v12593_v32 = vunpack.i.l.bf16 %v12592_v49  ;;  %v8605_v49 = vsel %vm965_vm6, %v12459_v59, %v12513_v33  ;;  %v12549_v59 = vunpack.i.h.bf16 %v16557_v14 }
 0x9f0   :  { %11127 = vmatmul.mubr.msk.f32.gmra.mrb[36].mxu0 %vm370_vm8, %v11122_v52  ;;  %v12548_v33 = vunpack.i.l.bf16 %v16557_v14 }
 0x9f1   :  { %v12582_v41 = vpop.permute.xlu0 %12581  ;;  %8098 = vmatprep.mubr.f32.mxu0 %v17453_v21  ;;  %v8275_v13 = vsel %vm621_vm7, %v12593_v32, %v12594_v8  ;;  %v11496_v8 = vpack.c.bf16 %v8608_v28, %v8604_v19  ;;  %v11498_v28 = vpack.c.bf16 %v8607_v35, %v8603_v34  ;;  %v12574_v34 = vunpack.i.h.bf16 %v16583_v48 }
 0x9f2   :  { %v12584_v43 = vunpack.i.h.bf16 %v12582_v41  ;;  %v12583_v53 = vunpack.i.l.bf16 %v12582_v41  ;;  %11132 = vmatmul.mubr.msk.f32.gmra.mrb[38].mxu1 %vm370_vm8, %v11123_v47  ;;  %v16621_v26 = vpop.permute.xlu1 %12596  ;;  %v11484_v30 = vpack.c.bf16 %v8275_v13, %v8271_v27  ;;  %v8602_v41 = vsel %vm965_vm6, %v12483_v25, %v12484_v50  ;;  %v7782_v50 = vld [vmem:[%s17309_s19 + $0x8] sm:$0xff] }
 0x9f3   :  { %8193 = vmatprep.mubr.f32.mxu1 %v17453_v21  ;;  %v16667_v13 = vsel %vm965_vm6, %v12548_v33, %v12549_v59 }
 0x9f4   :  { %v8272_v7 = vsel %vm621_vm7, %v12454_v54, %v12583_v53  ;;  %v8274_v0 = vsel %vm621_vm7, %v12584_v43, %v12593_v32  ;;  %11128 = vmatmul.mubr.msk.f32.gmra.mrb[38].mxu0 %vm370_vm8, %v11123_v47  ;;  %v8273_v57 = vsel %vm621_vm7, %v12583_v53, %v12584_v43  ;;  %11485 = vmatprep.subr.bf16.mxu1 %v11484_v30  ;;  %v12458_v47 = vunpack.i.l.bf16 %v16249_v15  ;;  %v7781_v15 = vld [vmem:[%s17309_s19] sm:$0xff] }
 0x9f5   :  { %v11478_v55 = vpack.c.bf16 %v8272_v7, %v8268_v10  ;;  %v11486_v52 = vpack.c.bf16 %v8274_v0, %v8270_v38  ;;  %v16624_v22 = vpop.permute.xlu0 %12586  ;;  %8104 = vmatprep.mubr.f32.mxu0 %v17453_v21  ;;  %v11476_v54 = vpack.c.bf16 %v8273_v57, %v8269_v11  ;;  %v12558_v32 = vunpack.i.l.bf16 %v16554_v51 }
 0x9f6   :  { %11133 = vmatmul.mubr.msk.f32.gmra.mrb[40].mxu1 %vm370_vm8, %v11124_v29  ;;  %v10167_v37 = vpop.permute.xlu1 %10166  ;;  %v11488_v43 = vpack.c.bf16 %v8606_v1, %v8602_v41  ;;  %v8601_v51 = vsel %vm965_vm6, %v12458_v47, %v12483_v25  ;;  %v12569_v38 = vunpack.i.h.bf16 %v16570_v39  ;;  %v12563_v7 = vunpack.i.l.bf16 %v16572_v24 }
 0x9f7   :  { %11487 = vmatpush1.bf16.msra.mxu1 %v11486_v52  ;;  %8457 = vmatprep.mubr.f32.mxu1 %v17453_v21  ;;  %v11490_v20 = vpack.c.bf16 %v8605_v49, %v8601_v51  ;;  %v16659_v25 = vsel %vm965_vm6, %v12558_v32, %v12559_v31  ;;  %v16662_v18 = vsel %vm965_vm6, %v12549_v59, %v12558_v32  ;;  %v12578_v52 = vunpack.i.l.bf16 %v16581_v62 }
 0x9f8   :  { %11129 = vmatmul.mubr.msk.f32.gmra.mrb[40].mxu0 %vm370_vm8, %v11124_v29  ;;  %11477 = vmatprep.subr.bf16.mxu0 %v11476_v54  ;;  %v12568_v29 = vunpack.i.l.bf16 %v16570_v39  ;;  %v12564_v54 = vunpack.i.h.bf16 %v16572_v24  ;;  %v12589_v19 = vunpack.i.h.bf16 %v16624_v22  ;;  %v12588_v47 = vunpack.i.l.bf16 %v16624_v22 }
 0x9f9   :  { %11479 = vmatpush1.bf16.msra.mxu0 %v11478_v55  ;;  %v16644_v53 = vpop.permute.xlu0 %10164  ;;  %11497 = vmatprep.subr.bf16.mxu1 %v11496_v8  ;;  %v12579_v55 = vunpack.i.h.bf16 %v16581_v62  ;;  %v7783_v8 = vld [vmem:[%s17309_s19 + $0x10] sm:$0xff]  ;;  %v11142_v62 = vld [vmem:[%s17309_s19 + $0x40] sm:$0xff] }
 0x9fa   :  { %11489 = vmatprep.subr.bf16.mxu0 %v11488_v43  ;;  %8368 = vmatprep.mubr.f32.mxu0 %v17453_v21  ;;  %v16652_v10 = vsel %vm337_vm4, %v16644_v53, %v10167_v37  ;;  %v10171_v14 = vpop.permute.xlu1 %10170 }
 0x9fb   :  { %11138 = vmatmul.mubr.msk.f32.vlgmr.msra.gmra.mrb[34].mxu1 %vm370_vm8, %v7781_v15  ;;  %v16676_v30 = vmul.f32 0.0, %v10171_v14  ;;  %v10181_v11 = vmul.f32 %v16652_v10, %v16099_v36  ;;  %v10186_v51 = vmul.f32 %v16652_v10, %v16178_v61 }
 0x9fc   :  { %11134 = vmatmul.mubr.msk.f32.vlgmr.msra.gmra.mrb[34].mxu0 %vm370_vm8, %v7781_v15  ;;  %11499 = vmatpush1.bf16.msra.mxu1 %v11498_v28  ;;  %v12573_v28 = vunpack.i.l.bf16 %v16583_v48  ;;  %v12598_v48 = vunpack.i.l.bf16 %v16621_v26 }
 0x9fd   :  { %11491 = vmatpush1.bf16.msra.mxu0 %v11490_v20  ;;  %v10169_v27 = vpop.permute.xlu0 %10168  ;;  %8374 = vmatprep.mubr.f32.mxu0 %v17453_v21 }
 0x9fe   :  { %v16671_v0 = vsel %vm337_vm4, %v10167_v37, %v10169_v27  ;;  %v16674_v57 = vsel %vm337_vm4, %v10169_v27, %v10171_v14  ;;  %8463 = vmatprep.mubr.f32.mxu1 %v17453_v21  ;;  %v12612_v41 = vpop.permute.xlu1 %12611  ;;  %v8609_v37 = vsel %vm965_vm6, %v12563_v7, %v12548_v33  ;;  %v8963_v33 = vsel %vm1325_vm5, %v12578_v52, %v12579_v55  ;;  %v7784_v7 = vld [vmem:[%s17309_s19 + $0x18] sm:$0xff] }
 0x9ff   :  { %v10182_v1 = vmul.f32 %v16671_v0, %v16113_v5  ;;  %11139 = vmatmul.mubr.msk.f32.gmra.mrb[36].mxu1 %vm370_vm8, %v7782_v50  ;;  %v10183_v49 = vmul.f32 %v16674_v57, %v16125_v3  ;;  %v10187_v35 = vmul.f32 %v16671_v0, %v16175_v44  ;;  %v12614_v32 = vunpack.i.h.bf16 %v12612_v41 }
 0xa00   :  { %11135 = vmatmul.mubr.msk.f32.gmra.mrb[36].mxu0 %vm370_vm8, %v7782_v50  ;;  %v12613_v24 = vunpack.i.l.bf16 %v12612_v41  ;;  %8469 = vmatprep.mubr.f32.mxu1 %v17453_v21  ;;  %v8965_v41 = vsel %vm1325_vm5, %v12588_v47, %v12589_v19  ;;  %v8964_v19 = vsel %vm1325_vm5, %v12579_v55, %v12588_v47  ;;  %v8960_v55 = vsel %vm1325_vm5, %v12569_v38, %v12573_v28 }
 0xa01   :  { %v12602_v31 = vpop.permute.xlu0 %12601  ;;  %8380 = vmatprep.mubr.f32.mxu0 %v17453_v21  ;;  %v12725_v22 = vpack.i.bf16 %v10182_v1, %v10181_v11  ;;  %v12730_v59 = vpack.i.bf16 %v16676_v30, %v10183_v49  ;;  %v12599_v1 = vunpack.i.h.bf16 %v16621_v26  ;;  %v11514_v47 = vpack.c.bf16 %v8964_v19, %v8960_v55 }
 0xa02   :  { %v12604_v43 = vunpack.i.h.bf16 %v12602_v31  ;;  %v12603_v15 = vunpack.i.l.bf16 %v12602_v31  ;;  %v8616_v20 = vsel %vm965_vm6, %v12613_v24, %v12614_v32  ;;  %v16718_v27 = vpop.permute.xlu1 %12616 }
 0xa03   :  { %12726 = vrot.lane.b32.xlu1 %v12725_v22, %s12929_s22  ;;  %11140 = vmatmul.mubr.msk.f32.gmra.mrb[38].mxu1 %vm370_vm8, %v7783_v8  ;;  %v10188_v22 = vmul.f32 %v16674_v57, %v16183_v6 }
 0xa04   :  { %v8613_v14 = vsel %vm965_vm6, %v12564_v54, %v12603_v15  ;;  %v8615_v50 = vsel %vm965_vm6, %v12604_v43, %v12613_v24  ;;  %12731 = vrot.lane.b32.xlu0 %v12730_v59, %s12929_s22  ;;  %11136 = vmatmul.mubr.msk.f32.gmra.mrb[38].mxu0 %vm370_vm8, %v7783_v8  ;;  %v8614_v11 = vsel %vm965_vm6, %v12603_v15, %v12604_v43 }
 0xa05   :  { %v16726_v49 = vpop.permute.xlu0 %12606  ;;  %8386 = vmatprep.mubr.f32.mxu0 %v17453_v21  ;;  %8475 = vmatprep.mubr.f32.mxu1 %v17453_v21  ;;  %v12735_v54 = vpack.i.bf16 %v10187_v35, %v10186_v51  ;;  %v11494_v8 = vpack.c.bf16 %v8613_v14, %v8609_v37  ;;  %v11502_v31 = vpack.c.bf16 %v8615_v50, %v16662_v18  ;;  %v11143_v14 = vld [vmem:[%s17309_s19 + $0x48] sm:$0xff] }
 0xa06   :  { %v11492_v32 = vpack.c.bf16 %v8614_v11, %v16667_v13  ;;  %v11500_v24 = vpack.c.bf16 %v8616_v20, %v16659_v25  ;;  %v16743_v26 = vpop.permute.xlu1 %10521  ;;  %v8959_v25 = vsel %vm1325_vm5, %v12568_v29, %v12569_v38  ;;  %v8961_v18 = vsel %vm1325_vm5, %v12573_v28, %v12574_v34 }
 0xa07   :  { %12736 = vrot.lane.b32.xlu1 %v12735_v54, %s12929_s22  ;;  %11141 = vmatmul.mubr.msk.f32.gmra.mrb[40].mxu1 %vm370_vm8, %v7784_v7  ;;  %v8958_v13 = vsel %vm1325_vm5, %v12598_v48, %v12568_v29  ;;  %v11504_v46 = vpack.c.bf16 %v8963_v33, %v8959_v25  ;;  %v8962_v35 = vsel %vm1325_vm5, %v12599_v1, %v12578_v52  ;;  %v12609_v1 = vunpack.i.h.bf16 %v16726_v49 }
 0xa08   :  { %12741 = vrot.lane.b32.xlu0 %v12740_v9, %s12931_s26  ;;  %11137 = vmatmul.mubr.msk.f32.gmra.mrb[40].mxu0 %vm370_vm8, %v7784_v7  ;;  %v11512_v9 = vpack.c.bf16 %v8965_v41, %v8961_v18  ;;  %v10180_v37 = vmul.f32 %v16644_v53, %v16095_v45  ;;  %v10185_v29 = vmul.f32 %v16644_v53, %v16169_v16  ;;  %v12608_v48 = vunpack.i.l.bf16 %v16726_v49 }
 0xa09   :  { %11493 = vmatprep.subr.bf16.mxu0 %v11492_v32  ;;  %11501 = vmatprep.subr.bf16.mxu1 %v11500_v24  ;;  %v16754_v2 = vpop.permute.xlu0 %12621  ;;  %v10192_v43 = vmul.f32 %v16671_v0, %v16226_v12  ;;  %v12745_v15 = vpack.i.bf16 %v16676_v30, %v10188_v22  ;;  %v11506_v59 = vpack.c.bf16 %v8962_v35, %v8958_v13  ;;  %v11144_v13 = vld [vmem:[%s17309_s19 + $0x50] sm:$0xff] }
 0xa0a   :  { %11495 = vmatpush1.bf16.msra.mxu0 %v11494_v8  ;;  %11503 = vmatpush1.bf16.msra.mxu1 %v11502_v31  ;;  %v10526_v52 = vpop.permute.xlu1 %10525  ;;  %v10191_v34 = vmul.f32 %v16652_v10, %v16237_v23  ;;  %v17474_v51 = vpack.i.bf16 %v16335_v4, %v16343_v42  ;;  %v10190_v38 = vmul.f32 %v16644_v53, %v16223_v40  ;;  %v12623_v8 = vunpack.i.l.bf16 %v16754_v2 }
 0xa0b   :  { %11505 = vmatprep.subr.bf16.mxu0 %v11504_v46  ;;  %11513 = vmatprep.subr.bf16.mxu1 %v11512_v9  ;;  %v10195_v20 = vmul.f32 %v16644_v53, %v16263_v63  ;;  %v16790_v33 = vmul.f32 %v16652_v10, %v16277_v56  ;;  %v10193_v4 = vmul.f32 %v16674_v57, %v16230_v58  ;;  %v12619_v53 = vunpack.i.h.bf16 %v16718_v27 }
 0xa0c   :  { %8709 = vmatprep.mubr.f32.mxu0 %v17453_v21  ;;  %8798 = vmatprep.mubr.f32.mxu1 %v17453_v21  ;;  %v12755_v42 = vpack.i.bf16 %v10185_v29, %v10180_v37  ;;  %v12760_v28 = vpack.i.bf16 %v10192_v43, %v10191_v34  ;;  %v12618_v10 = vunpack.i.l.bf16 %v16718_v27  ;;  %v12624_v22 = vunpack.i.h.bf16 %v16754_v2 }
 0xa0d   :  { %12751 = vrot.lane.b32.xlu1 %v17474_v51, %s12931_s26  ;;  %12746 = vrot.lane.b32.xlu0 %v12745_v15, %s12929_s22  ;;  %v10524_v39 = vpop.permute.xlu0 %10523  ;;  %v12770_v24 = vpack.i.bf16 %v10195_v20, %v10190_v38  ;;  %v12765_v18 = vpack.i.bf16 %v16676_v30, %v10193_v4  ;;  %v10197_v46 = vmul.f32 %v16671_v0, %v16266_v17 }
 0xa0e   :  { %11147 = vmatmul.mubr.msk.f32.vlgmr.msra.gmra.mrb[34].mxu0 %vm370_vm8, %v11142_v62  ;;  %11151 = vmatmul.mubr.msk.f32.vlgmr.msra.gmra.mrb[34].mxu1 %vm370_vm8, %v11142_v62  ;;  %v16803_v50 = vsel %vm621_vm7, %v16743_v26, %v10524_v39  ;;  %v16806_v7 = vsel %vm621_vm7, %v10524_v39, %v10526_v52  ;;  %v12632_v11 = vpop.permute.xlu1 %12631  ;;  %v8969_v19 = vsel %vm1325_vm5, %v12618_v10, %v12619_v53  ;;  %v11145_v39 = vld [vmem:[%s17309_s19 + $0x58] sm:$0xff] }
 0xa0f   :  { %11507 = vmatpush1.bf16.msra.mxu0 %v11506_v59  ;;  %11515 = vmatpush1.bf16.msra.mxu1 %v11514_v47  ;;  %v12634_v27 = vunpack.i.h.bf16 %v12632_v11  ;;  %v12633_v41 = vunpack.i.l.bf16 %v12632_v11  ;;  %v10538_v49 = vmul.f32 %v16803_v50, %v16099_v36  ;;  %v10539_v25 = vmul.f32 %v16806_v7, %v16113_v5 }
 0xa10   :  { %8715 = vmatprep.mubr.f32.mxu0 %v17453_v21  ;;  %8804 = vmatprep.mubr.f32.mxu1 %v17453_v21  ;;  %v8968_v37 = vsel %vm1325_vm5, %v12609_v1, %v12618_v10  ;;  %v8967_v0 = vsel %vm1325_vm5, %v12608_v48, %v12609_v1  ;;  %v8966_v62 = vsel %vm1325_vm5, %v12623_v8, %v12608_v48 }
 0xa11   :  { %12756 = vrot.lane.b32.xlu1 %v12755_v42, %s12929_s22  ;;  %v12627_v54 = vpop.permute.xlu0 %12626  ;;  %12761 = vrot.lane.b32.xlu0 %v12760_v28, %s12929_s22  ;;  %v8973_v35 = vsel %vm1325_vm5, %v12633_v41, %v12634_v27  ;;  %v12775_v51 = vpack.i.bf16 %v10539_v25, %v10538_v49  ;;  %v10198_v28 = vmul.f32 %v16674_v57, %v16270_v60 }
 0xa12   :  { %11148 = vmatmul.mubr.msk.f32.gmra.mrb[36].mxu0 %vm370_vm8, %v11143_v14  ;;  %v12629_v31 = vunpack.i.h.bf16 %v12627_v54  ;;  %v12628_v32 = vunpack.i.l.bf16 %v12627_v54  ;;  %11152 = vmatmul.mubr.msk.f32.gmra.mrb[36].mxu1 %vm370_vm8, %v11143_v14  ;;  %v16830_v2 = vpop.permute.xlu1 %12636  ;;  %v11516_v38 = vpack.c.bf16 %v8973_v35, %v8969_v19  ;;  %v11528_v53 = vpack.c.bf16 %v16183_v6, %v16125_v3 }
 0xa13   :  { %8721 = vmatprep.mubr.f32.mxu0 %v17453_v21  ;;  %8810 = vmatprep.mubr.f32.mxu1 %v17453_v21  ;;  %v10543_v11 = vmul.f32 %v16803_v50, %v16178_v61  ;;  %v12790_v1 = vpack.i.bf16 %v16676_v30, %v10198_v28  ;;  %v11522_v30 = vpack.c.bf16 %v16169_v16, %v16095_v45 }
 0xa14   :  { %v8971_v9 = vsel %vm1325_vm5, %v12628_v32, %v12629_v31  ;;  %v8970_v29 = vsel %vm1325_vm5, %v12624_v22, %v12628_v32  ;;  %v8972_v43 = vsel %vm1325_vm5, %v12629_v31, %v12633_v41  ;;  %11517 = vmatprep.subr.bf16.mxu1 %v11516_v38  ;;  %v11530_v41 = vpack.c.bf16 %v16175_v44, %v16113_v5 }
 0xa15   :  { %12766 = vrot.lane.b32.xlu1 %v12765_v18, %s12929_s22  ;;  %v10528_v15 = vpop.permute.xlu0 %10527  ;;  %12771 = vrot.lane.b32.xlu0 %v12770_v24, %s12929_s22  ;;  %v11508_v47 = vpack.c.bf16 %v8971_v9, %v8967_v0  ;;  %v11510_v20 = vpack.c.bf16 %v8970_v29, %v8966_v62  ;;  %v11518_v4 = vpack.c.bf16 %v8972_v43, %v8968_v37  ;;  %v12639_v31 = vunpack.i.h.bf16 %v16830_v2 }
 0xa16   :  { %11149 = vmatmul.mubr.msk.f32.gmra.mrb[38].mxu0 %vm370_vm8, %v11144_v13  ;;  %v16844_v55 = vsel %vm621_vm7, %v10526_v52, %v10528_v15  ;;  %11153 = vmatmul.mubr.msk.f32.gmra.mrb[38].mxu1 %vm370_vm8, %v11144_v13  ;;  %v16849_v34 = vmul.f32 0.0, %v10528_v15  ;;  %v12780_v52 = vpack.i.bf16 %v10197_v46, %v16790_v33  ;;  %v16857_v42 = vpop.permute.xlu1 %12646  ;;  %v11520_v33 = vpack.c.bf16 %v16178_v61, %v16099_v36  ;;  %v11155_v36 = vld [vmem:[%s17309_s19 + $0x60] sm:$0xff] }
 0xa17   :  { %v10540_v59 = vmul.f32 %v16844_v55, %v16125_v3  ;;  %8727 = vmatprep.mubr.f32.mxu0 %v17453_v21  ;;  %8816 = vmatprep.mubr.f32.mxu1 %v17453_v21  ;;  %v10544_v3 = vmul.f32 %v16806_v7, %v16175_v44  ;;  %v10545_v54 = vmul.f32 %v16844_v55, %v16183_v6  ;;  %v12649_v27 = vunpack.i.h.bf16 %v16857_v42 }
 0xa18   :  { %11509 = vmatprep.subr.bf16.mxu0 %v11508_v47  ;;  %11519 = vmatpush1.bf16.msra.mxu1 %v11518_v4  ;;  %v12648_v61 = vunpack.i.l.bf16 %v16857_v42  ;;  %v12638_v32 = vunpack.i.l.bf16 %v16830_v2  ;;  %v11524_v24 = vpack.c.bf16 %v16277_v56, %v16237_v23  ;;  %v11532_v22 = vpack.c.bf16 %v16270_v60, %v16230_v58  ;;  %v7761_v2 = vld [vmem:[%s17310_s20] sm:$0xff] }
 0xa19   :  { %12776 = vrot.lane.b32.xlu1 %v12775_v51, %s12930_s24  ;;  %v16862_v14 = vpop.permute.xlu0 %12641  ;;  %12781 = vrot.lane.b32.xlu0 %v12780_v52, %s12929_s22  ;;  %v12785_v57 = vpack.i.bf16 %v16849_v34, %v10540_v59  ;;  %v10548_v5 = vmul.f32 %v16803_v50, %v16237_v23  ;;  %v10549_v44 = vmul.f32 %v16806_v7, %v16226_v12  ;;  %v11156_v23 = vld [vmem:[%s17309_s19 + $0x68] sm:$0xff] }
 0xa1a   :  { %11150 = vmatmul.mubr.msk.f32.gmra.mrb[40].mxu0 %vm370_vm8, %v11145_v39  ;;  %11154 = vmatmul.mubr.msk.f32.gmra.mrb[40].mxu1 %vm370_vm8, %v11145_v39  ;;  %v16872_v10 = vpop.permute.xlu1 %12656  ;;  %v12644_v25 = vunpack.i.h.bf16 %v16862_v14  ;;  %v12643_v18 = vunpack.i.l.bf16 %v16862_v14  ;;  %v12800_v46 = vpack.i.bf16 %v16849_v34, %v10545_v54  ;;  %v12795_v9 = vpack.i.bf16 %v10544_v3, %v10543_v11 }
 0xa1b   :  { %11511 = vmatpush1.bf16.msra.mxu0 %v11510_v20  ;;  %11529 = vmatprep.subr.bf16.mxu1 %v11528_v53  ;;  %v9551_v19 = vsel %vm1236_vm3, %v12648_v61, %v12649_v27  ;;  %v10537_v35 = vmul.f32 %v16743_v26, %v16095_v45  ;;  %v10542_v37 = vmul.f32 %v16743_v26, %v16169_v16  ;;  %v12659_v20 = vunpack.i.h.bf16 %v16872_v10 }
 0xa1c   :  { %11521 = vmatprep.subr.bf16.mxu0 %v11520_v33  ;;  %9066 = vmatprep.mubr.f32.mxu0 %v17453_v21  ;;  %v11526_v43 = vpack.c.bf16 %v16263_v63, %v16223_v40  ;;  %v11534_v45 = vpack.c.bf16 %v16266_v17, %v16226_v12  ;;  %v9547_v16 = vsel %vm1236_vm3, %v12638_v32, %v12639_v31  ;;  %v12658_v4 = vunpack.i.l.bf16 %v16872_v10  ;;  %v11158_v33 = vld [vmem:[%s17309_s19 + $0x78] sm:$0xff] }
 0xa1d   :  { %v16880_v48 = vpop.permute.xlu0 %12651  ;;  %9155 = vmatprep.mubr.f32.mxu1 %v17453_v21  ;;  %12786 = vrot.lane.b32.xlu0 %v12785_v57, %s12930_s24  ;;  %v10553_v0 = vmul.f32 %v16803_v50, %v16277_v56  ;;  %v11536_v62 = vpack.c.bf16 %v9551_v19, %v9547_v16  ;;  %v9549_v12 = vsel %vm1236_vm3, %v12643_v18, %v12644_v25  ;;  %v11157_v56 = vld [vmem:[%s17309_s19 + $0x70] sm:$0xff] }
 0xa1e   :  { %12791 = vrot.lane.b32.xlu1 %v12790_v1, %s12929_s22  ;;  %v12654_v6 = vunpack.i.h.bf16 %v16880_v48  ;;  %v12653_v8 = vunpack.i.l.bf16 %v16880_v48  ;;  %11160 = vmatmul.mubr.msk.f32.vlgmr.msra.gmra.mrb[34].mxu0 %vm370_vm8, %v11155_v36  ;;  %v16906_v49 = vpop.permute.xlu1 %12666  ;;  %v10554_v59 = vmul.f32 %v16806_v7, %v16266_v17  ;;  %v12810_v51 = vpack.i.bf16 %v10549_v44, %v10548_v5  ;;  %v11168_v1 = vld [vmem:[%s17309_s19 + $0x80] sm:$0xff]  ;;  %v11170_v16 = vld [vmem:[%s17309_s19 + $0x90] sm:$0xff] }
 0xa1f   :  { %11164 = vmatmul.mubr.msk.f32.vlgmr.msra.gmra.mrb[34].mxu1 %vm370_vm8, %v11155_v36  ;;  %11523 = vmatpush1.bf16.msra.mxu0 %v11522_v30  ;;  %v10550_v39 = vmul.f32 %v16844_v55, %v16230_v58  ;;  %v12805_v38 = vpack.i.bf16 %v10542_v37, %v10537_v35  ;;  %v10547_v7 = vmul.f32 %v16743_v26, %v16223_v40  ;;  %v12669_v48 = vunpack.i.h.bf16 %v16906_v49  ;;  %v7762_v30 = vld [vmem:[%s17310_s20 + $0x8] sm:$0xff]  ;;  %v7764_v35 = vld [vmem:[%s17310_s20 + $0x18] sm:$0xff] }
 0xa20   :  { %11531 = vmatpush1.bf16.msra.mxu1 %v11530_v41  ;;  %11525 = vmatprep.subr.bf16.mxu0 %v11524_v24  ;;  %v9553_v29 = vsel %vm1236_vm3, %v12653_v8, %v12654_v6  ;;  %v10552_v52 = vmul.f32 %v16743_v26, %v16263_v63  ;;  %v10555_v28 = vmul.f32 %v16844_v55, %v16270_v60  ;;  %v12668_v42 = vunpack.i.l.bf16 %v16906_v49 }
 0xa21   :  { %v16914_v13 = vpop.permute.xlu0 %12661  ;;  %11533 = vmatprep.subr.bf16.mxu1 %v11532_v22  ;;  %9072 = vmatprep.mubr.f32.mxu0 %v17453_v21  ;;  %v11544_v50 = vpack.c.bf16 %v9553_v29, %v9549_v12  ;;  %v12820_v40 = vpack.i.bf16 %v10554_v59, %v10553_v0  ;;  %v12815_v53 = vpack.i.bf16 %v16849_v34, %v10550_v39 }
 0xa22   :  { %9161 = vmatprep.mubr.f32.mxu1 %v17453_v21  ;;  %12801 = vrot.lane.b32.xlu0 %v12800_v46, %s12930_s24  ;;  %v16945_v15 = vpop.permute.xlu1 %12676  ;;  %v9546_v60 = vsel %vm1236_vm3, %v12658_v4, %v12638_v32  ;;  %v9550_v26 = vsel %vm1236_vm3, %v12659_v20, %v12648_v61  ;;  %v9552_v57 = vsel %vm1236_vm3, %v12649_v27, %v12653_v8  ;;  %v12664_v36 = vunpack.i.h.bf16 %v16914_v13  ;;  %v11169_v8 = vld [vmem:[%s17309_s19 + $0x88] sm:$0xff] }
 0xa23   :  { %12796 = vrot.lane.b32.xlu1 %v12795_v9, %s12930_s24  ;;  %11161 = vmatmul.mubr.msk.f32.gmra.mrb[36].mxu0 %vm370_vm8, %v11156_v23  ;;  %v12830_v10 = vpack.i.bf16 %v10552_v52, %v10547_v7  ;;  %v12825_v11 = vpack.i.bf16 %v16849_v34, %v10555_v28  ;;  %v12663_v3 = vunpack.i.l.bf16 %v16914_v13  ;;  %v9548_v34 = vsel %vm1236_vm3, %v12639_v31, %v12643_v18 }
 0xa24   :  { %11165 = vmatmul.mubr.msk.f32.gmra.mrb[36].mxu1 %vm370_vm8, %v11156_v23  ;;  %11527 = vmatpush1.bf16.msra.mxu0 %v11526_v43  ;;  %v11538_v54 = vpack.c.bf16 %v9550_v26, %v9546_v60  ;;  %v11546_v61 = vpack.c.bf16 %v9552_v57, %v9548_v34  ;;  %v9557_v5 = vsel %vm1236_vm3, %v12668_v42, %v12669_v48  ;;  %v12679_v29 = vunpack.i.h.bf16 %v16945_v15  ;;  %v11181_v26 = vld [vmem:[%s17309_s19 + $0xa8] sm:$0xff]  ;;  %v11183_v57 = vld [vmem:[%s17309_s19 + $0xb8] sm:$0xff] }
 0xa25   :  { %v16954_v47 = vpop.permute.xlu0 %12671  ;;  %11535 = vmatpush1.bf16.msra.mxu1 %v11534_v45  ;;  %11537 = vmatprep.subr.bf16.mxu0 %v11536_v62  ;;  %v9555_v49 = vsel %vm1236_vm3, %v12663_v3, %v12664_v36  ;;  %v9556_v37 = vsel %vm1236_vm3, %v12664_v36, %v12668_v42  ;;  %v12678_v43 = vunpack.i.l.bf16 %v16945_v15  ;;  %v7763_v45 = vld [vmem:[%s17310_s20 + $0x10] sm:$0xff] }
 0xa26   :  { %9078 = vmatprep.mubr.f32.mxu0 %v17453_v21  ;;  %9167 = vmatprep.mubr.f32.mxu1 %v17453_v21  ;;  %v16966_v17 = vpop.permute.xlu1 %12686  ;;  %v12674_v24 = vunpack.i.h.bf16 %v16954_v47  ;;  %v12673_v22 = vunpack.i.l.bf16 %v16954_v47 }
 0xa27   :  { %12811 = vrot.lane.b32.xlu0 %v12810_v51, %s12930_s24  ;;  %12806 = vrot.lane.b32.xlu1 %v12805_v38, %s12930_s24  ;;  %v12689_v44 = vunpack.i.h.bf16 %v16966_v17  ;;  %v12688_v25 = vunpack.i.l.bf16 %v16966_v17  ;;  %v11171_v17 = vld [vmem:[%s17309_s19 + $0x98] sm:$0xff]  ;;  %v9904_v7 = vsel %vm876_vm2, %v12678_v43, %v12679_v29 }
 0xa28   :  { %11162 = vmatmul.mubr.msk.f32.gmra.mrb[38].mxu0 %vm370_vm8, %v11157_v56  ;;  %11166 = vmatmul.mubr.msk.f32.gmra.mrb[38].mxu1 %vm370_vm8, %v11157_v56  ;;  %v9554_v62 = vsel %vm1236_vm3, %v12673_v22, %v12663_v3 }
 0xa29   :  { %v16974_v58 = vpop.permute.xlu0 %12681  ;;  %11545 = vmatprep.subr.bf16.mxu1 %v11544_v50  ;;  %9084 = vmatprep.mubr.f32.mxu0 %v17453_v21  ;;  %v9908_v56 = vsel %vm876_vm2, %v12688_v25, %v12689_v44 }
 0xa2a   :  { %9173 = vmatprep.mubr.f32.mxu1 %v17453_v21  ;;  %v16988_v63 = vpop.permute.xlu1 %12696  ;;  %v12684_v12 = vunpack.i.h.bf16 %v16974_v58  ;;  %v12683_v47 = vunpack.i.l.bf16 %v16974_v58  ;;  %v11552_v20 = vpack.c.bf16 %v9908_v56, %v9904_v7 }
 0xa2b   :  { %12821 = vrot.lane.b32.xlu0 %v12820_v40, %s12930_s24  ;;  %12816 = vrot.lane.b32.xlu1 %v12815_v53, %s12930_s24  ;;  %v12699_v50 = vunpack.i.h.bf16 %v16988_v63  ;;  %v12698_v39 = vunpack.i.l.bf16 %v16988_v63 }
 0xa2c   :  { %11163 = vmatmul.mubr.msk.f32.gmra.mrb[40].mxu0 %vm370_vm8, %v11158_v33  ;;  %11167 = vmatmul.mubr.msk.f32.gmra.mrb[40].mxu1 %vm370_vm8, %v11158_v33  ;;  %v9906_v4 = vsel %vm876_vm2, %v12683_v47, %v12684_v12  ;;  %v11180_v33 = vld [vmem:[%s17309_s19 + $0xa0] sm:$0xff]  ;;  %v9905_v53 = vsel %vm876_vm2, %v12679_v29, %v12683_v47 }
 0xa2d   :  { %v16998_v55 = vpop.permute.xlu0 %12691  ;;  %9277 = vmatprep.mubr.f32.mxu0 %v17453_v21  ;;  %9366 = vmatprep.mubr.f32.mxu1 %v17453_v21  ;;  %v9903_v52 = vsel %vm876_vm2, %v12698_v39, %v12678_v43  ;;  %v9907_v28 = vsel %vm876_vm2, %v12699_v50, %v12688_v25 }
 0xa2e   :  { %v12712_v27 = vpop.permute.xlu1 %12711  ;;  %v12694_v46 = vunpack.i.h.bf16 %v16998_v55  ;;  %v12693_v9 = vunpack.i.l.bf16 %v16998_v55  ;;  %v11554_v63 = vpack.c.bf16 %v9907_v28, %v9903_v52  ;;  %v11182_v55 = vld [vmem:[%s17309_s19 + $0xb0] sm:$0xff] }
 0xa2f   :  { %12831 = vrot.lane.b32.xlu0 %v12830_v10, %s12930_s24  ;;  %12826 = vrot.lane.b32.xlu1 %v12825_v11, %s12930_s24  ;;  %v12714_v6 = vunpack.i.h.bf16 %v12712_v27  ;;  %v12713_v14 = vunpack.i.l.bf16 %v12712_v27 }
 0xa30   :  { %11172 = vmatmul.mubr.msk.f32.vlgmr.msra.gmra.mrb[34].mxu0 %vm370_vm8, %v11168_v1  ;;  %11176 = vmatmul.mubr.msk.f32.vlgmr.msra.gmra.mrb[34].mxu1 %vm370_vm8, %v11168_v1  ;;  %v9910_v38 = vsel %vm876_vm2, %v12693_v9, %v12694_v46  ;;  %v9909_v40 = vsel %vm876_vm2, %v12689_v44, %v12693_v9 }
 0xa31   :  { %v12702_v41 = vpop.permute.xlu0 %12701  ;;  %11539 = vmatpush1.bf16.msra.mxu0 %v11538_v54  ;;  %11547 = vmatpush1.bf16.msra.mxu1 %v11546_v61  ;;  %v9561_v13 = vsel %vm1236_vm3, %v12713_v14, %v12714_v6  ;;  %v11560_v58 = vpack.c.bf16 %v9910_v38, %v9906_v4  ;;  %v11562_v60 = vpack.c.bf16 %v9909_v40, %v9905_v53  ;;  %v11194_v4 = vld [vmem:[%s17309_s19 + $0xc8] sm:$0xff] }
 0xa32   :  { %v12704_v31 = vunpack.i.h.bf16 %v12702_v41  ;;  %v12703_v32 = vunpack.i.l.bf16 %v12702_v41  ;;  %9283 = vmatprep.mubr.f32.mxu0 %v17453_v21  ;;  %9372 = vmatprep.mubr.f32.mxu1 %v17453_v21  ;;  %v11548_v15 = vpack.c.bf16 %v9561_v13, %v9557_v5  ;;  %v12717_v11 = vpop.permute.xlu1 %12716 }
 0xa33   :  { %10862 = vperm.xlu0 %12333, %v7762_v30   ;;  %10857 = vperm.xlu1 %12334, %v7761_v2  }
 0xa34   :  { %v9559_v18 = vsel %vm1236_vm3, %v12703_v32, %v12704_v31  ;;  %11173 = vmatmul.mubr.msk.f32.gmra.mrb[36].mxu0 %vm370_vm8, %v11169_v8  ;;  %v9558_v23 = vsel %vm1236_vm3, %v12674_v24, %v12703_v32  ;;  %v9560_v19 = vsel %vm1236_vm3, %v12704_v31, %v12713_v14  ;;  %11177 = vmatmul.mubr.msk.f32.gmra.mrb[36].mxu1 %vm370_vm8, %v11169_v8  ;;  %v12719_v31 = vunpack.i.h.bf16 %v12717_v11 }
 0xa35   :  { %9289 = vmatprep.mubr.f32.mxu0 %v17453_v21  ;;  %v11540_v0 = vpack.c.bf16 %v9559_v18, %v9555_v49  ;;  %9378 = vmatprep.mubr.f32.mxu1 %v17453_v21  ;;  %v11542_v59 = vpack.c.bf16 %v9558_v23, %v9554_v62  ;;  %v11550_v51 = vpack.c.bf16 %v9560_v19, %v9556_v37  ;;  %v12707_v10 = vpop.permute.xlu0 %12706  ;;  %v12718_v32 = vunpack.i.l.bf16 %v12717_v11 }
 0xa36   :  { %11549 = vmatprep.subr.bf16.mxu1 %v11548_v15  ;;  %v12709_v48 = vunpack.i.h.bf16 %v12707_v10  ;;  %v12708_v42 = vunpack.i.l.bf16 %v12707_v10 }
 0xa37   :  { %10872 = vperm.xlu0 %12333, %v7764_v35   ;;  %11541 = vmatprep.subr.bf16.mxu0 %v11540_v0  ;;  %v11193_v0 = vld [vmem:[%s17309_s19 + $0xc0] sm:$0xff] }
 0xa38   :  { %10867 = vperm.xlu1 %12334, %v7763_v45   ;;  %11174 = vmatmul.mubr.msk.f32.gmra.mrb[38].mxu0 %vm370_vm8, %v11170_v16  ;;  %v9912_v5 = vsel %vm876_vm2, %v12708_v42, %v12709_v48  ;;  %v9913_v62 = vsel %vm876_vm2, %v12709_v48, %v12718_v32  ;;  %v11196_v48 = vld [vmem:[%s17309_s19 + $0xd8] sm:$0xff] }
 0xa39   :  { %11178 = vmatmul.mubr.msk.f32.gmra.mrb[38].mxu1 %vm370_vm8, %v11170_v16  ;;  %9295 = vmatprep.mubr.f32.mxu0 %v17453_v21  ;;  %v12722_v1 = vpop.permute.xlu0 %12721  ;;  %v9914_v16 = vsel %vm876_vm2, %v12718_v32, %v12719_v31 }
 0xa3a   :  { %9384 = vmatprep.mubr.f32.mxu1 %v17453_v21  ;;  %11543 = vmatpush1.bf16.msra.mxu0 %v11542_v59  ;;  %v12723_v34 = vunpack.i.l.bf16 %v12722_v1  ;;  %v12724_v14 = vunpack.i.h.bf16 %v12722_v1 }
 0xa3b   :  { %11551 = vmatpush1.bf16.msra.mxu1 %v11550_v51  ;;  %11553 = vmatprep.subr.bf16.mxu0 %v11552_v20 }
 0xa3c   :  { %11175 = vmatmul.mubr.msk.f32.gmra.mrb[40].mxu0 %vm370_vm8, %v11171_v17  ;;  %11561 = vmatprep.subr.bf16.mxu1 %v11560_v58  ;;  %v9911_v22 = vsel %vm876_vm2, %v12723_v34, %v12708_v42 }
 0xa3d   :  { %11179 = vmatmul.mubr.msk.f32.gmra.mrb[40].mxu1 %vm370_vm8, %v11171_v17  ;;  %9654 = vmatprep.mubr.f32.mxu0 %v17453_v21 }
 0xa3e   :  { %9743 = vmatprep.mubr.f32.mxu1 %v17453_v21 }
 0xa40   :  { %11185 = vmatmul.mubr.msk.f32.vlgmr.msra.gmra.mrb[34].mxu0 %vm370_vm8, %v11180_v33 }
 0xa41   :  { %11189 = vmatmul.mubr.msk.f32.vlgmr.msra.gmra.mrb[34].mxu1 %vm370_vm8, %v11180_v33  ;;  %11555 = vmatpush1.bf16.msra.mxu0 %v11554_v63 }
 0xa42   :  { %11563 = vmatpush1.bf16.msra.mxu1 %v11562_v60  ;;  %9660 = vmatprep.mubr.f32.mxu0 %v17453_v21  ;;  %v11195_v60 = vld [vmem:[%s17309_s19 + $0xd0] sm:$0xff] }
 0xa43   :  { %9749 = vmatprep.mubr.f32.mxu1 %v17453_v21 }
 0xa44   :  { %11186 = vmatmul.mubr.msk.f32.gmra.mrb[36].mxu0 %vm370_vm8, %v11181_v26 }
 0xa45   :  { %11190 = vmatmul.mubr.msk.f32.gmra.mrb[36].mxu1 %vm370_vm8, %v11181_v26  ;;  %9666 = vmatprep.mubr.f32.mxu0 %v17453_v21 }
 0xa46   :  { %9755 = vmatprep.mubr.f32.mxu1 %v17453_v21 }
 0xa48   :  { %11187 = vmatmul.mubr.msk.f32.gmra.mrb[38].mxu0 %vm370_vm8, %v11182_v55 }
 0xa49   :  { %11191 = vmatmul.mubr.msk.f32.gmra.mrb[38].mxu1 %vm370_vm8, %v11182_v55  ;;  %9672 = vmatprep.mubr.f32.mxu0 %v17453_v21 }
 0xa4a   :  { %9761 = vmatprep.mubr.f32.mxu1 %v17453_v21 }
 0xa4c   :  { %11188 = vmatmul.mubr.msk.f32.gmra.mrb[40].mxu0 %vm370_vm8, %v11183_v57 }
 0xa4d   :  { %11192 = vmatmul.mubr.msk.f32.gmra.mrb[40].mxu1 %vm370_vm8, %v11183_v57  ;;  %10011 = vmatprep.mubr.f32.mxu0 %v17453_v21 }
 0xa4e   :  { %10100 = vmatprep.mubr.f32.mxu1 %v17453_v21 }
 0xa75   :  { %v12727_v36 = vpop.permute.xlu1 %12726 }
 0xa76   :  { %v12732_v3 = vpop.permute.xlu0 %12731  ;;  %v12729_v27 = vunpack.i.h.bf16 %v12727_v36  ;;  %v12728_v61 = vunpack.i.l.bf16 %v12727_v36 }
 0xa77   :  { %v12734_v46 = vunpack.i.h.bf16 %v12732_v3  ;;  %v12733_v9 = vunpack.i.l.bf16 %v12732_v3 }
 0xa78   :  { %v10261_v13 = vsel %vm248_vm0, %v12728_v61, %v12729_v27 }
 0xa79   :  { %v12737_v54 = vpop.permute.xlu1 %12736  ;;  %v10263_v17 = vsel %vm248_vm0, %v12733_v9, %v12734_v46  ;;  %v10262_v28 = vsel %vm248_vm0, %v12729_v27, %v12733_v9 }
 0xa7a   :  { %v12742_v30 = vpop.permute.xlu0 %12741  ;;  %v12739_v41 = vunpack.i.h.bf16 %v12737_v54  ;;  %v12738_v6 = vunpack.i.l.bf16 %v12737_v54 }
 0xa7b   :  { %v12744_v2 = vunpack.i.h.bf16 %v12742_v30  ;;  %v12743_v8 = vunpack.i.l.bf16 %v12742_v30 }
 0xa7c   :  { %v10265_v24 = vsel %vm248_vm0, %v12738_v6, %v12739_v41 }
 0xa7d   :  { %v9915_v49 = vsel %vm876_vm2, %v12724_v14, %v12743_v8  ;;  %v9916_v44 = vsel %vm876_vm2, %v12743_v8, %v12744_v2  ;;  %v11568_v35 = vpack.c.bf16 %v10265_v24, %v10261_v13 }
 0xa7e   :  { %v11558_v25 = vpack.c.bf16 %v9915_v49, %v9911_v22  ;;  %v11556_v18 = vpack.c.bf16 %v9916_v44, %v9912_v5  ;;  %v11206_v49 = vld [vmem:[%s17309_s19 + $0xe0] sm:$0xff] }
 0xa7f   :  { %v12747_v23 = vpop.permute.xlu0 %12746  ;;  %v12752_v19 = vpop.permute.xlu1 %12751 }
 0xa80   :  { %v12749_v37 = vunpack.i.h.bf16 %v12747_v23  ;;  %v12748_v29 = vunpack.i.l.bf16 %v12747_v23  ;;  %v12754_v43 = vunpack.i.h.bf16 %v12752_v19  ;;  %v12753_v45 = vunpack.i.l.bf16 %v12752_v19  ;;  %11557 = vmatprep.subr.bf16.mxu0 %v11556_v18 }
 0xa81   :  { %11559 = vmatpush1.bf16.msra.mxu0 %v11558_v25 }
 0xa82   :  { %v9917_v12 = vsel %vm876_vm2, %v12744_v2, %v12753_v45  ;;  %11569 = vmatprep.subr.bf16.mxu0 %v11568_v35  ;;  %v9918_v47 = vsel %vm876_vm2, %v12753_v45, %v12754_v43  ;;  %v10267_v15 = vsel %vm248_vm0, %v12748_v29, %v12749_v37  ;;  %v10266_v7 = vsel %vm248_vm0, %v12739_v41, %v12748_v29  ;;  %v11207_v45 = vld [vmem:[%s17309_s19 + $0xe8] sm:$0xff] }
 0xa83   :  { %v11566_v59 = vpack.c.bf16 %v9917_v12, %v9913_v62  ;;  %v12757_v51 = vpop.permute.xlu1 %12756  ;;  %v11564_v56 = vpack.c.bf16 %v9918_v47, %v9914_v16  ;;  %v12762_v50 = vpop.permute.xlu0 %12761  ;;  %v11576_v20 = vpack.c.bf16 %v10267_v15, %v10263_v17  ;;  %v11578_v53 = vpack.c.bf16 %v10266_v7, %v10262_v28 }
 0xa84   :  { %v12759_v39 = vunpack.i.h.bf16 %v12757_v51  ;;  %v12758_v38 = vunpack.i.l.bf16 %v12757_v51  ;;  %11198 = vmatmul.mubr.msk.f32.vlgmr.msra.gmra.mrb[34].mxu0 %vm370_vm8, %v11193_v0  ;;  %v12764_v26 = vunpack.i.h.bf16 %v12762_v50  ;;  %v12763_v55 = vunpack.i.l.bf16 %v12762_v50 }
 0xa85   :  { %11565 = vmatprep.subr.bf16.mxu1 %v11564_v56  ;;  %10017 = vmatprep.mubr.f32.mxu0 %v17453_v21 }
 0xa86   :  { %v10260_v58 = vsel %vm248_vm0, %v12758_v38, %v12728_v61  ;;  %v10264_v52 = vsel %vm248_vm0, %v12759_v39, %v12738_v6  ;;  %11567 = vmatpush1.bf16.msra.mxu1 %v11566_v59  ;;  %v10269_v34 = vsel %vm248_vm0, %v12763_v55, %v12764_v26  ;;  %v11208_v38 = vld [vmem:[%s17309_s19 + $0xf0] sm:$0xff] }
 0xa87   :  { %v11570_v40 = vpack.c.bf16 %v10264_v52, %v10260_v58  ;;  %v12767_v33 = vpop.permute.xlu1 %12766  ;;  %11577 = vmatprep.subr.bf16.mxu1 %v11576_v20  ;;  %v12772_v63 = vpop.permute.xlu0 %12771 }
 0xa88   :  { %11199 = vmatmul.mubr.msk.f32.gmra.mrb[36].mxu0 %vm370_vm8, %v11194_v4  ;;  %v12773_v57 = vunpack.i.l.bf16 %v12772_v63  ;;  %v12774_v1 = vunpack.i.h.bf16 %v12772_v63  ;;  %v12769_v42 = vunpack.i.h.bf16 %v12767_v33  ;;  %v12768_v27 = vunpack.i.l.bf16 %v12767_v33 }
 0xa89   :  { %11202 = vmatmul.mubr.msk.f32.vlgmr.msra.gmra.mrb[34].mxu1 %vm370_vm8, %v11193_v0  ;;  %11571 = vmatpush1.bf16.msra.mxu0 %v11570_v40 }
 0xa8a   :  { %11579 = vmatpush1.bf16.msra.mxu1 %v11578_v53  ;;  %10106 = vmatprep.mubr.f32.mxu1 %v17453_v21  ;;  %v10268_v54 = vsel %vm248_vm0, %v12773_v57, %v12763_v55  ;;  %v10270_v32 = vsel %vm248_vm0, %v12764_v26, %v12768_v27  ;;  %v10271_v22 = vsel %vm248_vm0, %v12768_v27, %v12769_v42 }
 0xa8b   :  { %v17146_v10 = vpop.permute.xlu1 %12776  ;;  %10023 = vmatprep.mubr.f32.mxu0 %v17453_v21  ;;  %v12782_v11 = vpop.permute.xlu0 %12781 }
 0xa8c   :  { %11200 = vmatmul.mubr.msk.f32.gmra.mrb[38].mxu0 %vm370_vm8, %v11195_v60  ;;  %v12784_v36 = vunpack.i.h.bf16 %v12782_v11  ;;  %v12783_v3 = vunpack.i.l.bf16 %v12782_v11  ;;  %v12779_v24 = vunpack.i.h.bf16 %v17146_v10  ;;  %v12778_v5 = vunpack.i.l.bf16 %v17146_v10 }
 0xa8d   :  { %11203 = vmatmul.mubr.msk.f32.gmra.mrb[36].mxu1 %vm370_vm8, %v11194_v4  ;;  %10029 = vmatprep.mubr.f32.mxu0 %v17453_v21 }
 0xa8e   :  { %10112 = vmatprep.mubr.f32.mxu1 %v17453_v21  ;;  %v10272_v61 = vsel %vm248_vm0, %v12774_v1, %v12783_v3  ;;  %v10273_v30 = vsel %vm248_vm0, %v12783_v3, %v12784_v36  ;;  %v10618_v0 = vsel %vm187_vm1, %v12778_v5, %v12779_v24 }
 0xa8f   :  { %v11574_v41 = vpack.c.bf16 %v10272_v61, %v10268_v54  ;;  %v11572_v6 = vpack.c.bf16 %v10273_v30, %v10269_v34  ;;  %v12787_v14 = vpop.permute.xlu0 %12786 }
 0xa90   :  { %11201 = vmatmul.mubr.msk.f32.gmra.mrb[40].mxu0 %vm370_vm8, %v11196_v48  ;;  %v12792_v2 = vpop.permute.xlu1 %12791  ;;  %v12788_v44 = vunpack.i.l.bf16 %v12787_v14  ;;  %v12789_v13 = vunpack.i.h.bf16 %v12787_v14 }
 0xa91   :  { %11204 = vmatmul.mubr.msk.f32.gmra.mrb[38].mxu1 %vm370_vm8, %v11195_v60  ;;  %10368 = vmatprep.mubr.f32.mxu0 %v17453_v21  ;;  %v12794_v8 = vunpack.i.h.bf16 %v12792_v2  ;;  %v12793_v31 = vunpack.i.l.bf16 %v12792_v2  ;;  %v11209_v60 = vld [vmem:[%s17309_s19 + $0xf8] sm:$0xff] }
 0xa92   :  { %11573 = vmatprep.subr.bf16.mxu0 %v11572_v6  ;;  %10118 = vmatprep.mubr.f32.mxu1 %v17453_v21  ;;  %v10619_v16 = vsel %vm187_vm1, %v12779_v24, %v12788_v44  ;;  %v10620_v47 = vsel %vm187_vm1, %v12788_v44, %v12789_v13  ;;  %v11221_v24 = vld [vmem:[%s17309_s19 + $0x110] sm:$0xff] }
 0xa93   :  { %11575 = vmatpush1.bf16.msra.mxu0 %v11574_v41  ;;  %v10274_v25 = vsel %vm248_vm0, %v12784_v36, %v12793_v31  ;;  %v10275_v18 = vsel %vm248_vm0, %v12793_v31, %v12794_v8  ;;  %v11219_v31 = vld [vmem:[%s17309_s19 + $0x100] sm:$0xff] }
 0xa94   :  { %v11582_v46 = vpack.c.bf16 %v10274_v25, %v10270_v32  ;;  %v11580_v9 = vpack.c.bf16 %v10275_v18, %v10271_v22  ;;  %v12802_v23 = vpop.permute.xlu0 %12801  ;;  %v11220_v32 = vld [vmem:[%s17309_s19 + $0x108] sm:$0xff]  ;;  %v11222_v22 = vld [vmem:[%s17309_s19 + $0x118] sm:$0xff] }
 0xa95   :  { %11205 = vmatmul.mubr.msk.f32.gmra.mrb[40].mxu1 %vm370_vm8, %v11196_v48  ;;  %v12797_v19 = vpop.permute.xlu1 %12796  ;;  %v12804_v35 = vunpack.i.h.bf16 %v12802_v23  ;;  %v12803_v37 = vunpack.i.l.bf16 %v12802_v23 }
 0xa96   :  { %11211 = vmatmul.mubr.msk.f32.vlgmr.msra.gmra.mrb[34].mxu0 %vm370_vm8, %v11206_v49  ;;  %10457 = vmatprep.mubr.f32.mxu1 %v17453_v21  ;;  %v12799_v29 = vunpack.i.h.bf16 %v12797_v19  ;;  %v12798_v43 = vunpack.i.l.bf16 %v12797_v19 }
 0xa97   :  { %11581 = vmatprep.subr.bf16.mxu1 %v11580_v9  ;;  %10374 = vmatprep.mubr.f32.mxu0 %v17453_v21  ;;  %v10624_v15 = vsel %vm187_vm1, %v12803_v37, %v12804_v35 }
 0xa98   :  { %11583 = vmatpush1.bf16.msra.mxu1 %v11582_v46  ;;  %v10623_v62 = vsel %vm187_vm1, %v12799_v29, %v12803_v37  ;;  %v10622_v12 = vsel %vm187_vm1, %v12798_v43, %v12799_v29  ;;  %v11592_v50 = vpack.c.bf16 %v10624_v15, %v10620_v47 }
 0xa99   :  { %v11594_v59 = vpack.c.bf16 %v10623_v62, %v10619_v16  ;;  %v12812_v51 = vpop.permute.xlu0 %12811  ;;  %v11584_v56 = vpack.c.bf16 %v10622_v12, %v10618_v0  ;;  %v12807_v39 = vpop.permute.xlu1 %12806 }
 0xa9a   :  { %11212 = vmatmul.mubr.msk.f32.gmra.mrb[36].mxu0 %vm370_vm8, %v11207_v45  ;;  %v12809_v17 = vunpack.i.h.bf16 %v12807_v39  ;;  %v12808_v7 = vunpack.i.l.bf16 %v12807_v39  ;;  %11593 = vmatprep.subr.bf16.mxu1 %v11592_v50  ;;  %v12814_v20 = vunpack.i.h.bf16 %v12812_v51  ;;  %v12813_v4 = vunpack.i.l.bf16 %v12812_v51 }
 0xa9b   :  { %11215 = vmatmul.mubr.msk.f32.vlgmr.msra.gmra.mrb[34].mxu1 %vm370_vm8, %v11206_v49  ;;  %10380 = vmatprep.mubr.f32.mxu0 %v17453_v21 }
 0xa9c   :  { %11585 = vmatprep.subr.bf16.mxu0 %v11584_v56  ;;  %11595 = vmatpush1.bf16.msra.mxu1 %v11594_v59  ;;  %v10617_v58 = vsel %vm187_vm1, %v12808_v7, %v12778_v5  ;;  %v10621_v52 = vsel %vm187_vm1, %v12809_v17, %v12798_v43  ;;  %v10626_v55 = vsel %vm187_vm1, %v12813_v4, %v12814_v20 }
 0xa9d   :  { %10463 = vmatprep.mubr.f32.mxu1 %v17453_v21  ;;  %v12822_v28 = vpop.permute.xlu0 %12821  ;;  %v11586_v40 = vpack.c.bf16 %v10621_v52, %v10617_v58  ;;  %v12817_v63 = vpop.permute.xlu1 %12816 }
 0xa9e   :  { %11213 = vmatmul.mubr.msk.f32.gmra.mrb[38].mxu0 %vm370_vm8, %v11208_v38  ;;  %v12824_v33 = vunpack.i.h.bf16 %v12822_v28  ;;  %v12823_v53 = vunpack.i.l.bf16 %v12822_v28  ;;  %v12818_v26 = vunpack.i.l.bf16 %v12817_v63  ;;  %v12819_v10 = vunpack.i.h.bf16 %v12817_v63 }
 0xa9f   :  { %11216 = vmatmul.mubr.msk.f32.gmra.mrb[36].mxu1 %vm370_vm8, %v11207_v45  ;;  %10386 = vmatprep.mubr.f32.mxu0 %v17453_v21 }
 0xaa0   :  { %10469 = vmatprep.mubr.f32.mxu1 %v17453_v21  ;;  %11587 = vmatpush1.bf16.msra.mxu0 %v11586_v40  ;;  %v10630_v57 = vsel %vm187_vm1, %v12823_v53, %v12824_v33  ;;  %v10627_v54 = vsel %vm187_vm1, %v12814_v20, %v12818_v26  ;;  %v10628_v6 = vsel %vm187_vm1, %v12818_v26, %v12819_v10 }
 0xaa1   :  { %v12832_v11 = vpop.permute.xlu0 %12831  ;;  %v11588_v1 = vpack.c.bf16 %v10630_v57, %v10626_v55  ;;  %v12827_v48 = vpop.permute.xlu1 %12826 }
 0xaa2   :  { %11214 = vmatmul.mubr.msk.f32.gmra.mrb[40].mxu0 %vm370_vm8, %v11209_v60  ;;  %v12834_v36 = vunpack.i.h.bf16 %v12832_v11  ;;  %v12833_v3 = vunpack.i.l.bf16 %v12832_v11  ;;  %v12829_v42 = vunpack.i.h.bf16 %v12827_v48  ;;  %v12828_v34 = vunpack.i.l.bf16 %v12827_v48 }
 0xaa3   :  { %11217 = vmatmul.mubr.msk.f32.gmra.mrb[38].mxu1 %vm370_vm8, %v11208_v38  ;;  %10725 = vmatprep.mubr.f32.mxu0 %v17453_v21 }
 0xaa4   :  { %11589 = vmatprep.subr.bf16.mxu0 %v11588_v1  ;;  %10475 = vmatprep.mubr.f32.mxu1 %v17453_v21  ;;  %v10625_v27 = vsel %vm187_vm1, %v12833_v3, %v12813_v4  ;;  %v10629_v61 = vsel %vm187_vm1, %v12834_v36, %v12823_v53  ;;  %v10631_v41 = vsel %vm187_vm1, %v12824_v33, %v12828_v34 }
 0xaa5   :  { %v11590_v30 = vpack.c.bf16 %v10629_v61, %v10625_v27  ;;  %v10632_v14 = vsel %vm187_vm1, %v12828_v34, %v12829_v42  ;;  %v11598_v2 = vpack.c.bf16 %v10631_v41, %v10627_v54 }
 0xaa6   :  { %v11596_v8 = vpack.c.bf16 %v10632_v14, %v10628_v6 }
 0xaa7   :  { %11218 = vmatmul.mubr.msk.f32.gmra.mrb[40].mxu1 %vm370_vm8, %v11209_v60  ;;  %11591 = vmatpush1.bf16.msra.mxu0 %v11590_v30 }
 0xaa8   :  { %10814 = vmatprep.mubr.f32.mxu1 %v17453_v21  ;;  %11597 = vmatprep.subr.bf16.mxu1 %v11596_v8 }
 0xaa9   :  { %11599 = vmatpush1.bf16.msra.mxu1 %v11598_v2 }
 0xaaa   :  { %11224 = vmatmul.mubr.msk.f32.vlgmr.msra.gmra.mrb[34].mxu0 %vm370_vm8, %v11219_v31 }
 0xaab   :  { %10731 = vmatprep.mubr.f32.mxu0 %v17453_v21 }
 0xaac   :  { %11228 = vmatmul.mubr.msk.f32.vlgmr.msra.gmra.mrb[34].mxu1 %vm370_vm8, %v11219_v31 }
 0xaad   :  { %10820 = vmatprep.mubr.f32.mxu1 %v17453_v21 }
 0xaae   :  { %11225 = vmatmul.mubr.msk.f32.gmra.mrb[36].mxu0 %vm370_vm8, %v11220_v32 }
 0xaaf   :  { %10737 = vmatprep.mubr.f32.mxu0 %v17453_v21 }
 0xab0   :  { %11229 = vmatmul.mubr.msk.f32.gmra.mrb[36].mxu1 %vm370_vm8, %v11220_v32 }
 0xab1   :  { %10826 = vmatprep.mubr.f32.mxu1 %v17453_v21 }
 0xab2   :  { %11226 = vmatmul.mubr.msk.f32.gmra.mrb[38].mxu0 %vm370_vm8, %v11221_v24  ;;  %v10858_v49 = vpop.permute.xlu1 %10857  ;;  %v10863_v23 = vpop.permute.xlu0 %10862 }
 0xab3   :  { %10743 = vmatprep.mubr.f32.mxu0 %v17453_v21 }
 0xab4   :  { %11230 = vmatmul.mubr.msk.f32.gmra.mrb[38].mxu1 %vm370_vm8, %v11221_v24 }
 0xab5   :  { %10832 = vmatprep.mubr.f32.mxu1 %v17453_v21 }
 0xab6   :  { %11227 = vmatmul.mubr.msk.f32.gmra.mrb[40].mxu0 %vm370_vm8, %v11222_v22  ;;  %v10873_v39 = vpop.permute.xlu0 %10872 }
 0xab7   :  { %v10868_v0 = vpop.permute.xlu1 %10867 }
 0xab8   :  { %11231 = vmatmul.mubr.msk.f32.gmra.mrb[40].mxu1 %vm370_vm8, %v11222_v22 }
 0xb7d   :  { %v10727_v5 = vpop.f32.mrb[34].mxu0 }
 0xb7e   :  { %v10875_v44 = vadd.f32 %v10858_v49, %v10727_v5  ;;  %v10729_v25 = vpop.f32.mrb[35].mxu0 }
 0xb7f   :  { %v10876_v18 = vadd.f32 %v10858_v49, %v10729_v25  ;;  %v10816_v13 = vpop.f32.mrb[34].mxu1 }
 0xb80   :  { %10891 = vst [vmem:[%s17311_s21] sm:$0xff] %v10875_v44  ;;  %v10877_v46 = vadd.f32 %v10858_v49, %v10816_v13  ;;  %v10818_v9 = vpop.f32.mrb[35].mxu1 }
 0xb81   :  { %10892 = vst [vmem:[%s17311_s21 + $0x8] sm:$0xff] %v10876_v18  ;;  %v10878_v21 = vadd.f32 %v10858_v49, %v10818_v9  ;;  %v10733_v19 = vpop.f32.mrb[36].mxu0 }
 0xb82   :  { %10893 = vst [vmem:[%s17311_s21 + $0x10] sm:$0xff] %v10877_v46  ;;  %v10879_v35 = vadd.f32 %v10863_v23, %v10733_v19  ;;  %v10735_v37 = vpop.f32.mrb[37].mxu0 }
 0xb83   :  { %10894 = vst [vmem:[%s17311_s21 + $0x18] sm:$0xff] %v10878_v21  ;;  %v10880_v29 = vadd.f32 %v10863_v23, %v10735_v37  ;;  %v10822_v43 = vpop.f32.mrb[36].mxu1 }
 0xb84   :  { %10895 = vst [vmem:[%s17311_s21 + $0x20] sm:$0xff] %v10879_v35  ;;  %v10881_v45 = vadd.f32 %v10863_v23, %v10822_v43  ;;  %v10824_v16 = vpop.f32.mrb[37].mxu1 }
 0xb85   :  { %10896 = vst [vmem:[%s17311_s21 + $0x28] sm:$0xff] %v10880_v29  ;;  %v10882_v62 = vadd.f32 %v10863_v23, %v10824_v16  ;;  %v10739_v12 = vpop.f32.mrb[38].mxu0 }
 0xb86   :  { %10897 = vst [vmem:[%s17311_s21 + $0x30] sm:$0xff] %v10881_v45  ;;  %v10883_v47 = vadd.f32 %v10868_v0, %v10739_v12  ;;  %v10741_v15 = vpop.f32.mrb[39].mxu0 }
 0xb87   :  { %10898 = vst [vmem:[%s17311_s21 + $0x38] sm:$0xff] %v10882_v62  ;;  %v10884_v59 = vadd.f32 %v10868_v0, %v10741_v15  ;;  %v10828_v51 = vpop.f32.mrb[38].mxu1 }
 0xb88   :  { %10899 = vst [vmem:[%s17311_s21 + $0x40] sm:$0xff] %v10883_v47  ;;  %v10885_v56 = vadd.f32 %v10868_v0, %v10828_v51  ;;  %v10830_v50 = vpop.f32.mrb[39].mxu1 }
 0xb89   :  { %10900 = vst [vmem:[%s17311_s21 + $0x48] sm:$0xff] %v10884_v59  ;;  %v10886_v38 = vadd.f32 %v10868_v0, %v10830_v50  ;;  %v10745_v17 = vpop.f32.mrb[40].mxu0 }
 0xb8a   :  { %10901 = vst [vmem:[%s17311_s21 + $0x50] sm:$0xff] %v10885_v56  ;;  %v10887_v7 = vadd.f32 %v10873_v39, %v10745_v17  ;;  %v10747_v20 = vpop.f32.mrb[41].mxu0 }
 0xb8b   :  { %10902 = vst [vmem:[%s17311_s21 + $0x58] sm:$0xff] %v10886_v38  ;;  %v10888_v4 = vadd.f32 %v10873_v39, %v10747_v20  ;;  %v10834_v58 = vpop.f32.mrb[40].mxu1 }
 0xb8c   :  { %10903 = vst [vmem:[%s17311_s21 + $0x60] sm:$0xff] %v10887_v7  ;;  %v10889_v52 = vadd.f32 %v10873_v39, %v10834_v58  ;;  %v10836_v28 = vpop.f32.mrb[41].mxu1 }
 0xb8d   :  { %10904 = vst [vmem:[%s17311_s21 + $0x68] sm:$0xff] %v10888_v4  ;;  %v10890_v40 = vadd.f32 %v10873_v39, %v10836_v28 }
 0xb8e   :  { %10905 = vst [vmem:[%s17311_s21 + $0x70] sm:$0xff] %v10889_v52 }
 0xb8f   :  { %10906 = vst [vmem:[%s17311_s21 + $0x78] sm:$0xff] %v10890_v40 }
 0xb90   :  { %10911 = vsyncpa [#allocation4], 1 }
 0xb91   :  { %10912 = vsyncpa [#allocation6], 1 }

</bundles_post_ra>
